<compile_context>
chip_gen: v5e
topology: v5e:2x2
jax: 0.10.0
libtpu: 0.0.40
codegen_flags: <defaults>
</compile_context>

<pallas_src>
import jax
import jax.numpy as jnp
from jax.experimental import pallas as pl
from jax.experimental.pallas import tpu as pltpu

NODE_TYPES = ['AST', 'Add', 'And', 'AnnAssign', 'Assert', 'Assign', 'AsyncFor', 'AsyncFunctionDef', 'AsyncWith', 'Attribute', 'AugAssign', 'AugLoad', 'AugStore', 'Await', 'BinOp', 'BitAnd', 'BitOr', 'BitXor', 'BoolOp', 'Break', 'Bytes', 'Call', 'ClassDef', 'Compare', 'Constant', 'Continue', 'Del', 'Delete', 'Dict', 'DictComp', 'Div', 'Ellipsis', 'Eq', 'ExceptHandler', 'Expr', 'Expression', 'ExtSlice', 'FloorDiv', 'For', 'FormattedValue', 'FunctionDef', 'GeneratorExp', 'Global', 'Gt', 'GtE', 'If', 'IfExp', 'Import', 'ImportFrom', 'In', 'Index', 'Interactive', 'Invert', 'Is', 'IsNot', 'JoinedStr', 'LShift', 'Lambda', 'List', 'ListComp', 'Load', 'Lt', 'LtE', 'MatMult', 'Mod', 'Module', 'Mult', 'Name', 'NameConstant', 'NodeTransformer', 'NodeVisitor', 'Nonlocal', 'Not', 'NotEq', 'NotIn', 'Num', 'Or', 'Param', 'Pass', 'Pow', 'PyCF_ONLY_AST', 'RShift', 'Raise', 'Return', 'Set', 'SetComp', 'Slice', 'Starred', 'Store', 'Str', 'Sub', 'Subscript', 'Suite', 'Try', 'Tuple', 'UAdd', 'USub', 'UnaryOp', 'While', 'With', 'Yield', 'YieldFrom', '_NUM_TYPES', '__builtins__', '__cached__', '__doc__', '__file__', '__loader__', '__name__', '__package__', '__spec__', 'alias', 'arg', 'arguments', 'boolop', 'cmpop', 'comprehension', 'copy_location', 'dump', 'excepthandler', 'expr', 'expr_context', 'fix_missing_locations', 'get_docstring', 'increment_lineno', 'iter_child_nodes', 'iter_fields', 'keyword', 'literal_eval', 'mod', 'operator', 'parse', 'slice', 'stmt', 'unaryop', 'walk', 'withitem']


def _ast_lstm_kernel(x_ref, w_ih_ref, w_hh_ref, b_ref, out_ref, gx0_ref):
    """Batched multi-layer LSTM over B node sequences; emit last-timestep h.

    x_ref    : (S*B, H) bf16 time-major block: rows [t*B:(t+1)*B] = all B nodes
                             at timestep t (t=0 -> node embeddings, later
                             timesteps -> child embeddings).
    w_ih_ref : (L, H, 4H) bf16 pre-transposed input->gates weights (resident)
    w_hh_ref : (L, H, 4H) bf16 pre-transposed hidden->gates weights (resident)
    b_ref    : (L, 1, 4H) f32  combined bias (b_ih + b_hh) (resident)
    out_ref  : (B, H)    f32  last-layer, last-timestep hidden per node.
    gx0_ref  : (S*B, 4H) f32  VMEM scratch: hoisted layer-0 input projection.
    """
    SB, H = x_ref.shape
    L = w_ih_ref.shape[0]
    B = out_ref.shape[0]
    S = SB // B

    # --- hoisted layer-0 input projection (off the recurrence chain) ---------
    # Chunked per timestep so only one (B,4H) result tile is live at a time;
    # the S matmuls are mutually independent and pipeline in the MXU.
    w_ih0 = w_ih_ref[0]                                  # (H, 4H) bf16
    b0 = b_ref[0]                                        # (1, 4H) f32
    for t in range(S):                                   # static unroll
        gx0_ref[pl.ds(t * B, B), :] = (
            jnp.dot(x_ref[pl.ds(t * B, B), :], w_ih0,
                    preferred_element_type=jnp.float32) + b0)

    # --- resident weights / bias, loaded once ---------------------------------
    w_hh = [w_hh_ref[l] for l in range(L)]               # each (H, 4H) bf16
    w_ih_up = [w_ih_ref[l] for l in range(1, L)]         # inter-layer input weights
    b_up = [b_ref[l] for l in range(1, L)]

    # f32 recurrent state for every layer (stays in vregs across the wavefront)
    h = [jnp.zeros((B, H), jnp.float32) for _ in range(L)]
    c = [jnp.zeros((B, H), jnp.float32) for _ in range(L)]

    # --- wavefront over (layer, timestep) -------------------------------------
    # Step s runs layer l on timestep t = s - l, so the dependent-matmul chain
    # is S + L - 1 long and the per-step matmuls of different layers (and the
    # ih/hh matmuls of upper layers) are independent -> back-to-back MXU pushes.
    for s in range(S + L - 1):                           # static unroll
        h_prev = list(h)                                 # snapshot of step s-1 outputs
        for l in range(L):
            t = s - l
            if not (0 <= t < S):
                continue
            if l == 0:
                g_in = gx0_ref[pl.ds(t * B, B), :]                      # (B, 4H) f32
            else:
                g_in = jnp.dot(h_prev[l - 1].astype(jnp.bfloat16),
                               w_ih_up[l - 1],
                               preferred_element_type=jnp.float32) + b_up[l - 1]
            gates = g_in + jnp.dot(h_prev[l].astype(jnp.bfloat16), w_hh[l],
                                   preferred_element_type=jnp.float32)  # (B, 4H)

            # Full-width nonlinearities (2 EUP pushes on the (B,128) tile),
            # then slice PyTorch gate order i, f, g, o.
            sig = jax.nn.sigmoid(gates)
            tnh = jnp.tanh(gates)
            i_g = sig[:, 0 * H:1 * H]
            f_g = sig[:, 1 * H:2 * H]
            g_g = tnh[:, 2 * H:3 * H]
            o_g = sig[:, 3 * H:4 * H]

            c_new = f_g * c[l] + i_g * g_g
            c[l] = c_new
            h[l] = o_g * jnp.tanh(c_new)

    # final dropout is identity in eval mode; single sublane-dense (B,H) store.
    out_ref[...] = h[L - 1]


def ast_encoder_forward(x_seq, w_ih, w_hh, b, *, batch_block=64):
    """x_seq: (N, S, H) f32 per-node embedding sequences. Returns (N, H) f32."""
    N, S, H = x_seq.shape
    L = w_ih.shape[0]
    B = batch_block
    assert B % 8 == 0, "batch_block must be a multiple of 8 (sublane tile)"

    # pad node count to a multiple of the batch block (host glue; padded rows
    # compute garbage that is sliced off below)
    pad = (-N) % B
    if pad:
        x_seq = jnp.concatenate(
            [x_seq, jnp.zeros((pad, S, H), x_seq.dtype)], axis=0)
    n_total = N + pad
    nb = n_total // B

    # Single fused bf16-cast + relayout to time-major blocks: rows
    # [t*B:(t+1)*B] of block i hold all B nodes of that block at timestep t.
    # (Producers that can emit time-major bf16 sequences directly — e.g. an
    # embedding gather with (nb,S,B)-ordered ids — should bypass this.)
    x2 = (x_seq.astype(jnp.bfloat16)
               .reshape(nb, B, S, H)
               .transpose(0, 2, 1, 3)
               .reshape(nb * S * B, H))

    out = pl.pallas_call(
        _ast_lstm_kernel,
        out_shape=jax.ShapeDtypeStruct((n_total, H), jnp.float32),
        grid_spec=pltpu.PrefetchScalarGridSpec(
            num_scalar_prefetch=0,
            grid=(nb,),
            in_specs=[
                # per-block embedding sequence, pipelined over the grid
                pl.BlockSpec((S * B, H), lambda i: (i, 0)),
                # weights/bias: constant index_map -> loaded once, stay resident
                pl.BlockSpec((L, H, 4 * H), lambda i: (0, 0, 0)),
                pl.BlockSpec((L, H, 4 * H), lambda i: (0, 0, 0)),
                pl.BlockSpec((L, 1, 4 * H), lambda i: (0, 0, 0)),
            ],
            out_specs=pl.BlockSpec((B, H), lambda i: (i, 0)),
            # hoisted layer-0 input projection, staged in VMEM
            scratch_shapes=[pltpu.VMEM((S * B, 4 * H), jnp.float32)],
        ),
        compiler_params=pltpu.CompilerParams(
            # node blocks are independent -> v7x's two TensorCores split them
            dimension_semantics=("parallel",)),
    )(x2, w_ih.astype(jnp.bfloat16), w_hh.astype(jnp.bfloat16), b)
    return out[:N]


def lstm_reference(x_seq, w_ih, w_hh, b):
    """Pure-JAX f32 reference of the multi-layer LSTM last-timestep hidden."""
    N, S, H = x_seq.shape
    L = w_ih.shape[0]
    layer_in = x_seq
    h = jnp.zeros((N, H), jnp.float32)
    for l in range(L):
        h = jnp.zeros((N, H), jnp.float32)
        c = jnp.zeros((N, H), jnp.float32)
        outs = []
        for t in range(S):
            gates = layer_in[:, t, :] @ w_ih[l] + b[l] + h @ w_hh[l]
            i_g = jax.nn.sigmoid(gates[:, 0 * H:1 * H])
            f_g = jax.nn.sigmoid(gates[:, 1 * H:2 * H])
            g_g = jnp.tanh(gates[:, 2 * H:3 * H])
            o_g = jax.nn.sigmoid(gates[:, 3 * H:4 * H])
            c = f_g * c + i_g * g_g
            h = o_g * jnp.tanh(c)
            outs.append(h)
        layer_in = jnp.stack(outs, axis=1)
    return h


def init_params(key, n_types, emb_dim, num_layers):
    """Deterministic init matching the module's __init__ shapes.

    Layer 0 follows the module exactly (xavier-normal weight_ih/weight_hh,
    bias_ih=0, bias_hh=1); deeper layers reuse the same scheme for the demo.
    """
    def xavier(k, shape):
        fan_out, fan_in = shape[-2], shape[-1]
        std = (2.0 / (fan_in + fan_out)) ** 0.5
        return std * jax.random.normal(k, shape, dtype=jnp.float32)

    k_emb, k_ih, k_hh = jax.random.split(key, 3)
    emb_w = xavier(k_emb, (n_types, emb_dim))                     # Embedding.weight

    # torch.nn.LSTM weights: weight_ih_l* (4H, in), weight_hh_l* (4H, H)
    w_ih_t = xavier(k_ih, (num_layers, 4 * emb_dim, emb_dim))
    w_hh_t = xavier(k_hh, (num_layers, 4 * emb_dim, emb_dim))
    # pre-transpose for the kernel: (L, in, 4H)
    w_ih = jnp.transpose(w_ih_t, (0, 2, 1))
    w_hh = jnp.transpose(w_hh_t, (0, 2, 1))
    # bias_ih = 0, bias_hh = 1  ->  combined bias = 1
    b = jnp.ones((num_layers, 1, 4 * emb_dim), dtype=jnp.float32)
    return emb_w, w_ih, w_hh, b


if __name__ == "__main__":
    embedding_dims = 32     # params['embedding_dims']
    num_layers = 2          # params['num_layers']
    seq_len = 8             # node + 7 child embeddings per node
    n_nodes = 500           # pads to 512 -> 8 node blocks of 64 (4 per TC on v7x)
    n_types = len(NODE_TYPES)

    key = jax.random.PRNGKey(0)
    k_params, k_ids = jax.random.split(key)
    emb_w, w_ih, w_hh, b = init_params(k_params, n_types, embedding_dims,
                                       num_layers)

    # Host-side embedding gather (replaces an in-kernel one-hot matmul): row 0
    # of each sequence is the node's own type embedding, remaining rows stand
    # in for the child vectors the recursive traversal would supply.
    node_type_ids = jax.random.randint(k_ids, (n_nodes, seq_len), 0, n_types,
                                       dtype=jnp.int32)
    x_seq = jnp.take(emb_w, node_type_ids, axis=0)   # (N, S, H) f32

    out = ast_encoder_forward(x_seq, w_ih, w_hh, b, batch_block=64)
    jax.block_until_ready(out)
    assert out.shape == (n_nodes, embedding_dims)

    # correctness check vs pure-JAX f32 reference (kernel uses bf16 MXU operands)
    ref = lstm_reference(x_seq, w_ih, w_hh, b)
    max_err = float(jnp.max(jnp.abs(out - ref)))
    assert max_err < 0.1, f"kernel/reference mismatch: max abs err = {max_err}"

    print("KERNEL_OK")
</pallas_src>

<mosaic_0001>
module attributes {stable_mosaic.version = 11 : i64} {
  func.func @_ast_lstm_kernel(%arg0: i32, %arg1: memref<512x32xbf16, #tpu.memory_space<vmem>>, %arg2: memref<2x32x128xbf16, #tpu.memory_space<vmem>>, %arg3: memref<2x32x128xbf16, #tpu.memory_space<vmem>>, %arg4: memref<2x1x128xf32, #tpu.memory_space<vmem>>, %arg5: memref<64x32xf32, #tpu.memory_space<vmem>>, %arg6: memref<512x128xf32, #tpu.memory_space<vmem>>) attributes {dimension_semantics = [#tpu.dimension_semantics<parallel>], iteration_bounds = array<i64: 8>, scalar_prefetch = 0 : i64, scratch_operands = 1 : i64, tpu.core_type = #tpu.core_type<tc>, window_params = [{transform_indices = @transform_0, window_bounds = array<i64: 512, 32>}, {pipeline_mode = #tpu.pipeline_mode<synchronous>, transform_indices = @transform_1, window_bounds = array<i64: 2, 32, 128>}, {pipeline_mode = #tpu.pipeline_mode<synchronous>, transform_indices = @transform_2, window_bounds = array<i64: 2, 32, 128>}, {pipeline_mode = #tpu.pipeline_mode<synchronous>, transform_indices = @transform_3, window_bounds = array<i64: 2, 1, 128>}, {transform_indices = @transform_4, window_bounds = array<i64: 64, 32>}]} {
    %c0 = arith.constant 0 : index
    %c0_0 = arith.constant 0 : index
    %c0_1 = arith.constant 0 : index
    %0 = vector.load %arg2[%c0, %c0_0, %c0_1] : memref<2x32x128xbf16, #tpu.memory_space<vmem>>, vector<1x32x128xbf16>
    %1 = vector.shape_cast %0 : vector<1x32x128xbf16> to vector<32x128xbf16>
    %c0_2 = arith.constant 0 : index
    %c0_3 = arith.constant 0 : index
    %c0_4 = arith.constant 0 : index
    %2 = vector.load %arg4[%c0_2, %c0_3, %c0_4] : memref<2x1x128xf32, #tpu.memory_space<vmem>>, vector<1x1x128xf32>
    %3 = vector.shape_cast %2 : vector<1x1x128xf32> to vector<1x128xf32>
    %c0_5 = arith.constant 0 : index
    %c0_6 = arith.constant 0 : index
    %4 = vector.load %arg1[%c0_5, %c0_6] : memref<512x32xbf16, #tpu.memory_space<vmem>>, vector<64x32xbf16>
    %cst = arith.constant dense<0.000000e+00> : vector<64x128xf32>
    %5 = tpu.matmul %4, %1, %cst {dimension_numbers = #tpu.dot_dimension_numbers<[1], [0], [0], [1], [0, 0, 1, 1], [], []>} : vector<64x32xbf16>, vector<32x128xbf16>, vector<64x128xf32> -> vector<64x128xf32>
    %6 = vector.broadcast %3 : vector<1x128xf32> to vector<64x128xf32>
    %7 = arith.addf %5, %6 : vector<64x128xf32>
    %c0_7 = arith.constant 0 : index
    %c0_8 = arith.constant 0 : index
    %8 = vector.load %arg6[%c0_7, %c0_8] : memref<512x128xf32, #tpu.memory_space<vmem>>, vector<64x128xf32>
    tpu.vector_store %arg6[%c0_7, %c0_8], %7 {strides = array<i32>} : memref<512x128xf32, #tpu.memory_space<vmem>>, vector<64x128xf32>,
    %c64 = arith.constant 64 : index
    %c0_9 = arith.constant 0 : index
    %9 = vector.load %arg1[%c64, %c0_9] : memref<512x32xbf16, #tpu.memory_space<vmem>>, vector<64x32xbf16>
    %cst_10 = arith.constant dense<0.000000e+00> : vector<64x128xf32>
    %10 = tpu.matmul %9, %1, %cst_10 {dimension_numbers = #tpu.dot_dimension_numbers<[1], [0], [0], [1], [0, 0, 1, 1], [], []>} : vector<64x32xbf16>, vector<32x128xbf16>, vector<64x128xf32> -> vector<64x128xf32>
    %11 = vector.broadcast %3 : vector<1x128xf32> to vector<64x128xf32>
    %12 = arith.addf %10, %11 : vector<64x128xf32>
    %c64_11 = arith.constant 64 : index
    %c0_12 = arith.constant 0 : index
    %13 = vector.load %arg6[%c64_11, %c0_12] : memref<512x128xf32, #tpu.memory_space<vmem>>, vector<64x128xf32>
    tpu.vector_store %arg6[%c64_11, %c0_12], %12 {strides = array<i32>} : memref<512x128xf32, #tpu.memory_space<vmem>>, vector<64x128xf32>,
    %c128 = arith.constant 128 : index
    %c0_13 = arith.constant 0 : index
    %14 = vector.load %arg1[%c128, %c0_13] : memref<512x32xbf16, #tpu.memory_space<vmem>>, vector<64x32xbf16>
    %cst_14 = arith.constant dense<0.000000e+00> : vector<64x128xf32>
    %15 = tpu.matmul %14, %1, %cst_14 {dimension_numbers = #tpu.dot_dimension_numbers<[1], [0], [0], [1], [0, 0, 1, 1], [], []>} : vector<64x32xbf16>, vector<32x128xbf16>, vector<64x128xf32> -> vector<64x128xf32>
    %16 = vector.broadcast %3 : vector<1x128xf32> to vector<64x128xf32>
    %17 = arith.addf %15, %16 : vector<64x128xf32>
    %c128_15 = arith.constant 128 : index
    %c0_16 = arith.constant 0 : index
    %18 = vector.load %arg6[%c128_15, %c0_16] : memref<512x128xf32, #tpu.memory_space<vmem>>, vector<64x128xf32>
    tpu.vector_store %arg6[%c128_15, %c0_16], %17 {strides = array<i32>} : memref<512x128xf32, #tpu.memory_space<vmem>>, vector<64x128xf32>,
    %c192 = arith.constant 192 : index
    %c0_17 = arith.constant 0 : index
    %19 = vector.load %arg1[%c192, %c0_17] : memref<512x32xbf16, #tpu.memory_space<vmem>>, vector<64x32xbf16>
    %cst_18 = arith.constant dense<0.000000e+00> : vector<64x128xf32>
    %20 = tpu.matmul %19, %1, %cst_18 {dimension_numbers = #tpu.dot_dimension_numbers<[1], [0], [0], [1], [0, 0, 1, 1], [], []>} : vector<64x32xbf16>, vector<32x128xbf16>, vector<64x128xf32> -> vector<64x128xf32>
    %21 = vector.broadcast %3 : vector<1x128xf32> to vector<64x128xf32>
    %22 = arith.addf %20, %21 : vector<64x128xf32>
    %c192_19 = arith.constant 192 : index
    %c0_20 = arith.constant 0 : index
    %23 = vector.load %arg6[%c192_19, %c0_20] : memref<512x128xf32, #tpu.memory_space<vmem>>, vector<64x128xf32>
    tpu.vector_store %arg6[%c192_19, %c0_20], %22 {strides = array<i32>} : memref<512x128xf32, #tpu.memory_space<vmem>>, vector<64x128xf32>,
    %c256 = arith.constant 256 : index
    %c0_21 = arith.constant 0 : index
    %24 = vector.load %arg1[%c256, %c0_21] : memref<512x32xbf16, #tpu.memory_space<vmem>>, vector<64x32xbf16>
    %cst_22 = arith.constant dense<0.000000e+00> : vector<64x128xf32>
    %25 = tpu.matmul %24, %1, %cst_22 {dimension_numbers = #tpu.dot_dimension_numbers<[1], [0], [0], [1], [0, 0, 1, 1], [], []>} : vector<64x32xbf16>, vector<32x128xbf16>, vector<64x128xf32> -> vector<64x128xf32>
    %26 = vector.broadcast %3 : vector<1x128xf32> to vector<64x128xf32>
    %27 = arith.addf %25, %26 : vector<64x128xf32>
    %c256_23 = arith.constant 256 : index
    %c0_24 = arith.constant 0 : index
    %28 = vector.load %arg6[%c256_23, %c0_24] : memref<512x128xf32, #tpu.memory_space<vmem>>, vector<64x128xf32>
    tpu.vector_store %arg6[%c256_23, %c0_24], %27 {strides = array<i32>} : memref<512x128xf32, #tpu.memory_space<vmem>>, vector<64x128xf32>,
    %c320 = arith.constant 320 : index
    %c0_25 = arith.constant 0 : index
    %29 = vector.load %arg1[%c320, %c0_25] : memref<512x32xbf16, #tpu.memory_space<vmem>>, vector<64x32xbf16>
    %cst_26 = arith.constant dense<0.000000e+00> : vector<64x128xf32>
    %30 = tpu.matmul %29, %1, %cst_26 {dimension_numbers = #tpu.dot_dimension_numbers<[1], [0], [0], [1], [0, 0, 1, 1], [], []>} : vector<64x32xbf16>, vector<32x128xbf16>, vector<64x128xf32> -> vector<64x128xf32>
    %31 = vector.broadcast %3 : vector<1x128xf32> to vector<64x128xf32>
    %32 = arith.addf %30, %31 : vector<64x128xf32>
    %c320_27 = arith.constant 320 : index
    %c0_28 = arith.constant 0 : index
    %33 = vector.load %arg6[%c320_27, %c0_28] : memref<512x128xf32, #tpu.memory_space<vmem>>, vector<64x128xf32>
    tpu.vector_store %arg6[%c320_27, %c0_28], %32 {strides = array<i32>} : memref<512x128xf32, #tpu.memory_space<vmem>>, vector<64x128xf32>,
    %c384 = arith.constant 384 : index
    %c0_29 = arith.constant 0 : index
    %34 = vector.load %arg1[%c384, %c0_29] : memref<512x32xbf16, #tpu.memory_space<vmem>>, vector<64x32xbf16>
    %cst_30 = arith.constant dense<0.000000e+00> : vector<64x128xf32>
    %35 = tpu.matmul %34, %1, %cst_30 {dimension_numbers = #tpu.dot_dimension_numbers<[1], [0], [0], [1], [0, 0, 1, 1], [], []>} : vector<64x32xbf16>, vector<32x128xbf16>, vector<64x128xf32> -> vector<64x128xf32>
    %36 = vector.broadcast %3 : vector<1x128xf32> to vector<64x128xf32>
    %37 = arith.addf %35, %36 : vector<64x128xf32>
    %c384_31 = arith.constant 384 : index
    %c0_32 = arith.constant 0 : index
    %38 = vector.load %arg6[%c384_31, %c0_32] : memref<512x128xf32, #tpu.memory_space<vmem>>, vector<64x128xf32>
    tpu.vector_store %arg6[%c384_31, %c0_32], %37 {strides = array<i32>} : memref<512x128xf32, #tpu.memory_space<vmem>>, vector<64x128xf32>,
    %c448 = arith.constant 448 : index
    %c0_33 = arith.constant 0 : index
    %39 = vector.load %arg1[%c448, %c0_33] : memref<512x32xbf16, #tpu.memory_space<vmem>>, vector<64x32xbf16>
    %cst_34 = arith.constant dense<0.000000e+00> : vector<64x128xf32>
    %40 = tpu.matmul %39, %1, %cst_34 {dimension_numbers = #tpu.dot_dimension_numbers<[1], [0], [0], [1], [0, 0, 1, 1], [], []>} : vector<64x32xbf16>, vector<32x128xbf16>, vector<64x128xf32> -> vector<64x128xf32>
    %41 = vector.broadcast %3 : vector<1x128xf32> to vector<64x128xf32>
    %42 = arith.addf %40, %41 : vector<64x128xf32>
    %c448_35 = arith.constant 448 : index
    %c0_36 = arith.constant 0 : index
    %43 = vector.load %arg6[%c448_35, %c0_36] : memref<512x128xf32, #tpu.memory_space<vmem>>, vector<64x128xf32>
    tpu.vector_store %arg6[%c448_35, %c0_36], %42 {strides = array<i32>} : memref<512x128xf32, #tpu.memory_space<vmem>>, vector<64x128xf32>,
    %c0_37 = arith.constant 0 : index
    %c0_38 = arith.constant 0 : index
    %c0_39 = arith.constant 0 : index
    %44 = vector.load %arg3[%c0_37, %c0_38, %c0_39] : memref<2x32x128xbf16, #tpu.memory_space<vmem>>, vector<1x32x128xbf16>
    %45 = vector.shape_cast %44 : vector<1x32x128xbf16> to vector<32x128xbf16>
    %c1 = arith.constant 1 : index
    %c0_40 = arith.constant 0 : index
    %c0_41 = arith.constant 0 : index
    %46 = vector.load %arg3[%c1, %c0_40, %c0_41] : memref<2x32x128xbf16, #tpu.memory_space<vmem>>, vector<1x32x128xbf16>
    %47 = vector.shape_cast %46 : vector<1x32x128xbf16> to vector<32x128xbf16>
    %c1_42 = arith.constant 1 : index
    %c0_43 = arith.constant 0 : index
    %c0_44 = arith.constant 0 : index
    %48 = vector.load %arg2[%c1_42, %c0_43, %c0_44] : memref<2x32x128xbf16, #tpu.memory_space<vmem>>, vector<1x32x128xbf16>
    %49 = vector.shape_cast %48 : vector<1x32x128xbf16> to vector<32x128xbf16>
    %c1_45 = arith.constant 1 : index
    %c0_46 = arith.constant 0 : index
    %c0_47 = arith.constant 0 : index
    %50 = vector.load %arg4[%c1_45, %c0_46, %c0_47] : memref<2x1x128xf32, #tpu.memory_space<vmem>>, vector<1x1x128xf32>
    %51 = vector.shape_cast %50 : vector<1x1x128xf32> to vector<1x128xf32>
    %cst_48 = arith.constant 0.000000e+00 : f32
    %52 = vector.broadcast %cst_48 : f32 to vector<64x32xf32>
    %cst_49 = arith.constant 0.000000e+00 : f32
    %53 = vector.broadcast %cst_49 : f32 to vector<64x32xf32>
    %cst_50 = arith.constant 0.000000e+00 : f32
    %54 = vector.broadcast %cst_50 : f32 to vector<64x32xf32>
    %cst_51 = arith.constant 0.000000e+00 : f32
    %55 = vector.broadcast %cst_51 : f32 to vector<64x32xf32>
    %c0_52 = arith.constant 0 : index
    %c0_53 = arith.constant 0 : index
    %56 = vector.load %arg6[%c0_52, %c0_53] : memref<512x128xf32, #tpu.memory_space<vmem>>, vector<64x128xf32>
    %57 = arith.truncf %52 : vector<64x32xf32> to vector<64x32xbf16>
    %cst_54 = arith.constant dense<0.000000e+00> : vector<64x128xf32>
    %58 = tpu.matmul %57, %45, %cst_54 {dimension_numbers = #tpu.dot_dimension_numbers<[1], [0], [0], [1], [0, 0, 1, 1], [], []>} : vector<64x32xbf16>, vector<32x128xbf16>, vector<64x128xf32> -> vector<64x128xf32>
    %59 = arith.addf %56, %58 : vector<64x128xf32>
    %60 = arith.negf %59 : vector<64x128xf32>
    %61 = math.exp %60 : vector<64x128xf32>
    %cst_55 = arith.constant 1.000000e+00 : f32
    %62 = vector.broadcast %cst_55 : f32 to vector<64x128xf32>
    %63 = arith.addf %62, %61 : vector<64x128xf32>
    %64 = arith.divf %62, %63 : vector<64x128xf32>
    %65 = math.tanh %59 : vector<64x128xf32>
    %66 = vector.extract_strided_slice %64 {offsets = [0, 0], sizes = [64, 32], strides = [1, 1]} : vector<64x128xf32> to vector<64x32xf32>
    %67 = vector.extract_strided_slice %64 {offsets = [0, 32], sizes = [64, 32], strides = [1, 1]} : vector<64x128xf32> to vector<64x32xf32>
    %68 = vector.extract_strided_slice %65 {offsets = [0, 64], sizes = [64, 32], strides = [1, 1]} : vector<64x128xf32> to vector<64x32xf32>
    %69 = vector.extract_strided_slice %64 {offsets = [0, 96], sizes = [64, 32], strides = [1, 1]} : vector<64x128xf32> to vector<64x32xf32>
    %70 = arith.mulf %67, %54 : vector<64x32xf32>
    %71 = arith.mulf %66, %68 : vector<64x32xf32>
    %72 = arith.addf %70, %71 : vector<64x32xf32>
    %73 = math.tanh %72 : vector<64x32xf32>
    %74 = arith.mulf %69, %73 : vector<64x32xf32>
    %c64_56 = arith.constant 64 : index
    %c0_57 = arith.constant 0 : index
    %75 = vector.load %arg6[%c64_56, %c0_57] : memref<512x128xf32, #tpu.memory_space<vmem>>, vector<64x128xf32>
    %76 = arith.truncf %74 : vector<64x32xf32> to vector<64x32xbf16>
    %cst_58 = arith.constant dense<0.000000e+00> : vector<64x128xf32>
    %77 = tpu.matmul %76, %45, %cst_58 {dimension_numbers = #tpu.dot_dimension_numbers<[1], [0], [0], [1], [0, 0, 1, 1], [], []>} : vector<64x32xbf16>, vector<32x128xbf16>, vector<64x128xf32> -> vector<64x128xf32>
    %78 = arith.addf %75, %77 : vector<64x128xf32>
    %79 = arith.negf %78 : vector<64x128xf32>
    %80 = math.exp %79 : vector<64x128xf32>
    %cst_59 = arith.constant 1.000000e+00 : f32
    %81 = vector.broadcast %cst_59 : f32 to vector<64x128xf32>
    %82 = arith.addf %81, %80 : vector<64x128xf32>
    %83 = arith.divf %81, %82 : vector<64x128xf32>
    %84 = math.tanh %78 : vector<64x128xf32>
    %85 = vector.extract_strided_slice %83 {offsets = [0, 0], sizes = [64, 32], strides = [1, 1]} : vector<64x128xf32> to vector<64x32xf32>
    %86 = vector.extract_strided_slice %83 {offsets = [0, 32], sizes = [64, 32], strides = [1, 1]} : vector<64x128xf32> to vector<64x32xf32>
    %87 = vector.extract_strided_slice %84 {offsets = [0, 64], sizes = [64, 32], strides = [1, 1]} : vector<64x128xf32> to vector<64x32xf32>
    %88 = vector.extract_strided_slice %83 {offsets = [0, 96], sizes = [64, 32], strides = [1, 1]} : vector<64x128xf32> to vector<64x32xf32>
    %89 = arith.mulf %86, %72 : vector<64x32xf32>
    %90 = arith.mulf %85, %87 : vector<64x32xf32>
    %91 = arith.addf %89, %90 : vector<64x32xf32>
    %92 = math.tanh %91 : vector<64x32xf32>
    %93 = arith.mulf %88, %92 : vector<64x32xf32>
    %94 = arith.truncf %74 : vector<64x32xf32> to vector<64x32xbf16>
    %cst_60 = arith.constant dense<0.000000e+00> : vector<64x128xf32>
    %95 = tpu.matmul %94, %49, %cst_60 {dimension_numbers = #tpu.dot_dimension_numbers<[1], [0], [0], [1], [0, 0, 1, 1], [], []>} : vector<64x32xbf16>, vector<32x128xbf16>, vector<64x128xf32> -> vector<64x128xf32>
    %96 = vector.broadcast %51 : vector<1x128xf32> to vector<64x128xf32>
    %97 = arith.addf %95, %96 : vector<64x128xf32>
    %98 = arith.truncf %53 : vector<64x32xf32> to vector<64x32xbf16>
    %cst_61 = arith.constant dense<0.000000e+00> : vector<64x128xf32>
    %99 = tpu.matmul %98, %47, %cst_61 {dimension_numbers = #tpu.dot_dimension_numbers<[1], [0], [0], [1], [0, 0, 1, 1], [], []>} : vector<64x32xbf16>, vector<32x128xbf16>, vector<64x128xf32> -> vector<64x128xf32>
    %100 = arith.addf %97, %99 : vector<64x128xf32>
    %101 = arith.negf %100 : vector<64x128xf32>
    %102 = math.exp %101 : vector<64x128xf32>
    %cst_62 = arith.constant 1.000000e+00 : f32
    %103 = vector.broadcast %cst_62 : f32 to vector<64x128xf32>
    %104 = arith.addf %103, %102 : vector<64x128xf32>
    %105 = arith.divf %103, %104 : vector<64x128xf32>
    %106 = math.tanh %100 : vector<64x128xf32>
    %107 = vector.extract_strided_slice %105 {offsets = [0, 0], sizes = [64, 32], strides = [1, 1]} : vector<64x128xf32> to vector<64x32xf32>
    %108 = vector.extract_strided_slice %105 {offsets = [0, 32], sizes = [64, 32], strides = [1, 1]} : vector<64x128xf32> to vector<64x32xf32>
    %109 = vector.extract_strided_slice %106 {offsets = [0, 64], sizes = [64, 32], strides = [1, 1]} : vector<64x128xf32> to vector<64x32xf32>
    %110 = vector.extract_strided_slice %105 {offsets = [0, 96], sizes = [64, 32], strides = [1, 1]} : vector<64x128xf32> to vector<64x32xf32>
    %111 = arith.mulf %108, %55 : vector<64x32xf32>
    %112 = arith.mulf %107, %109 : vector<64x32xf32>
    %113 = arith.addf %111, %112 : vector<64x32xf32>
    %114 = math.tanh %113 : vector<64x32xf32>
    %115 = arith.mulf %110, %114 : vector<64x32xf32>
    %c128_63 = arith.constant 128 : index
    %c0_64 = arith.constant 0 : index
    %116 = vector.load %arg6[%c128_63, %c0_64] : memref<512x128xf32, #tpu.memory_space<vmem>>, vector<64x128xf32>
    %117 = arith.truncf %93 : vector<64x32xf32> to vector<64x32xbf16>
    %cst_65 = arith.constant dense<0.000000e+00> : vector<64x128xf32>
    %118 = tpu.matmul %117, %45, %cst_65 {dimension_numbers = #tpu.dot_dimension_numbers<[1], [0], [0], [1], [0, 0, 1, 1], [], []>} : vector<64x32xbf16>, vector<32x128xbf16>, vector<64x128xf32> -> vector<64x128xf32>
    %119 = arith.addf %116, %118 : vector<64x128xf32>
    %120 = arith.negf %119 : vector<64x128xf32>
    %121 = math.exp %120 : vector<64x128xf32>
    %cst_66 = arith.constant 1.000000e+00 : f32
    %122 = vector.broadcast %cst_66 : f32 to vector<64x128xf32>
    %123 = arith.addf %122, %121 : vector<64x128xf32>
    %124 = arith.divf %122, %123 : vector<64x128xf32>
    %125 = math.tanh %119 : vector<64x128xf32>
    %126 = vector.extract_strided_slice %124 {offsets = [0, 0], sizes = [64, 32], strides = [1, 1]} : vector<64x128xf32> to vector<64x32xf32>
    %127 = vector.extract_strided_slice %124 {offsets = [0, 32], sizes = [64, 32], strides = [1, 1]} : vector<64x128xf32> to vector<64x32xf32>
    %128 = vector.extract_strided_slice %125 {offsets = [0, 64], sizes = [64, 32], strides = [1, 1]} : vector<64x128xf32> to vector<64x32xf32>
    %129 = vector.extract_strided_slice %124 {offsets = [0, 96], sizes = [64, 32], strides = [1, 1]} : vector<64x128xf32> to vector<64x32xf32>
    %130 = arith.mulf %127, %91 : vector<64x32xf32>
    %131 = arith.mulf %126, %128 : vector<64x32xf32>
    %132 = arith.addf %130, %131 : vector<64x32xf32>
    %133 = math.tanh %132 : vector<64x32xf32>
    %134 = arith.mulf %129, %133 : vector<64x32xf32>
    %135 = arith.truncf %93 : vector<64x32xf32> to vector<64x32xbf16>
    %cst_67 = arith.constant dense<0.000000e+00> : vector<64x128xf32>
    %136 = tpu.matmul %135, %49, %cst_67 {dimension_numbers = #tpu.dot_dimension_numbers<[1], [0], [0], [1], [0, 0, 1, 1], [], []>} : vector<64x32xbf16>, vector<32x128xbf16>, vector<64x128xf32> -> vector<64x128xf32>
    %137 = vector.broadcast %51 : vector<1x128xf32> to vector<64x128xf32>
    %138 = arith.addf %136, %137 : vector<64x128xf32>
    %139 = arith.truncf %115 : vector<64x32xf32> to vector<64x32xbf16>
    %cst_68 = arith.constant dense<0.000000e+00> : vector<64x128xf32>
    %140 = tpu.matmul %139, %47, %cst_68 {dimension_numbers = #tpu.dot_dimension_numbers<[1], [0], [0], [1], [0, 0, 1, 1], [], []>} : vector<64x32xbf16>, vector<32x128xbf16>, vector<64x128xf32> -> vector<64x128xf32>
    %141 = arith.addf %138, %140 : vector<64x128xf32>
    %142 = arith.negf %141 : vector<64x128xf32>
    %143 = math.exp %142 : vector<64x128xf32>
    %cst_69 = arith.constant 1.000000e+00 : f32
    %144 = vector.broadcast %cst_69 : f32 to vector<64x128xf32>
    %145 = arith.addf %144, %143 : vector<64x128xf32>
    %146 = arith.divf %144, %145 : vector<64x128xf32>
    %147 = math.tanh %141 : vector<64x128xf32>
    %148 = vector.extract_strided_slice %146 {offsets = [0, 0], sizes = [64, 32], strides = [1, 1]} : vector<64x128xf32> to vector<64x32xf32>
    %149 = vector.extract_strided_slice %146 {offsets = [0, 32], sizes = [64, 32], strides = [1, 1]} : vector<64x128xf32> to vector<64x32xf32>
    %150 = vector.extract_strided_slice %147 {offsets = [0, 64], sizes = [64, 32], strides = [1, 1]} : vector<64x128xf32> to vector<64x32xf32>
    %151 = vector.extract_strided_slice %146 {offsets = [0, 96], sizes = [64, 32], strides = [1, 1]} : vector<64x128xf32> to vector<64x32xf32>
    %152 = arith.mulf %149, %113 : vector<64x32xf32>
    %153 = arith.mulf %148, %150 : vector<64x32xf32>
    %154 = arith.addf %152, %153 : vector<64x32xf32>
    %155 = math.tanh %154 : vector<64x32xf32>
    %156 = arith.mulf %151, %155 : vector<64x32xf32>
    %c192_70 = arith.constant 192 : index
    %c0_71 = arith.constant 0 : index
    %157 = vector.load %arg6[%c192_70, %c0_71] : memref<512x128xf32, #tpu.memory_space<vmem>>, vector<64x128xf32>
    %158 = arith.truncf %134 : vector<64x32xf32> to vector<64x32xbf16>
    %cst_72 = arith.constant dense<0.000000e+00> : vector<64x128xf32>
    %159 = tpu.matmul %158, %45, %cst_72 {dimension_numbers = #tpu.dot_dimension_numbers<[1], [0], [0], [1], [0, 0, 1, 1], [], []>} : vector<64x32xbf16>, vector<32x128xbf16>, vector<64x128xf32> -> vector<64x128xf32>
    %160 = arith.addf %157, %159 : vector<64x128xf32>
    %161 = arith.negf %160 : vector<64x128xf32>
    %162 = math.exp %161 : vector<64x128xf32>
    %cst_73 = arith.constant 1.000000e+00 : f32
    %163 = vector.broadcast %cst_73 : f32 to vector<64x128xf32>
    %164 = arith.addf %163, %162 : vector<64x128xf32>
    %165 = arith.divf %163, %164 : vector<64x128xf32>
    %166 = math.tanh %160 : vector<64x128xf32>
    %167 = vector.extract_strided_slice %165 {offsets = [0, 0], sizes = [64, 32], strides = [1, 1]} : vector<64x128xf32> to vector<64x32xf32>
    %168 = vector.extract_strided_slice %165 {offsets = [0, 32], sizes = [64, 32], strides = [1, 1]} : vector<64x128xf32> to vector<64x32xf32>
    %169 = vector.extract_strided_slice %166 {offsets = [0, 64], sizes = [64, 32], strides = [1, 1]} : vector<64x128xf32> to vector<64x32xf32>
    %170 = vector.extract_strided_slice %165 {offsets = [0, 96], sizes = [64, 32], strides = [1, 1]} : vector<64x128xf32> to vector<64x32xf32>
    %171 = arith.mulf %168, %132 : vector<64x32xf32>
    %172 = arith.mulf %167, %169 : vector<64x32xf32>
    %173 = arith.addf %171, %172 : vector<64x32xf32>
    %174 = math.tanh %173 : vector<64x32xf32>
    %175 = arith.mulf %170, %174 : vector<64x32xf32>
    %176 = arith.truncf %134 : vector<64x32xf32> to vector<64x32xbf16>
    %cst_74 = arith.constant dense<0.000000e+00> : vector<64x128xf32>
    %177 = tpu.matmul %176, %49, %cst_74 {dimension_numbers = #tpu.dot_dimension_numbers<[1], [0], [0], [1], [0, 0, 1, 1], [], []>} : vector<64x32xbf16>, vector<32x128xbf16>, vector<64x128xf32> -> vector<64x128xf32>
    %178 = vector.broadcast %51 : vector<1x128xf32> to vector<64x128xf32>
    %179 = arith.addf %177, %178 : vector<64x128xf32>
    %180 = arith.truncf %156 : vector<64x32xf32> to vector<64x32xbf16>
    %cst_75 = arith.constant dense<0.000000e+00> : vector<64x128xf32>
    %181 = tpu.matmul %180, %47, %cst_75 {dimension_numbers = #tpu.dot_dimension_numbers<[1], [0], [0], [1], [0, 0, 1, 1], [], []>} : vector<64x32xbf16>, vector<32x128xbf16>, vector<64x128xf32> -> vector<64x128xf32>
    %182 = arith.addf %179, %181 : vector<64x128xf32>
    %183 = arith.negf %182 : vector<64x128xf32>
    %184 = math.exp %183 : vector<64x128xf32>
    %cst_76 = arith.constant 1.000000e+00 : f32
    %185 = vector.broadcast %cst_76 : f32 to vector<64x128xf32>
    %186 = arith.addf %185, %184 : vector<64x128xf32>
    %187 = arith.divf %185, %186 : vector<64x128xf32>
    %188 = math.tanh %182 : vector<64x128xf32>
    %189 = vector.extract_strided_slice %187 {offsets = [0, 0], sizes = [64, 32], strides = [1, 1]} : vector<64x128xf32> to vector<64x32xf32>
    %190 = vector.extract_strided_slice %187 {offsets = [0, 32], sizes = [64, 32], strides = [1, 1]} : vector<64x128xf32> to vector<64x32xf32>
    %191 = vector.extract_strided_slice %188 {offsets = [0, 64], sizes = [64, 32], strides = [1, 1]} : vector<64x128xf32> to vector<64x32xf32>
    %192 = vector.extract_strided_slice %187 {offsets = [0, 96], sizes = [64, 32], strides = [1, 1]} : vector<64x128xf32> to vector<64x32xf32>
    %193 = arith.mulf %190, %154 : vector<64x32xf32>
    %194 = arith.mulf %189, %191 : vector<64x32xf32>
    %195 = arith.addf %193, %194 : vector<64x32xf32>
    %196 = math.tanh %195 : vector<64x32xf32>
    %197 = arith.mulf %192, %196 : vector<64x32xf32>
    %c256_77 = arith.constant 256 : index
    %c0_78 = arith.constant 0 : index
    %198 = vector.load %arg6[%c256_77, %c0_78] : memref<512x128xf32, #tpu.memory_space<vmem>>, vector<64x128xf32>
    %199 = arith.truncf %175 : vector<64x32xf32> to vector<64x32xbf16>
    %cst_79 = arith.constant dense<0.000000e+00> : vector<64x128xf32>
    %200 = tpu.matmul %199, %45, %cst_79 {dimension_numbers = #tpu.dot_dimension_numbers<[1], [0], [0], [1], [0, 0, 1, 1], [], []>} : vector<64x32xbf16>, vector<32x128xbf16>, vector<64x128xf32> -> vector<64x128xf32>
    %201 = arith.addf %198, %200 : vector<64x128xf32>
    %202 = arith.negf %201 : vector<64x128xf32>
    %203 = math.exp %202 : vector<64x128xf32>
    %cst_80 = arith.constant 1.000000e+00 : f32
    %204 = vector.broadcast %cst_80 : f32 to vector<64x128xf32>
    %205 = arith.addf %204, %203 : vector<64x128xf32>
    %206 = arith.divf %204, %205 : vector<64x128xf32>
    %207 = math.tanh %201 : vector<64x128xf32>
    %208 = vector.extract_strided_slice %206 {offsets = [0, 0], sizes = [64, 32], strides = [1, 1]} : vector<64x128xf32> to vector<64x32xf32>
    %209 = vector.extract_strided_slice %206 {offsets = [0, 32], sizes = [64, 32], strides = [1, 1]} : vector<64x128xf32> to vector<64x32xf32>
    %210 = vector.extract_strided_slice %207 {offsets = [0, 64], sizes = [64, 32], strides = [1, 1]} : vector<64x128xf32> to vector<64x32xf32>
    %211 = vector.extract_strided_slice %206 {offsets = [0, 96], sizes = [64, 32], strides = [1, 1]} : vector<64x128xf32> to vector<64x32xf32>
    %212 = arith.mulf %209, %173 : vector<64x32xf32>
    %213 = arith.mulf %208, %210 : vector<64x32xf32>
    %214 = arith.addf %212, %213 : vector<64x32xf32>
    %215 = math.tanh %214 : vector<64x32xf32>
    %216 = arith.mulf %211, %215 : vector<64x32xf32>
    %217 = arith.truncf %175 : vector<64x32xf32> to vector<64x32xbf16>
    %cst_81 = arith.constant dense<0.000000e+00> : vector<64x128xf32>
    %218 = tpu.matmul %217, %49, %cst_81 {dimension_numbers = #tpu.dot_dimension_numbers<[1], [0], [0], [1], [0, 0, 1, 1], [], []>} : vector<64x32xbf16>, vector<32x128xbf16>, vector<64x128xf32> -> vector<64x128xf32>
    %219 = vector.broadcast %51 : vector<1x128xf32> to vector<64x128xf32>
    %220 = arith.addf %218, %219 : vector<64x128xf32>
    %221 = arith.truncf %197 : vector<64x32xf32> to vector<64x32xbf16>
    %cst_82 = arith.constant dense<0.000000e+00> : vector<64x128xf32>
    %222 = tpu.matmul %221, %47, %cst_82 {dimension_numbers = #tpu.dot_dimension_numbers<[1], [0], [0], [1], [0, 0, 1, 1], [], []>} : vector<64x32xbf16>, vector<32x128xbf16>, vector<64x128xf32> -> vector<64x128xf32>
    %223 = arith.addf %220, %222 : vector<64x128xf32>
    %224 = arith.negf %223 : vector<64x128xf32>
    %225 = math.exp %224 : vector<64x128xf32>
    %cst_83 = arith.constant 1.000000e+00 : f32
    %226 = vector.broadcast %cst_83 : f32 to vector<64x128xf32>
    %227 = arith.addf %226, %225 : vector<64x128xf32>
    %228 = arith.divf %226, %227 : vector<64x128xf32>
    %229 = math.tanh %223 : vector<64x128xf32>
    %230 = vector.extract_strided_slice %228 {offsets = [0, 0], sizes = [64, 32], strides = [1, 1]} : vector<64x128xf32> to vector<64x32xf32>
    %231 = vector.extract_strided_slice %228 {offsets = [0, 32], sizes = [64, 32], strides = [1, 1]} : vector<64x128xf32> to vector<64x32xf32>
    %232 = vector.extract_strided_slice %229 {offsets = [0, 64], sizes = [64, 32], strides = [1, 1]} : vector<64x128xf32> to vector<64x32xf32>
    %233 = vector.extract_strided_slice %228 {offsets = [0, 96], sizes = [64, 32], strides = [1, 1]} : vector<64x128xf32> to vector<64x32xf32>
    %234 = arith.mulf %231, %195 : vector<64x32xf32>
    %235 = arith.mulf %230, %232 : vector<64x32xf32>
    %236 = arith.addf %234, %235 : vector<64x32xf32>
    %237 = math.tanh %236 : vector<64x32xf32>
    %238 = arith.mulf %233, %237 : vector<64x32xf32>
    %c320_84 = arith.constant 320 : index
    %c0_85 = arith.constant 0 : index
    %239 = vector.load %arg6[%c320_84, %c0_85] : memref<512x128xf32, #tpu.memory_space<vmem>>, vector<64x128xf32>
    %240 = arith.truncf %216 : vector<64x32xf32> to vector<64x32xbf16>
    %cst_86 = arith.constant dense<0.000000e+00> : vector<64x128xf32>
    %241 = tpu.matmul %240, %45, %cst_86 {dimension_numbers = #tpu.dot_dimension_numbers<[1], [0], [0], [1], [0, 0, 1, 1], [], []>} : vector<64x32xbf16>, vector<32x128xbf16>, vector<64x128xf32> -> vector<64x128xf32>
    %242 = arith.addf %239, %241 : vector<64x128xf32>
    %243 = arith.negf %242 : vector<64x128xf32>
    %244 = math.exp %243 : vector<64x128xf32>
    %cst_87 = arith.constant 1.000000e+00 : f32
    %245 = vector.broadcast %cst_87 : f32 to vector<64x128xf32>
    %246 = arith.addf %245, %244 : vector<64x128xf32>
    %247 = arith.divf %245, %246 : vector<64x128xf32>
    %248 = math.tanh %242 : vector<64x128xf32>
    %249 = vector.extract_strided_slice %247 {offsets = [0, 0], sizes = [64, 32], strides = [1, 1]} : vector<64x128xf32> to vector<64x32xf32>
    %250 = vector.extract_strided_slice %247 {offsets = [0, 32], sizes = [64, 32], strides = [1, 1]} : vector<64x128xf32> to vector<64x32xf32>
    %251 = vector.extract_strided_slice %248 {offsets = [0, 64], sizes = [64, 32], strides = [1, 1]} : vector<64x128xf32> to vector<64x32xf32>
    %252 = vector.extract_strided_slice %247 {offsets = [0, 96], sizes = [64, 32], strides = [1, 1]} : vector<64x128xf32> to vector<64x32xf32>
    %253 = arith.mulf %250, %214 : vector<64x32xf32>
    %254 = arith.mulf %249, %251 : vector<64x32xf32>
    %255 = arith.addf %253, %254 : vector<64x32xf32>
    %256 = math.tanh %255 : vector<64x32xf32>
    %257 = arith.mulf %252, %256 : vector<64x32xf32>
    %258 = arith.truncf %216 : vector<64x32xf32> to vector<64x32xbf16>
    %cst_88 = arith.constant dense<0.000000e+00> : vector<64x128xf32>
    %259 = tpu.matmul %258, %49, %cst_88 {dimension_numbers = #tpu.dot_dimension_numbers<[1], [0], [0], [1], [0, 0, 1, 1], [], []>} : vector<64x32xbf16>, vector<32x128xbf16>, vector<64x128xf32> -> vector<64x128xf32>
    %260 = vector.broadcast %51 : vector<1x128xf32> to vector<64x128xf32>
    %261 = arith.addf %259, %260 : vector<64x128xf32>
    %262 = arith.truncf %238 : vector<64x32xf32> to vector<64x32xbf16>
    %cst_89 = arith.constant dense<0.000000e+00> : vector<64x128xf32>
    %263 = tpu.matmul %262, %47, %cst_89 {dimension_numbers = #tpu.dot_dimension_numbers<[1], [0], [0], [1], [0, 0, 1, 1], [], []>} : vector<64x32xbf16>, vector<32x128xbf16>, vector<64x128xf32> -> vector<64x128xf32>
    %264 = arith.addf %261, %263 : vector<64x128xf32>
    %265 = arith.negf %264 : vector<64x128xf32>
    %266 = math.exp %265 : vector<64x128xf32>
    %cst_90 = arith.constant 1.000000e+00 : f32
    %267 = vector.broadcast %cst_90 : f32 to vector<64x128xf32>
    %268 = arith.addf %267, %266 : vector<64x128xf32>
    %269 = arith.divf %267, %268 : vector<64x128xf32>
    %270 = math.tanh %264 : vector<64x128xf32>
    %271 = vector.extract_strided_slice %269 {offsets = [0, 0], sizes = [64, 32], strides = [1, 1]} : vector<64x128xf32> to vector<64x32xf32>
    %272 = vector.extract_strided_slice %269 {offsets = [0, 32], sizes = [64, 32], strides = [1, 1]} : vector<64x128xf32> to vector<64x32xf32>
    %273 = vector.extract_strided_slice %270 {offsets = [0, 64], sizes = [64, 32], strides = [1, 1]} : vector<64x128xf32> to vector<64x32xf32>
    %274 = vector.extract_strided_slice %269 {offsets = [0, 96], sizes = [64, 32], strides = [1, 1]} : vector<64x128xf32> to vector<64x32xf32>
    %275 = arith.mulf %272, %236 : vector<64x32xf32>
    %276 = arith.mulf %271, %273 : vector<64x32xf32>
    %277 = arith.addf %275, %276 : vector<64x32xf32>
    %278 = math.tanh %277 : vector<64x32xf32>
    %279 = arith.mulf %274, %278 : vector<64x32xf32>
    %c384_91 = arith.constant 384 : index
    %c0_92 = arith.constant 0 : index
    %280 = vector.load %arg6[%c384_91, %c0_92] : memref<512x128xf32, #tpu.memory_space<vmem>>, vector<64x128xf32>
    %281 = arith.truncf %257 : vector<64x32xf32> to vector<64x32xbf16>
    %cst_93 = arith.constant dense<0.000000e+00> : vector<64x128xf32>
    %282 = tpu.matmul %281, %45, %cst_93 {dimension_numbers = #tpu.dot_dimension_numbers<[1], [0], [0], [1], [0, 0, 1, 1], [], []>} : vector<64x32xbf16>, vector<32x128xbf16>, vector<64x128xf32> -> vector<64x128xf32>
    %283 = arith.addf %280, %282 : vector<64x128xf32>
    %284 = arith.negf %283 : vector<64x128xf32>
    %285 = math.exp %284 : vector<64x128xf32>
    %cst_94 = arith.constant 1.000000e+00 : f32
    %286 = vector.broadcast %cst_94 : f32 to vector<64x128xf32>
    %287 = arith.addf %286, %285 : vector<64x128xf32>
    %288 = arith.divf %286, %287 : vector<64x128xf32>
    %289 = math.tanh %283 : vector<64x128xf32>
    %290 = vector.extract_strided_slice %288 {offsets = [0, 0], sizes = [64, 32], strides = [1, 1]} : vector<64x128xf32> to vector<64x32xf32>
    %291 = vector.extract_strided_slice %288 {offsets = [0, 32], sizes = [64, 32], strides = [1, 1]} : vector<64x128xf32> to vector<64x32xf32>
    %292 = vector.extract_strided_slice %289 {offsets = [0, 64], sizes = [64, 32], strides = [1, 1]} : vector<64x128xf32> to vector<64x32xf32>
    %293 = vector.extract_strided_slice %288 {offsets = [0, 96], sizes = [64, 32], strides = [1, 1]} : vector<64x128xf32> to vector<64x32xf32>
    %294 = arith.mulf %291, %255 : vector<64x32xf32>
    %295 = arith.mulf %290, %292 : vector<64x32xf32>
    %296 = arith.addf %294, %295 : vector<64x32xf32>
    %297 = math.tanh %296 : vector<64x32xf32>
    %298 = arith.mulf %293, %297 : vector<64x32xf32>
    %299 = arith.truncf %257 : vector<64x32xf32> to vector<64x32xbf16>
    %cst_95 = arith.constant dense<0.000000e+00> : vector<64x128xf32>
    %300 = tpu.matmul %299, %49, %cst_95 {dimension_numbers = #tpu.dot_dimension_numbers<[1], [0], [0], [1], [0, 0, 1, 1], [], []>} : vector<64x32xbf16>, vector<32x128xbf16>, vector<64x128xf32> -> vector<64x128xf32>
    %301 = vector.broadcast %51 : vector<1x128xf32> to vector<64x128xf32>
    %302 = arith.addf %300, %301 : vector<64x128xf32>
    %303 = arith.truncf %279 : vector<64x32xf32> to vector<64x32xbf16>
    %cst_96 = arith.constant dense<0.000000e+00> : vector<64x128xf32>
    %304 = tpu.matmul %303, %47, %cst_96 {dimension_numbers = #tpu.dot_dimension_numbers<[1], [0], [0], [1], [0, 0, 1, 1], [], []>} : vector<64x32xbf16>, vector<32x128xbf16>, vector<64x128xf32> -> vector<64x128xf32>
    %305 = arith.addf %302, %304 : vector<64x128xf32>
    %306 = arith.negf %305 : vector<64x128xf32>
    %307 = math.exp %306 : vector<64x128xf32>
    %cst_97 = arith.constant 1.000000e+00 : f32
    %308 = vector.broadcast %cst_97 : f32 to vector<64x128xf32>
    %309 = arith.addf %308, %307 : vector<64x128xf32>
    %310 = arith.divf %308, %309 : vector<64x128xf32>
    %311 = math.tanh %305 : vector<64x128xf32>
    %312 = vector.extract_strided_slice %310 {offsets = [0, 0], sizes = [64, 32], strides = [1, 1]} : vector<64x128xf32> to vector<64x32xf32>
    %313 = vector.extract_strided_slice %310 {offsets = [0, 32], sizes = [64, 32], strides = [1, 1]} : vector<64x128xf32> to vector<64x32xf32>
    %314 = vector.extract_strided_slice %311 {offsets = [0, 64], sizes = [64, 32], strides = [1, 1]} : vector<64x128xf32> to vector<64x32xf32>
    %315 = vector.extract_strided_slice %310 {offsets = [0, 96], sizes = [64, 32], strides = [1, 1]} : vector<64x128xf32> to vector<64x32xf32>
    %316 = arith.mulf %313, %277 : vector<64x32xf32>
    %317 = arith.mulf %312, %314 : vector<64x32xf32>
    %318 = arith.addf %316, %317 : vector<64x32xf32>
    %319 = math.tanh %318 : vector<64x32xf32>
    %320 = arith.mulf %315, %319 : vector<64x32xf32>
    %c448_98 = arith.constant 448 : index
    %c0_99 = arith.constant 0 : index
    %321 = vector.load %arg6[%c448_98, %c0_99] : memref<512x128xf32, #tpu.memory_space<vmem>>, vector<64x128xf32>
    %322 = arith.truncf %298 : vector<64x32xf32> to vector<64x32xbf16>
    %cst_100 = arith.constant dense<0.000000e+00> : vector<64x128xf32>
    %323 = tpu.matmul %322, %45, %cst_100 {dimension_numbers = #tpu.dot_dimension_numbers<[1], [0], [0], [1], [0, 0, 1, 1], [], []>} : vector<64x32xbf16>, vector<32x128xbf16>, vector<64x128xf32> -> vector<64x128xf32>
    %324 = arith.addf %321, %323 : vector<64x128xf32>
    %325 = arith.negf %324 : vector<64x128xf32>
    %326 = math.exp %325 : vector<64x128xf32>
    %cst_101 = arith.constant 1.000000e+00 : f32
    %327 = vector.broadcast %cst_101 : f32 to vector<64x128xf32>
    %328 = arith.addf %327, %326 : vector<64x128xf32>
    %329 = arith.divf %327, %328 : vector<64x128xf32>
    %330 = math.tanh %324 : vector<64x128xf32>
    %331 = vector.extract_strided_slice %329 {offsets = [0, 0], sizes = [64, 32], strides = [1, 1]} : vector<64x128xf32> to vector<64x32xf32>
    %332 = vector.extract_strided_slice %329 {offsets = [0, 32], sizes = [64, 32], strides = [1, 1]} : vector<64x128xf32> to vector<64x32xf32>
    %333 = vector.extract_strided_slice %330 {offsets = [0, 64], sizes = [64, 32], strides = [1, 1]} : vector<64x128xf32> to vector<64x32xf32>
    %334 = vector.extract_strided_slice %329 {offsets = [0, 96], sizes = [64, 32], strides = [1, 1]} : vector<64x128xf32> to vector<64x32xf32>
    %335 = arith.mulf %332, %296 : vector<64x32xf32>
    %336 = arith.mulf %331, %333 : vector<64x32xf32>
    %337 = arith.addf %335, %336 : vector<64x32xf32>
    %338 = math.tanh %337 : vector<64x32xf32>
    %339 = arith.mulf %334, %338 : vector<64x32xf32>
    %340 = arith.truncf %298 : vector<64x32xf32> to vector<64x32xbf16>
    %cst_102 = arith.constant dense<0.000000e+00> : vector<64x128xf32>
    %341 = tpu.matmul %340, %49, %cst_102 {dimension_numbers = #tpu.dot_dimension_numbers<[1], [0], [0], [1], [0, 0, 1, 1], [], []>} : vector<64x32xbf16>, vector<32x128xbf16>, vector<64x128xf32> -> vector<64x128xf32>
    %342 = vector.broadcast %51 : vector<1x128xf32> to vector<64x128xf32>
    %343 = arith.addf %341, %342 : vector<64x128xf32>
    %344 = arith.truncf %320 : vector<64x32xf32> to vector<64x32xbf16>
    %cst_103 = arith.constant dense<0.000000e+00> : vector<64x128xf32>
    %345 = tpu.matmul %344, %47, %cst_103 {dimension_numbers = #tpu.dot_dimension_numbers<[1], [0], [0], [1], [0, 0, 1, 1], [], []>} : vector<64x32xbf16>, vector<32x128xbf16>, vector<64x128xf32> -> vector<64x128xf32>
    %346 = arith.addf %343, %345 : vector<64x128xf32>
    %347 = arith.negf %346 : vector<64x128xf32>
    %348 = math.exp %347 : vector<64x128xf32>
    %cst_104 = arith.constant 1.000000e+00 : f32
    %349 = vector.broadcast %cst_104 : f32 to vector<64x128xf32>
    %350 = arith.addf %349, %348 : vector<64x128xf32>
    %351 = arith.divf %349, %350 : vector<64x128xf32>
    %352 = math.tanh %346 : vector<64x128xf32>
    %353 = vector.extract_strided_slice %351 {offsets = [0, 0], sizes = [64, 32], strides = [1, 1]} : vector<64x128xf32> to vector<64x32xf32>
    %354 = vector.extract_strided_slice %351 {offsets = [0, 32], sizes = [64, 32], strides = [1, 1]} : vector<64x128xf32> to vector<64x32xf32>
    %355 = vector.extract_strided_slice %352 {offsets = [0, 64], sizes = [64, 32], strides = [1, 1]} : vector<64x128xf32> to vector<64x32xf32>
    %356 = vector.extract_strided_slice %351 {offsets = [0, 96], sizes = [64, 32], strides = [1, 1]} : vector<64x128xf32> to vector<64x32xf32>
    %357 = arith.mulf %354, %318 : vector<64x32xf32>
    %358 = arith.mulf %353, %355 : vector<64x32xf32>
    %359 = arith.addf %357, %358 : vector<64x32xf32>
    %360 = math.tanh %359 : vector<64x32xf32>
    %361 = arith.mulf %356, %360 : vector<64x32xf32>
    %362 = arith.truncf %339 : vector<64x32xf32> to vector<64x32xbf16>
    %cst_105 = arith.constant dense<0.000000e+00> : vector<64x128xf32>
    %363 = tpu.matmul %362, %49, %cst_105 {dimension_numbers = #tpu.dot_dimension_numbers<[1], [0], [0], [1], [0, 0, 1, 1], [], []>} : vector<64x32xbf16>, vector<32x128xbf16>, vector<64x128xf32> -> vector<64x128xf32>
    %364 = vector.broadcast %51 : vector<1x128xf32> to vector<64x128xf32>
    %365 = arith.addf %363, %364 : vector<64x128xf32>
    %366 = arith.truncf %361 : vector<64x32xf32> to vector<64x32xbf16>
    %cst_106 = arith.constant dense<0.000000e+00> : vector<64x128xf32>
    %367 = tpu.matmul %366, %47, %cst_106 {dimension_numbers = #tpu.dot_dimension_numbers<[1], [0], [0], [1], [0, 0, 1, 1], [], []>} : vector<64x32xbf16>, vector<32x128xbf16>, vector<64x128xf32> -> vector<64x128xf32>
    %368 = arith.addf %365, %367 : vector<64x128xf32>
    %369 = arith.negf %368 : vector<64x128xf32>
    %370 = math.exp %369 : vector<64x128xf32>
    %cst_107 = arith.constant 1.000000e+00 : f32
    %371 = vector.broadcast %cst_107 : f32 to vector<64x128xf32>
    %372 = arith.addf %371, %370 : vector<64x128xf32>
    %373 = arith.divf %371, %372 : vector<64x128xf32>
    %374 = math.tanh %368 : vector<64x128xf32>
    %375 = vector.extract_strided_slice %373 {offsets = [0, 0], sizes = [64, 32], strides = [1, 1]} : vector<64x128xf32> to vector<64x32xf32>
    %376 = vector.extract_strided_slice %373 {offsets = [0, 32], sizes = [64, 32], strides = [1, 1]} : vector<64x128xf32> to vector<64x32xf32>
    %377 = vector.extract_strided_slice %374 {offsets = [0, 64], sizes = [64, 32], strides = [1, 1]} : vector<64x128xf32> to vector<64x32xf32>
    %378 = vector.extract_strided_slice %373 {offsets = [0, 96], sizes = [64, 32], strides = [1, 1]} : vector<64x128xf32> to vector<64x32xf32>
    %379 = arith.mulf %376, %359 : vector<64x32xf32>
    %380 = arith.mulf %375, %377 : vector<64x32xf32>
    %381 = arith.addf %379, %380 : vector<64x32xf32>
    %382 = math.tanh %381 : vector<64x32xf32>
    %383 = arith.mulf %378, %382 : vector<64x32xf32>
    %c0_108 = arith.constant 0 : index
    %c0_109 = arith.constant 0 : index
    %384 = vector.load %arg5[%c0_108, %c0_109] : memref<64x32xf32, #tpu.memory_space<vmem>>, vector<64x32xf32>
    tpu.vector_store %arg5[%c0_108, %c0_109], %383 {strides = array<i32>} : memref<64x32xf32, #tpu.memory_space<vmem>>, vector<64x32xf32>,
    return
  }
  func.func @transform_0(%arg0: i32) -> (i32, i32) {
    %c0_i32 = arith.constant 0 : i32
    %c0_i32_0 = arith.constant 0 : i32
    return %arg0, %c0_i32 : i32, i32
  }
  func.func @transform_1(%arg0: i32) -> (i32, i32, i32) {
    %c0_i32 = arith.constant 0 : i32
    %c0_i32_0 = arith.constant 0 : i32
    %c0_i32_1 = arith.constant 0 : i32
    %c0_i32_2 = arith.constant 0 : i32
    return %c0_i32, %c0_i32_0, %c0_i32_1 : i32, i32, i32
  }
  func.func @transform_2(%arg0: i32) -> (i32, i32, i32) {
    %c0_i32 = arith.constant 0 : i32
    %c0_i32_0 = arith.constant 0 : i32
    %c0_i32_1 = arith.constant 0 : i32
    %c0_i32_2 = arith.constant 0 : i32
    return %c0_i32, %c0_i32_0, %c0_i32_1 : i32, i32, i32
  }
  func.func @transform_3(%arg0: i32) -> (i32, i32, i32) {
    %c0_i32 = arith.constant 0 : i32
    %c0_i32_0 = arith.constant 0 : i32
    %c0_i32_1 = arith.constant 0 : i32
    %c0_i32_2 = arith.constant 0 : i32
    return %c0_i32, %c0_i32_0, %c0_i32_1 : i32, i32, i32
  }
  func.func @transform_4(%arg0: i32) -> (i32, i32) {
    %c0_i32 = arith.constant 0 : i32
    %c0_i32_0 = arith.constant 0 : i32
    return %arg0, %c0_i32 : i32, i32
  }
}

</mosaic_0001>

<bundles_post_ra>
// kernel: tpu_custom_call.1
= control target key start
LH: loop header
LB: loop body
LE: loop exit
PB: predicated region body
PF: predicated region fallthrough
CT: control target
= control target key end

     0   :  { %s8614_s15 = smov 0   ;;  %s13010_s0 = inlined_call_operand.vmem [shape: bf16[4096,32], index: 0, kind: input, shape index: {}]   ;;  %s13011_s1 = inlined_call_operand.vmem [shape: bf16[2,32,128], index: 1, kind: input, shape index: {}]   ;;  %s13012_s2 = inlined_call_operand.vmem [shape: bf16[2,32,128], index: 2, kind: input, shape index: {}]   ;;  %s13013_s3 = inlined_call_operand.vmem [shape: f32[2,1,128], index: 3, kind: input, shape index: {}]   ;;  %s13014_s4 = inlined_call_operand.vmem [shape: f32[512,32], index: 4, kind: output, shape index: {}]  }
   0x1 LB: > { %s7037_s16 = sadd.s32 4294967295, %s8584_s15   ;;  %p7041_p0 = scmp.ge.s32.totalorder %s8584_s15, 1  ;;  %s8584_s15 = sphi %s8614_s15, %s14_s15  }
   0x2   : > { %p163_p1 = scmp.lt.s32.totalorder %s8584_s15, 9 }
   0x4   : > { %p164_p2 = pnand %p7041_p0, %p163_p1 }
   0x6   : > { %167 = sbr.rel (%p164_p2) target bundleno = 5835 (0x16cb), region = 36 }
   0xb   : > { %v7466_v0 = vld [vmem:[%s13011_s1 + $0x8] sm:$0xff]  ;;  %s7042_s19 = sshll.u32 %s7037_s16, 6  ;;  %v7465_v1 = vld [vmem:[%s13011_s1] sm:$0xff]  ;;  %vm250_vm0 = vcmask 261120   ;;  %v8586_v13 = vmov 0   ;;  %s8587_s6 = smov 64  }
   0xc   : > { %p190_p3 = scmp.lt.s32.totalorder %s7042_s19, 511  ;;  %269 = vmatpush.bf16.msra.mxu0 %v7466_v0  ;;  %346 = vmatpush.bf16.msra.mxu1 %v7466_v0  ;;  %v8644_v5 = vld [vmem:[%s13012_s2 + $0x8] sm:$0xff]  ;;  %v8654_v8 = vld [vmem:[%s13012_s2] sm:$0xff]  ;;  %s8588_s7 = smov 32  }
   0xd   : > { %423 = vmatpush.bf16.msra.mxu2 %v7466_v0  ;;  %500 = vmatpush.bf16.msra.mxu3 %v7466_v0  ;;  %v8690_v29 = vld [vmem:[%s13013_s3] ss:$0 sm:$0xff] }
   0xe   : > { %s13202_s19 = smov (!%p190_p3, %s7042_s19), 511 }
   0xf   : > { %s7043_s22 = sshll.u32 %s13202_s19, 2 }
  0x10   : > { %270 = vmatpush.bf16.msra.mxu0 %v7465_v1  ;;  %s8633_s25 = scalar_lea.vmem %s13010_s0, %s7043_s22  ;;  %347 = vmatpush.bf16.msra.mxu1 %v7465_v1 }
  0x11   : > { %v7467_v2 = vld [vmem:[%s8633_s25] sm:$0xff]  ;;  %424 = vmatpush.bf16.msra.mxu2 %v7465_v1  ;;  %501 = vmatpush.bf16.msra.mxu3 %v7465_v1  ;;  %v7468_v3 = vld [vmem:[%s8633_s25 + $0x8] sm:$0xff]  ;;  %v7469_v4 = vld [vmem:[%s8633_s25 + $0x10] sm:$0xff] }
  0x12   : > { %v7470_v6 = vld [vmem:[%s8633_s25 + $0x18] sm:$0xff]  ;;  %v7483_v7 = vld [vmem:[%s8633_s25 + $0x80] sm:$0xff]  ;;  %v7484_v9 = vld [vmem:[%s8633_s25 + $0x88] sm:$0xff] }
  0x13   : > { %7070 = vmatmul.msk.bf16.vlgmr.msra.gmra.mxu0 %vm250_vm0, %v7467_v2  ;;  %v7485_v10 = vld [vmem:[%s8633_s25 + $0x90] sm:$0xff]  ;;  %v7486_v11 = vld [vmem:[%s8633_s25 + $0x98] sm:$0xff] }
  0x14   : > { %577 = vmatpush.bf16.msrb.mxu0 %v7466_v0  ;;  %654 = vmatpush.bf16.msrb.mxu1 %v7466_v0 }
  0x15   : > { %731 = vmatpush.bf16.msrb.mxu2 %v7466_v0  ;;  %808 = vmatpush.bf16.msrb.mxu3 %v7466_v0 }
  0x18   : > { %578 = vmatpush.bf16.msrb.mxu0 %v7465_v1  ;;  %655 = vmatpush.bf16.msrb.mxu1 %v7465_v1 }
  0x19   : > { %732 = vmatpush.bf16.msrb.mxu2 %v7465_v1  ;;  %809 = vmatpush.bf16.msrb.mxu3 %v7465_v1 }
  0x1c   : > { %884 = vmatpush.bf16.msra.mxu0 %v8644_v5 }
  0x20   : > { %885 = vmatpush.bf16.msra.mxu0 %v8654_v8 }
  0x23   : > { %7071 = vmatmul.msk.bf16.gmra.mxu0 %vm250_vm0, %v7468_v3 }
  0x33   : > { %7072 = vmatmul.msk.bf16.gmra.mxu0 %vm250_vm0, %v7469_v4 }
  0x43   : > { %7073 = vmatmul.msk.bf16.gmra.mxu0 %vm250_vm0, %v7470_v6 }
  0x53   : > { %7150 = vmatmul.msk.bf16.vlgmr.msrb.gmra.mxu0 %vm250_vm0, %v7483_v7 }
  0x54   : > { %2011 = vmatpush.bf16.msrb.mxu0 %v8644_v5 }
  0x58   : > { %2012 = vmatpush.bf16.msrb.mxu0 %v8654_v8 }
  0x63   : > { %7151 = vmatmul.msk.bf16.gmra.mxu0 %vm250_vm0, %v7484_v9 }
  0x73   : > { %7152 = vmatmul.msk.bf16.gmra.mxu0 %vm250_vm0, %v7485_v10 }
  0x83   : > { %7153 = vmatmul.msk.bf16.gmra.mxu0 %vm250_vm0, %v7486_v11 }
  0x90   : > { %v272_v12 = vpop.f32.mrf.mxu0 }
  0x91   : > { %v273_v30 = vadd.f32 %v8690_v29, %v272_v12 }
  0x93   : > { %886 = vmatmul.bf16.vlgmr.msra.gmra.mxu0 %v8586_v13 }
  0x98   : > { %v274_v14 = vpop.f32.mrf.mxu0 }
  0x99   : > { %v275_v33 = vadd.f32 %v8690_v29, %v274_v14 }
  0xa0   : > { %v277_v15 = vpop.f32.mrf.mxu0 }
  0xa1   : > { %v278_v37 = vadd.f32 %v8690_v29, %v277_v15 }
  0xa3   : > { %891 = vmatmul.bf16.gmra.mxu0 %v8586_v13 }
  0xa8   : > { %v279_v16 = vpop.f32.mrf.mxu0 }
  0xa9   : > { %v280_v41 = vadd.f32 %v8690_v29, %v279_v16 }
  0xb0   : > { %v282_v17 = vpop.f32.mrf.mxu0 }
  0xb1   : > { %v283_v45 = vadd.f32 %v8690_v29, %v282_v17 }
  0xb3   : > { %896 = vmatmul.bf16.gmra.mxu0 %v8586_v13 }
  0xb8   : > { %v284_v18 = vpop.f32.mrf.mxu0 }
  0xb9   : > { %v285_v49 = vadd.f32 %v8690_v29, %v284_v18 }
  0xc0   : > { %v287_v19 = vpop.f32.mrf.mxu0 }
  0xc1   : > { %v288_v53 = vadd.f32 %v8690_v29, %v287_v19 }
  0xc3   : > { %901 = vmatmul.bf16.gmra.mxu0 %v8586_v13 }
  0xc8   : > { %v8669_v20 = vpop.f32.mrf.mxu0 }
  0xd0   : > { %v8671_v21 = vpop.f32.mrf.mxu0 }
  0xd1   : > { %13015 = vst [vmem:[#allocation3_spill] sm:$0xff] %v8671_v21 }
  0xd8   : > { %v8673_v22 = vpop.f32.mrf.mxu0 }
  0xd9   : > { %13016 = vst [vmem:[#allocation4_spill] sm:$0xff] %v8673_v22 }
  0xe0   : > { %v8675_v23 = vpop.f32.mrf.mxu0 }
  0xe1   : > { %13017 = vst [vmem:[#allocation5_spill] sm:$0xff] %v8675_v23 }
  0xe8   : > { %v8677_v24 = vpop.f32.mrf.mxu0 }
  0xe9   : > { %13018 = vst [vmem:[#allocation6_spill] sm:$0xff] %v8677_v24 }
  0xf0   : > { %v8679_v25 = vpop.f32.mrf.mxu0 }
  0xf1   : > { %13019 = vst [vmem:[#allocation7_spill] sm:$0xff] %v8679_v25 }
  0xf8   : > { %v8681_v26 = vpop.f32.mrf.mxu0 }
  0xf9   : > { %13020 = vst [vmem:[#allocation8_spill] sm:$0xff] %v8681_v26 }
 0x100   : > { %v8683_v27 = vpop.f32.mrf.mxu0 }
 0x101   : > { %13021 = vst [vmem:[#allocation9_spill] sm:$0xff] %v8683_v27 }
 0x108   : > { %v8685_v28 = vpop.f32.mrf.mxu0 }
 0x109   : > { %13022 = vst [vmem:[#allocation10_spill] sm:$0xff] %v8685_v28 }
 0x110   : > { %v887_v31 = vpop.f32.mrf.mxu0 }
 0x111   : > { %v907_v32 = vadd.f32 %v887_v31, %v273_v30 }
 0x113   : > { %7518 = vtanh.f32 %v907_v32  ;;  %v7231_v58 = vmul.f32 -1.442695, %v907_v32 }
 0x118   : > { %v889_v34 = vpop.f32.mrf.mxu0 }
 0x119   : > { %v7519_v35 = vpop.eup %7518  ;;  %v908_v36 = vadd.f32 %v889_v34, %v275_v33 }
 0x11a   : > { %1091 = vrot.lane.b32.xlu0 %v7519_v35, %s8587_s6 }
 0x11b   : > { %7520 = vtanh.f32 %v908_v36  ;;  %v7232_v59 = vmul.f32 -1.442695, %v908_v36 }
 0x120   : > { %v892_v38 = vpop.f32.mrf.mxu0 }
 0x121   : > { %v7521_v39 = vpop.eup %7520  ;;  %v909_v40 = vadd.f32 %v892_v38, %v278_v37 }
 0x122   : > { %1093 = vrot.lane.b32.xlu0 %v7521_v39, %s8587_s6 }
 0x123   : > { %7522 = vtanh.f32 %v909_v40  ;;  %v7233_v62 = vmul.f32 -1.442695, %v909_v40 }
 0x128   : > { %v894_v42 = vpop.f32.mrf.mxu0 }
 0x129   : > { %v7523_v43 = vpop.eup %7522  ;;  %v910_v44 = vadd.f32 %v894_v42, %v280_v41  ;;  %v290_v41 = vadd.f32 %v8690_v29, %v8669_v20 }
 0x12a   : > { %1095 = vrot.lane.b32.xlu1 %v7523_v43, %s8587_s6 }
 0x12b   : > { %7524 = vtanh.f32 %v910_v44  ;;  %v7234_v3 = vmul.f32 -1.442695, %v910_v44 }
 0x130   : > { %v897_v46 = vpop.f32.mrf.mxu0 }
 0x131   : > { %v7525_v47 = vpop.eup %7524  ;;  %v911_v48 = vadd.f32 %v897_v46, %v283_v45 }
 0x132   : > { %1097 = vrot.lane.b32.xlu1 %v7525_v47, %s8587_s6 }
 0x133   : > { %7526 = vtanh.f32 %v911_v48  ;;  %v7235_v63 = vmul.f32 -1.442695, %v911_v48 }
 0x138   : > { %v899_v50 = vpop.f32.mrf.mxu0 }
 0x139   : > { %v7527_v51 = vpop.eup %7526  ;;  %v912_v52 = vadd.f32 %v899_v50, %v285_v49 }
 0x13a   : > { %1099 = vrot.lane.b32.xlu2 %v7527_v51, %s8587_s6 }
 0x13b   : > { %7528 = vtanh.f32 %v912_v52  ;;  %v7236_v4 = vmul.f32 -1.442695, %v912_v52 }
 0x140   : > { %v902_v54 = vpop.f32.mrf.mxu0 }
 0x141   : > { %v7529_v55 = vpop.eup %7528  ;;  %v913_v56 = vadd.f32 %v902_v54, %v288_v53 }
 0x142   : > { %1101 = vrot.lane.b32.xlu2 %v7529_v55, %s8587_s6 }
 0x143   : > { %7530 = vtanh.f32 %v913_v56  ;;  %v7237_v15 = vmul.f32 -1.442695, %v913_v56 }
 0x144   : > { %7532 = vpow2.f32 %v7231_v58 }
 0x145   : > { %7534 = vpow2.f32 %v7232_v59 }
 0x148   : > { %v904_v38 = vpop.f32.mrf.mxu0 }
 0x149   : > { %v7531_v57 = vpop.eup %7530  ;;  %v8732_v46 = vadd.f32 %v904_v38, %v290_v41 }
 0x14a   : > { %1103 = vrot.lane.b32.xlu2 %v7531_v57, %s8587_s6  ;;  %v7533_v60 = vpop.eup %7532 }
 0x14b   : > { %v939_v61 = vadd.f32 1.0, %v7533_v60  ;;  %v7535_v0 = vpop.eup %7534 }
 0x14c   : > { %v8706_v1 = vadd.f32 1.0, %v7535_v0 }
 0x14d   : > { %7536 = vrcp.f32 %v939_v61  ;;  %v958_v36 = vand.u32 2147483648, %v939_v61  ;;  %vm952_vm2 = vweird.f32 %v939_v61  ;;  %v956_v37 = vand.u32 2147483647, %v939_v61 }
 0x14e   : > { %7538 = vpow2.f32 %v7233_v62  ;;  %v973_v55 = vand.u32 2147483648, %v8706_v1  ;;  %vm967_vm6 = vweird.f32 %v8706_v1  ;;  %v971_v56 = vand.u32 2147483647, %v8706_v1 }
 0x14f   : > { %7540 = vpow2.f32 %v7235_v63  ;;  %v959_v45 = vor.u32 1.1754944e-38, %v958_v36  ;;  %vm957_vm4 = vcmp.eq.f32.partialorder %v956_v37, 8.507059e+37 }
 0x150   : > { %7542 = vrcp.f32 %v8706_v1  ;;  %v974_v62 = vor.u32 1.1754944e-38, %v973_v55  ;;  %vm972_vm8 = vcmp.eq.f32.partialorder %v971_v56, 8.507059e+37 }
 0x151   : > { %7544 = vpow2.f32 %v7234_v3 }
 0x152   : > { %7546 = vpow2.f32 %v7236_v4 }
 0x153   : > { %v7537_v2 = vpop.eup %7536 }
 0x154   : > { %v7539_v6 = vpop.eup %7538  ;;  %v948_v9 = vmul.f32 %v7537_v2, %v939_v61  ;;  %vm953_vm1 = vweird.f32 %v7537_v2 }
 0x155   : > { %v7541_v7 = vpop.eup %7540  ;;  %v8709_v10 = vadd.f32 1.0, %v7539_v6  ;;  %vm954_vm3 = vmor %vm952_vm2, %vm953_vm1 }
 0x156   : > { %v8711_v11 = vadd.f32 1.0, %v7541_v7  ;;  %v949_v12 = vsub.f32 1.0, %v948_v9  ;;  %v7543_v14 = vpop.eup %7542 }
 0x157   : > { %7548 = vrcp.f32 %v8709_v10  ;;  %v7545_v16 = vpop.eup %7544  ;;  %v963_v19 = vmul.f32 %v7543_v14, %v8706_v1  ;;  %vm968_vm5 = vweird.f32 %v7543_v14  ;;  %vm982_vm11 = vweird.f32 %v8709_v10 }
 0x158   : > { %7550 = vrcp.f32 %v8711_v11  ;;  %v7547_v17 = vpop.eup %7546  ;;  %v950_v18 = vmul.f32 %v7537_v2, %v949_v12  ;;  %v8716_v30 = vadd.f32 1.0, %v7545_v16  ;;  %vm969_vm7 = vmor %vm967_vm6, %vm968_vm5  ;;  %vm1012_vm12 = vweird.f32 %v8711_v11 }
 0x159   : > { %7552 = vpow2.f32 %v7237_v15  ;;  %v8718_v31 = vadd.f32 1.0, %v7547_v17  ;;  %v964_v34 = vsub.f32 1.0, %v963_v19  ;;  %v988_v15 = vand.u32 2147483648, %v8709_v10 }
 0x15a   : > { %v951_v33 = vadd.f32 %v7537_v2, %v950_v18  ;;  %7554 = vrcp.f32 %v8716_v30  ;;  %v1016_v16 = vand.u32 2147483647, %v8711_v11  ;;  %v986_v18 = vand.u32 2147483647, %v8709_v10 }
 0x15b   : > { %7556 = vrcp.f32 %v8718_v31  ;;  %v965_v44 = vmul.f32 %v7543_v14, %v964_v34  ;;  %v989_v38 = vor.u32 1.1754944e-38, %v988_v15  ;;  %vm1027_vm5 = vweird.f32 %v8718_v31 }
 0x15c   : > { %v955_v42 = vsel %vm954_vm3, %v7537_v2, %v951_v33  ;;  %7558 = vtanh.f32 %v8732_v46  ;;  %vm1017_vm15 = vcmp.eq.f32.partialorder %v1016_v16, 8.507059e+37  ;;  %vm987_vm1 = vcmp.eq.f32.partialorder %v986_v18, 8.507059e+37 }
 0x15d   : > { %v8720_v32 = vpop.eup %7548  ;;  %v8736_v49 = vsel %vm957_vm4, %v959_v45, %v955_v42  ;;  %v966_v53 = vadd.f32 %v7543_v14, %v965_v44  ;;  %v1033_v44 = vand.u32 2147483648, %v8718_v31  ;;  %vm997_vm4 = vweird.f32 %v8716_v30 }
 0x15e   : > { %v8722_v35 = vpop.eup %7550  ;;  %v978_v39 = vmul.f32 %v8720_v32, %v8709_v10  ;;  %vm983_vm9 = vweird.f32 %v8720_v32  ;;  %v1003_v45 = vand.u32 2147483648, %v8716_v30 }
 0x15f   : > { %v7553_v40 = vpop.eup %7552  ;;  %v1008_v43 = vmul.f32 %v8722_v35, %v8711_v11  ;;  %v970_v60 = vsel %vm969_vm7, %v7543_v14, %v966_v53  ;;  %vm1013_vm10 = vweird.f32 %v8722_v35  ;;  %v1018_v14 = vand.u32 2147483648, %v8711_v11  ;;  %vm8773_vm13 = vmor %vm982_vm11, %vm983_vm9 }
 0x160   : > { %v8734_v47 = vadd.f32 1.0, %v7553_v40  ;;  %v979_v50 = vsub.f32 1.0, %v978_v39  ;;  %v8738_v51 = vpop.eup %7554  ;;  %v8755_v63 = vsel %vm972_vm8, %v974_v62, %v970_v60  ;;  %vm1014_vm14 = vmor %vm1012_vm12, %vm1013_vm10  ;;  %v1004_v56 = vor.u32 1.1754944e-38, %v1003_v45 }
 0x161   : > { %v1009_v20 = vsub.f32 1.0, %v1008_v43  ;;  %v8741_v54 = vpop.eup %7556  ;;  %v993_v58 = vmul.f32 %v8738_v51, %v8716_v30  ;;  %v1019_v37 = vor.u32 1.1754944e-38, %v1018_v14  ;;  %vm998_vm2 = vweird.f32 %v8738_v51 }
 0x162   : > { %7560 = vrcp.f32 %v8734_v47  ;;  %v980_v57 = vmul.f32 %v8720_v32, %v979_v50  ;;  %v1023_v61 = vmul.f32 %v8741_v54, %v8718_v31  ;;  %v7559_v3 = vpop.eup %7558  ;;  %vm1028_vm3 = vweird.f32 %v8741_v54  ;;  %vm999_vm6 = vmor %vm997_vm4, %vm998_vm2 }
 0x163   : > { %v1010_v59 = vmul.f32 %v8722_v35, %v1009_v20  ;;  %v994_v2 = vsub.f32 1.0, %v993_v58  ;;  %v1001_v50 = vand.u32 2147483647, %v8716_v30  ;;  %vm1029_vm7 = vmor %vm1027_vm5, %vm1028_vm3  ;;  %vm1042_vm11 = vweird.f32 %v8734_v47 }
 0x164   : > { %v981_v1 = vadd.f32 %v8720_v32, %v980_v57  ;;  %v1024_v7 = vsub.f32 1.0, %v1023_v61  ;;  %v1048_v61 = vand.u32 2147483648, %v8734_v47 }
 0x165   : > { %v1011_v4 = vadd.f32 %v8722_v35, %v1010_v59  ;;  %v995_v19 = vmul.f32 %v8738_v51, %v994_v2  ;;  %vm1002_vm9 = vcmp.eq.f32.partialorder %v1001_v50, 8.507059e+37 }
 0x166   : > { %v1025_v34 = vmul.f32 %v8741_v54, %v1024_v7  ;;  %v985_v11 = vsel %vm8773_vm13, %v8720_v32, %v981_v1 }
 0x167   : > { %v1015_v33 = vsel %vm1014_vm14, %v8722_v35, %v1011_v4  ;;  %v8790_v39 = vsel %vm987_vm1, %v989_v38, %v985_v11  ;;  %v996_v40 = vadd.f32 %v8738_v51, %v995_v19  ;;  %v7238_v4 = vmul.f32 -1.442695, %v8732_v46 }
 0x168   : > { %v8762_v9 = vpop.eup %7560  ;;  %v8787_v10 = vsel %vm1017_vm15, %v1019_v37, %v1015_v33  ;;  %v1026_v41 = vadd.f32 %v8741_v54, %v1025_v34  ;;  %v1076_v37 = vmul.f32 0.0, %v8755_v63 }
 0x169   : > { %v1038_v36 = vmul.f32 %v8762_v9, %v8734_v47  ;;  %v1000_v55 = vsel %vm999_vm6, %v8738_v51, %v996_v40  ;;  %vm1043_vm10 = vweird.f32 %v8762_v9  ;;  %v1046_v51 = vand.u32 2147483647, %v8734_v47 }
 0x16a   : > { %v1030_v20 = vsel %vm1029_vm7, %v8741_v54, %v1026_v41  ;;  %v8813_v58 = vsel %vm1002_vm9, %v1004_v56, %v1000_v55  ;;  %vm1044_vm12 = vmor %vm1042_vm11, %vm1043_vm10  ;;  %7562 = vpow2.f32 %v7238_v4  ;;  %v7479_v4 = vld [vmem:[%s8633_s25 + $0x60] sm:$0xff] }
 0x16b   : > { %v1039_v43 = vsub.f32 1.0, %v1038_v36  ;;  %vm1047_vm13 = vcmp.eq.f32.partialorder %v1046_v51, 8.507059e+37  ;;  %v1078_v34 = vmul.f32 0.0, %v8813_v58  ;;  %7130 = vmatmul.msk.bf16.vlgmr.msra.gmra.mxu3 %vm250_vm0, %v7479_v4  ;;  %v7494_v4 = vld [vmem:[%s8633_s25 + $0xd8] sm:$0xff] }
 0x16d   : > { %v1040_v53 = vmul.f32 %v8762_v9, %v1039_v43 }
 0x16f   : > { %v1041_v60 = vadd.f32 %v8762_v9, %v1040_v53 }
 0x170   : > { %v7563_v47 = vpop.eup %7562 }
 0x171   : > { %v1045_v62 = vsel %vm1044_vm12, %v8762_v9, %v1041_v60  ;;  %v1075_v9 = vmul.f32 0.0, %v8736_v49 }
 0x18c   : > { %v1092_v48 = vpop.permute.xlu0 %1091 }
 0x18d   : > { %v1115_v52 = vmul.f32 %v1092_v48, %v8736_v49  ;;  %v1031_v48 = vand.u32 2147483647, %v8718_v31  ;;  %v1034_v31 = vor.u32 1.1754944e-38, %v1033_v44  ;;  %v1077_v44 = vmul.f32 0.0, %v8790_v39 }
 0x18f   : > { %1131 = vrot.lane.b32.xlu0 %v1115_v52, %s8588_s7  ;;  %vm1032_vm8 = vcmp.eq.f32.partialorder %v1031_v48, 8.507059e+37  ;;  %v1079_v48 = vmul.f32 0.0, %v8787_v10 }
 0x190   : > { %v8811_v57 = vsel %vm1032_vm8, %v1034_v31, %v1030_v20 }
 0x194   : > { %v1094_v0 = vpop.permute.xlu0 %1093  ;;  %v1100_v12 = vpop.permute.xlu2 %1099 }
 0x195   : > { %v1116_v6 = vmul.f32 %v1094_v0, %v8755_v63  ;;  %v1119_v32 = vmul.f32 %v1100_v12, %v8787_v10  ;;  %v1049_v0 = vor.u32 1.1754944e-38, %v1048_v61 }
 0x197   : > { %1133 = vrot.lane.b32.xlu1 %v1116_v6, %s8588_s7  ;;  %1105 = vrot.lane.b32.xlu0 %v7559_v3, %s8587_s6  ;;  %v8825_v2 = vsel %vm1047_vm13, %v1049_v0, %v1045_v62  ;;  %v946_v6 = vadd.f32 1.0, %v7563_v47  ;;  %v7472_v47 = vld [vmem:[%s8633_s25 + $0x28] sm:$0xff] }
 0x198   : > { %v1081_v56 = vmul.f32 0.0, %v8825_v2 }
 0x199   : > { %7564 = vrcp.f32 %v946_v6  ;;  %v1063_v19 = vand.u32 2147483648, %v946_v6  ;;  %vm1057_vm15 = vweird.f32 %v946_v6  ;;  %v1061_v46 = vand.u32 2147483647, %v946_v6 }
 0x19b   : > { %v1064_v38 = vor.u32 1.1754944e-38, %v1063_v19  ;;  %vm1062_vm2 = vcmp.eq.f32.partialorder %v1061_v46, 8.507059e+37 }
 0x19c   : > { %v1096_v35 = vpop.permute.xlu1 %1095  ;;  %v1102_v52 = vpop.permute.xlu2 %1101 }
 0x19d   : > { %v1117_v42 = vmul.f32 %v1096_v35, %v8790_v39  ;;  %v1120_v30 = vmul.f32 %v1102_v52, %v8811_v57 }
 0x19f   : > { %1135 = vrot.lane.b32.xlu1 %v1117_v42, %s8588_s7  ;;  %1139 = vrot.lane.b32.xlu0 %v1119_v32, %s8588_s7  ;;  %v7565_v7 = vpop.eup %7564 }
 0x1a0   : > { %v1053_v12 = vmul.f32 %v7565_v7, %v946_v6  ;;  %vm1058_vm14 = vweird.f32 %v7565_v7  ;;  %v7476_v6 = vld [vmem:[%s8633_s25 + $0x48] sm:$0xff] }
 0x1a1   : > { %vm1059_vm1 = vmor %vm1057_vm15, %vm1058_vm14 }
 0x1a2   : > { %v1054_v14 = vsub.f32 1.0, %v1053_v12  ;;  %v7473_v12 = vld [vmem:[%s8633_s25 + $0x30] sm:$0xff] }
 0x1a4   : > { %v1098_v59 = vpop.permute.xlu1 %1097  ;;  %v1104_v1 = vpop.permute.xlu2 %1103  ;;  %v1055_v15 = vmul.f32 %v7565_v7, %v1054_v14  ;;  %v7477_v14 = vld [vmem:[%s8633_s25 + $0x50] sm:$0xff] }
 0x1a5   : > { %v1118_v54 = vmul.f32 %v1098_v59, %v8813_v58  ;;  %v1121_v3 = vmul.f32 %v1104_v1, %v8825_v2  ;;  %v1080_v59 = vmul.f32 0.0, %v8811_v57  ;;  %v7471_v1 = vld [vmem:[%s8633_s25 + $0x20] sm:$0xff] }
 0x1a6   : > { %v1056_v18 = vadd.f32 %v7565_v7, %v1055_v15  ;;  %7090 = vmatmul.msk.bf16.vlgmr.msra.gmra.mxu1 %vm250_vm0, %v7471_v1  ;;  %v7481_v15 = vld [vmem:[%s8633_s25 + $0x70] sm:$0xff] }
 0x1a7   : > { %1137 = vrot.lane.b32.xlu2 %v1118_v54, %s8588_s7  ;;  %1141 = vrot.lane.b32.xlu1 %v1120_v30, %s8588_s7  ;;  %v7497_v1 = vld [vmem:[%s8633_s25 + $0xf0] sm:$0xff] }
 0x1a8   : > { %v1060_v11 = vsel %vm1059_vm1, %v7565_v7, %v1056_v18  ;;  %1253 = vmatpush.bf16.msra.mxu1 %v8644_v5  ;;  %v7480_v7 = vld [vmem:[%s8633_s25 + $0x68] sm:$0xff] }
 0x1a9   : > { %v8840_v32 = vsel %vm1062_vm2, %v1064_v38, %v1060_v11  ;;  %7131 = vmatmul.msk.bf16.gmra.mxu3 %vm250_vm0, %v7480_v7  ;;  %v7478_v38 = vld [vmem:[%s8633_s25 + $0x58] sm:$0xff] }
 0x1aa   : > { %v1082_v18 = vmul.f32 0.0, %v8840_v32 }
 0x1ac   : > { %1254 = vmatpush.bf16.msra.mxu1 %v8654_v8 }
 0x1af   : > { %1143 = vrot.lane.b32.xlu2 %v1121_v3, %s8588_s7  ;;  %v7475_v3 = vld [vmem:[%s8633_s25 + $0x40] sm:$0xff] }
 0x1b0   : > { %7110 = vmatmul.msk.bf16.vlgmr.msra.gmra.mxu2 %vm250_vm0, %v7475_v3  ;;  %v7490_v3 = vld [vmem:[%s8633_s25 + $0xb8] sm:$0xff] }
 0x1b6   : > { %7091 = vmatmul.msk.bf16.gmra.mxu1 %vm250_vm0, %v7472_v47  ;;  %v7498_v47 = vld [vmem:[%s8633_s25 + $0xf8] sm:$0xff] }
 0x1b9   : > { %7132 = vmatmul.msk.bf16.gmra.mxu3 %vm250_vm0, %v7481_v15 }
 0x1c0   : > { %7111 = vmatmul.msk.bf16.gmra.mxu2 %vm250_vm0, %v7476_v6 }
 0x1c6   : > { %7092 = vmatmul.msk.bf16.gmra.mxu1 %vm250_vm0, %v7473_v12 }
 0x1d0   : > { %7112 = vmatmul.msk.bf16.gmra.mxu2 %vm250_vm0, %v7477_v14 }
 0x1e0   : > { %7113 = vmatmul.msk.bf16.gmra.mxu2 %vm250_vm0, %v7478_v38 }
 0x1ee   : > { %v8952_v12 = vpop.f32.mrf.mxu3 }
 0x201   : > { %v1132_v16 = vpop.permute.xlu0 %1131  ;;  %v1138_v33 = vpop.permute.xlu2 %1137 }
 0x202   : > { %v8831_v17 = vadd.f32 %v1132_v16, %v1075_v9  ;;  %v8835_v36 = vadd.f32 %v1138_v33, %v1078_v34 }
 0x204   : > { %7566 = vtanh.f32 %v8831_v17 }
 0x205   : > { %7568 = vtanh.f32 %v8835_v36 }
 0x209   : > { %v1134_v35 = vpop.permute.xlu1 %1133  ;;  %v1106_v41 = vpop.permute.xlu0 %1105 }
 0x20a   : > { %v8838_v40 = vadd.f32 %v1134_v35, %v1076_v37  ;;  %v7567_v42 = vpop.eup %7566  ;;  %v1122_v43 = vmul.f32 %v1106_v41, %v8840_v32  ;;  %v1144_v31 = vpop.permute.xlu2 %1143  ;;  %v7474_v37 = vld [vmem:[%s8633_s25 + $0x38] sm:$0xff] }
 0x20b   : > { %1179 = vrot.lane.b32.xlu1 %v7567_v42, %s8587_s6  ;;  %v7569_v50 = vpop.eup %7568  ;;  %v8859_v30 = vadd.f32 %v1144_v31, %v1081_v56  ;;  %v7482_v35 = vld [vmem:[%s8633_s25 + $0x78] sm:$0xff]  ;;  %7093 = vmatmul.msk.bf16.gmra.mxu1 %vm250_vm0, %v7474_v37 }
 0x20c   : > { %7570 = vtanh.f32 %v8838_v40  ;;  %1145 = vrot.lane.b32.xlu0 %v1122_v43, %s8588_s7  ;;  %7133 = vmatmul.msk.bf16.gmra.mxu3 %vm250_vm0, %v7482_v35 }
 0x211   : > { %v1136_v45 = vpop.permute.xlu1 %1135  ;;  %v1140_v20 = vpop.permute.xlu0 %1139 }
 0x212   : > { %v8849_v52 = vadd.f32 %v1136_v45, %v1077_v44  ;;  %v7571_v53 = vpop.eup %7570  ;;  %v8851_v55 = vadd.f32 %v1140_v20, %v1079_v48  ;;  %v7487_v45 = vld [vmem:[%s8633_s25 + $0xa0] sm:$0xff] }
 0x213   : > { %1181 = vrot.lane.b32.xlu2 %v7571_v53, %s8587_s6  ;;  %1185 = vrot.lane.b32.xlu1 %v7569_v50, %s8587_s6  ;;  %v7491_v48 = vld [vmem:[%s8633_s25 + $0xc0] sm:$0xff] }
 0x214   : > { %7572 = vtanh.f32 %v8849_v52  ;;  %v7495_v20 = vld [vmem:[%s8633_s25 + $0xe0] sm:$0xff]  ;;  %7190 = vmatmul.msk.bf16.vlgmr.msrb.gmra.mxu2 %vm250_vm0, %v7491_v48 }
 0x215   : > { %7574 = vtanh.f32 %v8851_v55 }
 0x219   : > { %v1142_v60 = vpop.permute.xlu1 %1141 }
 0x21a   : > { %v7573_v54 = vpop.eup %7572  ;;  %v8861_v61 = vadd.f32 %v1142_v60, %v1080_v59  ;;  %v7492_v59 = vld [vmem:[%s8633_s25 + $0xc8] sm:$0xff] }
 0x21b   : > { %v7575_v51 = vpop.eup %7574  ;;  %1183 = vrot.lane.b32.xlu0 %v7573_v54, %s8587_s6  ;;  %7170 = vmatmul.msk.bf16.vlgmr.msrb.gmra.mxu1 %vm250_vm0, %v7487_v45  ;;  %v7496_v60 = vld [vmem:[%s8633_s25 + $0xe8] sm:$0xff]  ;;  %v7503_v54 = vld [vmem:[%s13011_s1 + $0x10] sm:$0xff] }
 0x21c   : > { %7576 = vtanh.f32 %v8861_v61  ;;  %1187 = vrot.lane.b32.xlu2 %v7575_v51, %s8587_s6  ;;  %7210 = vmatmul.msk.bf16.vlgmr.msrb.gmra.mxu3 %vm250_vm0, %v7495_v20  ;;  %v7501_v51 = vld [vmem:[%s13012_s2 + $0x10] sm:$0xff] }
 0x21d   : > { %7578 = vtanh.f32 %v8859_v30 }
 0x222   : > { %v7577_v62 = vpop.eup %7576 }
 0x223   : > { %v7579_v0 = vpop.eup %7578  ;;  %1189 = vrot.lane.b32.xlu0 %v7577_v62, %s8587_s6  ;;  %v7489_v62 = vld [vmem:[%s8633_s25 + $0xb0] sm:$0xff]  ;;  %v8947_v6 = vpop.f32.mrf.mxu1 }
 0x224   : > { %1191 = vrot.lane.b32.xlu2 %v7579_v0, %s8587_s6  ;;  %7191 = vmatmul.msk.bf16.gmra.mxu2 %vm250_vm0, %v7492_v59  ;;  %v7493_v0 = vld [vmem:[%s8633_s25 + $0xd0] sm:$0xff] }
 0x22b   : > { %v8954_v14 = vpop.f32.mrf.mxu1 }
 0x22c   : > { %7211 = vmatmul.msk.bf16.gmra.mxu3 %vm250_vm0, %v7496_v60 }
 0x233   : > { %v8950_v7 = vpop.f32.mrf.mxu2 }
 0x234   : > { %7192 = vmatmul.msk.bf16.gmra.mxu2 %vm250_vm0, %v7493_v0 }
 0x23b   : > { %v8956_v15 = vpop.f32.mrf.mxu2 }
 0x23c   : > { %7212 = vmatmul.msk.bf16.gmra.mxu3 %vm250_vm0, %v7497_v1 }
 0x244   : > { %7193 = vmatmul.msk.bf16.gmra.mxu2 %vm250_vm0, %v7494_v4 }
 0x24c   : > { %7213 = vmatmul.msk.bf16.gmra.mxu3 %vm250_vm0, %v7498_v47 }
 0x26d   : > { %v1182_v9 = vpop.permute.xlu2 %1181 }
 0x26e   : > { %v1204_v19 = vmul.f32 %v1182_v9, %v8755_v63  ;;  %v8958_v9 = vpop.f32.mrf.mxu3 }
 0x276   : > { %v1188_v50 = vpop.permute.xlu2 %1187 }
 0x277   : > { %v1207_v31 = vmul.f32 %v1188_v50, %v8787_v10  ;;  %v7504_v10 = vld [vmem:[%s13011_s1 + $0x18] sm:$0xff] }
 0x278   : > { %1601 = vmatpush.bf16.msra.mxu2 %v7504_v10  ;;  %2344 = vmatpush.bf16.msrb.mxu1 %v7504_v10 }
 0x279   : > { %3103 = vmatpush.bf16.msra.mxu0 %v7504_v10 }
 0x27c   : > { %1602 = vmatpush.bf16.msra.mxu2 %v7503_v54  ;;  %2345 = vmatpush.bf16.msrb.mxu1 %v7503_v54 }
 0x27d   : > { %v1180_v16 = vpop.permute.xlu1 %1179  ;;  %3104 = vmatpush.bf16.msra.mxu0 %v7503_v54 }
 0x27e   : > { %v1203_v33 = vmul.f32 %v1180_v16, %v8736_v49  ;;  %v1146_v46 = vpop.permute.xlu0 %1145  ;;  %v8960_v16 = vpop.f32.mrf.mxu1 }
 0x27f   : > { %v8892_v34 = vadd.f32 %v1146_v46, %v1082_v18  ;;  %v8963_v18 = vpop.f32.mrf.mxu3  ;;  %v1192_v38 = vpop.permute.xlu2 %1191 }
 0x280   : > { %v1219_v11 = vpack.c.bf16 %v1204_v19, %v1203_v33  ;;  %v8965_v19 = vpop.f32.mrf.mxu2 }
 0x281   : > { %7580 = vtanh.f32 %v8892_v34 }
 0x282   : > { %1227 = vrot.lane.b32.xlu1 %v1219_v11, %s8588_s7 }
 0x285   : > { %v1186_v49 = vpop.permute.xlu1 %1185 }
 0x286   : > { %v1206_v42 = vmul.f32 %v1186_v49, %v8813_v58  ;;  %v8967_v33 = vpop.f32.mrf.mxu1 }
 0x287   : > { %v7581_v63 = vpop.eup %7580  ;;  %v8969_v46 = vpop.f32.mrf.mxu3 }
 0x288   : > { %1193 = vrot.lane.b32.xlu0 %v7581_v63, %s8587_s6  ;;  %v8973_v37 = vpop.f32.mrf.mxu2 }
 0x28d   : > { %v1184_v41 = vpop.permute.xlu0 %1183 }
 0x28e   : > { %v1205_v43 = vmul.f32 %v1184_v41, %v8790_v39  ;;  %v7488_v39 = vld [vmem:[%s8633_s25 + $0xa8] sm:$0xff]  ;;  %v8977_v35 = vpop.f32.mrf.mxu1  ;;  %v1209_v41 = vmul.f32 %v1192_v38, %v8825_v2 }
 0x28f   : > { %7171 = vmatmul.msk.bf16.gmra.mxu1 %vm250_vm0, %v7488_v39  ;;  %v8979_v49 = vpop.f32.mrf.mxu3 }
 0x290   : > { %v1220_v44 = vpack.c.bf16 %v1206_v42, %v1205_v43 }
 0x292   : > { %1229 = vrot.lane.b32.xlu1 %v1220_v44, %s8588_s7  ;;  %v8985_v44 = vpop.f32.mrf.mxu2 }
 0x295   : > { %v1190_v53 = vpop.permute.xlu0 %1189 }
 0x296   : > { %v1208_v58 = vmul.f32 %v1190_v53, %v8811_v57  ;;  %v7502_v57 = vld [vmem:[%s13012_s2 + $0x18] sm:$0xff]  ;;  %v8989_v48 = vpop.f32.mrf.mxu1 }
 0x297   : > { %1642 = vmatpush.bf16.msra.mxu3 %v7502_v57  ;;  %2401 = vmatpush.bf16.msrb.mxu2 %v7502_v57 }
 0x298   : > { %v1221_v56 = vpack.c.bf16 %v1208_v58, %v1207_v31 }
 0x29a   : > { %1231 = vrot.lane.b32.xlu2 %v1221_v56, %s8588_s7 }
 0x29b   : > { %1643 = vmatpush.bf16.msra.mxu3 %v7501_v51  ;;  %2402 = vmatpush.bf16.msrb.mxu2 %v7501_v51 }
 0x29e   : > { %1644 = vmatmul.bf16.vlgmr.msra.gmra.mxu3 %v8586_v13 }
 0x29f   : > { %2770 = vmatpush.bf16.msrb.mxu3 %v8644_v5  ;;  %7172 = vmatmul.msk.bf16.gmra.mxu1 %vm250_vm0, %v7489_v62 }
 0x2a3   : > { %2771 = vmatpush.bf16.msrb.mxu3 %v8654_v8 }
 0x2a7   : > { %3862 = vmatpush.bf16.msra.mxu3 %v7504_v10 }
 0x2ab   : > { %3863 = vmatpush.bf16.msra.mxu3 %v7503_v54 }
 0x2ae   : > { %1649 = vmatmul.bf16.gmra.mxu3 %v8586_v13 }
 0x2af   : > { %7173 = vmatmul.msk.bf16.gmra.mxu1 %vm250_vm0, %v7490_v3 }
 0x2be   : > { %1654 = vmatmul.bf16.gmra.mxu3 %v8586_v13 }
 0x2ce   : > { %1659 = vmatmul.bf16.gmra.mxu3 %v8586_v13 }
 0x2f4   : > { %v1228_v11 = vpop.permute.xlu1 %1227  ;;  %v1232_v50 = vpop.permute.xlu2 %1231 }
 0x2f5   : > { %7239 = vmatmul.msk.bf16.vlgmr.msra.gmra.mxu1 %vm250_vm0, %v1228_v11  ;;  %7259 = vmatmul.msk.bf16.vlgmr.msra.gmra.mxu2 %vm250_vm0, %v1228_v11 }
 0x2f6   : > { %3160 = vmatpush.bf16.msra.mxu1 %v7502_v57  ;;  %3529 = vmatpush.bf16.msra.mxu2 %v8644_v5  ;;  %v8987_v5 = vpop.f32.mrf.mxu3 }
 0x2f7   : > { %13025 = vst [vmem:[#allocation11_spill] sm:$0xff] %v8987_v5 }
 0x2fa   : > { %v1194_v63 = vpop.permute.xlu0 %1193  ;;  %3161 = vmatpush.bf16.msra.mxu1 %v7501_v51  ;;  %3530 = vmatpush.bf16.msra.mxu2 %v8654_v8  ;;  %v8994_v8 = vpop.f32.mrf.mxu2 }
 0x2fb   : > { %v1210_v42 = vmul.f32 %v1194_v63, %v8840_v32  ;;  %v8998_v32 = vpop.f32.mrf.mxu1 }
 0x2fd   : > { %v1222_v43 = vpack.c.bf16 %v1210_v42, %v1209_v41 }
 0x2fe   : > { %v8996_v2 = vpop.f32.mrf.mxu3 }
 0x2ff   : > { %1233 = vrot.lane.b32.xlu0 %v1222_v43, %s8588_s7  ;;  %13026 = vst [vmem:[#allocation12_spill] sm:$0xff] %v8996_v2 }
 0x302   : > { %v9000_v20 = vpop.f32.mrf.mxu2 }
 0x303   : > { %v9006_v31 = vpop.f32.mrf.mxu1 }
 0x304   : > { %v1230_v45 = vpop.permute.xlu1 %1229 }
 0x305   : > { %7240 = vmatmul.msk.bf16.gmra.mxu1 %vm250_vm0, %v1230_v45  ;;  %7260 = vmatmul.msk.bf16.gmra.mxu2 %vm250_vm0, %v1230_v45 }
 0x306   : > { %v9002_v53 = vpop.f32.mrf.mxu3 }
 0x307   : > { %13027 = vst [vmem:[#allocation13_spill] sm:$0xff] %v9002_v53 }
 0x30a   : > { %v9008_v58 = vpop.f32.mrf.mxu2 }
 0x30b   : > { %v9012_v56 = vpop.f32.mrf.mxu1 }
 0x30c   : > { %13029 = vst [vmem:[#allocation15_spill] sm:$0xff] %v9012_v56 }
 0x30e   : > { %v9010_v13 = vpop.f32.mrf.mxu3 }
 0x30f   : > { %13028 = vst [vmem:[#allocation14_spill] sm:$0xff] %v9010_v13 }
 0x312   : > { %v9014_v39 = vpop.f32.mrf.mxu2 }
 0x313   : > { %13030 = vst [vmem:[#allocation16_spill] sm:$0xff] %v9014_v39  ;;  %v9018_v60 = vpop.f32.mrf.mxu1 }
 0x314   : > { %13032 = vst [vmem:[#allocation18_spill] sm:$0xff] %v9018_v60 }
 0x315   : > { %7241 = vmatmul.msk.bf16.gmra.mxu1 %vm250_vm0, %v1232_v50  ;;  %7261 = vmatmul.msk.bf16.gmra.mxu2 %vm250_vm0, %v1232_v50 }
 0x316   : > { %v9016_v59 = vpop.f32.mrf.mxu3 }
 0x317   : > { %13031 = vst [vmem:[#allocation17_spill] sm:$0xff] %v9016_v59 }
 0x31a   : > { %v9020_v10 = vpop.f32.mrf.mxu2 }
 0x31b   : > { %13033 = vst [vmem:[#allocation19_spill] sm:$0xff] %v9020_v10  ;;  %v9024_v54 = vpop.f32.mrf.mxu1 }
 0x31c   : > { %13035 = vst [vmem:[#allocation21_spill] sm:$0xff] %v9024_v54 }
 0x31e   : > { %v9022_v57 = vpop.f32.mrf.mxu3 }
 0x31f   : > { %13034 = vst [vmem:[#allocation20_spill] sm:$0xff] %v9022_v57 }
 0x322   : > { %v9026_v51 = vpop.f32.mrf.mxu2 }
 0x323   : > { %13036 = vst [vmem:[#allocation22_spill] sm:$0xff] %v9026_v51  ;;  %v9030_v0 = vpop.f32.mrf.mxu1 }
 0x324   : > { %13038 = vst [vmem:[#allocation24_spill] sm:$0xff] %v9030_v0 }
 0x326   : > { %v9028_v62 = vpop.f32.mrf.mxu3 }
 0x327   : > { %13037 = vst [vmem:[#allocation23_spill] sm:$0xff] %v9028_v62 }
 0x32a   : > { %v9032_v1 = vpop.f32.mrf.mxu2 }
 0x32b   : > { %13039 = vst [vmem:[#allocation25_spill] sm:$0xff] %v9032_v1  ;;  %v9036_v4 = vpop.f32.mrf.mxu1 }
 0x32c   : > { %13041 = vst [vmem:[#allocation27_spill] sm:$0xff] %v9036_v4 }
 0x32e   : > { %v9034_v3 = vpop.f32.mrf.mxu3 }
 0x32f   : > { %13040 = vst [vmem:[#allocation26_spill] sm:$0xff] %v9034_v3 }
 0x332   : > { %v9038_v47 = vpop.f32.mrf.mxu2 }
 0x333   : > { %13042 = vst [vmem:[#allocation28_spill] sm:$0xff] %v9038_v47  ;;  %v9042_v38 = vpop.f32.mrf.mxu1 }
 0x334   : > { %13044 = vst [vmem:[#allocation30_spill] sm:$0xff] %v9042_v38 }
 0x336   : > { %v9040_v11 = vpop.f32.mrf.mxu3 }
 0x337   : > { %13043 = vst [vmem:[#allocation29_spill] sm:$0xff] %v9040_v11  ;;  %v350_v11 = vadd.f32 %v8690_v29, %v8947_v6  ;;  %v352_v6 = vadd.f32 %v8690_v29, %v8954_v14 }
 0x33a   : > { %v9044_v63 = vpop.f32.mrf.mxu2 }
 0x33b   : > { %13045 = vst [vmem:[#allocation31_spill] sm:$0xff] %v9044_v63  ;;  %v9048_v42 = vpop.f32.mrf.mxu1 }
 0x33c   : > { %13047 = vst [vmem:[#allocation33_spill] sm:$0xff] %v9048_v42 }
 0x33e   : > { %v9046_v41 = vpop.f32.mrf.mxu3 }
 0x33f   : > { %13046 = vst [vmem:[#allocation32_spill] sm:$0xff] %v9046_v41 }
 0x342   : > { %v9050_v43 = vpop.f32.mrf.mxu2 }
 0x343   : > { %13048 = vst [vmem:[#allocation34_spill] sm:$0xff] %v9050_v43  ;;  %v9054_v50 = vpop.f32.mrf.mxu1 }
 0x344   : > { %13050 = vst [vmem:[#allocation36_spill] sm:$0xff] %v9054_v50 }
 0x346   : > { %v9052_v45 = vpop.f32.mrf.mxu3 }
 0x347   : > { %13049 = vst [vmem:[#allocation35_spill] sm:$0xff] %v9052_v45  ;;  %v9068_v45 = vld [vmem:[%s13013_s3 + $0x1] ss:$0 sm:$0xff] }
 0x34a   : > { %v9056_v3 = vpop.f32.mrf.mxu2 }
 0x34b   : > { %13051 = vst [vmem:[#allocation37_spill] sm:$0xff] %v9056_v3 }
 0x34e   : > { %v1645_v62 = vpop.f32.mrf.mxu3 }
 0x356   : > { %v1647_v3 = vpop.f32.mrf.mxu3 }
 0x371   : > { %v1234_v57 = vpop.permute.xlu0 %1233 }
 0x372   : > { %v1256_v59 = vpop.f32.mrf.mxu1  ;;  %7242 = vmatmul.msk.bf16.gmra.mxu1 %vm250_vm0, %v1234_v57  ;;  %7262 = vmatmul.msk.bf16.gmra.mxu2 %vm250_vm0, %v1234_v57 }
 0x373   : > { %v9062_v41 = vadd.f32 %v1256_v59, %v350_v11  ;;  %v355_v11 = vadd.f32 %v8690_v29, %v8960_v16  ;;  %v357_v16 = vadd.f32 %v8690_v29, %v8967_v33  ;;  %v360_v33 = vadd.f32 %v8690_v29, %v8977_v35 }
 0x374   : > { %v362_v35 = vadd.f32 %v8690_v29, %v8989_v48 }
 0x375   : > { %7582 = vtanh.f32 %v9062_v41 }
 0x378   : > { %v1604_v13 = vpop.f32.mrf.mxu2 }
 0x379   : > { %v1605_v43 = vadd.f32 %v9068_v45, %v1604_v13  ;;  %v1650_v13 = vpop.f32.mrf.mxu3 }
 0x37a   : > { %v1258_v63 = vpop.f32.mrf.mxu1 }
 0x37b   : > { %v7583_v47 = vpop.eup %7582  ;;  %v9073_v1 = vadd.f32 %v1258_v63, %v352_v6  ;;  %v9075_v59 = vadd.f32 %v1645_v62, %v1605_v43 }
 0x37c   : > { %1460 = vrot.lane.b32.xlu1 %v7583_v47, %s8587_s6 }
 0x37d   : > { %7584 = vtanh.f32 %v9073_v1 }
 0x37e   : > { %7586 = vtanh.f32 %v9075_v59 }
 0x380   : > { %v1606_v57 = vpop.f32.mrf.mxu2 }
 0x381   : > { %v1607_v14 = vadd.f32 %v9068_v45, %v1606_v57 }
 0x382   : > { %v1261_v51 = vpop.f32.mrf.mxu1 }
 0x383   : > { %v7585_v10 = vpop.eup %7584  ;;  %v9083_v39 = vadd.f32 %v1261_v51, %v355_v11  ;;  %v9085_v63 = vadd.f32 %v1647_v3, %v1607_v14 }
 0x384   : > { %v7587_v62 = vpop.eup %7586  ;;  %1462 = vrot.lane.b32.xlu2 %v7585_v10, %s8587_s6  ;;  %v1652_v10 = vpop.f32.mrf.mxu3 }
 0x385   : > { %7588 = vtanh.f32 %v9083_v39  ;;  %1849 = vrot.lane.b32.xlu0 %v7587_v62, %s8587_s6 }
 0x386   : > { %7590 = vtanh.f32 %v9085_v63 }
 0x388   : > { %v1609_v47 = vpop.f32.mrf.mxu2 }
 0x389   : > { %v1610_v43 = vadd.f32 %v9068_v45, %v1609_v47 }
 0x38a   : > { %v1263_v6 = vpop.f32.mrf.mxu1 }
 0x38b   : > { %v7589_v51 = vpop.eup %7588  ;;  %v9094_v57 = vadd.f32 %v1263_v6, %v357_v16  ;;  %v9096_v3 = vadd.f32 %v1650_v13, %v1610_v43 }
 0x38c   : > { %v7591_v11 = vpop.eup %7590  ;;  %1464 = vrot.lane.b32.xlu2 %v7589_v51, %s8587_s6  ;;  %v1655_v51 = vpop.f32.mrf.mxu3 }
 0x38d   : > { %7592 = vtanh.f32 %v9094_v57  ;;  %1851 = vrot.lane.b32.xlu1 %v7591_v11, %s8587_s6 }
 0x38e   : > { %7594 = vtanh.f32 %v9096_v3 }
 0x390   : > { %v1611_v14 = vpop.f32.mrf.mxu2 }
 0x391   : > { %v1612_v62 = vadd.f32 %v9068_v45, %v1611_v14 }
 0x392   : > { %v1266_v47 = vpop.f32.mrf.mxu1 }
 0x393   : > { %v7593_v16 = vpop.eup %7592  ;;  %v9105_v13 = vadd.f32 %v1266_v47, %v360_v33  ;;  %v9107_v43 = vadd.f32 %v1652_v10, %v1612_v62 }
 0x394   : > { %v7595_v6 = vpop.eup %7594  ;;  %1466 = vrot.lane.b32.xlu0 %v7593_v16, %s8587_s6  ;;  %v1657_v50 = vpop.f32.mrf.mxu3 }
 0x395   : > { %7596 = vtanh.f32 %v9105_v13  ;;  %1853 = vrot.lane.b32.xlu1 %v7595_v6, %s8587_s6 }
 0x396   : > { %7598 = vtanh.f32 %v9107_v43 }
 0x398   : > { %v1614_v11 = vpop.f32.mrf.mxu2 }
 0x399   : > { %v1615_v14 = vadd.f32 %v9068_v45, %v1614_v11 }
 0x39a   : > { %v1268_v33 = vpop.f32.mrf.mxu1 }
 0x39b   : > { %v7597_v47 = vpop.eup %7596  ;;  %v9116_v10 = vadd.f32 %v1268_v33, %v362_v35  ;;  %v9118_v62 = vadd.f32 %v1655_v51, %v1615_v14  ;;  %v7244_v14 = vmul.f32 -1.442695, %v9073_v1 }
 0x39c   : > { %v7599_v16 = vpop.eup %7598  ;;  %1468 = vrot.lane.b32.xlu0 %v7597_v47, %s8587_s6 }
 0x39d   : > { %7600 = vtanh.f32 %v9116_v10  ;;  %1855 = vrot.lane.b32.xlu2 %v7599_v16, %s8587_s6 }
 0x39e   : > { %7602 = vtanh.f32 %v9118_v62 }
 0x3a0   : > { %v1616_v6 = vpop.f32.mrf.mxu2 }
 0x3a1   : > { %v1617_v29 = vadd.f32 %v9068_v45, %v1616_v6 }
 0x3a3   : > { %v7601_v48 = vpop.eup %7600  ;;  %v9125_v11 = vadd.f32 %v1657_v50, %v1617_v29  ;;  %v7271_v50 = vmul.f32 -1.442695, %v9075_v59 }
 0x3a4   : > { %v7603_v35 = vpop.eup %7602  ;;  %1470 = vrot.lane.b32.xlu1 %v7601_v48, %s8587_s6  ;;  %v7272_v48 = vmul.f32 -1.442695, %v9085_v63 }
 0x3a5   : > { %7604 = vtanh.f32 %v9125_v11  ;;  %1857 = vrot.lane.b32.xlu2 %v7603_v35, %s8587_s6  ;;  %v7243_v35 = vmul.f32 -1.442695, %v9062_v41 }
 0x3a6   : > { %7606 = vpow2.f32 %v7244_v14  ;;  %v7245_v14 = vmul.f32 -1.442695, %v9083_v39  ;;  %v7273_v39 = vmul.f32 -1.442695, %v9096_v3  ;;  %v7246_v3 = vmul.f32 -1.442695, %v9094_v57 }
 0x3ab   : > { %v7605_v51 = vpop.eup %7604 }
 0x3ac   : > { %1859 = vrot.lane.b32.xlu0 %v7605_v51, %s8587_s6  ;;  %v7607_v33 = vpop.eup %7606 }
 0x3ad   : > { %v1309_v47 = vadd.f32 1.0, %v7607_v33 }
 0x3af   : > { %7608 = vrcp.f32 %v1309_v47  ;;  %v1342_v33 = vand.u32 2147483648, %v1309_v47  ;;  %vm1336_vm4 = vweird.f32 %v1309_v47  ;;  %v1340_v59 = vand.u32 2147483647, %v1309_v47 }
 0x3b0   : > { %7610 = vpow2.f32 %v7271_v50 }
 0x3b1   : > { %7612 = vpow2.f32 %v7272_v48  ;;  %vm1341_vm6 = vcmp.eq.f32.partialorder %v1340_v59, 8.507059e+37  ;;  %v7248_v59 = vmul.f32 -1.442695, %v9116_v10  ;;  %v9173_v10 = vld [vmem:[%s13013_s3] ss:$0 sm:$0xff] }
 0x3b2   : > { %7614 = vpow2.f32 %v7243_v35 }
 0x3b5   : > { %v7609_v16 = vpop.eup %7608 }
 0x3b6   : > { %v1332_v6 = vmul.f32 %v7609_v16, %v1309_v47  ;;  %v7611_v38 = vpop.eup %7610  ;;  %vm1337_vm3 = vweird.f32 %v7609_v16 }
 0x3b7   : > { %v9135_v51 = vadd.f32 1.0, %v7611_v38  ;;  %vm1338_vm5 = vmor %vm1336_vm4, %vm1337_vm3  ;;  %v7613_v63 = vpop.eup %7612 }
 0x3b8   : > { %v1333_v29 = vsub.f32 1.0, %v1332_v6  ;;  %v1343_v6 = vor.u32 1.1754944e-38, %v1342_v33  ;;  %v7615_v41 = vpop.eup %7614 }
 0x3b9   : > { %7616 = vrcp.f32 %v9135_v51  ;;  %v9147_v47 = vadd.f32 1.0, %v7615_v41  ;;  %vm1710_vm8 = vweird.f32 %v9135_v51 }
 0x3ba   : > { %v1334_v42 = vmul.f32 %v7609_v16, %v1333_v29  ;;  %7618 = vpow2.f32 %v7245_v14 }
 0x3bb   : > { %vm1321_vm13 = vweird.f32 %v9147_v47 }
 0x3bc   : > { %v1335_v1 = vadd.f32 %v7609_v16, %v1334_v42  ;;  %v9141_v42 = vadd.f32 1.0, %v7613_v63 }
 0x3be   : > { %v1339_v50 = vsel %vm1338_vm5, %v7609_v16, %v1335_v1  ;;  %v7274_v1 = vmul.f32 -1.442695, %v9107_v43  ;;  %7620 = vrcp.f32 %v9141_v42  ;;  %v7275_v43 = vmul.f32 -1.442695, %v9118_v62 }
 0x3bf   : > { %v9139_v38 = vsel %vm1341_vm6, %v1343_v6, %v1339_v50  ;;  %v9145_v35 = vpop.eup %7616  ;;  %7622 = vpow2.f32 %v7273_v39  ;;  %v365_v62 = vadd.f32 %v9173_v10, %v8998_v32  ;;  %v1716_v32 = vand.u32 2147483648, %v9135_v51 }
 0x3c0   : > { %v7619_v16 = vpop.eup %7618  ;;  %v1706_v14 = vmul.f32 %v9145_v35, %v9135_v51  ;;  %7624 = vrcp.f32 %v9147_v47  ;;  %vm1711_vm7 = vweird.f32 %v9145_v35  ;;  %vm1725_vm12 = vweird.f32 %v9141_v42 }
 0x3c1   : > { %v9155_v33 = vadd.f32 1.0, %v7619_v16  ;;  %7626 = vpow2.f32 %v7274_v1  ;;  %vm9198_vm9 = vmor %vm1710_vm8, %vm1711_vm7  ;;  %v1717_v28 = vor.u32 1.1754944e-38, %v1716_v32 }
 0x3c2   : > { %v1707_v50 = vsub.f32 1.0, %v1706_v14 }
 0x3c3   : > { %7628 = vrcp.f32 %v9155_v33  ;;  %vm1351_vm3 = vweird.f32 %v9155_v33 }
 0x3c4   : > { %v9159_v63 = vpop.eup %7620  ;;  %7630 = vpow2.f32 %v7246_v3 }
 0x3c5   : > { %v7623_v6 = vpop.eup %7622  ;;  %7632 = vpow2.f32 %v7248_v59  ;;  %v1721_v57 = vmul.f32 %v9159_v63, %v9141_v42  ;;  %v7247_v59 = vmul.f32 -1.442695, %v9105_v13  ;;  %v1714_v13 = vand.u32 2147483647, %v9135_v51 }
 0x3c6   : > { %v9163_v41 = vpop.eup %7624  ;;  %v9168_v39 = vadd.f32 1.0, %v7623_v6  ;;  %7634 = vpow2.f32 %v7275_v43  ;;  %vm1726_vm11 = vweird.f32 %v9159_v63 }
 0x3c7   : > { %v1317_v14 = vmul.f32 %v9163_v41, %v9147_v47  ;;  %v1722_v6 = vsub.f32 1.0, %v1721_v57  ;;  %vm1715_vm10 = vcmp.eq.f32.partialorder %v1714_v13, 8.507059e+37  ;;  %vm9247_vm14 = vmor %vm1725_vm12, %vm1726_vm11  ;;  %vm1322_vm15 = vweird.f32 %v9163_v41 }
 0x3c8   : > { %7636 = vrcp.f32 %v9168_v39  ;;  %vm9281_vm4 = vmor %vm1321_vm13, %vm1322_vm15  ;;  %vm1740_vm11 = vweird.f32 %v9168_v39 }
 0x3c9   : > { %v1723_v51 = vmul.f32 %v9159_v63, %v1722_v6 }
 0x3de   : > { %v1463_v29 = vpop.permute.xlu2 %1462 }
 0x3df   : > { %v1485_v48 = vmul.f32 %v1463_v29, %v9139_v38  ;;  %v7627_v29 = vpop.eup %7626 }
 0x3e0   : > { %v9177_v16 = vpop.eup %7628  ;;  %v9179_v1 = vadd.f32 1.0, %v7627_v29 }
 0x3e1   : > { %1502 = vrot.lane.b32.xlu2 %v1485_v48, %s8588_s7  ;;  %v1708_v48 = vmul.f32 %v9145_v35, %v1707_v50  ;;  %v7631_v4 = vpop.eup %7630  ;;  %v1347_v0 = vmul.f32 %v9177_v16, %v9155_v33  ;;  %vm1352_vm1 = vweird.f32 %v9177_v16 }
 0x3e2   : > { %v7633_v29 = vpop.eup %7632  ;;  %v9204_v54 = vadd.f32 1.0, %v7631_v4  ;;  %v367_v4 = vadd.f32 %v9173_v10, %v9006_v31  ;;  %v7276_v31 = vmul.f32 -1.442695, %v9125_v11  ;;  %v1325_v11 = vand.u32 2147483647, %v9147_v47  ;;  %vm9291_vm5 = vmor %vm1351_vm3, %vm1352_vm1 }
 0x3e3   : > { %v1709_v43 = vadd.f32 %v9145_v35, %v1708_v48  ;;  %v1318_v48 = vsub.f32 1.0, %v1317_v14  ;;  %v9210_v56 = vadd.f32 1.0, %v7633_v29  ;;  %v1348_v26 = vsub.f32 1.0, %v1347_v0 }
 0x3e4   : > { %v1724_v0 = vadd.f32 %v9159_v63, %v1723_v51  ;;  %v1729_v51 = vand.u32 2147483647, %v9141_v42  ;;  %vm1326_vm7 = vcmp.eq.f32.partialorder %v1325_v11, 8.507059e+37 }
 0x3e5   : > { %v1713_v60 = vsel %vm9198_vm9, %v9145_v35, %v1709_v43 }
 0x3e6   : > { %v9223_v43 = vsel %vm1715_vm10, %v1717_v28, %v1713_v60  ;;  %v1731_v28 = vand.u32 2147483648, %v9141_v42  ;;  %vm1730_vm2 = vcmp.eq.f32.partialorder %v1729_v51, 8.507059e+37  ;;  %vm1755_vm10 = vweird.f32 %v9179_v1 }
 0x3e8   : > { %v1732_v23 = vor.u32 1.1754944e-38, %v1731_v28 }
 0x3ee   : > { %v9221_v57 = vpop.permute.xlu1 %1460 }
 0x3ef   : > { %v1271_v3 = vpop.f32.mrf.mxu1 }
 0x3f0   : > { %v9185_v50 = vadd.f32 %v1271_v3, %v365_v62  ;;  %v7635_v62 = vpop.eup %7634  ;;  %v9202_v3 = vpop.f32.mrf.mxu3 }
 0x3f1   : > { %v9214_v27 = vadd.f32 1.0, %v7635_v62  ;;  %v9216_v25 = vpop.eup %7636 }
 0x3f2   : > { %7638 = vtanh.f32 %v9185_v50  ;;  %vm1741_vm8 = vweird.f32 %v9216_v25 }
 0x3f3   : > { %7640 = vrcp.f32 %v9179_v1  ;;  %vm9343_vm12 = vmor %vm1740_vm11, %vm1741_vm8 }
 0x3f4   : > { %7642 = vpow2.f32 %v7247_v59  ;;  %v1319_v59 = vmul.f32 %v9163_v41, %v1318_v48  ;;  %v1349_v48 = vmul.f32 %v9177_v16, %v1348_v26  ;;  %v1736_v26 = vmul.f32 %v9216_v25, %v9168_v39 }
 0x3f5   : > { %v9212_v14 = vpop.f32.mrf.mxu2  ;;  %7644 = vrcp.f32 %v9204_v54 }
 0x3f6   : > { %7646 = vrcp.f32 %v9210_v56  ;;  %v1350_v53 = vadd.f32 %v9177_v16, %v1349_v48 }
 0x3f7   : > { %v1850_v35 = vpop.permute.xlu0 %1849  ;;  %v1273_v29 = vpop.f32.mrf.mxu1  ;;  %7648 = vrcp.f32 %v9214_v27 }
 0x3f8   : > { %v7639_v6 = vpop.eup %7638  ;;  %v1873_v32 = vmul.f32 %v1850_v35, %v9223_v43  ;;  %v9233_v62 = vadd.f32 %v1273_v29, %v367_v4  ;;  %v1327_v35 = vand.u32 2147483648, %v9147_v47  ;;  %v1320_v29 = vadd.f32 %v9163_v41, %v1319_v59  ;;  %v1662_v22 = vpop.f32.mrf.mxu3 }
 0x3f9   : > { %v9229_v13 = vpop.eup %7640  ;;  %1472 = vrot.lane.b32.xlu0 %v7639_v6, %s8587_s6  ;;  %v1728_v6 = vsel %vm9247_vm14, %v9159_v63, %v1724_v0  ;;  %v1357_v63 = vand.u32 2147483648, %v9155_v33  ;;  %v1354_v47 = vsel %vm9291_vm5, %v9177_v16, %v1350_v53  ;;  %vm1366_vm14 = vweird.f32 %v9204_v54 }
 0x3fa   : > { %v7643_v60 = vpop.eup %7642  ;;  %1889 = vrot.lane.b32.xlu2 %v1873_v32, %s8588_s7  ;;  %7650 = vtanh.f32 %v9233_v62  ;;  %v1751_v42 = vmul.f32 %v9229_v13, %v9179_v1  ;;  %v9272_v0 = vsel %vm1730_vm2, %v1732_v23, %v1728_v6  ;;  %v1465_v6 = vpop.permute.xlu2 %1464  ;;  %vm1756_vm9 = vweird.f32 %v9229_v13 }
 0x3fb   : > { %v9260_v32 = vadd.f32 1.0, %v7643_v60  ;;  %7652 = vpow2.f32 %v7276_v31  ;;  %v9263_v21 = vpop.eup %7644  ;;  %v1737_v31 = vsub.f32 1.0, %v1736_v26  ;;  %v1355_v60 = vand.u32 2147483647, %v9155_v33  ;;  %vm9353_vm13 = vmor %vm1755_vm10, %vm1756_vm9 }
 0x3fc   : > { %v9268_v5 = vpop.eup %7646  ;;  %v1752_v48 = vsub.f32 1.0, %v1751_v42  ;;  %v1328_v26 = vor.u32 1.1754944e-38, %v1327_v35  ;;  %v1324_v42 = vsel %vm9281_vm4, %v9163_v41, %v1320_v29  ;;  %v1358_v35 = vor.u32 1.1754944e-38, %v1357_v63 }
 0x3fd   : > { %v1621_v24 = vpop.f32.mrf.mxu2  ;;  %v9274_v28 = vpop.eup %7648  ;;  %7654 = vrcp.f32 %v9260_v32  ;;  %v1738_v53 = vmul.f32 %v9216_v25, %v1737_v31  ;;  %v1392_v41 = vmul.f32 %v9268_v5, %v9210_v56  ;;  %vm1356_vm6 = vcmp.eq.f32.partialorder %v1355_v60, 8.507059e+37 }
 0x3fe   : > { %v1622_v2 = vadd.f32 %v9068_v45, %v1621_v24  ;;  %v1753_v16 = vmul.f32 %v9229_v13, %v1752_v48  ;;  %v1766_v29 = vmul.f32 %v9274_v28, %v9214_v27  ;;  %v9314_v24 = vsel %vm1356_vm6, %v1358_v35, %v1354_v47 }
 0x3ff   : > { %v1852_v59 = vpop.permute.xlu1 %1851  ;;  %v1739_v31 = vadd.f32 %v9216_v25, %v1738_v53  ;;  %v1393_v60 = vsub.f32 1.0, %v1392_v41  ;;  %v1486_v33 = vmul.f32 %v1465_v6, %v9314_v24  ;;  %vm1367_vm15 = vweird.f32 %v9263_v21 }
 0x400   : > { %v1874_v51 = vmul.f32 %v1852_v59, %v9272_v0  ;;  %v9286_v4 = vadd.f32 %v1662_v22, %v1622_v2  ;;  %v7651_v23 = vpop.eup %7650  ;;  %v1362_v22 = vmul.f32 %v9263_v21, %v9204_v54  ;;  %v1620_v59 = vadd.f32 %v9068_v45, %v9212_v14  ;;  %vm9387_vm5 = vmor %vm1366_vm14, %vm1367_vm15 }
 0x401   : > { %1474 = vrot.lane.b32.xlu1 %v7651_v23, %s8587_s6  ;;  %v7653_v2 = vpop.eup %7652  ;;  %v1746_v45 = vand.u32 2147483648, %v9168_v39  ;;  %v1754_v47 = vadd.f32 %v9229_v13, %v1753_v16  ;;  %v1394_v53 = vmul.f32 %v9268_v5, %v1393_v60  ;;  %vm1397_vm3 = vweird.f32 %v9268_v5 }
 0x402   : > { %7656 = vtanh.f32 %v9286_v4  ;;  %1891 = vrot.lane.b32.xlu0 %v1874_v51, %s8588_s7  ;;  %v9316_v51 = vsel %vm1326_vm7, %v1328_v26, %v1324_v42  ;;  %v9318_v63 = vadd.f32 1.0, %v7653_v2  ;;  %v1363_v23 = vsub.f32 1.0, %v1362_v22 }
 0x403   : > { %v9322_v14 = vpop.eup %7654  ;;  %v9326_v11 = vadd.f32 %v9202_v3, %v1620_v59  ;;  %v1484_v26 = vmul.f32 %v9221_v57, %v9316_v51  ;;  %v1767_v42 = vsub.f32 1.0, %v1766_v29  ;;  %v1761_v22 = vand.u32 2147483648, %v9179_v1 }
 0x404   : > { %v1744_v3 = vand.u32 2147483647, %v9168_v39  ;;  %7658 = vrcp.f32 %v9318_v63  ;;  %v1759_v2 = vand.u32 2147483647, %v9179_v1  ;;  %v1364_v6 = vmul.f32 %v9263_v21, %v1363_v23  ;;  %v1856_v1 = vpop.permute.xlu2 %1855 }
 0x405   : > { %v1377_v39 = vmul.f32 %v9322_v14, %v9260_v32  ;;  %7660 = vtanh.f32 %v9326_v11  ;;  %v1743_v59 = vsel %vm9343_vm12, %v9216_v25, %v1739_v31  ;;  %v1758_v41 = vsel %vm9353_vm13, %v9229_v13, %v1754_v47 }
 0x406   : > { %v1768_v16 = vmul.f32 %v9274_v28, %v1767_v42  ;;  %v1747_v29 = vor.u32 1.1754944e-38, %v1746_v45  ;;  %vm1745_vm1 = vcmp.eq.f32.partialorder %v1744_v3, 8.507059e+37  ;;  %vm1760_vm2 = vcmp.eq.f32.partialorder %v1759_v2, 8.507059e+37 }
 0x407   : > { %v1854_v23 = vpop.permute.xlu1 %1853  ;;  %v1378_v31 = vsub.f32 1.0, %v1377_v39  ;;  %vm1771_vm4 = vweird.f32 %v9274_v28  ;;  %v1776_v2 = vand.u32 2147483648, %v9214_v27  ;;  %v1372_v57 = vand.u32 2147483648, %v9204_v54 }
 0x408   : > { %v7657_v48 = vpop.eup %7656  ;;  %v9369_v25 = vsel %vm1745_vm1, %v1747_v29, %v1743_v59  ;;  %v1769_v42 = vadd.f32 %v9274_v28, %v1768_v16  ;;  %vm1396_vm6 = vweird.f32 %v9210_v56  ;;  %v1400_v39 = vand.u32 2147483647, %v9210_v56 }
 0x409   : > { %1863 = vrot.lane.b32.xlu2 %v7657_v48, %s8587_s6  ;;  %1500 = vrot.lane.b32.xlu1 %v1484_v26, %s8588_s7  ;;  %v1762_v48 = vor.u32 1.1754944e-38, %v1761_v22  ;;  %v1875_v13 = vmul.f32 %v1854_v23, %v9369_v25  ;;  %v1395_v26 = vadd.f32 %v9268_v5, %v1394_v53  ;;  %v1402_v22 = vand.u32 2147483648, %v9210_v56  ;;  %vm9402_vm8 = vmor %vm1396_vm6, %vm1397_vm3  ;;  %v1467_v53 = vpop.permute.xlu0 %1466 }
 0x40a   : > { %1504 = vrot.lane.b32.xlu0 %v1486_v33, %s8588_s7  ;;  %v1365_v33 = vadd.f32 %v9263_v21, %v1364_v6  ;;  %v9376_v45 = vpop.eup %7658  ;;  %vm1770_vm7 = vweird.f32 %v9214_v27  ;;  %v1774_v35 = vand.u32 2147483647, %v9214_v27  ;;  %v1379_v16 = vmul.f32 %v9322_v14, %v1378_v31 }
 0x40b   : > { %v9371_v60 = vsel %vm1760_vm2, %v1762_v48, %v1758_v41  ;;  %v7661_v3 = vpop.eup %7660  ;;  %vm9408_vm9 = vmor %vm1770_vm7, %vm1771_vm4  ;;  %v1403_v29 = vor.u32 1.1754944e-38, %v1402_v22  ;;  %v1781_v23 = vmul.f32 %v9376_v45, %v9318_v63  ;;  %v1777_v48 = vor.u32 1.1754944e-38, %v1776_v2 }
 0x40c   : > { %v1876_v47 = vmul.f32 %v1856_v1, %v9371_v60  ;;  %v1370_v1 = vand.u32 2147483647, %v9204_v54  ;;  %v1369_v27 = vsel %vm9387_vm5, %v9263_v21, %v1365_v33  ;;  %v1399_v54 = vsel %vm9402_vm8, %v9268_v5, %v1395_v26 }
 0x40d   : > { %v1773_v41 = vsel %vm9408_vm9, %v9274_v28, %v1769_v42  ;;  %vm1401_vm10 = vcmp.eq.f32.partialorder %v1400_v39, 8.507059e+37  ;;  %vm1775_vm11 = vcmp.eq.f32.partialorder %v1774_v35, 8.507059e+37  ;;  %vm1382_vm13 = vweird.f32 %v9322_v14 }
 0x40e   : > { %vm1371_vm12 = vcmp.eq.f32.partialorder %v1370_v1, 8.507059e+37  ;;  %v9424_v21 = vsel %vm1401_vm10, %v1403_v29, %v1399_v54  ;;  %v9426_v5 = vsel %vm1775_vm11, %v1777_v48, %v1773_v41  ;;  %v1380_v22 = vadd.f32 %v9322_v14, %v1379_v16 }
 0x40f   : > { %v1387_v2 = vand.u32 2147483648, %v9260_v32  ;;  %vm1381_vm14 = vweird.f32 %v9260_v32  ;;  %v1385_v6 = vand.u32 2147483647, %v9260_v32  ;;  %vm1786_vm2 = vweird.f32 %v9376_v45 }
 0x410   : > { %vm1383_vm15 = vmor %vm1381_vm14, %vm1382_vm13  ;;  %v1791_v32 = vand.u32 2147483648, %v9318_v63  ;;  %vm1785_vm3 = vweird.f32 %v9318_v63  ;;  %v7250_v48 = vmul.f32 -1.442695, %v9233_v62 }
 0x411   : > { %1893 = vrot.lane.b32.xlu2 %v1875_v13, %s8588_s7  ;;  %1861 = vrot.lane.b32.xlu1 %v7661_v3, %s8587_s6  ;;  %v1858_v13 = vpop.permute.xlu2 %1857  ;;  %v1782_v3 = vsub.f32 1.0, %v1781_v23  ;;  %v1469_v35 = vpop.permute.xlu0 %1468  ;;  %v1388_v1 = vor.u32 1.1754944e-38, %v1387_v2  ;;  %vm1386_vm1 = vcmp.eq.f32.partialorder %v1385_v6, 8.507059e+37  ;;  %vm1787_vm4 = vmor %vm1785_vm3, %vm1786_vm2  ;;  %v7249_v23 = vmul.f32 -1.442695, %v9185_v50 }
 0x412   : > { %1895 = vrot.lane.b32.xlu0 %v1876_v47, %s8588_s7  ;;  %v1373_v47 = vor.u32 1.1754944e-38, %v1372_v57  ;;  %v1877_v31 = vmul.f32 %v1858_v13, %v9426_v5  ;;  %v1384_v57 = vsel %vm1383_vm15, %v9322_v14, %v1380_v22  ;;  %v1792_v54 = vor.u32 1.1754944e-38, %v1791_v32 }
 0x413   : > { %v1783_v39 = vmul.f32 %v9376_v45, %v1782_v3  ;;  %v9443_v59 = vsel %vm1386_vm1, %v1388_v1, %v1384_v57  ;;  %7662 = vpow2.f32 %v7249_v23  ;;  %v7278_v3 = vmul.f32 -1.442695, %v9286_v4 }
 0x414   : > { %v9428_v26 = vsel %vm1371_vm12, %v1373_v47, %v1369_v27  ;;  %v1488_v56 = vmul.f32 %v1469_v35, %v9443_v59  ;;  %v1789_v27 = vand.u32 2147483647, %v9318_v63  ;;  %7664 = vpow2.f32 %v7250_v48 }
 0x415   : > { %v1487_v42 = vmul.f32 %v1467_v53, %v9428_v26  ;;  %v1784_v53 = vadd.f32 %v9376_v45, %v1783_v39  ;;  %v1445_v4 = vmul.f32 %v9139_v38, %v8838_v40 }
 0x416   : > { %v1471_v33 = vpop.permute.xlu1 %1470  ;;  %vm1790_vm5 = vcmp.eq.f32.partialorder %v1789_v27, 8.507059e+37 }
 0x417   : > { %v1489_v28 = vmul.f32 %v1471_v33, %v9424_v21  ;;  %v1788_v14 = vsel %vm1787_vm4, %v9376_v45, %v1784_v53 }
 0x418   : > { %v9453_v16 = vsel %vm1790_vm5, %v1792_v54, %v1788_v14 }
 0x419   : > { %1510 = vrot.lane.b32.xlu2 %v1489_v28, %s8588_s7  ;;  %1506 = vrot.lane.b32.xlu1 %v1487_v42, %s8588_s7  ;;  %v7663_v63 = vpop.eup %7662  ;;  %v7277_v28 = vmul.f32 -1.442695, %v9326_v11 }
 0x41a   : > { %1897 = vrot.lane.b32.xlu0 %v1877_v31, %s8588_s7  ;;  %v1314_v13 = vadd.f32 1.0, %v7663_v63  ;;  %v7665_v47 = vpop.eup %7664 }
 0x41b   : > { %v1315_v45 = vadd.f32 1.0, %v7665_v47 }
 0x41c   : > { %7666 = vrcp.f32 %v1314_v13  ;;  %v1417_v39 = vand.u32 2147483648, %v1314_v13  ;;  %vm1411_vm7 = vweird.f32 %v1314_v13  ;;  %v1415_v1 = vand.u32 2147483647, %v1314_v13 }
 0x41d   : > { %7668 = vrcp.f32 %v1315_v45  ;;  %vm1426_vm11 = vweird.f32 %v1315_v45  ;;  %v1430_v40 = vand.u32 2147483647, %v1315_v45 }
 0x41e   : > { %v1860_v41 = vpop.permute.xlu0 %1859  ;;  %7670 = vpow2.f32 %v7277_v28  ;;  %v1418_v32 = vor.u32 1.1754944e-38, %v1417_v39  ;;  %vm1416_vm9 = vcmp.eq.f32.partialorder %v1415_v1, 8.507059e+37 }
 0x41f   : > { %v1878_v29 = vmul.f32 %v1860_v41, %v9453_v16  ;;  %7672 = vpow2.f32 %v7278_v3  ;;  %vm1431_vm13 = vcmp.eq.f32.partialorder %v1430_v40, 8.507059e+37  ;;  %v1834_v40 = vmul.f32 0.0, %v9272_v0 }
 0x421   : > { %1508 = vrot.lane.b32.xlu1 %v1488_v56, %s8588_s7 }
 0x422   : > { %v7667_v33 = vpop.eup %7666 }
 0x423   : > { %v1407_v31 = vmul.f32 %v7667_v33, %v1314_v13  ;;  %v7669_v22 = vpop.eup %7668  ;;  %vm1412_vm6 = vweird.f32 %v7667_v33  ;;  %v1432_v13 = vand.u32 2147483648, %v1315_v45 }
 0x424   : > { %v7671_v2 = vpop.eup %7670  ;;  %v1422_v6 = vmul.f32 %v7669_v22, %v1315_v45  ;;  %vm1413_vm8 = vmor %vm1411_vm7, %vm1412_vm6  ;;  %vm1427_vm10 = vweird.f32 %v7669_v22 }
 0x425   : > { %v1408_v42 = vsub.f32 1.0, %v1407_v31  ;;  %v9461_v62 = vadd.f32 1.0, %v7671_v2  ;;  %v7673_v53 = vpop.eup %7672  ;;  %vm1428_vm12 = vmor %vm1426_vm11, %vm1427_vm10 }
 0x426   : > { %v1423_v35 = vsub.f32 1.0, %v1422_v6 }
 0x427   : > { %v1409_v50 = vmul.f32 %v7667_v33, %v1408_v42  ;;  %7674 = vrcp.f32 %v9461_v62  ;;  %v1433_v42 = vor.u32 1.1754944e-38, %v1432_v13  ;;  %vm1800_vm15 = vweird.f32 %v9461_v62 }
 0x428   : > { %v1424_v27 = vmul.f32 %v7669_v22, %v1423_v35 }
 0x429   : > { %1899 = vrot.lane.b32.xlu1 %v1878_v29, %s8588_s7  ;;  %v1410_v57 = vadd.f32 %v7667_v33, %v1409_v50  ;;  %v9470_v29 = vadd.f32 1.0, %v7673_v53 }
 0x42a   : > { %v1425_v48 = vadd.f32 %v7669_v22, %v1424_v27 }
 0x42b   : > { %v1414_v56 = vsel %vm1413_vm8, %v7667_v33, %v1410_v57  ;;  %v1833_v33 = vmul.f32 0.0, %v9223_v43  ;;  %vm1815_vm4 = vweird.f32 %v9470_v29 }
 0x42c   : > { %v9468_v41 = vsel %vm1416_vm9, %v1418_v32, %v1414_v56  ;;  %v1429_v28 = vsel %vm1428_vm12, %v7669_v22, %v1425_v48  ;;  %v1804_v48 = vand.u32 2147483647, %v9461_v62 }
 0x42d   : > { %v7675_v63 = vpop.eup %7674  ;;  %v9480_v50 = vsel %vm1431_vm13, %v1433_v42, %v1429_v28 }
 0x42e   : > { %v1796_v31 = vmul.f32 %v7675_v63, %v9461_v62  ;;  %vm1801_vm14 = vweird.f32 %v7675_v63  ;;  %vm1805_vm2 = vcmp.eq.f32.partialorder %v1804_v48, 8.507059e+37 }
 0x42f   : > { %vm1802_vm1 = vmor %vm1800_vm15, %vm1801_vm14 }
 0x430   : > { %v1797_v45 = vsub.f32 1.0, %v1796_v31 }
 0x432   : > { %v1798_v35 = vmul.f32 %v7675_v63, %v1797_v45 }
 0x434   : > { %v1799_v27 = vadd.f32 %v7675_v63, %v1798_v35  ;;  %v1446_v35 = vmul.f32 %v9314_v24, %v8849_v52 }
 0x436   : > { %v1803_v13 = vsel %vm1802_vm1, %v7675_v63, %v1799_v27  ;;  %v1819_v63 = vand.u32 2147483647, %v9470_v29 }
 0x438   : > { %vm1820_vm6 = vcmp.eq.f32.partialorder %v1819_v63, 8.507059e+37 }
 0x43b   : > { %v1503_v11 = vpop.permute.xlu2 %1502 }
 0x43c   : > { %v9466_v14 = vadd.f32 %v1503_v11, %v1445_v4  ;;  %v1444_v11 = vmul.f32 %v9316_v51, %v8831_v17 }
 0x43e   : > { %7676 = vtanh.f32 %v9466_v14 }
 0x43f   : > { %7678 = vrcp.f32 %v9470_v29 }
 0x444   : > { %v7677_v6 = vpop.eup %7676 }
 0x445   : > { %v7679_v39 = vpop.eup %7678 }
 0x446   : > { %v1811_v22 = vmul.f32 %v7679_v39, %v9470_v29  ;;  %vm1816_vm3 = vweird.f32 %v7679_v39 }
 0x447   : > { %vm1817_vm5 = vmor %vm1815_vm4, %vm1816_vm3 }
 0x448   : > { %v1812_v4 = vsub.f32 1.0, %v1811_v22 }
 0x44a   : > { %v1813_v17 = vmul.f32 %v7679_v39, %v1812_v4 }
 0x44c   : > { %v1814_v42 = vadd.f32 %v7679_v39, %v1813_v17  ;;  %v1836_v17 = vmul.f32 0.0, %v9371_v60 }
 0x44e   : > { %v1818_v22 = vsel %vm1817_vm5, %v7679_v39, %v1814_v42 }
 0x454   : > { %v1890_v47 = vpop.permute.xlu2 %1889 }
 0x455   : > { %v9478_v3 = vadd.f32 %v1890_v47, %v1833_v33 }
 0x457   : > { %7680 = vtanh.f32 %v9478_v3 }
 0x45d   : > { %v7681_v53 = vpop.eup %7680 }
 0x46b   : > { %v1473_v54 = vpop.permute.xlu0 %1472 }
 0x46c   : > { %v1490_v23 = vmul.f32 %v1473_v54, %v9468_v41  ;;  %v1864_v54 = vpop.permute.xlu2 %1863 }
 0x46e   : > { %1512 = vrot.lane.b32.xlu2 %v1490_v23, %s8588_s7  ;;  %v1806_v23 = vand.u32 2147483648, %v9461_v62 }
 0x470   : > { %v1807_v47 = vor.u32 1.1754944e-38, %v1806_v23 }
 0x472   : > { %v9499_v28 = vsel %vm1805_vm2, %v1807_v47, %v1803_v13  ;;  %v1448_v13 = vmul.f32 %v9443_v59, %v8851_v55 }
 0x473   : > { %v1475_v2 = vpop.permute.xlu1 %1474 }
 0x474   : > { %v1491_v57 = vmul.f32 %v1475_v2, %v9480_v50  ;;  %v1892_v1 = vpop.permute.xlu0 %1891  ;;  %v1894_v45 = vpop.permute.xlu2 %1893 }
 0x475   : > { %v9497_v33 = vadd.f32 %v1892_v1, %v1834_v40 }
 0x476   : > { %1550 = vrot.lane.b32.xlu2 %v7677_v6, %s8587_s6  ;;  %1514 = vrot.lane.b32.xlu0 %v1491_v57, %s8588_s7  ;;  %v1821_v57 = vand.u32 2147483648, %v9470_v29  ;;  %v1447_v29 = vmul.f32 %v9428_v26, %v8835_v36 }
 0x478   : > { %v1822_v1 = vor.u32 1.1754944e-38, %v1821_v57  ;;  %v1838_v57 = vmul.f32 0.0, %v9453_v16 }
 0x47b   : > { %v1501_v56 = vpop.permute.xlu1 %1500 }
 0x47c   : > { %v9489_v32 = vadd.f32 %v1501_v56, %v1444_v11  ;;  %v1505_v2 = vpop.permute.xlu0 %1504  ;;  %v1835_v11 = vmul.f32 0.0, %v9369_v25  ;;  %v1511_v36 = vpop.permute.xlu2 %1510 }
 0x47d   : > { %v9511_v56 = vadd.f32 %v1505_v2, %v1446_v35 }
 0x47e   : > { %1937 = vrot.lane.b32.xlu2 %v7681_v53, %s8587_s6  ;;  %7682 = vtanh.f32 %v9489_v32  ;;  %v9515_v53 = vsel %vm1820_vm6, %v1822_v1, %v1818_v22  ;;  %v9518_v23 = vadd.f32 %v1894_v45, %v1835_v11 }
 0x47f   : > { %7684 = vtanh.f32 %v9497_v33  ;;  %v1880_v27 = vmul.f32 %v1864_v54, %v9515_v53  ;;  %v1449_v54 = vmul.f32 %v9424_v21, %v8861_v61  ;;  %v1837_v61 = vmul.f32 0.0, %v9426_v5 }
 0x480   : > { %7686 = vtanh.f32 %v9511_v56 }
 0x481   : > { %v9534_v42 = vadd.f32 %v1511_v36, %v1449_v54 }
 0x483   : > { %v1862_v31 = vpop.permute.xlu1 %1861 }
 0x484   : > { %v1879_v6 = vmul.f32 %v1862_v31, %v9499_v28  ;;  %v7683_v62 = vpop.eup %7682  ;;  %v1896_v52 = vpop.permute.xlu0 %1895 }
 0x485   : > { %1548 = vrot.lane.b32.xlu1 %v7683_v62, %s8587_s6  ;;  %v7685_v48 = vpop.eup %7684  ;;  %v9532_v40 = vadd.f32 %v1896_v52, %v1836_v17  ;;  %v1451_v17 = vmul.f32 %v9480_v50, %v8892_v34 }
 0x486   : > { %1901 = vrot.lane.b32.xlu0 %v1879_v6, %s8588_s7  ;;  %v7687_v31 = vpop.eup %7686 }
 0x48b   : > { %v1507_v4 = vpop.permute.xlu1 %1506 }
 0x48c   : > { %v9520_v39 = vadd.f32 %v1507_v4, %v1447_v29  ;;  %v1898_v55 = vpop.permute.xlu0 %1897 }
 0x48d   : > { %1903 = vrot.lane.b32.xlu1 %v1880_v27, %s8588_s7  ;;  %v9546_v63 = vadd.f32 %v1898_v55, %v1837_v61  ;;  %v1450_v27 = vmul.f32 %v9468_v41, %v8859_v30 }
 0x48e   : > { %1939 = vrot.lane.b32.xlu0 %v7685_v48, %s8587_s6  ;;  %7688 = vtanh.f32 %v9520_v39 }
 0x48f   : > { %7690 = vtanh.f32 %v9518_v23 }
 0x493   : > { %v1509_v47 = vpop.permute.xlu1 %1508 }
 0x494   : > { %v9536_v2 = vadd.f32 %v1509_v47, %v1448_v13  ;;  %v7689_v6 = vpop.eup %7688 }
 0x495   : > { %v7691_v62 = vpop.eup %7690  ;;  %1552 = vrot.lane.b32.xlu1 %v7687_v31, %s8587_s6  ;;  %1554 = vrot.lane.b32.xlu2 %v7689_v6, %s8587_s6  ;;  %v1839_v6 = vmul.f32 0.0, %v9499_v28 }
 0x496   : > { %7692 = vtanh.f32 %v9536_v2  ;;  %1941 = vrot.lane.b32.xlu0 %v7691_v62, %s8587_s6 }
 0x497   : > { %7694 = vtanh.f32 %v9532_v40 }
 0x498   : > { %7696 = vtanh.f32 %v9534_v42 }
 0x49b   : > { %v1900_v45 = vpop.permute.xlu1 %1899 }
 0x49c   : > { %v7693_v22 = vpop.eup %7692  ;;  %v9548_v35 = vadd.f32 %v1900_v45, %v1838_v57 }
 0x49d   : > { %v7695_v1 = vpop.eup %7694  ;;  %1556 = vrot.lane.b32.xlu2 %v7693_v22, %s8587_s6  ;;  %v1840_v22 = vmul.f32 0.0, %v9515_v53 }
 0x49e   : > { %v7697_v11 = vpop.eup %7696  ;;  %7698 = vtanh.f32 %v9548_v35  ;;  %1943 = vrot.lane.b32.xlu1 %v7695_v1, %s8587_s6 }
 0x49f   : > { %7700 = vtanh.f32 %v9546_v63  ;;  %1558 = vrot.lane.b32.xlu0 %v7697_v11, %s8587_s6 }
 0x4a4   : > { %v7699_v29 = vpop.eup %7698 }
 0x4a5   : > { %v7701_v4 = vpop.eup %7700  ;;  %1947 = vrot.lane.b32.xlu2 %v7699_v29, %s8587_s6 }
 0x4a6   : > { %1945 = vrot.lane.b32.xlu1 %v7701_v4, %s8587_s6 }
 0x4c8   : > { %v1513_v48 = vpop.permute.xlu2 %1512 }
 0x4c9   : > { %v9559_v52 = vadd.f32 %v1513_v48, %v1450_v27 }
 0x4cb   : > { %7702 = vtanh.f32 %v9559_v52 }
 0x4d0   : > { %v1551_v47 = vpop.permute.xlu2 %1550 }
 0x4d1   : > { %v7703_v36 = vpop.eup %7702  ;;  %v1573_v62 = vmul.f32 %v1551_v47, %v9139_v38 }
 0x4d2   : > { %1560 = vrot.lane.b32.xlu1 %v7703_v36, %s8587_s6 }
 0x4d8   : > { %v1938_v57 = vpop.permute.xlu2 %1937 }
 0x4d9   : > { %v1961_v38 = vmul.f32 %v1938_v57, %v9223_v43 }
 0x4e8   : > { %v1515_v54 = vpop.permute.xlu0 %1514 }
 0x4e9   : > { %v9565_v13 = vadd.f32 %v1515_v54, %v1451_v17 }
 0x4eb   : > { %7704 = vtanh.f32 %v9565_v13 }
 0x4ef   : > { %v1555_v27 = vpop.permute.xlu2 %1554 }
 0x4f0   : > { %v1575_v54 = vmul.f32 %v1555_v27, %v9428_v26 }
 0x4f1   : > { %v7705_v31 = vpop.eup %7704 }
 0x4f2   : > { %1562 = vrot.lane.b32.xlu2 %v7705_v31, %s8587_s6 }
 0x4f7   : > { %v1549_v30 = vpop.permute.xlu1 %1548 }
 0x4f8   : > { %v1572_v55 = vmul.f32 %v1549_v30, %v9316_v51  ;;  %v1902_v61 = vpop.permute.xlu0 %1901  ;;  %v1557_v30 = vpop.permute.xlu2 %1556 }
 0x4f9   : > { %v9572_v45 = vadd.f32 %v1902_v61, %v1839_v6  ;;  %v1576_v61 = vmul.f32 %v1557_v30, %v9443_v59 }
 0x4fa   : > { %v1977_v34 = vpack.c.bf16 %v1573_v62, %v1572_v55 }
 0x4fb   : > { %7706 = vtanh.f32 %v9572_v45 }
 0x4fc   : > { %1985 = vrot.lane.b32.xlu0 %v1977_v34, %s8588_s7 }
 0x4ff   : > { %v1904_v1 = vpop.permute.xlu1 %1903 }
 0x500   : > { %v9577_v11 = vadd.f32 %v1904_v1, %v1840_v22  ;;  %v1940_v29 = vpop.permute.xlu0 %1939 }
 0x501   : > { %v7707_v4 = vpop.eup %7706  ;;  %v1962_v51 = vmul.f32 %v1940_v29, %v9272_v0 }
 0x502   : > { %7708 = vtanh.f32 %v9577_v11  ;;  %1949 = vrot.lane.b32.xlu1 %v7707_v4, %s8587_s6 }
 0x503   : > { %v2367_v48 = vpack.c.bf16 %v1962_v51, %v1961_v38  ;;  %v8545_v51 = vld [vmem:[%s13012_s2 + $0x10] sm:$0xff] }
 0x505   : > { %2375 = vrot.lane.b32.xlu0 %v2367_v48, %s8588_s7  ;;  %v8546_v48 = vld [vmem:[%s13012_s2] sm:$0xff] }
 0x507   : > { %v1553_v36 = vpop.permute.xlu1 %1552 }
 0x508   : > { %v7709_v17 = vpop.eup %7708  ;;  %v1574_v47 = vmul.f32 %v1553_v36, %v9314_v24  ;;  %v1942_v31 = vpop.permute.xlu0 %1941 }
 0x509   : > { %1951 = vrot.lane.b32.xlu2 %v7709_v17, %s8587_s6  ;;  %v1963_v6 = vmul.f32 %v1942_v31, %v9369_v25  ;;  %v1948_v24 = vpop.permute.xlu2 %1947  ;;  %v8547_v31 = vld [vmem:[%s13011_s1 + $0x18] sm:$0xff] }
 0x50a   : > { %v1978_v43 = vpack.c.bf16 %v1575_v54, %v1574_v47  ;;  %v1966_v1 = vmul.f32 %v1948_v24, %v9453_v16  ;;  %v8544_v16 = vld [vmem:[%s13012_s2 + $0x8] sm:$0xff] }
 0x50d   : > { %1987 = vrot.lane.b32.xlu0 %v1978_v43, %s8588_s7  ;;  %v8548_v43 = vld [vmem:[%s13011_s1 + $0x10] sm:$0xff] }
 0x510   : > { %v1944_v0 = vpop.permute.xlu1 %1943 }
 0x511   : > { %v1964_v62 = vmul.f32 %v1944_v0, %v9371_v60  ;;  %v1559_v55 = vpop.permute.xlu0 %1558 }
 0x512   : > { %v1577_v57 = vmul.f32 %v1559_v55, %v9424_v21  ;;  %v427_v55 = vadd.f32 %v9173_v10, %v8950_v7  ;;  %v9647_v7 = vld [vmem:[%s13013_s3 + $0x1] ss:$0 sm:$0xff] }
 0x513   : > { %v2368_v26 = vpack.c.bf16 %v1964_v62, %v1963_v6 }
 0x514   : > { %v1979_v34 = vpack.c.bf16 %v1577_v57, %v1576_v61 }
 0x515   : > { %2377 = vrot.lane.b32.xlu1 %v2368_v26, %s8588_s7 }
 0x516   : > { %1989 = vrot.lane.b32.xlu2 %v1979_v34, %s8588_s7  ;;  %v429_v34 = vadd.f32 %v9173_v10, %v8956_v15  ;;  %v432_v15 = vadd.f32 %v9173_v10, %v8965_v19  ;;  %v9665_v19 = vld [vmem:[%s13013_s3] ss:$0 sm:$0xff] }
 0x517   : > { %v434_v10 = vadd.f32 %v9665_v19, %v8973_v37  ;;  %v437_v37 = vadd.f32 %v9665_v19, %v8985_v44  ;;  %v439_v44 = vadd.f32 %v9665_v19, %v8994_v8 }
 0x518   : > { %v1946_v22 = vpop.permute.xlu1 %1945 }
 0x519   : > { %v1965_v29 = vmul.f32 %v1946_v22, %v9426_v5  ;;  %v8543_v5 = vld [vmem:[%s13012_s2 + $0x18] sm:$0xff] }
 0x51b   : > { %v2369_v25 = vpack.c.bf16 %v1966_v1, %v1965_v29 }
 0x51d   : > { %2379 = vrot.lane.b32.xlu0 %v2369_v25, %s8588_s7 }
 0x544   : > { %v1561_v60 = vpop.permute.xlu1 %1560 }
 0x545   : > { %v1578_v59 = vmul.f32 %v1561_v60, %v9468_v41 }
 0x54c   : > { %v1563_v4 = vpop.permute.xlu2 %1562 }
 0x54d   : > { %v1579_v21 = vmul.f32 %v1563_v4, %v9480_v50 }
 0x54f   : > { %v1980_v38 = vpack.c.bf16 %v1579_v21, %v1578_v59 }
 0x551   : > { %1991 = vrot.lane.b32.xlu1 %v1980_v38, %s8588_s7 }
 0x563   : > { %v1952_v41 = vpop.permute.xlu2 %1951 }
 0x564   : > { %v1968_v36 = vmul.f32 %v1952_v41, %v9515_v53 }
 0x56e   : > { %v1986_v27 = vpop.permute.xlu0 %1985 }
 0x56f   : > { %7279 = vmatmul.msk.bf16.vlgmr.msrb.gmra.mxu0 %vm250_vm0, %v1986_v27  ;;  %7291 = vmatmul.msk.bf16.vlgmr.msrb.gmra.mxu1 %vm250_vm0, %v1986_v27 }
 0x570   : > { %3919 = vmatpush.bf16.msrb.mxu0 %v8543_v5  ;;  %4288 = vmatpush.bf16.msrb.mxu1 %v8544_v16  ;;  %v1990_v53 = vpop.permute.xlu2 %1989 }
 0x574   : > { %v1950_v50 = vpop.permute.xlu1 %1949  ;;  %3920 = vmatpush.bf16.msrb.mxu0 %v8545_v51  ;;  %4289 = vmatpush.bf16.msrb.mxu1 %v8546_v48 }
 0x575   : > { %v1967_v17 = vmul.f32 %v1950_v50, %v9499_v28 }
 0x577   : > { %v2370_v54 = vpack.c.bf16 %v1968_v36, %v1967_v17  ;;  %v2376_v47 = vpop.permute.xlu0 %2375 }
 0x578   : > { %7295 = vmatmul.msk.bf16.vlgmr.msrb.gmra.mxu2 %vm250_vm0, %v2376_v47 }
 0x579   : > { %2381 = vrot.lane.b32.xlu2 %v2370_v54, %s8588_s7  ;;  %4621 = vmatpush.bf16.msrb.mxu2 %v8547_v31 }
 0x57d   : > { %4622 = vmatpush.bf16.msrb.mxu2 %v8548_v43 }
 0x57f   : > { %v1988_v30 = vpop.permute.xlu0 %1987 }
 0x580   : > { %7280 = vmatmul.msk.bf16.gmra.mxu0 %vm250_vm0, %v1988_v30  ;;  %7292 = vmatmul.msk.bf16.gmra.mxu1 %vm250_vm0, %v1988_v30 }
 0x587   : > { %v2378_v28 = vpop.permute.xlu1 %2377 }
 0x588   : > { %7296 = vmatmul.msk.bf16.gmra.mxu2 %vm250_vm0, %v2378_v28 }
 0x58f   : > { %v2380_v0 = vpop.permute.xlu0 %2379 }
 0x590   : > { %7281 = vmatmul.msk.bf16.gmra.mxu0 %vm250_vm0, %v1990_v53  ;;  %7293 = vmatmul.msk.bf16.gmra.mxu1 %vm250_vm0, %v1990_v53 }
 0x598   : > { %7297 = vmatmul.msk.bf16.gmra.mxu2 %vm250_vm0, %v2380_v0 }
 0x5c3   : > { %v1992_v6 = vpop.permute.xlu1 %1991 }
 0x5c4   : > { %7282 = vmatmul.msk.bf16.gmra.mxu0 %vm250_vm0, %v1992_v6  ;;  %7294 = vmatmul.msk.bf16.gmra.mxu1 %vm250_vm0, %v1992_v6 }
 0x5d3   : > { %v2382_v62 = vpop.permute.xlu2 %2381 }
 0x5d4   : > { %7298 = vmatmul.msk.bf16.gmra.mxu2 %vm250_vm0, %v2382_v62 }
 0x5ec   : > { %v2014_v61 = vpop.f32.mrf.mxu0  ;;  %v2347_v26 = vpop.f32.mrf.mxu1 }
 0x5ed   : > { %v9635_v57 = vadd.f32 %v2014_v61, %v427_v55  ;;  %v2348_v25 = vadd.f32 %v9647_v7, %v2347_v26 }
 0x5ef   : > { %7710 = vtanh.f32 %v9635_v57 }
 0x5f4   : > { %v2016_v24 = vpop.f32.mrf.mxu0  ;;  %v2349_v29 = vpop.f32.mrf.mxu1 }
 0x5f5   : > { %v7711_v22 = vpop.eup %7710  ;;  %v9640_v1 = vadd.f32 %v2016_v24, %v429_v34  ;;  %v2350_v5 = vadd.f32 %v9647_v7, %v2349_v29 }
 0x5f6   : > { %2218 = vrot.lane.b32.xlu0 %v7711_v22, %s8587_s6 }
 0x5f7   : > { %7712 = vtanh.f32 %v9640_v1 }
 0x5fb   : > { %v2404_v60 = vpop.f32.mrf.mxu2 }
 0x5fc   : > { %v9652_v4 = vadd.f32 %v2404_v60, %v2348_v25 }
 0x5fd   : > { %v7713_v59 = vpop.eup %7712  ;;  %v2019_v21 = vpop.f32.mrf.mxu0 }
 0x5fe   : > { %7714 = vtanh.f32 %v9652_v4  ;;  %v9655_v38 = vadd.f32 %v2019_v21, %v432_v15  ;;  %2220 = vrot.lane.b32.xlu1 %v7713_v59, %s8587_s6  ;;  %v2352_v27 = vpop.f32.mrf.mxu1 }
 0x5ff   : > { %v2353_v17 = vadd.f32 %v9647_v7, %v2352_v27 }
 0x600   : > { %7716 = vtanh.f32 %v9655_v38 }
 0x603   : > { %v2406_v16 = vpop.f32.mrf.mxu2 }
 0x604   : > { %v7715_v41 = vpop.eup %7714  ;;  %v9660_v50 = vadd.f32 %v2406_v16, %v2350_v5 }
 0x605   : > { %v2021_v51 = vpop.f32.mrf.mxu0  ;;  %2608 = vrot.lane.b32.xlu2 %v7715_v41, %s8587_s6  ;;  %v7283_v41 = vmul.f32 -1.442695, %v9635_v57 }
 0x606   : > { %7718 = vtanh.f32 %v9660_v50  ;;  %v7717_v48 = vpop.eup %7716  ;;  %v2037_v36 = vadd.f32 %v2021_v51, %v434_v10  ;;  %v2354_v54 = vpop.f32.mrf.mxu1  ;;  %v7284_v51 = vmul.f32 -1.442695, %v9640_v1  ;;  %v7285_v1 = vmul.f32 -1.442695, %v9655_v38 }
 0x607   : > { %2222 = vrot.lane.b32.xlu1 %v7717_v48, %s8587_s6  ;;  %v2355_v0 = vadd.f32 %v9647_v7, %v2354_v54 }
 0x608   : > { %7720 = vtanh.f32 %v2037_v36  ;;  %v7286_v57 = vmul.f32 -1.442695, %v2037_v36 }
 0x60b   : > { %v2409_v47 = vpop.f32.mrf.mxu2 }
 0x60c   : > { %v7719_v31 = vpop.eup %7718  ;;  %v9673_v43 = vadd.f32 %v2409_v47, %v2353_v17  ;;  %v7299_v17 = vmul.f32 -1.442695, %v9652_v4  ;;  %v444_v47 = vadd.f32 %v9665_v19, %v9008_v58 }
 0x60d   : > { %v2024_v30 = vpop.f32.mrf.mxu0  ;;  %2610 = vrot.lane.b32.xlu0 %v7719_v31, %s8587_s6 }
 0x60e   : > { %7722 = vtanh.f32 %v9673_v43  ;;  %v9679_v28 = vadd.f32 %v2024_v30, %v437_v37  ;;  %v7721_v53 = vpop.eup %7720  ;;  %v2357_v61 = vpop.f32.mrf.mxu1 }
 0x60f   : > { %2224 = vrot.lane.b32.xlu2 %v7721_v53, %s8587_s6  ;;  %v2358_v25 = vadd.f32 %v9647_v7, %v2357_v61 }
 0x610   : > { %7724 = vtanh.f32 %v9679_v28 }
 0x613   : > { %v2411_v6 = vpop.f32.mrf.mxu2 }
 0x614   : > { %v7723_v62 = vpop.eup %7722  ;;  %v9684_v55 = vadd.f32 %v2411_v6, %v2355_v0 }
 0x615   : > { %v2026_v26 = vpop.f32.mrf.mxu0  ;;  %2612 = vrot.lane.b32.xlu0 %v7723_v62, %s8587_s6  ;;  %v7300_v62 = vmul.f32 -1.442695, %v9660_v50  ;;  %v7301_v50 = vmul.f32 -1.442695, %v9673_v43 }
 0x616   : > { %7726 = vtanh.f32 %v9684_v55  ;;  %v9690_v34 = vadd.f32 %v2026_v26, %v439_v44  ;;  %v7725_v24 = vpop.eup %7724  ;;  %v2359_v60 = vpop.f32.mrf.mxu1 }
 0x617   : > { %2226 = vrot.lane.b32.xlu2 %v7725_v24, %s8587_s6  ;;  %v2360_v8 = vadd.f32 %v9647_v7, %v2359_v60 }
 0x618   : > { %7728 = vtanh.f32 %v9690_v34 }
 0x61b   : > { %v2414_v22 = vpop.f32.mrf.mxu2 }
 0x61c   : > { %v7727_v29 = vpop.eup %7726  ;;  %v9696_v15 = vadd.f32 %v2414_v22, %v2358_v25 }
 0x61d   : > { %2614 = vrot.lane.b32.xlu1 %v7727_v29, %s8587_s6 }
 0x61e   : > { %v7729_v59 = vpop.eup %7728  ;;  %7730 = vtanh.f32 %v9696_v15 }
 0x61f   : > { %2228 = vrot.lane.b32.xlu0 %v7729_v59, %s8587_s6  ;;  %v7287_v59 = vmul.f32 -1.442695, %v9679_v28 }
 0x623   : > { %v2416_v21 = vpop.f32.mrf.mxu2 }
 0x624   : > { %v9701_v27 = vadd.f32 %v2416_v21, %v2360_v8  ;;  %v7731_v5 = vpop.eup %7730 }
 0x626   : > { %7732 = vtanh.f32 %v9701_v27 }
 0x627   : > { %2616 = vrot.lane.b32.xlu0 %v7731_v5, %s8587_s6  ;;  %7734 = vpow2.f32 %v7283_v41 }
 0x628   : > { %7736 = vpow2.f32 %v7284_v51 }
 0x629   : > { %7738 = vpow2.f32 %v7299_v17 }
 0x62c   : > { %v7733_v16 = vpop.eup %7732 }
 0x62d   : > { %2618 = vrot.lane.b32.xlu1 %v7733_v16, %s8587_s6  ;;  %v7735_v48 = vpop.eup %7734 }
 0x62e   : > { %v9711_v54 = vadd.f32 1.0, %v7735_v48  ;;  %v7737_v37 = vpop.eup %7736  ;;  %v7302_v48 = vmul.f32 -1.442695, %v9684_v55 }
 0x62f   : > { %v7739_v53 = vpop.eup %7738  ;;  %v9720_v4 = vadd.f32 1.0, %v7737_v37 }
 0x630   : > { %7740 = vrcp.f32 %v9711_v54  ;;  %v9722_v6 = vadd.f32 1.0, %v7739_v53  ;;  %v2085_v28 = vand.u32 2147483648, %v9711_v54  ;;  %vm2079_vm8 = vweird.f32 %v9711_v54 }
 0x631   : > { %vm2094_vm13 = vweird.f32 %v9720_v4 }
 0x632   : > { %v2086_v53 = vor.u32 1.1754944e-38, %v2085_v28  ;;  %vm2469_vm14 = vweird.f32 %v9722_v6 }
 0x636   : > { %v7741_v0 = vpop.eup %7740 }
 0x637   : > { %v2075_v36 = vmul.f32 %v7741_v0, %v9711_v54  ;;  %vm2080_vm7 = vweird.f32 %v7741_v0 }
 0x638   : > { %vm2081_vm9 = vmor %vm2079_vm8, %vm2080_vm7 }
 0x639   : > { %v2076_v44 = vsub.f32 1.0, %v2075_v36  ;;  %v2098_v36 = vand.u32 2147483647, %v9720_v4 }
 0x63b   : > { %v2077_v60 = vmul.f32 %v7741_v0, %v2076_v44  ;;  %vm2099_vm2 = vcmp.eq.f32.partialorder %v2098_v36, 8.507059e+37 }
 0x63d   : > { %v2078_v16 = vadd.f32 %v7741_v0, %v2077_v60 }
 0x63f   : > { %v2082_v37 = vsel %vm2081_vm9, %v7741_v0, %v2078_v16  ;;  %v2473_v16 = vand.u32 2147483647, %v9722_v6 }
 0x641   : > { %v9707_v10 = vpop.f32.mrf.mxu0  ;;  %vm2474_vm3 = vcmp.eq.f32.partialorder %v2473_v16, 8.507059e+37 }
 0x649   : > { %v2031_v31 = vpop.f32.mrf.mxu0 }
 0x64a   : > { %v9715_v30 = vadd.f32 %v2031_v31, %v444_v47  ;;  %v2083_v47 = vand.u32 2147483647, %v9711_v54 }
 0x64c   : > { %7742 = vtanh.f32 %v9715_v30  ;;  %vm2084_vm10 = vcmp.eq.f32.partialorder %v2083_v47, 8.507059e+37 }
 0x64d   : > { %7744 = vpow2.f32 %v7286_v57  ;;  %v9767_v0 = vsel %vm2084_vm10, %v2086_v53, %v2082_v37 }
 0x64e   : > { %7746 = vpow2.f32 %v7285_v1 }
 0x64f   : > { %7748 = vrcp.f32 %v9720_v4 }
 0x650   : > { %7750 = vrcp.f32 %v9722_v6 }
 0x651   : > { %7752 = vpow2.f32 %v7300_v62 }
 0x652   : > { %v7743_v58 = vpop.eup %7742 }
 0x653   : > { %2232 = vrot.lane.b32.xlu0 %v7743_v58, %s8587_s6  ;;  %v7745_v38 = vpop.eup %7744 }
 0x654   : > { %v7747_v61 = vpop.eup %7746  ;;  %v9729_v26 = vadd.f32 1.0, %v7745_v38  ;;  %v7288_v38 = vmul.f32 -1.442695, %v9690_v34  ;;  %v2475_v34 = vand.u32 2147483648, %v9722_v6 }
 0x655   : > { %v9731_v24 = vpop.eup %7748  ;;  %v9733_v22 = vadd.f32 1.0, %v7747_v61 }
 0x656   : > { %v9735_v29 = vpop.eup %7750  ;;  %7754 = vrcp.f32 %v9729_v26  ;;  %v2090_v21 = vmul.f32 %v9731_v24, %v9720_v4  ;;  %vm2095_vm12 = vweird.f32 %v9731_v24  ;;  %vm2124_vm6 = vweird.f32 %v9729_v26 }
 0x657   : > { %v7753_v25 = vpop.eup %7752  ;;  %7756 = vrcp.f32 %v9733_v22  ;;  %v2465_v8 = vmul.f32 %v9735_v29, %v9722_v6  ;;  %vm2470_vm11 = vweird.f32 %v9735_v29  ;;  %vm9788_vm15 = vmor %vm2094_vm13, %vm2095_vm12  ;;  %v2128_v16 = vand.u32 2147483647, %v9729_v26 }
 0x658   : > { %7758 = vpow2.f32 %v7301_v50  ;;  %v9745_v5 = vadd.f32 1.0, %v7753_v25  ;;  %v2091_v41 = vsub.f32 1.0, %v2090_v21  ;;  %v2100_v21 = vand.u32 2147483648, %v9720_v4  ;;  %vm9796_vm1 = vmor %vm2469_vm14, %vm2470_vm11 }
 0x659   : > { %7760 = vpow2.f32 %v7287_v59  ;;  %v2466_v43 = vsub.f32 1.0, %v2465_v8  ;;  %v442_v4 = vadd.f32 %v9665_v19, %v9000_v20  ;;  %v7303_v19 = vmul.f32 -1.442695, %v9696_v15 }
 0x65a   : > { %7762 = vrcp.f32 %v9745_v5  ;;  %v2092_v55 = vmul.f32 %v9731_v24, %v2091_v41  ;;  %v2101_v53 = vor.u32 1.1754944e-38, %v2100_v21  ;;  %v2130_v21 = vand.u32 2147483648, %v9729_v26 }
 0x65b   : > { %v2467_v57 = vmul.f32 %v9735_v29, %v2466_v43  ;;  %7764 = vpow2.f32 %v7302_v48  ;;  %v9781_v43 = vpop.f32.mrf.mxu1  ;;  %vm2109_vm8 = vweird.f32 %v9733_v22  ;;  %vm2129_vm10 = vcmp.eq.f32.partialorder %v2128_v16, 8.507059e+37 }
 0x65c   : > { %v9747_v51 = vpop.eup %7754  ;;  %v2093_v59 = vadd.f32 %v9731_v24, %v2092_v55  ;;  %vm2484_vm13 = vweird.f32 %v9745_v5  ;;  %v2488_v16 = vand.u32 2147483647, %v9745_v5 }
 0x65d   : > { %v9751_v17 = vpop.eup %7756  ;;  %v2120_v1 = vmul.f32 %v9747_v51, %v9729_v26  ;;  %v2468_v50 = vadd.f32 %v9735_v29, %v2467_v57  ;;  %vm2125_vm4 = vweird.f32 %v9747_v51 }
 0x65e   : > { %v7759_v31 = vpop.eup %7758  ;;  %v2105_v54 = vmul.f32 %v9751_v17, %v9733_v22  ;;  %v2097_v20 = vsel %vm9788_vm15, %v9731_v24, %v2093_v59  ;;  %vm2110_vm5 = vweird.f32 %v9751_v17  ;;  %vm9844_vm7 = vmor %vm2124_vm6, %vm2125_vm4  ;;  %vm2489_vm15 = vcmp.eq.f32.partialorder %v2488_v16, 8.507059e+37 }
 0x65f   : > { %v7761_v58 = vpop.eup %7760  ;;  %v9760_v62 = vadd.f32 1.0, %v7759_v31  ;;  %v2121_v60 = vsub.f32 1.0, %v2120_v1  ;;  %v9802_v31 = vpop.f32.mrf.mxu2  ;;  %v2472_v57 = vsel %vm9796_vm1, %v9735_v29, %v2468_v50  ;;  %v2476_v1 = vor.u32 1.1754944e-38, %v2475_v34  ;;  %vm9860_vm9 = vmor %vm2109_vm8, %vm2110_vm5 }
 0x660   : > { %v9770_v44 = vpop.eup %7762  ;;  %v9775_v8 = vadd.f32 1.0, %v7761_v58  ;;  %v2106_v48 = vsub.f32 1.0, %v2105_v54  ;;  %v2609_v55 = vpop.permute.xlu2 %2608  ;;  %v2115_v29 = vand.u32 2147483648, %v9733_v22  ;;  %v9822_v24 = vsel %vm2099_vm2, %v2101_v53, %v2097_v20 }
 0x661   : > { %7766 = vrcp.f32 %v9760_v62  ;;  %v7765_v28 = vpop.eup %7764  ;;  %v2480_v6 = vmul.f32 %v9770_v44, %v9745_v5  ;;  %v2122_v37 = vmul.f32 %v9747_v51, %v2121_v60  ;;  %vm2485_vm11 = vweird.f32 %v9770_v44 }
 0x662   : > { %7768 = vpow2.f32 %v7288_v38  ;;  %v9813_v58 = vadd.f32 1.0, %v7765_v28  ;;  %v2107_v54 = vmul.f32 %v9751_v17, %v2106_v48  ;;  %v9818_v38 = vadd.f32 %v9707_v10, %v442_v4  ;;  %vm2486_vm14 = vmor %vm2484_vm13, %vm2485_vm11 }
 0x663   : > { %7770 = vrcp.f32 %v9775_v8  ;;  %v2481_v50 = vsub.f32 1.0, %v2480_v6  ;;  %v2123_v60 = vadd.f32 %v9747_v51, %v2122_v37  ;;  %v7304_v10 = vmul.f32 -1.442695, %v9701_v27  ;;  %v2364_v47 = vpop.f32.mrf.mxu1 }
 0x664   : > { %7772 = vpow2.f32 %v7303_v19  ;;  %v2108_v41 = vadd.f32 %v9751_v17, %v2107_v54  ;;  %v2131_v37 = vor.u32 1.1754944e-38, %v2130_v21  ;;  %v2365_v54 = vadd.f32 %v9647_v7, %v2364_v47 }
 0x665   : > { %7774 = vrcp.f32 %v9813_v58  ;;  %v2482_v28 = vmul.f32 %v9770_v44, %v2481_v50  ;;  %v2127_v6 = vsel %vm9844_vm7, %v9747_v51, %v2123_v60  ;;  %vm2499_vm2 = vweird.f32 %v9760_v62 }
 0x666   : > { %7776 = vtanh.f32 %v9818_v38  ;;  %v2112_v51 = vsel %vm9860_vm9, %v9751_v17, %v2108_v41  ;;  %vm2139_vm5 = vweird.f32 %v9775_v8 }
 0x667   : > { %v9824_v15 = vpop.eup %7766  ;;  %7778 = vpow2.f32 %v7304_v10  ;;  %v2483_v50 = vadd.f32 %v9770_v44, %v2482_v28 }
 0x668   : > { %v2219_v61 = vpop.permute.xlu0 %2218  ;;  %v7769_v34 = vpop.eup %7768  ;;  %v2495_v26 = vmul.f32 %v9824_v15, %v9760_v62  ;;  %vm2500_vm1 = vweird.f32 %v9824_v15 }
 0x669   : > { %v2242_v25 = vmul.f32 %v2219_v61, %v9767_v0  ;;  %v9820_v61 = vsel %vm2474_vm3, %v2476_v1, %v2472_v57  ;;  %v9839_v48 = vpop.eup %7770  ;;  %v9851_v4 = vadd.f32 1.0, %v7769_v34  ;;  %v2113_v57 = vand.u32 2147483647, %v9733_v22  ;;  %v2225_v20 = vpop.permute.xlu2 %2224  ;;  %vm9923_vm4 = vmor %vm2499_vm2, %vm2500_vm1 }
 0x66a   : > { %v2116_v1 = vor.u32 1.1754944e-38, %v2115_v29  ;;  %v2135_v53 = vmul.f32 %v9839_v48, %v9775_v8  ;;  %v7773_v22 = vpop.eup %7772  ;;  %vm2140_vm3 = vweird.f32 %v9839_v48 }
 0x66b   : > { %2258 = vrot.lane.b32.xlu1 %v2242_v25, %s8588_s7  ;;  %v2632_v25 = vmul.f32 %v2609_v55, %v9820_v61  ;;  %v2421_v55 = vpop.f32.mrf.mxu2  ;;  %v9874_v29 = vpop.eup %7774  ;;  %7780 = vrcp.f32 %v9851_v4  ;;  %vm2114_vm12 = vcmp.eq.f32.partialorder %v2113_v57, 8.507059e+37  ;;  %v9894_v57 = vadd.f32 1.0, %v7773_v22  ;;  %vm9936_vm6 = vmor %vm2139_vm5, %vm2140_vm3 }
 0x66c   : > { %v7777_v17 = vpop.eup %7776  ;;  %v9879_v34 = vadd.f32 %v2421_v55, %v2365_v54  ;;  %v9881_v10 = vsel %vm2114_vm12, %v2116_v1, %v2112_v51  ;;  %v2136_v41 = vsub.f32 1.0, %v2135_v53  ;;  %v2505_v22 = vand.u32 2147483648, %v9760_v62 }
 0x66d   : > { %v7779_v28 = vpop.eup %7778  ;;  %v2503_v54 = vand.u32 2147483647, %v9760_v62  ;;  %v2145_v62 = vand.u32 2147483648, %v9775_v8  ;;  %vm2515_vm8 = vweird.f32 %v9874_v29  ;;  %vm2529_vm3 = vweird.f32 %v9894_v57 }
 0x66e   : > { %7782 = vtanh.f32 %v9879_v34  ;;  %v9902_v19 = vadd.f32 1.0, %v7779_v28  ;;  %v2506_v16 = vor.u32 1.1754944e-38, %v2505_v22 }
 0x66f   : > { %7784 = vrcp.f32 %v9894_v57  ;;  %vm2504_vm7 = vcmp.eq.f32.partialorder %v2503_v54, 8.507059e+37 }
 0x670   : > { %v2221_v36 = vpop.permute.xlu1 %2220  ;;  %7786 = vrcp.f32 %v9902_v19 }
 0x671   : > { %v2243_v59 = vmul.f32 %v2221_v36, %v9822_v24  ;;  %v9871_v36 = vsel %vm2129_vm10, %v2131_v37, %v2127_v6  ;;  %v2510_v6 = vmul.f32 %v9874_v29, %v9813_v58  ;;  %v2363_v37 = vadd.f32 %v9647_v7, %v9781_v43 }
 0x672   : > { %v2245_v60 = vmul.f32 %v2225_v20, %v9871_v36  ;;  %v9900_v20 = vpop.eup %7780  ;;  %vm2514_vm10 = vweird.f32 %v9813_v58 }
 0x673   : > { %2648 = vrot.lane.b32.xlu1 %v2632_v25, %s8588_s7  ;;  %2260 = vrot.lane.b32.xlu2 %v2243_v59, %s8588_s7  ;;  %v2496_v25 = vsub.f32 1.0, %v2495_v26  ;;  %v2490_v59 = vand.u32 2147483648, %v9745_v5  ;;  %v2487_v26 = vsel %vm2486_vm14, %v9770_v44, %v2483_v50  ;;  %v2137_v44 = vmul.f32 %v9839_v48, %v2136_v41  ;;  %vm2516_vm11 = vmor %vm2514_vm10, %vm2515_vm8 }
 0x674   : > { %v9909_v53 = vadd.f32 %v9802_v31, %v2363_v37  ;;  %v2511_v43 = vsub.f32 1.0, %v2510_v6  ;;  %v2150_v50 = vmul.f32 %v9900_v20, %v9851_v4  ;;  %v2146_v6 = vor.u32 1.1754944e-38, %v2145_v62 }
 0x675   : > { %v2497_v47 = vmul.f32 %v9824_v15, %v2496_v25  ;;  %v2491_v5 = vor.u32 1.1754944e-38, %v2490_v59  ;;  %v2138_v31 = vadd.f32 %v9839_v48, %v2137_v44  ;;  %vm2155_vm13 = vweird.f32 %v9900_v20 }
 0x676   : > { %7788 = vtanh.f32 %v9909_v53  ;;  %vm2154_vm14 = vweird.f32 %v9851_v4 }
 0x677   : > { %v9905_v1 = vsel %vm2489_vm15, %v2491_v5, %v2487_v26  ;;  %v2498_v7 = vadd.f32 %v9824_v15, %v2497_v47  ;;  %vm2156_vm15 = vmor %vm2154_vm14, %vm2155_vm13 }
 0x679   : > { %v2223_v21 = vpop.permute.xlu1 %2222  ;;  %v2502_v59 = vsel %vm9923_vm4, %v9824_v15, %v2498_v7  ;;  %v2142_v15 = vsel %vm9936_vm6, %v9839_v48, %v2138_v31  ;;  %v2518_v7 = vand.u32 2147483647, %v9813_v58  ;;  %vm2544_vm6 = vweird.f32 %v9902_v19 }
 0x67a   : > { %v2244_v27 = vmul.f32 %v2223_v21, %v9881_v10  ;;  %v2143_v21 = vand.u32 2147483647, %v9775_v8  ;;  %v9945_v47 = vsel %vm2504_vm7, %v2506_v16, %v2502_v59  ;;  %v2227_v8 = vpop.permute.xlu2 %2226 }
 0x67b   : > { %2264 = vrot.lane.b32.xlu1 %v2245_v60, %s8588_s7  ;;  %2230 = vrot.lane.b32.xlu2 %v7777_v17, %s8587_s6  ;;  %v7783_v60 = vpop.eup %7782  ;;  %v2512_v17 = vmul.f32 %v9874_v29, %v2511_v43  ;;  %vm2519_vm12 = vcmp.eq.f32.partialorder %v2518_v7, 8.507059e+37  ;;  %v2550_v7 = vand.u32 2147483648, %v9902_v19 }
 0x67c   : > { %2262 = vrot.lane.b32.xlu0 %v2244_v27, %s8588_s7  ;;  %v2151_v27 = vsub.f32 1.0, %v2150_v50  ;;  %v9940_v28 = vpop.eup %7784  ;;  %vm2144_vm9 = vcmp.eq.f32.partialorder %v2143_v21, 8.507059e+37 }
 0x67d   : > { %v2513_v37 = vadd.f32 %v9874_v29, %v2512_v17  ;;  %v9950_v44 = vpop.eup %7786  ;;  %v9954_v48 = vsel %vm2144_vm9, %v2146_v6, %v2142_v15  ;;  %v2525_v22 = vmul.f32 %v9940_v28, %v9894_v57  ;;  %v2160_v17 = vand.u32 2147483648, %v9851_v4 }
 0x67e   : > { %v2152_v43 = vmul.f32 %v9900_v20, %v2151_v27  ;;  %v2246_v54 = vmul.f32 %v2227_v8, %v9954_v48  ;;  %v2540_v31 = vmul.f32 %v9950_v44, %v9902_v19  ;;  %vm2530_vm2 = vweird.f32 %v9940_v28 }
 0x67f   : > { %v2611_v55 = vpop.permute.xlu0 %2610  ;;  %v2517_v50 = vsel %vm2516_vm11, %v9874_v29, %v2513_v37  ;;  %v2158_v29 = vand.u32 2147483647, %v9851_v4  ;;  %v2161_v15 = vor.u32 1.1754944e-38, %v2160_v17  ;;  %v7290_v4 = vmul.f32 -1.442695, %v9715_v30  ;;  %vm2531_vm5 = vmor %vm2529_vm3, %vm2530_vm2 }
 0x680   : > { %v2633_v51 = vmul.f32 %v2611_v55, %v9905_v1  ;;  %v2520_v55 = vand.u32 2147483648, %v9813_v58  ;;  %v2153_v58 = vadd.f32 %v9900_v20, %v2152_v43  ;;  %v2541_v16 = vsub.f32 1.0, %v2540_v31 }
 0x681   : > { %vm2159_vm1 = vcmp.eq.f32.partialorder %v2158_v29, 8.507059e+37  ;;  %vm2545_vm4 = vweird.f32 %v9950_v44  ;;  %v2548_v30 = vand.u32 2147483647, %v9902_v19  ;;  %7790 = vpow2.f32 %v7290_v4 }
 0x682   : > { %v2521_v25 = vor.u32 1.1754944e-38, %v2520_v55  ;;  %v2157_v41 = vsel %vm2156_vm15, %v9900_v20, %v2153_v58  ;;  %v2535_v20 = vand.u32 2147483648, %v9894_v57  ;;  %v2533_v55 = vand.u32 2147483647, %v9894_v57  ;;  %vm2546_vm7 = vmor %vm2544_vm6, %vm2545_vm4 }
 0x683   : > { %2650 = vrot.lane.b32.xlu2 %v2633_v51, %s8588_s7  ;;  %v7789_v51 = vpop.eup %7788  ;;  %v9979_v6 = vsel %vm2159_vm1, %v2161_v15, %v2157_v41  ;;  %v2551_v31 = vor.u32 1.1754944e-38, %v2550_v7  ;;  %vm2549_vm9 = vcmp.eq.f32.partialorder %v2548_v30, 8.507059e+37 }
 0x684   : > { %2622 = vrot.lane.b32.xlu0 %v7783_v60, %s8587_s6  ;;  %v2526_v60 = vsub.f32 1.0, %v2525_v22  ;;  %v9969_v62 = vsel %vm2519_vm12, %v2521_v25, %v2517_v50  ;;  %v2536_v22 = vor.u32 1.1754944e-38, %v2535_v20  ;;  %vm2534_vm8 = vcmp.eq.f32.partialorder %v2533_v55, 8.507059e+37 }
 0x686   : > { %v2527_v27 = vmul.f32 %v9940_v28, %v2526_v60 }
 0x687   : > { %v2613_v26 = vpop.permute.xlu0 %2612  ;;  %v7791_v60 = vpop.eup %7790 }
 0x688   : > { %v2634_v5 = vmul.f32 %v2613_v26, %v9945_v47  ;;  %v2542_v26 = vmul.f32 %v9950_v44, %v2541_v16  ;;  %v2528_v37 = vadd.f32 %v9940_v28, %v2527_v27  ;;  %v7305_v27 = vmul.f32 -1.442695, %v9909_v53 }
 0x68a   : > { %2652 = vrot.lane.b32.xlu1 %v2634_v5, %s8588_s7  ;;  %v2532_v43 = vsel %vm2531_vm5, %v9940_v28, %v2528_v37 }
 0x68b   : > { %2620 = vrot.lane.b32.xlu2 %v7789_v51, %s8587_s6  ;;  %v2543_v51 = vadd.f32 %v9950_v44, %v2542_v26  ;;  %v9996_v50 = vsel %vm2534_vm8, %v2536_v22, %v2532_v43  ;;  %v7306_v22 = vmul.f32 -1.442695, %v9879_v34 }
 0x68c   : > { %2266 = vrot.lane.b32.xlu0 %v2246_v54, %s8588_s7 }
 0x68d   : > { %v2547_v54 = vsel %vm2546_vm7, %v9950_v44, %v2543_v51  ;;  %v7289_v44 = vmul.f32 -1.442695, %v9818_v38 }
 0x68e   : > { %v9999_v58 = vsel %vm2549_vm9, %v2551_v31, %v2547_v54 }
 0x68f   : > { %v2615_v59 = vpop.permute.xlu1 %2614 }
 0x690   : > { %v2635_v21 = vmul.f32 %v2615_v59, %v9969_v62  ;;  %v2073_v59 = vadd.f32 1.0, %v7791_v60 }
 0x691   : > { %v2229_v8 = vpop.permute.xlu0 %2228 }
 0x692   : > { %v2247_v5 = vmul.f32 %v2229_v8, %v9979_v6  ;;  %7792 = vrcp.f32 %v2073_v59  ;;  %v2190_v8 = vand.u32 2147483648, %v2073_v59  ;;  %vm2184_vm11 = vweird.f32 %v2073_v59 }
 0x693   : > { %2654 = vrot.lane.b32.xlu2 %v2635_v21, %s8588_s7  ;;  %7794 = vpow2.f32 %v7289_v44  ;;  %v2188_v37 = vand.u32 2147483647, %v2073_v59  ;;  %v2203_v44 = vmul.f32 %v9822_v24, %v9466_v14  ;;  %v2202_v14 = vmul.f32 %v9767_v0, %v9489_v32 }
 0x694   : > { %2268 = vrot.lane.b32.xlu1 %v2247_v5, %s8588_s7  ;;  %v2191_v20 = vor.u32 1.1754944e-38, %v2190_v8  ;;  %v2593_v32 = vmul.f32 %v9905_v1, %v9497_v33 }
 0x695   : > { %vm2189_vm13 = vcmp.eq.f32.partialorder %v2188_v37, 8.507059e+37 }
 0x698   : > { %v7793_v17 = vpop.eup %7792 }
 0x699   : > { %v2617_v57 = vpop.permute.xlu0 %2616  ;;  %v2180_v21 = vmul.f32 %v7793_v17, %v2073_v59  ;;  %v7795_v29 = vpop.eup %7794  ;;  %vm2185_vm10 = vweird.f32 %v7793_v17 }
 0x69a   : > { %v2636_v25 = vmul.f32 %v2617_v57, %v9996_v50  ;;  %v2072_v16 = vadd.f32 1.0, %v7795_v29  ;;  %vm2186_vm12 = vmor %vm2184_vm11, %vm2185_vm10 }
 0x69b   : > { %v2181_v41 = vsub.f32 1.0, %v2180_v21 }
 0x69c   : > { %2656 = vrot.lane.b32.xlu2 %v2636_v25, %s8588_s7  ;;  %7796 = vrcp.f32 %v2072_v16  ;;  %vm2169_vm15 = vweird.f32 %v2072_v16 }
 0x69d   : > { %v2182_v15 = vmul.f32 %v7793_v17, %v2181_v41  ;;  %7798 = vpow2.f32 %v7305_v27 }
 0x69f   : > { %v2619_v28 = vpop.permute.xlu1 %2618  ;;  %v2183_v26 = vadd.f32 %v7793_v17, %v2182_v15 }
 0x6a0   : > { %v2637_v19 = vmul.f32 %v2619_v28, %v9999_v58  ;;  %v2175_v28 = vand.u32 2147483648, %v2072_v16 }
 0x6a1   : > { %v2187_v38 = vsel %vm2186_vm12, %v7793_v17, %v2183_v26 }
 0x6a2   : > { %2658 = vrot.lane.b32.xlu0 %v2637_v19, %s8588_s7  ;;  %v7797_v5 = vpop.eup %7796  ;;  %v10006_v7 = vsel %vm2189_vm13, %v2191_v20, %v2187_v38  ;;  %v2173_v19 = vand.u32 2147483647, %v2072_v16  ;;  %v2176_v17 = vor.u32 1.1754944e-38, %v2175_v28 }
 0x6a3   : > { %v7799_v4 = vpop.eup %7798  ;;  %v2165_v55 = vmul.f32 %v7797_v5, %v2072_v16  ;;  %vm2170_vm14 = vweird.f32 %v7797_v5 }
 0x6a4   : > { %v2462_v43 = vadd.f32 1.0, %v7799_v4  ;;  %vm2171_vm1 = vmor %vm2169_vm15, %vm2170_vm14  ;;  %vm2174_vm2 = vcmp.eq.f32.partialorder %v2173_v19, 8.507059e+37 }
 0x6a5   : > { %v2166_v30 = vsub.f32 1.0, %v2165_v55 }
 0x6a6   : > { %7800 = vrcp.f32 %v2462_v43  ;;  %v2565_v20 = vand.u32 2147483648, %v2462_v43  ;;  %vm2559_vm4 = vweird.f32 %v2462_v43  ;;  %v2563_v55 = vand.u32 2147483647, %v2462_v43 }
 0x6a7   : > { %v2167_v54 = vmul.f32 %v7797_v5, %v2166_v30  ;;  %7802 = vpow2.f32 %v7306_v22  ;;  %v2592_v22 = vmul.f32 %v9820_v61, %v9478_v3  ;;  %v2205_v3 = vmul.f32 %v9871_v36, %v9520_v39 }
 0x6a8   : > { %v2566_v30 = vor.u32 1.1754944e-38, %v2565_v20  ;;  %vm2564_vm6 = vcmp.eq.f32.partialorder %v2563_v55, 8.507059e+37 }
 0x6a9   : > { %v2168_v31 = vadd.f32 %v7797_v5, %v2167_v54 }
 0x6ab   : > { %v2172_v60 = vsel %vm2171_vm1, %v7797_v5, %v2168_v31 }
 0x6ac   : > { %v7801_v25 = vpop.eup %7800  ;;  %v10015_v34 = vsel %vm2174_vm2, %v2176_v17, %v2172_v60 }
 0x6ad   : > { %v2555_v59 = vmul.f32 %v7801_v25, %v2462_v43  ;;  %v7803_v21 = vpop.eup %7802  ;;  %vm2560_vm3 = vweird.f32 %v7801_v25 }
 0x6ae   : > { %v2463_v26 = vadd.f32 1.0, %v7803_v21  ;;  %vm2561_vm5 = vmor %vm2559_vm4, %vm2560_vm3 }
 0x6af   : > { %v2556_v15 = vsub.f32 1.0, %v2555_v59 }
 0x6b0   : > { %vm2574_vm8 = vweird.f32 %v2463_v26 }
 0x6b1   : > { %v2557_v16 = vmul.f32 %v7801_v25, %v2556_v15 }
 0x6b3   : > { %v2558_v38 = vadd.f32 %v7801_v25, %v2557_v16  ;;  %v2580_v16 = vand.u32 2147483648, %v2463_v26 }
 0x6c5   : > { %v2233_v51 = vpop.permute.xlu0 %2232 }
 0x6c6   : > { %v2249_v53 = vmul.f32 %v2233_v51, %v10006_v7 }
 0x6c8   : > { %2272 = vrot.lane.b32.xlu2 %v2249_v53, %s8588_s7  ;;  %v2562_v53 = vsel %vm2561_vm5, %v7801_v25, %v2558_v38 }
 0x6c9   : > { %v10032_v31 = vsel %vm2564_vm6, %v2566_v30, %v2562_v53 }
 0x6cd   : > { %v2261_v57 = vpop.permute.xlu2 %2260 }
 0x6ce   : > { %v10013_v29 = vadd.f32 %v2261_v57, %v2203_v44 }
 0x6d0   : > { %7804 = vtanh.f32 %v10013_v29 }
 0x6d1   : > { %7806 = vrcp.f32 %v2463_v26 }
 0x6d5   : > { %v2231_v41 = vpop.permute.xlu2 %2230 }
 0x6d6   : > { %v2248_v27 = vmul.f32 %v2231_v41, %v10015_v34  ;;  %v7805_v4 = vpop.eup %7804 }
 0x6d7   : > { %v7807_v51 = vpop.eup %7806 }
 0x6d8   : > { %2270 = vrot.lane.b32.xlu1 %v2248_v27, %s8588_s7  ;;  %v2570_v54 = vmul.f32 %v7807_v51, %v2463_v26  ;;  %vm2575_vm7 = vweird.f32 %v7807_v51 }
 0x6d9   : > { %vm2576_vm9 = vmor %vm2574_vm8, %vm2575_vm7 }
 0x6da   : > { %v2571_v33 = vsub.f32 1.0, %v2570_v54 }
 0x6dc   : > { %v2572_v59 = vmul.f32 %v7807_v51, %v2571_v33 }
 0x6dd   : > { %v2651_v8 = vpop.permute.xlu2 %2650  ;;  %v2259_v5 = vpop.permute.xlu1 %2258 }
 0x6de   : > { %v10022_v37 = vadd.f32 %v2259_v5, %v2202_v14  ;;  %v10030_v57 = vadd.f32 %v2651_v8, %v2593_v32  ;;  %v2573_v15 = vadd.f32 %v7807_v51, %v2572_v59  ;;  %v2578_v14 = vand.u32 2147483647, %v2463_v26 }
 0x6df   : > { %v2204_v8 = vmul.f32 %v9881_v10, %v9511_v56  ;;  %v2581_v5 = vor.u32 1.1754944e-38, %v2580_v16  ;;  %v2594_v56 = vmul.f32 %v9945_v47, %v9518_v23  ;;  %v2207_v59 = vmul.f32 %v9979_v6, %v9534_v42 }
 0x6e0   : > { %2308 = vrot.lane.b32.xlu1 %v7805_v4, %s8587_s6  ;;  %7808 = vtanh.f32 %v10022_v37  ;;  %v2577_v39 = vsel %vm2576_vm9, %v7807_v51, %v2573_v15  ;;  %vm2579_vm10 = vcmp.eq.f32.partialorder %v2578_v14, 8.507059e+37  ;;  %v2595_v51 = vmul.f32 %v9969_v62, %v9532_v40 }
 0x6e1   : > { %v10052_v20 = vsel %vm2579_vm10, %v2581_v5, %v2577_v39  ;;  %v2596_v40 = vmul.f32 %v9996_v50, %v9546_v63  ;;  %v2209_v14 = vmul.f32 %v10006_v7, %v9565_v13 }
 0x6e5   : > { %v2621_v28 = vpop.permute.xlu2 %2620  ;;  %v2649_v43 = vpop.permute.xlu1 %2648 }
 0x6e6   : > { %v2638_v19 = vmul.f32 %v2621_v28, %v10032_v31  ;;  %v10035_v60 = vadd.f32 %v2649_v43, %v2592_v22  ;;  %v7809_v25 = vpop.eup %7808  ;;  %v2206_v22 = vmul.f32 %v9954_v48, %v9536_v2 }
 0x6e7   : > { %2306 = vrot.lane.b32.xlu0 %v7809_v25, %s8587_s6 }
 0x6e8   : > { %7810 = vtanh.f32 %v10035_v60  ;;  %2660 = vrot.lane.b32.xlu2 %v2638_v19, %s8588_s7 }
 0x6e9   : > { %7812 = vtanh.f32 %v10030_v57 }
 0x6ed   : > { %v2265_v44 = vpop.permute.xlu1 %2264  ;;  %v2655_v32 = vpop.permute.xlu2 %2654 }
 0x6ee   : > { %v7811_v17 = vpop.eup %7810  ;;  %v10043_v21 = vadd.f32 %v2265_v44, %v2205_v3  ;;  %v2263_v27 = vpop.permute.xlu0 %2262  ;;  %v10066_v54 = vadd.f32 %v2655_v32, %v2595_v51 }
 0x6ef   : > { %v7813_v41 = vpop.eup %7812  ;;  %2696 = vrot.lane.b32.xlu1 %v7811_v17, %s8587_s6  ;;  %v10050_v4 = vadd.f32 %v2263_v27, %v2204_v8  ;;  %v2597_v27 = vmul.f32 %v9999_v58, %v9548_v35  ;;  %v2598_v35 = vmul.f32 %v10032_v31, %v9572_v45 }
 0x6f0   : > { %2698 = vrot.lane.b32.xlu2 %v7813_v41, %s8587_s6  ;;  %7814 = vtanh.f32 %v10043_v21 }
 0x6f1   : > { %7816 = vtanh.f32 %v10050_v4 }
 0x6f6   : > { %v7815_v38 = vpop.eup %7814  ;;  %v2623_v55 = vpop.permute.xlu0 %2622 }
 0x6f7   : > { %v2639_v53 = vmul.f32 %v2623_v55, %v10052_v20  ;;  %2312 = vrot.lane.b32.xlu1 %v7815_v38, %s8587_s6  ;;  %v7817_v19 = vpop.eup %7816  ;;  %v2657_v23 = vpop.permute.xlu2 %2656 }
 0x6f8   : > { %v10076_v2 = vadd.f32 %v2657_v23, %v2596_v40 }
 0x6f9   : > { %2662 = vrot.lane.b32.xlu0 %v2639_v53, %s8588_s7 }
 0x6fc   : > { %v2653_v26 = vpop.permute.xlu1 %2652 }
 0x6fd   : > { %v10062_v30 = vadd.f32 %v2653_v26, %v2594_v56  ;;  %v2208_v56 = vmul.f32 %v10015_v34, %v9559_v52 }
 0x6fe   : > { %v2267_v28 = vpop.permute.xlu0 %2266 }
 0x6ff   : > { %7818 = vtanh.f32 %v10062_v30  ;;  %v10069_v43 = vadd.f32 %v2267_v28, %v2206_v22 }
 0x701   : > { %7820 = vtanh.f32 %v10069_v43  ;;  %2310 = vrot.lane.b32.xlu0 %v7817_v19, %s8587_s6 }
 0x702   : > { %7822 = vtanh.f32 %v10066_v54 }
 0x703   : > { %7824 = vtanh.f32 %v10076_v2 }
 0x705   : > { %v7819_v25 = vpop.eup %7818 }
 0x706   : > { %2700 = vrot.lane.b32.xlu2 %v7819_v25, %s8587_s6  ;;  %v2269_v44 = vpop.permute.xlu1 %2268 }
 0x707   : > { %v7821_v33 = vpop.eup %7820  ;;  %v10084_v17 = vadd.f32 %v2269_v44, %v2207_v59 }
 0x708   : > { %v7823_v3 = vpop.eup %7822  ;;  %2314 = vrot.lane.b32.xlu1 %v7821_v33, %s8587_s6 }
 0x709   : > { %2702 = vrot.lane.b32.xlu0 %v7823_v3, %s8587_s6  ;;  %7826 = vtanh.f32 %v10084_v17  ;;  %v7825_v63 = vpop.eup %7824 }
 0x70f   : > { %v7827_v41 = vpop.eup %7826 }
 0x710   : > { %2704 = vrot.lane.b32.xlu1 %v7825_v63, %s8587_s6  ;;  %2316 = vrot.lane.b32.xlu2 %v7827_v41, %s8587_s6 }
 0x714   : > { %v2659_v42 = vpop.permute.xlu0 %2658 }
 0x715   : > { %v10091_v15 = vadd.f32 %v2659_v42, %v2597_v27 }
 0x717   : > { %7828 = vtanh.f32 %v10091_v15 }
 0x71d   : > { %v7829_v16 = vpop.eup %7828 }
 0x71e   : > { %2706 = vrot.lane.b32.xlu2 %v7829_v16, %s8587_s6 }
 0x722   : > { %v2273_v39 = vpop.permute.xlu2 %2272 }
 0x723   : > { %v10097_v8 = vadd.f32 %v2273_v39, %v2209_v14 }
 0x725   : > { %7830 = vtanh.f32 %v10097_v8 }
 0x72b   : > { %v7831_v5 = vpop.eup %7830 }
 0x72c   : > { %2320 = vrot.lane.b32.xlu1 %v7831_v5, %s8587_s6 }
 0x742   : > { %v2661_v38 = vpop.permute.xlu2 %2660 }
 0x743   : > { %v10103_v55 = vadd.f32 %v2661_v38, %v2598_v35 }
 0x745   : > { %7832 = vtanh.f32 %v10103_v55 }
 0x74a   : > { %v2271_v13 = vpop.permute.xlu1 %2270  ;;  %v2699_v19 = vpop.permute.xlu2 %2698 }
 0x74b   : > { %v7833_v53 = vpop.eup %7832  ;;  %v10111_v28 = vadd.f32 %v2271_v13, %v2208_v56  ;;  %v2721_v40 = vmul.f32 %v2699_v19, %v9905_v1  ;;  %v8552_v56 = vld [vmem:[%s13011_s1 + $0x10] sm:$0xff]  ;;  %v8553_v19 = vld [vmem:[%s13012_s2 + $0x18] sm:$0xff] }
 0x74c   : > { %2708 = vrot.lane.b32.xlu1 %v7833_v53, %s8587_s6 }
 0x74d   : > { %7834 = vtanh.f32 %v10111_v28 }
 0x752   : > { %v2309_v32 = vpop.permute.xlu1 %2308 }
 0x753   : > { %v2331_v51 = vmul.f32 %v2309_v32, %v9822_v24  ;;  %v7835_v52 = vpop.eup %7834 }
 0x759   : > { %v2307_v26 = vpop.permute.xlu0 %2306 }
 0x75a   : > { %v2330_v22 = vmul.f32 %v2307_v26, %v9767_v0  ;;  %v2599_v0 = vmul.f32 %v10052_v20, %v9577_v11 }
 0x75c   : > { %v2736_v45 = vpack.c.bf16 %v2331_v51, %v2330_v22 }
 0x75e   : > { %2744 = vrot.lane.b32.xlu0 %v2736_v45, %s8588_s7 }
 0x760   : > { %v2701_v59 = vpop.permute.xlu2 %2700 }
 0x761   : > { %v2697_v23 = vpop.permute.xlu1 %2696  ;;  %v2722_v5 = vmul.f32 %v2701_v59, %v9945_v47  ;;  %v8551_v47 = vld [vmem:[%s13011_s1 + $0x18] sm:$0xff] }
 0x762   : > { %v2720_v25 = vmul.f32 %v2697_v23, %v9820_v61  ;;  %v8554_v23 = vld [vmem:[%s13012_s2 + $0x8] sm:$0xff] }
 0x764   : > { %v3126_v33 = vpack.c.bf16 %v2721_v40, %v2720_v25 }
 0x766   : > { %3134 = vrot.lane.b32.xlu2 %v3126_v33, %s8588_s7  ;;  %2318 = vrot.lane.b32.xlu0 %v7835_v52, %s8587_s6 }
 0x769   : > { %v2313_v44 = vpop.permute.xlu1 %2312 }
 0x76a   : > { %v2333_v61 = vmul.f32 %v2313_v44, %v9871_v36  ;;  %v2317_v42 = vpop.permute.xlu2 %2316 }
 0x76b   : > { %v2663_v24 = vpop.permute.xlu0 %2662  ;;  %v2335_v16 = vmul.f32 %v2317_v42, %v9979_v6  ;;  %v10184_v42 = vld [vmem:[%s13013_s3] ss:$0 sm:$0xff] }
 0x76c   : > { %v10121_v3 = vadd.f32 %v2663_v24, %v2599_v0 }
 0x76e   : > { %7836 = vtanh.f32 %v10121_v3 }
 0x773   : > { %v2311_v63 = vpop.permute.xlu0 %2310 }
 0x774   : > { %v7837_v1 = vpop.eup %7836  ;;  %v2332_v41 = vmul.f32 %v2311_v63, %v9881_v10 }
 0x775   : > { %2710 = vrot.lane.b32.xlu2 %v7837_v1, %s8587_s6  ;;  %v10174_v1 = vld [vmem:[%s13013_s3 + $0x1] ss:$0 sm:$0xff] }
 0x776   : > { %v2737_v27 = vpack.c.bf16 %v2333_v61, %v2332_v41 }
 0x778   : > { %2746 = vrot.lane.b32.xlu0 %v2737_v27, %s8588_s7  ;;  %v2707_v10 = vpop.permute.xlu2 %2706 }
 0x779   : > { %v2725_v13 = vmul.f32 %v2707_v10, %v9999_v58  ;;  %v506_v10 = vadd.f32 %v10184_v42, %v8958_v9 }
 0x77a   : > { %v2315_v11 = vpop.permute.xlu1 %2314 }
 0x77b   : > { %v2334_v14 = vmul.f32 %v2315_v11, %v9954_v48  ;;  %v2703_v39 = vpop.permute.xlu0 %2702  ;;  %v504_v11 = vadd.f32 %v10184_v42, %v8952_v12 }
 0x77c   : > { %v2723_v35 = vmul.f32 %v2703_v39, %v9969_v62 }
 0x77d   : > { %v2738_v38 = vpack.c.bf16 %v2335_v16, %v2334_v14 }
 0x77e   : > { %v3127_v36 = vpack.c.bf16 %v2723_v35, %v2722_v5 }
 0x77f   : > { %2748 = vrot.lane.b32.xlu1 %v2738_v38, %s8588_s7 }
 0x780   : > { %3136 = vrot.lane.b32.xlu0 %v3127_v36, %s8588_s7 }
 0x782   : > { %v2705_v53 = vpop.permute.xlu1 %2704 }
 0x783   : > { %v2724_v32 = vmul.f32 %v2705_v53, %v9996_v50 }
 0x785   : > { %v3128_v6 = vpack.c.bf16 %v2725_v13, %v2724_v32 }
 0x787   : > { %3138 = vrot.lane.b32.xlu2 %v3128_v6, %s8588_s7 }
 0x79e   : > { %v2321_v62 = vpop.permute.xlu1 %2320 }
 0x79f   : > { %v2337_v25 = vmul.f32 %v2321_v62, %v10006_v7 }
 0x7be   : > { %v2709_v58 = vpop.permute.xlu1 %2708 }
 0x7bf   : > { %v2726_v50 = vmul.f32 %v2709_v58, %v10032_v31  ;;  %v8555_v31 = vld [vmem:[%s13012_s2 + $0x10] sm:$0xff] }
 0x7c0   : > { %v3135_v48 = vpop.permute.xlu2 %3134 }
 0x7c1   : > { %7323 = vmatmul.msk.bf16.vlgmr.msra.gmra.mxu1 %vm250_vm0, %v3135_v48 }
 0x7c2   : > { %5380 = vmatpush.bf16.msra.mxu1 %v8551_v47  ;;  %v509_v47 = vadd.f32 %v10184_v42, %v8963_v18 }
 0x7c6   : > { %5381 = vmatpush.bf16.msra.mxu1 %v8552_v56 }
 0x7cf   : > { %v2711_v26 = vpop.permute.xlu2 %2710 }
 0x7d0   : > { %v2727_v51 = vmul.f32 %v2711_v26, %v10052_v20  ;;  %v2745_v22 = vpop.permute.xlu0 %2744  ;;  %v8556_v20 = vld [vmem:[%s13012_s2] sm:$0xff] }
 0x7d1   : > { %7307 = vmatmul.msk.bf16.vlgmr.msrb.gmra.mxu3 %vm250_vm0, %v2745_v22  ;;  %7319 = vmatmul.msk.bf16.vlgmr.msra.gmra.mxu0 %vm250_vm0, %v2745_v22 }
 0x7d2   : > { %v3129_v45 = vpack.c.bf16 %v2727_v51, %v2726_v50  ;;  %4678 = vmatpush.bf16.msrb.mxu3 %v8553_v19  ;;  %5047 = vmatpush.bf16.msra.mxu0 %v8554_v23  ;;  %v511_v51 = vadd.f32 %v10184_v42, %v8969_v46 }
 0x7d4   : > { %3140 = vrot.lane.b32.xlu1 %v3129_v45, %s8588_s7 }
 0x7d6   : > { %4679 = vmatpush.bf16.msrb.mxu3 %v8555_v31  ;;  %5048 = vmatpush.bf16.msra.mxu0 %v8556_v20 }
 0x7d8   : > { %v2319_v40 = vpop.permute.xlu0 %2318 }
 0x7d9   : > { %v2336_v33 = vmul.f32 %v2319_v40, %v10015_v34 }
 0x7db   : > { %v2739_v52 = vpack.c.bf16 %v2337_v25, %v2336_v33  ;;  %v514_v25 = vadd.f32 %v10184_v42, %v8979_v49 }
 0x7dd   : > { %2750 = vrot.lane.b32.xlu0 %v2739_v52, %s8588_s7 }
 0x7e1   : > { %v3139_v44 = vpop.permute.xlu2 %3138 }
 0x7ea   : > { %v2747_v0 = vpop.permute.xlu0 %2746 }
 0x7eb   : > { %7308 = vmatmul.msk.bf16.gmra.mxu3 %vm250_vm0, %v2747_v0  ;;  %7320 = vmatmul.msk.bf16.gmra.mxu0 %vm250_vm0, %v2747_v0 }
 0x7f1   : > { %v2749_v59 = vpop.permute.xlu1 %2748 }
 0x7f2   : > { %v3137_v24 = vpop.permute.xlu0 %3136 }
 0x7f3   : > { %7324 = vmatmul.msk.bf16.gmra.mxu1 %vm250_vm0, %v3137_v24 }
 0x7fb   : > { %7309 = vmatmul.msk.bf16.gmra.mxu3 %vm250_vm0, %v2749_v59  ;;  %7321 = vmatmul.msk.bf16.gmra.mxu0 %vm250_vm0, %v2749_v59 }
 0x803   : > { %7325 = vmatmul.msk.bf16.gmra.mxu1 %vm250_vm0, %v3139_v44 }
 0x83e   : > { %v3163_v63 = vpop.f32.mrf.mxu1 }
 0x846   : > { %v3141_v7 = vpop.permute.xlu1 %3140  ;;  %v3165_v38 = vpop.f32.mrf.mxu1 }
 0x847   : > { %7326 = vmatmul.msk.bf16.gmra.mxu1 %vm250_vm0, %v3141_v7  ;;  %v13082_v7 = vld [vmem:[#allocation11_spill] sm:$0xff] }
 0x84e   : > { %v3106_v34 = vpop.f32.mrf.mxu0 }
 0x84f   : > { %v3107_v61 = vadd.f32 %v10174_v1, %v3106_v34  ;;  %v2751_v41 = vpop.permute.xlu0 %2750  ;;  %v516_v34 = vadd.f32 %v10184_v42, %v13082_v7 }
 0x850   : > { %7310 = vmatmul.msk.bf16.gmra.mxu3 %vm250_vm0, %v2751_v41  ;;  %7322 = vmatmul.msk.bf16.gmra.mxu0 %vm250_vm0, %v2751_v41 }
 0x851   : > { %v10179_v27 = vadd.f32 %v3163_v63, %v3107_v61 }
 0x853   : > { %7838 = vtanh.f32 %v10179_v27 }
 0x854   : > { %v2773_v16 = vpop.f32.mrf.mxu3 }
 0x855   : > { %v10189_v14 = vadd.f32 %v2773_v16, %v504_v11 }
 0x856   : > { %v3108_v39 = vpop.f32.mrf.mxu0 }
 0x857   : > { %7840 = vtanh.f32 %v10189_v14  ;;  %v3109_v5 = vadd.f32 %v10174_v1, %v3108_v39 }
 0x859   : > { %v7839_v35 = vpop.eup %7838  ;;  %v10193_v36 = vadd.f32 %v3165_v38, %v3109_v5 }
 0x85a   : > { %3367 = vrot.lane.b32.xlu1 %v7839_v35, %s8587_s6 }
 0x85b   : > { %7842 = vtanh.f32 %v10193_v36 }
 0x85c   : > { %v2775_v12 = vpop.f32.mrf.mxu3 }
 0x85d   : > { %v7841_v53 = vpop.eup %7840  ;;  %v2794_v13 = vadd.f32 %v2775_v12, %v506_v10  ;;  %v7327_v12 = vmul.f32 -1.442695, %v10179_v27 }
 0x85e   : > { %2977 = vrot.lane.b32.xlu2 %v7841_v53, %s8587_s6 }
 0x85f   : > { %7844 = vtanh.f32 %v2794_v13  ;;  %v7312_v10 = vmul.f32 -1.442695, %v2794_v13 }
 0x861   : > { %v7843_v32 = vpop.eup %7842 }
 0x865   : > { %v7845_v6 = vpop.eup %7844 }
 0x866   : > { %3369 = vrot.lane.b32.xlu2 %v7843_v32, %s8587_s6  ;;  %2979 = vrot.lane.b32.xlu0 %v7845_v6, %s8587_s6  ;;  %v7328_v32 = vmul.f32 -1.442695, %v10193_v36 }
 0x868   : > { %v3111_v48 = vpop.f32.mrf.mxu0 }
 0x869   : > { %v3112_v9 = vadd.f32 %v10174_v1, %v3111_v48  ;;  %v7311_v48 = vmul.f32 -1.442695, %v10189_v14 }
 0x86e   : > { %v2778_v62 = vpop.f32.mrf.mxu3 }
 0x86f   : > { %v2795_v56 = vadd.f32 %v2778_v62, %v509_v47 }
 0x870   : > { %v3168_v58 = vpop.f32.mrf.mxu1  ;;  %v3113_v50 = vpop.f32.mrf.mxu0 }
 0x871   : > { %7846 = vtanh.f32 %v2795_v56  ;;  %v3185_v26 = vadd.f32 %v3168_v58, %v3112_v9  ;;  %v3114_v18 = vadd.f32 %v10174_v1, %v3113_v50  ;;  %v7313_v47 = vmul.f32 -1.442695, %v2795_v56 }
 0x873   : > { %7848 = vtanh.f32 %v3185_v26  ;;  %v7329_v36 = vmul.f32 -1.442695, %v3185_v26 }
 0x876   : > { %v2780_v22 = vpop.f32.mrf.mxu3 }
 0x877   : > { %v7847_v45 = vpop.eup %7846  ;;  %v10207_v19 = vadd.f32 %v2780_v22, %v511_v51 }
 0x878   : > { %v3170_v23 = vpop.f32.mrf.mxu1  ;;  %2981 = vrot.lane.b32.xlu0 %v7847_v45, %s8587_s6  ;;  %v3116_v40 = vpop.f32.mrf.mxu0 }
 0x879   : > { %7850 = vtanh.f32 %v10207_v19  ;;  %v7849_v31 = vpop.eup %7848  ;;  %v3186_v20 = vadd.f32 %v3170_v23, %v3114_v18  ;;  %v3117_v24 = vadd.f32 %v10174_v1, %v3116_v40  ;;  %v7314_v40 = vmul.f32 -1.442695, %v10207_v19 }
 0x87a   : > { %3371 = vrot.lane.b32.xlu2 %v7849_v31, %s8587_s6 }
 0x87b   : > { %7852 = vtanh.f32 %v3186_v20  ;;  %v7330_v18 = vmul.f32 -1.442695, %v3186_v20 }
 0x87e   : > { %v2783_v46 = vpop.f32.mrf.mxu3 }
 0x87f   : > { %v7851_v33 = vpop.eup %7850  ;;  %v10215_v52 = vadd.f32 %v2783_v46, %v514_v25 }
 0x880   : > { %v3173_v0 = vpop.f32.mrf.mxu1  ;;  %2983 = vrot.lane.b32.xlu1 %v7851_v33, %s8587_s6  ;;  %v3118_v63 = vpop.f32.mrf.mxu0 }
 0x881   : > { %7854 = vtanh.f32 %v10215_v52  ;;  %v10220_v59 = vadd.f32 %v3173_v0, %v3117_v24  ;;  %v7853_v44 = vpop.eup %7852  ;;  %v3119_v16 = vadd.f32 %v10174_v1, %v3118_v63  ;;  %v13083_v63 = vld [vmem:[#allocation12_spill] sm:$0xff] }
 0x882   : > { %3373 = vrot.lane.b32.xlu0 %v7853_v44, %s8587_s6 }
 0x883   : > { %7856 = vtanh.f32 %v10220_v59  ;;  %v7331_v19 = vmul.f32 -1.442695, %v10220_v59  ;;  %v13084_v59 = vld [vmem:[#allocation13_spill] sm:$0xff] }
 0x886   : > { %v2785_v49 = vpop.f32.mrf.mxu3 }
 0x887   : > { %v7855_v61 = vpop.eup %7854  ;;  %v2798_v41 = vadd.f32 %v2785_v49, %v516_v34  ;;  %v519_v49 = vadd.f32 %v10184_v42, %v13083_v63 }
 0x888   : > { %v3175_v11 = vpop.f32.mrf.mxu1  ;;  %2985 = vrot.lane.b32.xlu1 %v7855_v61, %s8587_s6 }
 0x889   : > { %7858 = vtanh.f32 %v2798_v41  ;;  %v10228_v39 = vadd.f32 %v3175_v11, %v3119_v16  ;;  %v7857_v5 = vpop.eup %7856  ;;  %v7316_v26 = vmul.f32 -1.442695, %v2798_v41 }
 0x88a   : > { %3375 = vrot.lane.b32.xlu0 %v7857_v5, %s8587_s6 }
 0x88b   : > { %7860 = vtanh.f32 %v10228_v39 }
 0x88c   : > { %7862 = vpow2.f32 %v7312_v10 }
 0x88d   : > { %7864 = vpow2.f32 %v7327_v12 }
 0x88e   : > { %7866 = vpow2.f32 %v7328_v32 }
 0x88f   : > { %v7859_v35 = vpop.eup %7858 }
 0x890   : > { %2987 = vrot.lane.b32.xlu2 %v7859_v35, %s8587_s6 }
 0x891   : > { %v7861_v38 = vpop.eup %7860 }
 0x892   : > { %3377 = vrot.lane.b32.xlu1 %v7861_v38, %s8587_s6  ;;  %v7863_v53 = vpop.eup %7862  ;;  %v521_v38 = vadd.f32 %v10184_v42, %v13084_v59 }
 0x893   : > { %v10236_v6 = vadd.f32 1.0, %v7863_v53  ;;  %v7865_v62 = vpop.eup %7864 }
 0x894   : > { %v7867_v9 = vpop.eup %7866  ;;  %v10240_v58 = vadd.f32 1.0, %v7865_v62 }
 0x895   : > { %7868 = vrcp.f32 %v10236_v6  ;;  %v10244_v27 = vadd.f32 1.0, %v7867_v9  ;;  %v2859_v61 = vand.u32 2147483648, %v10236_v6  ;;  %vm2853_vm12 = vweird.f32 %v10236_v6 }
 0x896   : > { %7870 = vpow2.f32 %v7311_v48  ;;  %v2857_v5 = vand.u32 2147483647, %v10236_v6  ;;  %v7315_v48 = vmul.f32 -1.442695, %v10215_v52  ;;  %vm3228_vm14 = vweird.f32 %v10240_v58 }
 0x897   : > { %7872 = vpow2.f32 %v7313_v47  ;;  %vm3243_vm2 = vweird.f32 %v10244_v27 }
 0x898   : > { %7874 = vrcp.f32 %v10240_v58  ;;  %vm2858_vm15 = vcmp.eq.f32.partialorder %v2857_v5, 8.507059e+37  ;;  %v7332_v5 = vmul.f32 -1.442695, %v10228_v39 }
 0x899   : > { %7876 = vrcp.f32 %v10244_v27 }
 0x89a   : > { %7878 = vpow2.f32 %v7329_v36  ;;  %v3232_v36 = vand.u32 2147483647, %v10240_v58 }
 0x89b   : > { %v10242_v13 = vpop.eup %7868 }
 0x89c   : > { %v7871_v50 = vpop.eup %7870  ;;  %v2849_v14 = vmul.f32 %v10242_v13, %v10236_v6  ;;  %vm2854_vm11 = vweird.f32 %v10242_v13  ;;  %vm3233_vm7 = vcmp.eq.f32.partialorder %v3232_v36, 8.507059e+37 }
 0x89d   : > { %v7873_v51 = vpop.eup %7872  ;;  %v10250_v56 = vadd.f32 1.0, %v7871_v50  ;;  %vm10289_vm13 = vmor %vm2853_vm12, %vm2854_vm11  ;;  %v2860_v50 = vor.u32 1.1754944e-38, %v2859_v61 }
 0x89e   : > { %v10252_v22 = vadd.f32 1.0, %v7873_v51  ;;  %v2850_v45 = vsub.f32 1.0, %v2849_v14  ;;  %v10254_v23 = vpop.eup %7874 }
 0x89f   : > { %7880 = vrcp.f32 %v10250_v56  ;;  %v10257_v31 = vpop.eup %7876  ;;  %v3224_v46 = vmul.f32 %v10254_v23, %v10240_v58  ;;  %vm3229_vm1 = vweird.f32 %v10254_v23  ;;  %vm2838_vm5 = vweird.f32 %v10250_v56 }
 0x8a0   : > { %v7879_v25 = vpop.eup %7878  ;;  %7882 = vrcp.f32 %v10252_v22  ;;  %v2851_v33 = vmul.f32 %v10242_v13, %v2850_v45  ;;  %v3239_v20 = vmul.f32 %v10257_v31, %v10244_v27  ;;  %vm3244_vm3 = vweird.f32 %v10257_v31  ;;  %vm10335_vm4 = vmor %vm3228_vm14, %vm3229_vm1 }
 0x8a1   : > { %7884 = vpow2.f32 %v7330_v18  ;;  %v10268_v24 = vadd.f32 1.0, %v7879_v25  ;;  %v3225_v7 = vsub.f32 1.0, %v3224_v46  ;;  %vm10355_vm6 = vmor %vm3243_vm2, %vm3244_vm3  ;;  %vm2868_vm12 = vweird.f32 %v10252_v22 }
 0x8a2   : > { %7886 = vpow2.f32 %v7316_v26  ;;  %v2852_v34 = vadd.f32 %v10242_v13, %v2851_v33  ;;  %v3240_v11 = vsub.f32 1.0, %v3239_v20 }
 0x8a3   : > { %7888 = vpow2.f32 %v7314_v40  ;;  %v3226_v47 = vmul.f32 %v10254_v23, %v3225_v7  ;;  %v3249_v7 = vand.u32 2147483648, %v10244_v27  ;;  %vm3258_vm2 = vweird.f32 %v10268_v24 }
 0x8a4   : > { %7890 = vrcp.f32 %v10268_v24  ;;  %v2856_v42 = vsel %vm10289_vm13, %v10242_v13, %v2852_v34  ;;  %v3241_v14 = vmul.f32 %v10257_v31, %v3240_v11  ;;  %v3234_v34 = vand.u32 2147483648, %v10240_v58 }
 0x8a5   : > { %v10270_v44 = vpop.eup %7880  ;;  %7892 = vpow2.f32 %v7331_v19  ;;  %v10313_v18 = vsel %vm2858_vm15, %v2860_v50, %v2856_v42  ;;  %v3227_v25 = vadd.f32 %v10254_v23, %v3226_v47  ;;  %v3247_v19 = vand.u32 2147483647, %v10244_v27 }
 0x8a6   : > { %v10278_v41 = vpop.eup %7882  ;;  %v2834_v10 = vmul.f32 %v10270_v44, %v10250_v56  ;;  %v3250_v36 = vor.u32 1.1754944e-38, %v3249_v7  ;;  %vm2839_vm9 = vweird.f32 %v10270_v44  ;;  %v2842_v7 = vand.u32 2147483647, %v10250_v56 }
 0x8a7   : > { %v7885_v35 = vpop.eup %7884  ;;  %v2864_v51 = vmul.f32 %v10278_v41, %v10252_v22  ;;  %v3231_v39 = vsel %vm10335_vm4, %v10254_v23, %v3227_v25  ;;  %vm10365_vm8 = vcmp.eq.f32.partialorder %v3247_v19, 8.507059e+37  ;;  %vm2869_vm10 = vweird.f32 %v10278_v41  ;;  %vm10400_vm11 = vmor %vm2838_vm5, %vm2839_vm9 }
 0x8a8   : > { %v7887_v32 = vpop.eup %7886  ;;  %v10305_v52 = vadd.f32 1.0, %v7885_v35  ;;  %v2835_v13 = vsub.f32 1.0, %v2834_v10  ;;  %v2872_v35 = vand.u32 2147483647, %v10252_v22  ;;  %vm10423_vm13 = vmor %vm2868_vm12, %vm2869_vm10  ;;  %vm2843_vm14 = vcmp.eq.f32.partialorder %v2842_v7, 8.507059e+37 }
 0x8a9   : > { %v7889_v62 = vpop.eup %7888  ;;  %v10310_v45 = vadd.f32 1.0, %v7887_v32  ;;  %v2865_v11 = vsub.f32 1.0, %v2864_v51 }
 0x8aa   : > { %v10315_v40 = vadd.f32 1.0, %v7889_v62  ;;  %v10319_v20 = vpop.eup %7890  ;;  %v2836_v53 = vmul.f32 %v10270_v44, %v2835_v13  ;;  %vm2873_vm15 = vcmp.eq.f32.partialorder %v2872_v35, 8.507059e+37  ;;  %vm3273_vm5 = vweird.f32 %v10305_v52 }
 0x8ab   : > { %v7893_v63 = vpop.eup %7892  ;;  %v3254_v32 = vmul.f32 %v10319_v20, %v10268_v24  ;;  %v2866_v50 = vmul.f32 %v10278_v41, %v2865_v11  ;;  %vm3259_vm1 = vweird.f32 %v10319_v20  ;;  %vm2913_vm9 = vweird.f32 %v10310_v45 }
 0x8ac   : > { %v10360_v47 = vadd.f32 1.0, %v7893_v63  ;;  %v2837_v25 = vadd.f32 %v10270_v44, %v2836_v53  ;;  %vm3260_vm3 = vmor %vm3258_vm2, %vm3259_vm1  ;;  %vm2883_vm12 = vweird.f32 %v10315_v40 }
 0x8ad   : > { %v2867_v11 = vadd.f32 %v10278_v41, %v2866_v50 }
 0x8b8   : > { %v10300_v9 = vpop.permute.xlu2 %2977 }
 0x8c4   : > { %v10294_v6 = vpop.f32.mrf.mxu1 }
 0x8cc   : > { %v3180_v27 = vpop.f32.mrf.mxu1 }
 0x8cd   : > { %v10266_v0 = vpop.f32.mrf.mxu0 }
 0x8d3   : > { %v2788_v16 = vpop.f32.mrf.mxu3 }
 0x8d4   : > { %v10287_v12 = vadd.f32 %v2788_v16, %v519_v49  ;;  %v3242_v49 = vadd.f32 %v10257_v31, %v3241_v14  ;;  %v3370_v14 = vpop.permute.xlu2 %3369 }
 0x8d5   : > { %v3123_v46 = vpop.f32.mrf.mxu0 }
 0x8d6   : > { %7894 = vtanh.f32 %v10287_v12  ;;  %v3124_v59 = vadd.f32 %v10174_v1, %v3123_v46  ;;  %v3246_v42 = vsel %vm10355_vm6, %v10257_v31, %v3242_v49  ;;  %v3255_v46 = vsub.f32 1.0, %v3254_v32 }
 0x8d7   : > { %7896 = vpow2.f32 %v7315_v48  ;;  %v3368_v48 = vpop.permute.xlu1 %3367  ;;  %v10387_v63 = vsel %vm10365_vm8, %v3250_v36, %v3246_v42 }
 0x8d8   : > { %v2980_v26 = vpop.permute.xlu0 %2979  ;;  %7898 = vrcp.f32 %v10305_v52  ;;  %v10372_v13 = vadd.f32 %v3180_v27, %v3124_v59  ;;  %v2874_v59 = vand.u32 2147483648, %v10252_v22  ;;  %v3256_v32 = vmul.f32 %v10319_v20, %v3255_v46 }
 0x8d9   : > { %v3002_v33 = vmul.f32 %v2980_v26, %v10313_v18  ;;  %7900 = vrcp.f32 %v10310_v45  ;;  %v2871_v22 = vsel %vm10423_vm13, %v10278_v41, %v2867_v11 }
 0x8da   : > { %7902 = vrcp.f32 %v10315_v40  ;;  %v2875_v62 = vor.u32 1.1754944e-38, %v2874_v59  ;;  %v3257_v50 = vadd.f32 %v10319_v20, %v3256_v32 }
 0x8db   : > { %3019 = vrot.lane.b32.xlu0 %v3002_v33, %s8588_s7  ;;  %v2790_v61 = vpop.f32.mrf.mxu3 }
 0x8dc   : > { %v7895_v16 = vpop.eup %7894  ;;  %v10340_v10 = vadd.f32 %v2790_v61, %v521_v38  ;;  %v3235_v38 = vor.u32 1.1754944e-38, %v3234_v34  ;;  %v2844_v34 = vand.u32 2147483648, %v10250_v56  ;;  %v3392_v61 = vmul.f32 %v3370_v14, %v10387_v63  ;;  %v3372_v59 = vpop.permute.xlu2 %3371 }
 0x8dd   : > { %2989 = vrot.lane.b32.xlu1 %v7895_v16, %s8587_s6  ;;  %v7897_v23 = vpop.eup %7896 }
 0x8de   : > { %7904 = vtanh.f32 %v10340_v10  ;;  %v10370_v51 = vsel %vm3233_vm7, %v3235_v38, %v3231_v39  ;;  %v10374_v26 = vpop.eup %7898  ;;  %v10381_v19 = vadd.f32 1.0, %v7897_v23  ;;  %v2841_v39 = vsel %vm10400_vm11, %v10270_v44, %v2837_v25 }
 0x8df   : > { %7906 = vpow2.f32 %v7332_v5  ;;  %v3391_v31 = vmul.f32 %v3368_v48, %v10370_v51  ;;  %v10379_v33 = vpop.eup %7900  ;;  %v3269_v53 = vmul.f32 %v10374_v26, %v10305_v52  ;;  %v2845_v38 = vor.u32 1.1754944e-38, %v2844_v34 }
 0x8e0   : > { %v10389_v49 = vpop.eup %7902  ;;  %7908 = vrcp.f32 %v10360_v47  ;;  %v2909_v56 = vmul.f32 %v10379_v33, %v10310_v45  ;;  %v3122_v48 = vadd.f32 %v10174_v1, %v10266_v0  ;;  %v3264_v25 = vand.u32 2147483648, %v10268_v24 }
 0x8e1   : > { %7910 = vtanh.f32 %v10372_v13  ;;  %v2879_v23 = vmul.f32 %v10389_v49, %v10315_v40  ;;  %v10432_v42 = vsel %vm2843_vm14, %v2845_v38, %v2841_v39  ;;  %v3270_v27 = vsub.f32 1.0, %v3269_v53 }
 0x8e2   : > { %7912 = vrcp.f32 %v10381_v19  ;;  %v2910_v36 = vsub.f32 1.0, %v2909_v56  ;;  %v10441_v41 = vadd.f32 %v10294_v6, %v3122_v48  ;;  %v3001_v7 = vmul.f32 %v10300_v9, %v10432_v42 }
 0x8e3   : > { %3407 = vrot.lane.b32.xlu0 %v3391_v31, %s8588_s7  ;;  %v10445_v31 = vsel %vm2873_vm15, %v2875_v62, %v2871_v22  ;;  %v3262_v34 = vand.u32 2147483647, %v10268_v24  ;;  %v2880_v11 = vsub.f32 1.0, %v2879_v23  ;;  %v3271_v6 = vmul.f32 %v10374_v26, %v3270_v27 }
 0x8e4   : > { %v7905_v16 = vpop.eup %7904  ;;  %v3261_v5 = vsel %vm3260_vm3, %v10319_v20, %v3257_v50  ;;  %v2911_v35 = vmul.f32 %v10379_v33, %v2910_v36  ;;  %v3265_v9 = vor.u32 1.1754944e-38, %v3264_v25  ;;  %vm3274_vm6 = vweird.f32 %v10374_v26 }
 0x8e5   : > { %3409 = vrot.lane.b32.xlu1 %v3392_v61, %s8588_s7  ;;  %2991 = vrot.lane.b32.xlu2 %v7905_v16, %s8587_s6  ;;  %v7907_v58 = vpop.eup %7906  ;;  %vm3263_vm4 = vcmp.eq.f32.partialorder %v3262_v34, 8.507059e+37  ;;  %v2881_v53 = vmul.f32 %v10389_v49, %v2880_v11  ;;  %v3272_v32 = vadd.f32 %v10374_v26, %v3271_v6  ;;  %vm2914_vm7 = vweird.f32 %v10379_v33  ;;  %vm10486_vm10 = vmor %vm3273_vm5, %vm3274_vm6 }
 0x8e6   : > { %v10434_v1 = vpop.eup %7908  ;;  %v10436_v0 = vadd.f32 1.0, %v7907_v58  ;;  %v10466_v20 = vsel %vm3263_vm4, %v3265_v9, %v3261_v5  ;;  %v2912_v58 = vadd.f32 %v10379_v33, %v2911_v35  ;;  %v2919_v48 = vand.u32 2147483648, %v10310_v45  ;;  %vm10490_vm11 = vmor %vm2913_vm9, %vm2914_vm7 }
 0x8e7   : > { %v7911_v14 = vpop.eup %7910  ;;  %v3284_v24 = vmul.f32 %v10434_v1, %v10360_v47  ;;  %v3393_v56 = vmul.f32 %v3372_v59, %v10466_v20  ;;  %vm2884_vm8 = vweird.f32 %v10389_v49  ;;  %v3277_v44 = vand.u32 2147483647, %v10305_v52 }
 0x8e8   : > { %v10452_v16 = vpop.eup %7912  ;;  %7914 = vrcp.f32 %v10436_v0  ;;  %v3279_v22 = vand.u32 2147483648, %v10305_v52  ;;  %v2917_v62 = vand.u32 2147483647, %v10310_v45  ;;  %v2882_v27 = vadd.f32 %v10389_v49, %v2881_v53  ;;  %vm10507_vm13 = vmor %vm2883_vm12, %vm2884_vm8 }
 0x8e9   : > { %7916 = vtanh.f32 %v10441_v41  ;;  %v2894_v39 = vmul.f32 %v10452_v16, %v10381_v19  ;;  %v3285_v38 = vsub.f32 1.0, %v3284_v24  ;;  %v2889_v45 = vand.u32 2147483648, %v10315_v40 }
 0x8ea   : > { %v2982_v46 = vpop.permute.xlu0 %2981  ;;  %v3276_v52 = vsel %vm10486_vm10, %v10374_v26, %v3272_v32  ;;  %v2920_v11 = vor.u32 1.1754944e-38, %v2919_v48  ;;  %vm3278_vm14 = vcmp.eq.f32.partialorder %v3277_v44, 8.507059e+37  ;;  %vm2918_vm15 = vcmp.eq.f32.partialorder %v2917_v62, 8.507059e+37 }
 0x8eb   : > { %v3003_v61 = vmul.f32 %v2982_v46, %v10445_v31  ;;  %3381 = vrot.lane.b32.xlu0 %v7911_v14, %s8587_s6  ;;  %v2895_v36 = vsub.f32 1.0, %v2894_v39  ;;  %v2887_v46 = vand.u32 2147483647, %v10315_v40  ;;  %v3286_v34 = vmul.f32 %v10434_v1, %v3285_v38 }
 0x8ec   : > { %v2886_v40 = vsel %vm10507_vm13, %v10389_v49, %v2882_v27  ;;  %v2890_v9 = vor.u32 1.1754944e-38, %v2889_v45  ;;  %vm3289_vm2 = vweird.f32 %v10434_v1  ;;  %vm3288_vm3 = vweird.f32 %v10360_v47 }
 0x8ed   : > { %3021 = vrot.lane.b32.xlu1 %v3003_v61, %s8588_s7  ;;  %3017 = vrot.lane.b32.xlu2 %v3001_v7, %s8588_s7  ;;  %v2916_v7 = vsel %vm10490_vm11, %v10379_v33, %v2912_v58  ;;  %v2988_v61 = vpop.permute.xlu2 %2987  ;;  %v3280_v33 = vor.u32 1.1754944e-38, %v3279_v22  ;;  %v2896_v26 = vmul.f32 %v10452_v16, %v2895_v36  ;;  %vm2888_vm1 = vcmp.eq.f32.partialorder %v2887_v46, 8.507059e+37  ;;  %vm3290_vm5 = vmor %vm3288_vm3, %vm3289_vm2 }
 0x8ee   : > { %v10478_v23 = vpop.eup %7914  ;;  %v10517_v24 = vsel %vm2918_vm15, %v2920_v11, %v2916_v7  ;;  %v10525_v49 = vsel %vm2888_vm1, %v2890_v9, %v2886_v40  ;;  %v3292_v58 = vand.u32 2147483647, %v10360_v47  ;;  %v3294_v38 = vand.u32 2147483648, %v10360_v47 }
 0x8ef   : > { %v7917_v14 = vpop.eup %7916  ;;  %v3299_v35 = vmul.f32 %v10478_v23, %v10436_v0  ;;  %v10519_v59 = vsel %vm3278_vm14, %v3280_v33, %v3276_v52  ;;  %v3006_v39 = vmul.f32 %v2988_v61, %v10517_v24  ;;  %v2897_v44 = vadd.f32 %v10452_v16, %v2896_v26 }
 0x8f0   : > { %vm2899_vm4 = vweird.f32 %v10452_v16  ;;  %v2904_v62 = vand.u32 2147483648, %v10381_v19  ;;  %vm2898_vm6 = vweird.f32 %v10381_v19  ;;  %v2902_v27 = vand.u32 2147483647, %v10381_v19 }
 0x8f1   : > { %v3300_v22 = vsub.f32 1.0, %v3299_v35  ;;  %vm2900_vm7 = vmor %vm2898_vm6, %vm2899_vm4  ;;  %v3295_v50 = vor.u32 1.1754944e-38, %v3294_v38  ;;  %vm3293_vm8 = vcmp.eq.f32.partialorder %v3292_v58, 8.507059e+37  ;;  %vm3304_vm10 = vweird.f32 %v10478_v23 }
 0x8f2   : > { %v2984_v5 = vpop.permute.xlu1 %2983  ;;  %v2901_v36 = vsel %vm2900_vm7, %v10452_v16, %v2897_v44  ;;  %v2905_v25 = vor.u32 1.1754944e-38, %v2904_v62  ;;  %vm2903_vm9 = vcmp.eq.f32.partialorder %v2902_v27, 8.507059e+37  ;;  %v3309_v16 = vand.u32 2147483648, %v10436_v0 }
 0x8f3   : > { %3411 = vrot.lane.b32.xlu0 %v3393_v56, %s8588_s7  ;;  %v3287_v56 = vadd.f32 %v10434_v1, %v3286_v34  ;;  %v3004_v48 = vmul.f32 %v2984_v5, %v10525_v49  ;;  %vm3303_vm11 = vweird.f32 %v10436_v0  ;;  %v3307_v61 = vand.u32 2147483647, %v10436_v0 }
 0x8f4   : > { %v3374_v53 = vpop.permute.xlu0 %3373  ;;  %v10545_v19 = vsel %vm2903_vm9, %v2905_v25, %v2901_v36  ;;  %vm3305_vm12 = vmor %vm3303_vm11, %vm3304_vm10  ;;  %v3310_v6 = vor.u32 1.1754944e-38, %v3309_v16  ;;  %v7318_v26 = vmul.f32 -1.442695, %v10340_v10  ;;  %v7333_v0 = vmul.f32 -1.442695, %v10441_v41 }
 0x8f5   : > { %3379 = vrot.lane.b32.xlu2 %v7917_v14, %s8587_s6  ;;  %v3394_v32 = vmul.f32 %v3374_v53, %v10519_v59  ;;  %v3291_v47 = vsel %vm3290_vm5, %v10434_v1, %v3287_v56  ;;  %v3301_v14 = vmul.f32 %v10478_v23, %v3300_v22  ;;  %vm3308_vm13 = vcmp.eq.f32.partialorder %v3307_v61, 8.507059e+37 }
 0x8f6   : > { %v10542_v7 = vsel %vm3293_vm8, %v3295_v50, %v3291_v47  ;;  %7918 = vpow2.f32 %v7318_v26  ;;  %v7317_v53 = vmul.f32 -1.442695, %v10287_v12 }
 0x8f7   : > { %3413 = vrot.lane.b32.xlu1 %v3394_v32, %s8588_s7  ;;  %v3302_v34 = vadd.f32 %v10478_v23, %v3301_v14 }
 0x8f9   : > { %v3306_v11 = vsel %vm3305_vm12, %v10478_v23, %v3302_v34 }
 0x8fa   : > { %v2986_v46 = vpop.permute.xlu1 %2985  ;;  %v10556_v33 = vsel %vm3308_vm13, %v3310_v6, %v3306_v11  ;;  %v2961_v11 = vmul.f32 %v10432_v42, %v10022_v37 }
 0x8fb   : > { %3027 = vrot.lane.b32.xlu0 %v3006_v39, %s8588_s7  ;;  %v3005_v1 = vmul.f32 %v2986_v46, %v10545_v19 }
 0x8fc   : > { %v3376_v45 = vpop.permute.xlu0 %3375  ;;  %v7919_v35 = vpop.eup %7918 }
 0x8fd   : > { %3023 = vrot.lane.b32.xlu2 %v3004_v48, %s8588_s7  ;;  %v3395_v52 = vmul.f32 %v3376_v45, %v10542_v7  ;;  %v2832_v9 = vadd.f32 1.0, %v7919_v35  ;;  %v7334_v48 = vmul.f32 -1.442695, %v10372_v13 }
 0x8ff   : > { %3415 = vrot.lane.b32.xlu1 %v3395_v52, %s8588_s7  ;;  %7920 = vrcp.f32 %v2832_v9  ;;  %v2949_v62 = vand.u32 2147483648, %v2832_v9  ;;  %vm2943_vm15 = vweird.f32 %v2832_v9  ;;  %v2947_v47 = vand.u32 2147483647, %v2832_v9 }
 0x900   : > { %7922 = vpow2.f32 %v7333_v0 }
 0x901   : > { %7924 = vpow2.f32 %v7317_v53  ;;  %v2950_v13 = vor.u32 1.1754944e-38, %v2949_v62  ;;  %vm2948_vm2 = vcmp.eq.f32.partialorder %v2947_v47, 8.507059e+37 }
 0x904   : > { %v3378_v5 = vpop.permute.xlu1 %3377 }
 0x905   : > { %3025 = vrot.lane.b32.xlu2 %v3005_v1, %s8588_s7  ;;  %v3396_v40 = vmul.f32 %v3378_v5, %v10556_v33  ;;  %v7921_v23 = vpop.eup %7920 }
 0x906   : > { %v7923_v39 = vpop.eup %7922  ;;  %v2939_v56 = vmul.f32 %v7921_v23, %v2832_v9  ;;  %vm2944_vm14 = vweird.f32 %v7921_v23 }
 0x907   : > { %v7925_v32 = vpop.eup %7924  ;;  %v3221_v58 = vadd.f32 1.0, %v7923_v39  ;;  %vm2945_vm1 = vmor %vm2943_vm15, %vm2944_vm14 }
 0x908   : > { %v2831_v38 = vadd.f32 1.0, %v7925_v32  ;;  %v2940_v44 = vsub.f32 1.0, %v2939_v56 }
 0x909   : > { %7926 = vrcp.f32 %v3221_v58  ;;  %vm3318_vm5 = vweird.f32 %v3221_v58  ;;  %v3322_v9 = vand.u32 2147483647, %v3221_v58  ;;  %v3324_v0 = vand.u32 2147483648, %v3221_v58 }
 0x90a   : > { %7928 = vrcp.f32 %v2831_v38  ;;  %v2941_v10 = vmul.f32 %v7921_v23, %v2940_v44  ;;  %v2934_v53 = vand.u32 2147483648, %v2831_v38  ;;  %vm2928_vm7 = vweird.f32 %v2831_v38 }
 0x90b   : > { %7930 = vpow2.f32 %v7334_v48  ;;  %v2932_v37 = vand.u32 2147483647, %v2831_v38  ;;  %v2962_v48 = vmul.f32 %v10313_v18, %v10013_v29  ;;  %v3325_v44 = vor.u32 1.1754944e-38, %v3324_v0 }
 0x90c   : > { %v2942_v41 = vadd.f32 %v7921_v23, %v2941_v10  ;;  %v2935_v10 = vor.u32 1.1754944e-38, %v2934_v53  ;;  %vm3323_vm9 = vcmp.eq.f32.partialorder %v3322_v9, 8.507059e+37 }
 0x90d   : > { %3417 = vrot.lane.b32.xlu2 %v3396_v40, %s8588_s7  ;;  %vm2933_vm10 = vcmp.eq.f32.partialorder %v2932_v37, 8.507059e+37 }
 0x90e   : > { %v2946_v50 = vsel %vm2945_vm1, %v7921_v23, %v2942_v41  ;;  %v2963_v23 = vmul.f32 %v10445_v31, %v10050_v4  ;;  %v2965_v4 = vmul.f32 %v10545_v19, %v10069_v43  ;;  %v2966_v43 = vmul.f32 %v10517_v24, %v10084_v17 }
 0x90f   : > { %v7927_v22 = vpop.eup %7926  ;;  %v10566_v45 = vsel %vm2948_vm2, %v2950_v13, %v2946_v50  ;;  %v3355_v17 = vmul.f32 %v10542_v7, %v10076_v2 }
 0x910   : > { %v7929_v12 = vpop.eup %7928  ;;  %v3314_v36 = vmul.f32 %v7927_v22, %v3221_v58  ;;  %vm3319_vm3 = vweird.f32 %v7927_v22  ;;  %v2968_v2 = vmul.f32 %v10566_v45, %v10097_v8 }
 0x911   : > { %v7931_v27 = vpop.eup %7930  ;;  %v2924_v14 = vmul.f32 %v7929_v12, %v2831_v38  ;;  %vm2929_vm4 = vweird.f32 %v7929_v12  ;;  %vm10576_vm6 = vmor %vm3318_vm5, %vm3319_vm3 }
 0x912   : > { %v10564_v25 = vadd.f32 1.0, %v7931_v27  ;;  %v3315_v1 = vsub.f32 1.0, %v3314_v36  ;;  %vm2930_vm8 = vmor %vm2928_vm7, %vm2929_vm4 }
 0x913   : > { %v2925_v34 = vsub.f32 1.0, %v2924_v14  ;;  %v3351_v14 = vmul.f32 %v10370_v51, %v10035_v60 }
 0x914   : > { %7932 = vrcp.f32 %v10564_v25  ;;  %v3316_v16 = vmul.f32 %v7927_v22, %v3315_v1  ;;  %vm3333_vm12 = vweird.f32 %v10564_v25 }
 0x915   : > { %v2926_v61 = vmul.f32 %v7929_v12, %v2925_v34 }
 0x916   : > { %v3317_v26 = vadd.f32 %v7927_v22, %v3316_v16  ;;  %v3339_v16 = vand.u32 2147483648, %v10564_v25 }
 0x917   : > { %v2927_v35 = vadd.f32 %v7929_v12, %v2926_v61 }
 0x918   : > { %v3321_v32 = vsel %vm10576_vm6, %v7927_v22, %v3317_v26 }
 0x919   : > { %v2931_v56 = vsel %vm2930_vm8, %v7929_v12, %v2927_v35  ;;  %v10587_v38 = vsel %vm3323_vm9, %v3325_v44, %v3321_v32  ;;  %v2964_v35 = vmul.f32 %v10525_v49, %v10043_v21 }
 0x91a   : > { %v7933_v6 = vpop.eup %7932  ;;  %v10589_v47 = vsel %vm2933_vm10, %v2935_v10, %v2931_v56  ;;  %v3353_v56 = vmul.f32 %v10466_v20, %v10062_v30  ;;  %v3354_v30 = vmul.f32 %v10519_v59, %v10066_v54 }
 0x91b   : > { %v3329_v39 = vmul.f32 %v7933_v6, %v10564_v25  ;;  %vm3334_vm11 = vweird.f32 %v7933_v6 }
 0x91c   : > { %vm3335_vm13 = vmor %vm3333_vm12, %vm3334_vm11 }
 0x91d   : > { %v3330_v41 = vsub.f32 1.0, %v3329_v39 }
 0x91f   : > { %v3331_v29 = vmul.f32 %v7933_v6, %v3330_v41 }
 0x921   : > { %v3332_v1 = vadd.f32 %v7933_v6, %v3331_v29 }
 0x923   : > { %v3336_v60 = vsel %vm3335_vm13, %v7933_v6, %v3332_v1 }
 0x93f   : > { %v2992_v46 = vpop.permute.xlu2 %2991 }
 0x940   : > { %v3008_v52 = vmul.f32 %v2992_v46, %v10566_v45 }
 0x942   : > { %3031 = vrot.lane.b32.xlu1 %v3008_v52, %s8588_s7  ;;  %v3352_v52 = vmul.f32 %v10387_v63, %v10030_v57  ;;  %v3340_v57 = vor.u32 1.1754944e-38, %v3339_v16 }
 0x947   : > { %v3018_v5 = vpop.permute.xlu2 %3017 }
 0x948   : > { %v10573_v40 = vadd.f32 %v3018_v5, %v2961_v11  ;;  %v3337_v5 = vand.u32 2147483647, %v10564_v25 }
 0x94a   : > { %7934 = vtanh.f32 %v10573_v40  ;;  %vm3338_vm14 = vcmp.eq.f32.partialorder %v3337_v5, 8.507059e+37 }
 0x94b   : > { %v10613_v9 = vsel %vm3338_vm14, %v3340_v57, %v3336_v60 }
 0x94c   : > { %v3358_v57 = vmul.f32 %v10613_v9, %v10121_v3 }
 0x94d   : > { %v3020_v58 = vpop.permute.xlu0 %3019 }
 0x94e   : > { %v10585_v62 = vadd.f32 %v3020_v58, %v2962_v48 }
 0x94f   : > { %v3380_v27 = vpop.permute.xlu2 %3379  ;;  %v2990_v50 = vpop.permute.xlu1 %2989 }
 0x950   : > { %v7935_v36 = vpop.eup %7934  ;;  %v3397_v22 = vmul.f32 %v3380_v27, %v10587_v38  ;;  %v3007_v12 = vmul.f32 %v2990_v50, %v10589_v47  ;;  %7936 = vtanh.f32 %v10585_v62  ;;  %v3356_v50 = vmul.f32 %v10556_v33, %v10091_v15 }
 0x951   : > { %3065 = vrot.lane.b32.xlu2 %v7935_v36, %s8587_s6 }
 0x952   : > { %3419 = vrot.lane.b32.xlu1 %v3397_v22, %s8588_s7  ;;  %3029 = vrot.lane.b32.xlu0 %v3007_v12, %s8588_s7 }
 0x955   : > { %v3408_v13 = vpop.permute.xlu0 %3407 }
 0x956   : > { %v10599_v46 = vadd.f32 %v3408_v13, %v3351_v14  ;;  %v7937_v26 = vpop.eup %7936 }
 0x957   : > { %v3410_v34 = vpop.permute.xlu1 %3409  ;;  %v3024_v61 = vpop.permute.xlu2 %3023 }
 0x958   : > { %v10604_v11 = vadd.f32 %v3410_v34, %v3352_v52  ;;  %7938 = vtanh.f32 %v10599_v46  ;;  %v10615_v53 = vadd.f32 %v3024_v61, %v2964_v35 }
 0x95a   : > { %3067 = vrot.lane.b32.xlu0 %v7937_v26, %s8587_s6  ;;  %7940 = vtanh.f32 %v10604_v11 }
 0x95b   : > { %7942 = vtanh.f32 %v10615_v53 }
 0x95d   : > { %v3382_v0 = vpop.permute.xlu0 %3381 }
 0x95e   : > { %v3398_v25 = vmul.f32 %v3382_v0, %v10613_v9  ;;  %v7939_v39 = vpop.eup %7938 }
 0x95f   : > { %v3022_v37 = vpop.permute.xlu1 %3021  ;;  %v3026_v21 = vpop.permute.xlu2 %3025 }
 0x960   : > { %v10620_v6 = vadd.f32 %v3022_v37, %v2963_v23  ;;  %3421 = vrot.lane.b32.xlu2 %v3398_v25, %s8588_s7  ;;  %v7941_v32 = vpop.eup %7940  ;;  %v10633_v44 = vadd.f32 %v3026_v21, %v2965_v4  ;;  %v2967_v23 = vmul.f32 %v10589_v47, %v10111_v28 }
 0x961   : > { %3457 = vrot.lane.b32.xlu1 %v7941_v32, %s8587_s6  ;;  %v7943_v10 = vpop.eup %7942  ;;  %v3357_v32 = vmul.f32 %v10587_v38, %v10103_v55 }
 0x962   : > { %3455 = vrot.lane.b32.xlu0 %v7939_v39, %s8587_s6  ;;  %7944 = vtanh.f32 %v10620_v6 }
 0x965   : > { %v3412_v48 = vpop.permute.xlu0 %3411 }
 0x966   : > { %v10631_v58 = vadd.f32 %v3412_v48, %v3353_v56 }
 0x967   : > { %v3418_v27 = vpop.permute.xlu2 %3417 }
 0x968   : > { %7946 = vtanh.f32 %v10631_v58  ;;  %v7945_v41 = vpop.eup %7944  ;;  %v10649_v13 = vadd.f32 %v3418_v27, %v3356_v50 }
 0x969   : > { %3069 = vrot.lane.b32.xlu2 %v7945_v41, %s8587_s6  ;;  %7948 = vtanh.f32 %v10633_v44  ;;  %v3414_v36 = vpop.permute.xlu1 %3413 }
 0x96a   : > { %3071 = vrot.lane.b32.xlu0 %v7943_v10, %s8587_s6  ;;  %v10645_v29 = vadd.f32 %v3414_v36, %v3354_v30 }
 0x96c   : > { %7950 = vtanh.f32 %v10645_v29 }
 0x96d   : > { %v3028_v22 = vpop.permute.xlu0 %3027 }
 0x96e   : > { %v7947_v12 = vpop.eup %7946  ;;  %v10647_v14 = vadd.f32 %v3028_v22, %v2966_v43 }
 0x96f   : > { %3459 = vrot.lane.b32.xlu1 %v7947_v12, %s8587_s6  ;;  %v7949_v54 = vpop.eup %7948 }
 0x970   : > { %7952 = vtanh.f32 %v10647_v14 }
 0x971   : > { %7954 = vtanh.f32 %v10649_v13  ;;  %v3416_v15 = vpop.permute.xlu1 %3415 }
 0x972   : > { %3073 = vrot.lane.b32.xlu0 %v7949_v54, %s8587_s6  ;;  %v7951_v52 = vpop.eup %7950  ;;  %v10658_v1 = vadd.f32 %v3416_v15, %v3355_v17 }
 0x973   : > { %3461 = vrot.lane.b32.xlu2 %v7951_v52, %s8587_s6 }
 0x974   : > { %7956 = vtanh.f32 %v10658_v1 }
 0x976   : > { %v7953_v34 = vpop.eup %7952 }
 0x977   : > { %3075 = vrot.lane.b32.xlu1 %v7953_v34, %s8587_s6  ;;  %v7955_v16 = vpop.eup %7954 }
 0x97a   : > { %3465 = vrot.lane.b32.xlu0 %v7955_v16, %s8587_s6  ;;  %v7957_v61 = vpop.eup %7956 }
 0x97b   : > { %3463 = vrot.lane.b32.xlu2 %v7957_v61, %s8587_s6 }
 0x9ab   : > { %v3066_v5 = vpop.permute.xlu2 %3065 }
 0x9ac   : > { %v3089_v48 = vmul.f32 %v3066_v5, %v10432_v42 }
 0x9b4   : > { %v3032_v26 = vpop.permute.xlu1 %3031 }
 0x9b5   : > { %v10667_v60 = vadd.f32 %v3032_v26, %v2968_v2 }
 0x9b7   : > { %7958 = vtanh.f32 %v10667_v60 }
 0x9ba   : > { %v3422_v35 = vpop.permute.xlu2 %3421 }
 0x9bb   : > { %v10672_v0 = vadd.f32 %v3422_v35, %v3358_v57 }
 0x9bd   : > { %v7959_v25 = vpop.eup %7958  ;;  %7960 = vtanh.f32 %v10672_v0 }
 0x9be   : > { %3079 = vrot.lane.b32.xlu0 %v7959_v25, %s8587_s6 }
 0x9c3   : > { %v7961_v37 = vpop.eup %7960  ;;  %v3070_v50 = vpop.permute.xlu2 %3069 }
 0x9c4   : > { %v3030_v8 = vpop.permute.xlu0 %3029  ;;  %v3420_v3 = vpop.permute.xlu1 %3419  ;;  %v3091_v36 = vmul.f32 %v3070_v50, %v10445_v31 }
 0x9c5   : > { %v10678_v39 = vadd.f32 %v3030_v8, %v2967_v23  ;;  %v10684_v21 = vadd.f32 %v3420_v3, %v3357_v32  ;;  %v8563_v32 = vld [vmem:[%s13011_s1 + $0x18] sm:$0xff] }
 0x9c6   : > { %3469 = vrot.lane.b32.xlu0 %v7961_v37, %s8587_s6 }
 0x9c7   : > { %7962 = vtanh.f32 %v10678_v39 }
 0x9c8   : > { %7964 = vtanh.f32 %v10684_v21 }
 0x9cc   : > { %v3068_v56 = vpop.permute.xlu0 %3067 }
 0x9cd   : > { %v7963_v4 = vpop.eup %7962  ;;  %v3090_v28 = vmul.f32 %v3068_v56, %v10313_v18  ;;  %v3462_v12 = vpop.permute.xlu2 %3461  ;;  %v8564_v56 = vld [vmem:[%s13011_s1 + $0x10] sm:$0xff] }
 0x9ce   : > { %3077 = vrot.lane.b32.xlu2 %v7963_v4, %s8587_s6  ;;  %v7965_v30 = vpop.eup %7964 }
 0x9cf   : > { %v3495_v10 = vpack.c.bf16 %v3090_v28, %v3089_v48 }
 0x9d1   : > { %3503 = vrot.lane.b32.xlu1 %v3495_v10, %s8588_s7 }
 0x9d3   : > { %v3458_v41 = vpop.permute.xlu1 %3457 }
 0x9d4   : > { %v3456_v27 = vpop.permute.xlu0 %3455  ;;  %v3480_v55 = vmul.f32 %v3458_v41, %v10387_v63  ;;  %v3482_v63 = vmul.f32 %v3462_v12, %v10519_v59 }
 0x9d5   : > { %v3479_v43 = vmul.f32 %v3456_v27, %v10370_v51  ;;  %v3464_v34 = vpop.permute.xlu2 %3463 }
 0x9d6   : > { %3467 = vrot.lane.b32.xlu2 %v7965_v30, %s8587_s6  ;;  %v3483_v5 = vmul.f32 %v3464_v34, %v10542_v7  ;;  %v10746_v30 = vld [vmem:[%s13013_s3] ss:$0 sm:$0xff] }
 0x9d7   : > { %v3885_v42 = vpack.c.bf16 %v3480_v55, %v3479_v43  ;;  %v13105_v55 = vld [vmem:[#allocation3_spill] sm:$0xff] }
 0x9d8   : > { %v581_v43 = vadd.f32 %v10746_v30, %v13105_v55 }
 0x9d9   : > { %3893 = vrot.lane.b32.xlu1 %v3885_v42, %s8588_s7 }
 0x9dc   : > { %v3072_v18 = vpop.permute.xlu0 %3071 }
 0x9dd   : > { %v3092_v22 = vmul.f32 %v3072_v18, %v10525_v49 }
 0x9df   : > { %v3496_v54 = vpack.c.bf16 %v3092_v22, %v3091_v36  ;;  %v10755_v36 = vld [vmem:[%s13013_s3 + $0x1] ss:$0 sm:$0xff] }
 0x9e1   : > { %3505 = vrot.lane.b32.xlu1 %v3496_v54, %s8588_s7  ;;  %v3460_v17 = vpop.permute.xlu1 %3459 }
 0x9e2   : > { %v3481_v51 = vmul.f32 %v3460_v17, %v10466_v20  ;;  %v13106_v17 = vld [vmem:[#allocation4_spill] sm:$0xff] }
 0x9e4   : > { %v3886_v15 = vpack.c.bf16 %v3482_v63, %v3481_v51  ;;  %v3074_v52 = vpop.permute.xlu0 %3073  ;;  %v583_v63 = vadd.f32 %v10746_v30, %v13106_v17 }
 0x9e5   : > { %v3093_v61 = vmul.f32 %v3074_v52, %v10545_v19 }
 0x9e6   : > { %3895 = vrot.lane.b32.xlu2 %v3886_v15, %s8588_s7 }
 0x9e9   : > { %v3076_v16 = vpop.permute.xlu1 %3075 }
 0x9ea   : > { %v3094_v31 = vmul.f32 %v3076_v16, %v10517_v24 }
 0x9ec   : > { %v3466_v49 = vpop.permute.xlu0 %3465  ;;  %v3497_v2 = vpack.c.bf16 %v3094_v31, %v3093_v61 }
 0x9ed   : > { %v3484_v26 = vmul.f32 %v3466_v49, %v10556_v33 }
 0x9ee   : > { %3507 = vrot.lane.b32.xlu0 %v3497_v2, %s8588_s7 }
 0x9ef   : > { %v3887_v57 = vpack.c.bf16 %v3484_v26, %v3483_v5  ;;  %v13107_v5 = vld [vmem:[#allocation5_spill] sm:$0xff] }
 0x9f0   : > { %v586_v2 = vadd.f32 %v10746_v30, %v13107_v5 }
 0x9f1   : > { %3897 = vrot.lane.b32.xlu1 %v3887_v57, %s8588_s7 }
 0xa28   : > { %v3078_v20 = vpop.permute.xlu2 %3077 }
 0xa29   : > { %v3095_v35 = vmul.f32 %v3078_v20, %v10589_v47  ;;  %v8560_v47 = vld [vmem:[%s13012_s2 + $0x8] sm:$0xff] }
 0xa30   : > { %v3080_v59 = vpop.permute.xlu0 %3079  ;;  %v3468_v24 = vpop.permute.xlu2 %3467 }
 0xa31   : > { %v3096_v25 = vmul.f32 %v3080_v59, %v10566_v45  ;;  %v3485_v7 = vmul.f32 %v3468_v24, %v10587_v38  ;;  %v8559_v45 = vld [vmem:[%s13012_s2 + $0x18] sm:$0xff]  ;;  %v8561_v38 = vld [vmem:[%s13012_s2 + $0x10] sm:$0xff] }
 0xa33   : > { %v3498_v19 = vpack.c.bf16 %v3096_v25, %v3095_v35 }
 0xa35   : > { %3509 = vrot.lane.b32.xlu2 %v3498_v19, %s8588_s7 }
 0xa38   : > { %v3470_v23 = vpop.permute.xlu0 %3469 }
 0xa39   : > { %v3486_v33 = vmul.f32 %v3470_v23, %v10613_v9  ;;  %v8562_v9 = vld [vmem:[%s13012_s2] sm:$0xff]  ;;  %v13108_v23 = vld [vmem:[#allocation6_spill] sm:$0xff] }
 0xa3b   : > { %v3888_v8 = vpack.c.bf16 %v3486_v33, %v3485_v7  ;;  %v588_v7 = vadd.f32 %v10746_v30, %v13108_v23 }
 0xa3d   : > { %3899 = vrot.lane.b32.xlu0 %v3888_v8, %s8588_s7 }
 0xa40   : > { %v3896_v48 = vpop.permute.xlu2 %3895 }
 0xa43   : > { %v3504_v37 = vpop.permute.xlu1 %3503 }
 0xa44   : > { %7335 = vmatmul.msk.bf16.vlgmr.msra.gmra.mxu2 %vm250_vm0, %v3504_v37  ;;  %7347 = vmatmul.msk.bf16.vlgmr.msra.gmra.mxu3 %vm250_vm0, %v3504_v37 }
 0xa45   : > { %5437 = vmatpush.bf16.msra.mxu2 %v8559_v45  ;;  %5806 = vmatpush.bf16.msra.mxu3 %v8560_v47 }
 0xa49   : > { %5438 = vmatpush.bf16.msra.mxu2 %v8561_v38  ;;  %5807 = vmatpush.bf16.msra.mxu3 %v8562_v9 }
 0xa4b   : > { %v3894_v3 = vpop.permute.xlu1 %3893 }
 0xa4c   : > { %7351 = vmatmul.msk.bf16.vlgmr.msrb.gmra.mxu0 %vm250_vm0, %v3894_v3 }
 0xa4d   : > { %6139 = vmatpush.bf16.msrb.mxu0 %v8563_v32  ;;  %v13109_v32 = vld [vmem:[#allocation7_spill] sm:$0xff] }
 0xa51   : > { %6140 = vmatpush.bf16.msrb.mxu0 %v8564_v56  ;;  %v591_v56 = vadd.f32 %v10746_v30, %v13109_v32 }
 0xa53   : > { %v3506_v4 = vpop.permute.xlu1 %3505 }
 0xa54   : > { %7336 = vmatmul.msk.bf16.gmra.mxu2 %vm250_vm0, %v3506_v4  ;;  %7348 = vmatmul.msk.bf16.gmra.mxu3 %vm250_vm0, %v3506_v4 }
 0xa5c   : > { %7352 = vmatmul.msk.bf16.gmra.mxu0 %vm250_vm0, %v3896_v48 }
 0xa60   : > { %v3508_v28 = vpop.permute.xlu0 %3507 }
 0xa63   : > { %v3898_v10 = vpop.permute.xlu1 %3897 }
 0xa64   : > { %7337 = vmatmul.msk.bf16.gmra.mxu2 %vm250_vm0, %v3508_v28  ;;  %7349 = vmatmul.msk.bf16.gmra.mxu3 %vm250_vm0, %v3508_v28 }
 0xa6c   : > { %7353 = vmatmul.msk.bf16.gmra.mxu0 %vm250_vm0, %v3898_v10 }
 0xa8f   : > { %v3510_v41 = vpop.permute.xlu2 %3509 }
 0xa90   : > { %7338 = vmatmul.msk.bf16.gmra.mxu2 %vm250_vm0, %v3510_v41  ;;  %7350 = vmatmul.msk.bf16.gmra.mxu3 %vm250_vm0, %v3510_v41 }
 0xaaf   : > { %v3900_v27 = vpop.permute.xlu0 %3899 }
 0xab0   : > { %7354 = vmatmul.msk.bf16.gmra.mxu0 %vm250_vm0, %v3900_v27 }
 0xac7   : > { %v3532_v50 = vpop.f32.mrf.mxu2  ;;  %v3865_v42 = vpop.f32.mrf.mxu3 }
 0xac8   : > { %v10750_v18 = vadd.f32 %v3532_v50, %v581_v43  ;;  %v3866_v22 = vadd.f32 %v10755_v36, %v3865_v42  ;;  %v13110_v50 = vld [vmem:[#allocation8_spill] sm:$0xff] }
 0xac9   : > { %v3922_v12 = vpop.f32.mrf.mxu0  ;;  %v593_v42 = vadd.f32 %v10746_v30, %v13110_v50 }
 0xaca   : > { %7966 = vtanh.f32 %v10750_v18  ;;  %v10759_v54 = vadd.f32 %v3922_v12, %v3866_v22 }
 0xacc   : > { %7968 = vtanh.f32 %v10759_v54 }
 0xacf   : > { %v3534_v51 = vpop.f32.mrf.mxu2  ;;  %v3867_v15 = vpop.f32.mrf.mxu3 }
 0xad0   : > { %v7967_v52 = vpop.eup %7966  ;;  %v10764_v34 = vadd.f32 %v3534_v51, %v583_v63  ;;  %v3868_v16 = vadd.f32 %v10755_v36, %v3867_v15 }
 0xad1   : > { %3736 = vrot.lane.b32.xlu1 %v7967_v52, %s8587_s6  ;;  %v3924_v61 = vpop.f32.mrf.mxu0 }
 0xad2   : > { %7970 = vtanh.f32 %v10764_v34  ;;  %v7969_v31 = vpop.eup %7968  ;;  %v10769_v49 = vadd.f32 %v3924_v61, %v3868_v16  ;;  %v7340_v5 = vmul.f32 -1.442695, %v10764_v34 }
 0xad3   : > { %4126 = vrot.lane.b32.xlu0 %v7969_v31, %s8587_s6 }
 0xad4   : > { %7972 = vtanh.f32 %v10769_v49 }
 0xad7   : > { %v3537_v26 = vpop.f32.mrf.mxu2  ;;  %v3870_v57 = vpop.f32.mrf.mxu3 }
 0xad8   : > { %v7971_v20 = vpop.eup %7970  ;;  %v10775_v59 = vadd.f32 %v3537_v26, %v586_v2  ;;  %v3871_v35 = vadd.f32 %v10755_v36, %v3870_v57  ;;  %v7339_v57 = vmul.f32 -1.442695, %v10750_v18 }
 0xad9   : > { %3738 = vrot.lane.b32.xlu2 %v7971_v20, %s8587_s6  ;;  %v3927_v25 = vpop.f32.mrf.mxu0  ;;  %v7355_v20 = vmul.f32 -1.442695, %v10759_v54 }
 0xada   : > { %7974 = vtanh.f32 %v10775_v59  ;;  %v10780_v19 = vadd.f32 %v3927_v25, %v3871_v35  ;;  %v7973_v24 = vpop.eup %7972  ;;  %v7341_v18 = vmul.f32 -1.442695, %v10775_v59 }
 0xadb   : > { %4128 = vrot.lane.b32.xlu1 %v7973_v24, %s8587_s6 }
 0xadc   : > { %7976 = vtanh.f32 %v10780_v19  ;;  %v7357_v54 = vmul.f32 -1.442695, %v10780_v19 }
 0xadf   : > { %v3539_v33 = vpop.f32.mrf.mxu2  ;;  %v3872_v8 = vpop.f32.mrf.mxu3 }
 0xae0   : > { %v7975_v37 = vpop.eup %7974  ;;  %v10786_v45 = vadd.f32 %v3539_v33, %v588_v7  ;;  %v3873_v47 = vadd.f32 %v10755_v36, %v3872_v8  ;;  %v7356_v33 = vmul.f32 -1.442695, %v10769_v49 }
 0xae1   : > { %v3929_v38 = vpop.f32.mrf.mxu0  ;;  %3740 = vrot.lane.b32.xlu2 %v7975_v37, %s8587_s6 }
 0xae2   : > { %7978 = vtanh.f32 %v10786_v45  ;;  %v10791_v9 = vadd.f32 %v3929_v38, %v3873_v47  ;;  %v7977_v3 = vpop.eup %7976 }
 0xae3   : > { %4130 = vrot.lane.b32.xlu1 %v7977_v3, %s8587_s6 }
 0xae4   : > { %7980 = vtanh.f32 %v10791_v9  ;;  %v7358_v59 = vmul.f32 -1.442695, %v10791_v9 }
 0xae7   : > { %v3542_v4 = vpop.f32.mrf.mxu2  ;;  %v3875_v48 = vpop.f32.mrf.mxu3 }
 0xae8   : > { %v7979_v28 = vpop.eup %7978  ;;  %v10797_v10 = vadd.f32 %v3542_v4, %v591_v56  ;;  %v3876_v41 = vadd.f32 %v10755_v36, %v3875_v48 }
 0xae9   : > { %3742 = vrot.lane.b32.xlu0 %v7979_v28, %s8587_s6  ;;  %v3932_v27 = vpop.f32.mrf.mxu0 }
 0xaea   : > { %7982 = vtanh.f32 %v10797_v10  ;;  %v10802_v55 = vadd.f32 %v3932_v27, %v3876_v41  ;;  %v7981_v43 = vpop.eup %7980  ;;  %v13111_v27 = vld [vmem:[#allocation9_spill] sm:$0xff] }
 0xaeb   : > { %4132 = vrot.lane.b32.xlu2 %v7981_v43, %s8587_s6  ;;  %v596_v43 = vadd.f32 %v10746_v30, %v13111_v27 }
 0xaec   : > { %7984 = vtanh.f32 %v10802_v55 }
 0xaef   : > { %v3544_v22 = vpop.f32.mrf.mxu2  ;;  %v3877_v12 = vpop.f32.mrf.mxu3 }
 0xaf0   : > { %v7983_v17 = vpop.eup %7982  ;;  %v10808_v63 = vadd.f32 %v3544_v22, %v593_v42  ;;  %v3878_v51 = vadd.f32 %v10755_v36, %v3877_v12 }
 0xaf1   : > { %3744 = vrot.lane.b32.xlu0 %v7983_v17, %s8587_s6  ;;  %v3934_v15 = vpop.f32.mrf.mxu0 }
 0xaf2   : > { %7986 = vtanh.f32 %v10808_v63  ;;  %v10813_v52 = vadd.f32 %v3934_v15, %v3878_v51  ;;  %v7985_v16 = vpop.eup %7984  ;;  %v7342_v15 = vmul.f32 -1.442695, %v10786_v45 }
 0xaf3   : > { %4134 = vrot.lane.b32.xlu2 %v7985_v16, %s8587_s6 }
 0xaf4   : > { %7988 = vtanh.f32 %v10813_v52 }
 0xaf5   : > { %7990 = vpow2.f32 %v7340_v5 }
 0xaf8   : > { %v7987_v61 = vpop.eup %7986 }
 0xaf9   : > { %3746 = vrot.lane.b32.xlu1 %v7987_v61, %s8587_s6 }
 0xafa   : > { %v7989_v31 = vpop.eup %7988 }
 0xafb   : > { %4136 = vrot.lane.b32.xlu0 %v7989_v31, %s8587_s6  ;;  %v7991_v2 = vpop.eup %7990 }
 0xafc   : > { %v3585_v26 = vadd.f32 1.0, %v7991_v2 }
 0xafe   : > { %7992 = vrcp.f32 %v3585_v26  ;;  %v3618_v49 = vand.u32 2147483648, %v3585_v26  ;;  %vm3612_vm1 = vweird.f32 %v3585_v26  ;;  %v3616_v4 = vand.u32 2147483647, %v3585_v26 }
 0xaff   : > { %7994 = vpow2.f32 %v7339_v57  ;;  %v7359_v57 = vmul.f32 -1.442695, %v10802_v55  ;;  %v7343_v55 = vmul.f32 -1.442695, %v10797_v10 }
 0xb00   : > { %7996 = vpow2.f32 %v7355_v20  ;;  %v3619_v42 = vor.u32 1.1754944e-38, %v3618_v49  ;;  %vm3617_vm3 = vcmp.eq.f32.partialorder %v3616_v4, 8.507059e+37  ;;  %v7344_v4 = vmul.f32 -1.442695, %v10808_v63 }
 0xb04   : > { %v7993_v35 = vpop.eup %7992 }
 0xb05   : > { %v7995_v25 = vpop.eup %7994  ;;  %v3608_v24 = vmul.f32 %v7993_v35, %v3585_v26  ;;  %vm3613_vm15 = vweird.f32 %v7993_v35 }
 0xb06   : > { %v7997_v23 = vpop.eup %7996  ;;  %v10822_v7 = vadd.f32 1.0, %v7995_v25  ;;  %vm3614_vm2 = vmor %vm3612_vm1, %vm3613_vm15 }
 0xb07   : > { %v3609_v8 = vsub.f32 1.0, %v3608_v24  ;;  %v10825_v34 = vadd.f32 1.0, %v7997_v23 }
 0xb08   : > { %7998 = vrcp.f32 %v10822_v7  ;;  %vm3597_vm4 = vweird.f32 %v10822_v7  ;;  %v3603_v49 = vand.u32 2147483648, %v10822_v7 }
 0xb09   : > { %8000 = vpow2.f32 %v7356_v33  ;;  %v3610_v37 = vmul.f32 %v7993_v35, %v3609_v8  ;;  %v3993_v63 = vand.u32 2147483648, %v10825_v34  ;;  %vm3987_vm8 = vweird.f32 %v10825_v34 }
 0xb0a   : > { %8002 = vrcp.f32 %v10825_v34  ;;  %v3991_v27 = vand.u32 2147483647, %v10825_v34 }
 0xb0b   : > { %8004 = vpow2.f32 %v7341_v18  ;;  %v3611_v38 = vadd.f32 %v7993_v35, %v3610_v37 }
 0xb0c   : > { %8006 = vpow2.f32 %v7357_v54  ;;  %vm3992_vm11 = vcmp.eq.f32.partialorder %v3991_v27, 8.507059e+37 }
 0xb0d   : > { %v3615_v19 = vsel %vm3614_vm2, %v7993_v35, %v3611_v38  ;;  %8008 = vpow2.f32 %v7358_v59  ;;  %v3601_v38 = vand.u32 2147483647, %v10822_v7 }
 0xb0e   : > { %v10833_v3 = vpop.eup %7998  ;;  %v10850_v9 = vsel %vm3617_vm3, %v3619_v42, %v3615_v19 }
 0xb0f   : > { %v8001_v32 = vpop.eup %8000  ;;  %v3593_v41 = vmul.f32 %v10833_v3, %v10822_v7  ;;  %vm3598_vm5 = vweird.f32 %v10833_v3  ;;  %vm3602_vm9 = vcmp.eq.f32.partialorder %v3601_v38, 8.507059e+37  ;;  %v3604_v7 = vor.u32 1.1754944e-38, %v3603_v49 }
 0xb10   : > { %v10837_v48 = vpop.eup %8002  ;;  %v10844_v50 = vadd.f32 1.0, %v8001_v32  ;;  %vm10890_vm7 = vmor %vm3597_vm4, %vm3598_vm5 }
 0xb11   : > { %v8005_v22 = vpop.eup %8004  ;;  %v3983_v12 = vmul.f32 %v10837_v48, %v10825_v34  ;;  %v3594_v61 = vsub.f32 1.0, %v3593_v41  ;;  %vm3988_vm6 = vweird.f32 %v10837_v48 }
 0xb12   : > { %8010 = vrcp.f32 %v10844_v50  ;;  %v10855_v31 = vadd.f32 1.0, %v8005_v22  ;;  %v8007_v5 = vpop.eup %8006  ;;  %vm10903_vm10 = vmor %vm3987_vm8, %vm3988_vm6  ;;  %v4008_v27 = vand.u32 2147483648, %v10844_v50  ;;  %vm4002_vm13 = vweird.f32 %v10844_v50 }
 0xb13   : > { %v10831_v47 = vpop.f32.mrf.mxu3  ;;  %v3547_v28 = vpop.f32.mrf.mxu2  ;;  %v3984_v26 = vsub.f32 1.0, %v3983_v12  ;;  %v3595_v45 = vmul.f32 %v10833_v3, %v3594_v61  ;;  %v10862_v35 = vadd.f32 1.0, %v8007_v5 }
 0xb14   : > { %v10848_v17 = vadd.f32 %v3547_v28, %v596_v43  ;;  %v8009_v24 = vpop.eup %8008  ;;  %vm3627_vm1 = vweird.f32 %v10855_v31 }
 0xb15   : > { %v3985_v23 = vmul.f32 %v10837_v48, %v3984_v26  ;;  %v3596_v18 = vadd.f32 %v10833_v3, %v3595_v45  ;;  %v10875_v54 = vadd.f32 1.0, %v8009_v24  ;;  %v13116_v26 = vld [vmem:[#allocation10_spill] sm:$0xff]  ;;  %vm4017_vm6 = vweird.f32 %v10862_v35 }
 0xb16   : > { %8012 = vtanh.f32 %v10848_v17 }
 0xb17   : > { %8014 = vpow2.f32 %v7342_v15  ;;  %v3986_v10 = vadd.f32 %v10837_v48, %v3985_v23  ;;  %v3600_v41 = vsel %vm10890_vm7, %v10833_v3, %v3596_v18  ;;  %v7360_v15 = vmul.f32 -1.442695, %v10813_v52 }
 0xb18   : > { %8016 = vrcp.f32 %v10855_v31  ;;  %v10866_v33 = vpop.eup %8010  ;;  %v10915_v61 = vsel %vm3602_vm9, %v3604_v7, %v3600_v41  ;;  %v4006_v7 = vand.u32 2147483647, %v10844_v50 }
 0xb19   : > { %8018 = vpow2.f32 %v7359_v57  ;;  %v3998_v59 = vmul.f32 %v10866_v33, %v10844_v50  ;;  %v3990_v3 = vsel %vm10903_vm10, %v10837_v48, %v3986_v10  ;;  %v598_v57 = vadd.f32 %v10746_v30, %v13116_v26 }
 0xb1a   : > { %8020 = vrcp.f32 %v10862_v35  ;;  %vm4003_vm12 = vweird.f32 %v10866_v33  ;;  %v4009_v26 = vor.u32 1.1754944e-38, %v4008_v27  ;;  %vm4007_vm2 = vcmp.eq.f32.partialorder %v4006_v7, 8.507059e+37 }
 0xb1b   : > { %v3882_v2 = vpop.f32.mrf.mxu3  ;;  %v3999_v34 = vsub.f32 1.0, %v3998_v59  ;;  %vm10957_vm15 = vmor %vm4002_vm13, %vm4003_vm12  ;;  %vm4032_vm10 = vweird.f32 %v10875_v54 }
 0xb1c   : > { %v3883_v25 = vadd.f32 %v10755_v36, %v3882_v2  ;;  %v8013_v37 = vpop.eup %8012  ;;  %v3994_v2 = vor.u32 1.1754944e-38, %v3993_v63 }
 0xb1d   : > { %v8015_v32 = vpop.eup %8014  ;;  %v4000_v30 = vmul.f32 %v10866_v33, %v3999_v34 }
 0xb1e   : > { %v10885_v28 = vpop.eup %8016  ;;  %v10900_v43 = vadd.f32 1.0, %v8015_v32 }
 0xb1f   : > { %v8019_v22 = vpop.eup %8018  ;;  %v3623_v12 = vmul.f32 %v10885_v28, %v10855_v31  ;;  %v4001_v10 = vadd.f32 %v10866_v33, %v4000_v30  ;;  %vm3628_vm14 = vweird.f32 %v10885_v28 }
 0xb20   : > { %v10921_v48 = vadd.f32 1.0, %v8019_v22  ;;  %v3633_v22 = vand.u32 2147483648, %v10855_v31  ;;  %vm10982_vm3 = vmor %vm3627_vm1, %vm3628_vm14  ;;  %vm3642_vm13 = vweird.f32 %v10900_v43 }
 0xb21   : > { %v3624_v23 = vsub.f32 1.0, %v3623_v12  ;;  %v4005_v34 = vsel %vm10957_vm15, %v10866_v33, %v4001_v10  ;;  %v3631_v33 = vand.u32 2147483647, %v10855_v31  ;;  %v4023_v10 = vand.u32 2147483648, %v10862_v35 }
 0xb23   : > { %vm3632_vm5 = vcmp.eq.f32.partialorder %v3631_v33, 8.507059e+37 }
 0xb2d   : > { %v10835_v56 = vpop.f32.mrf.mxu0 }
 0xb33   : > { %v3739_v51 = vpop.permute.xlu2 %3738 }
 0xb34   : > { %v3761_v16 = vmul.f32 %v3739_v51, %v10850_v9  ;;  %v10912_v51 = vpop.eup %8020 }
 0xb35   : > { %v3939_v20 = vpop.f32.mrf.mxu0  ;;  %v4013_v18 = vmul.f32 %v10912_v51, %v10862_v35  ;;  %vm4018_vm4 = vweird.f32 %v10912_v51 }
 0xb36   : > { %3778 = vrot.lane.b32.xlu2 %v3761_v16, %s8588_s7  ;;  %v10868_v8 = vadd.f32 %v3939_v20, %v3883_v25  ;;  %v3549_v16 = vpop.f32.mrf.mxu2  ;;  %v10923_v25 = vsel %vm3992_vm11, %v3994_v2, %v3990_v3  ;;  %vm4019_vm7 = vmor %vm4017_vm6, %vm4018_vm4 }
 0xb37   : > { %v10925_v52 = vadd.f32 %v3549_v16, %v598_v57  ;;  %v4014_v59 = vsub.f32 1.0, %v4013_v18 }
 0xb38   : > { %8022 = vtanh.f32 %v10868_v8 }
 0xb39   : > { %8024 = vpow2.f32 %v7343_v55  ;;  %v4015_v50 = vmul.f32 %v10912_v51, %v4014_v59 }
 0xb3a   : > { %8026 = vrcp.f32 %v10875_v54 }
 0xb3b   : > { %8028 = vpow2.f32 %v7344_v4  ;;  %v3625_v4 = vmul.f32 %v10885_v28, %v3624_v23  ;;  %v3741_v23 = vpop.permute.xlu2 %3740 }
 0xb3c   : > { %8030 = vrcp.f32 %v10900_v43 }
 0xb3d   : > { %8032 = vpow2.f32 %v7360_v15  ;;  %v3626_v3 = vadd.f32 %v10885_v28, %v3625_v4 }
 0xb3e   : > { %3748 = vrot.lane.b32.xlu2 %v8013_v37, %s8587_s6  ;;  %v8023_v45 = vpop.eup %8022  ;;  %8034 = vrcp.f32 %v10921_v48 }
 0xb3f   : > { %v8025_v24 = vpop.eup %8024  ;;  %8036 = vtanh.f32 %v10925_v52  ;;  %v3630_v31 = vsel %vm10982_vm3, %v10885_v28, %v3626_v3  ;;  %v4021_v28 = vand.u32 2147483647, %v10862_v35  ;;  %v4024_v3 = vor.u32 1.1754944e-38, %v4023_v10 }
 0xb40   : > { %v10932_v37 = vpop.eup %8026  ;;  %v10935_v32 = vadd.f32 1.0, %v8025_v24  ;;  %vm4047_vm3 = vweird.f32 %v10921_v48 }
 0xb41   : > { %v8029_v49 = vpop.eup %8028  ;;  %v4028_v41 = vmul.f32 %v10932_v37, %v10875_v54  ;;  %vm4033_vm8 = vweird.f32 %v10932_v37  ;;  %vm4022_vm9 = vcmp.eq.f32.partialorder %v4021_v28, 8.507059e+37 }
 0xb42   : > { %v10943_v19 = vpop.eup %8030  ;;  %v10945_v63 = vadd.f32 1.0, %v8029_v49  ;;  %8038 = vrcp.f32 %v10935_v32  ;;  %vm11031_vm11 = vmor %vm4032_vm10, %vm4033_vm8  ;;  %vm3657_vm6 = vweird.f32 %v10935_v32 }
 0xb43   : > { %v3737_v5 = vpop.permute.xlu1 %3736  ;;  %v8033_v42 = vpop.eup %8032  ;;  %v3638_v15 = vmul.f32 %v10943_v19, %v10900_v43  ;;  %v4029_v2 = vsub.f32 1.0, %v4028_v41  ;;  %vm3643_vm12 = vweird.f32 %v10943_v19 }
 0xb44   : > { %v3760_v20 = vmul.f32 %v3737_v5, %v10915_v61  ;;  %v10968_v16 = vpop.eup %8034  ;;  %8040 = vrcp.f32 %v10945_v63  ;;  %v3881_v5 = vadd.f32 %v10755_v36, %v10831_v47  ;;  %v10986_v36 = vsel %vm4007_vm2, %v4009_v26, %v4005_v34  ;;  %vm3644_vm15 = vmor %vm3642_vm13, %vm3643_vm12 }
 0xb45   : > { %v4127_v55 = vpop.permute.xlu0 %4126  ;;  %v8037_v57 = vpop.eup %8036  ;;  %v3639_v30 = vsub.f32 1.0, %v3638_v15  ;;  %v4030_v49 = vmul.f32 %v10932_v37, %v4029_v2  ;;  %v4043_v4 = vmul.f32 %v10968_v16, %v10921_v48  ;;  %v4038_v34 = vand.u32 2147483648, %v10875_v54 }
 0xb46   : > { %4140 = vrot.lane.b32.xlu2 %v8023_v45, %s8587_s6  ;;  %3776 = vrot.lane.b32.xlu1 %v3760_v20, %s8588_s7  ;;  %v4150_v38 = vmul.f32 %v4127_v55, %v10923_v25  ;;  %v10973_v20 = vadd.f32 1.0, %v8033_v42  ;;  %v10978_v45 = vadd.f32 %v10835_v56, %v3881_v5  ;;  %v4016_v55 = vadd.f32 %v10912_v51, %v4015_v50 }
 0xb47   : > { %v3640_v7 = vmul.f32 %v10943_v19, %v3639_v30  ;;  %v4044_v12 = vsub.f32 1.0, %v4043_v4  ;;  %v3646_v30 = vand.u32 2147483647, %v10900_v43  ;;  %vm4048_vm1 = vweird.f32 %v10968_v16 }
 0xb48   : > { %4166 = vrot.lane.b32.xlu0 %v4150_v38, %s8588_s7  ;;  %v10995_v18 = vpop.eup %8038  ;;  %v3634_v38 = vor.u32 1.1754944e-38, %v3633_v22  ;;  %8042 = vrcp.f32 %v10973_v20  ;;  %v4020_v27 = vsel %vm4019_vm7, %v10912_v51, %v4016_v55  ;;  %v4031_v22 = vadd.f32 %v10932_v37, %v4030_v49  ;;  %vm11065_vm4 = vmor %vm4047_vm3, %vm4048_vm1 }
 0xb49   : > { %8044 = vtanh.f32 %v10978_v45  ;;  %v3653_v42 = vmul.f32 %v10995_v18, %v10935_v32  ;;  %v4036_v51 = vand.u32 2147483647, %v10875_v54  ;;  %v11024_v15 = vsel %vm4022_vm9, %v4024_v3, %v4020_v27 }
 0xb4a   : > { %v11005_v59 = vpop.eup %8040  ;;  %v11008_v41 = vsel %vm3632_vm5, %v3634_v38, %v3630_v31  ;;  %v3641_v24 = vadd.f32 %v10943_v19, %v3640_v7  ;;  %v4045_v31 = vmul.f32 %v10968_v16, %v4044_v12  ;;  %v4039_v55 = vor.u32 1.1754944e-38, %v4038_v34 }
 0xb4b   : > { %v3762_v35 = vmul.f32 %v3741_v23, %v11008_v41  ;;  %v3668_v50 = vmul.f32 %v11005_v59, %v10945_v63  ;;  %v3654_v54 = vsub.f32 1.0, %v3653_v42  ;;  %v4035_v23 = vsel %vm11031_vm11, %v10932_v37, %v4031_v22 }
 0xb4c   : > { %vm4037_vm14 = vcmp.eq.f32.partialorder %v4036_v51, 8.507059e+37  ;;  %v4053_v49 = vand.u32 2147483648, %v10921_v48  ;;  %v3645_v10 = vsel %vm3644_vm15, %v10943_v19, %v3641_v24  ;;  %vm3647_vm2 = vcmp.eq.f32.partialorder %v3646_v30, 8.507059e+37 }
 0xb4d   : > { %v4129_v47 = vpop.permute.xlu1 %4128  ;;  %v3669_v38 = vsub.f32 1.0, %v3668_v50  ;;  %v11050_v37 = vsel %vm4037_vm14, %v4039_v55, %v4035_v23  ;;  %v3655_v28 = vmul.f32 %v10995_v18, %v3654_v54  ;;  %v4051_v22 = vand.u32 2147483647, %v10921_v48 }
 0xb4e   : > { %v4151_v56 = vmul.f32 %v4129_v47, %v10986_v36  ;;  %v11027_v2 = vpop.eup %8042  ;;  %vm3658_vm5 = vweird.f32 %v10995_v18  ;;  %v4054_v48 = vor.u32 1.1754944e-38, %v4053_v49  ;;  %vm3673_vm7 = vweird.f32 %v11005_v59 }
 0xb4f   : > { %v8045_v47 = vpop.eup %8044  ;;  %v4058_v27 = vmul.f32 %v11027_v2, %v10973_v20  ;;  %v3656_v34 = vadd.f32 %v10995_v18, %v3655_v28  ;;  %vm4052_vm8 = vcmp.eq.f32.partialorder %v4051_v22, 8.507059e+37  ;;  %vm3659_vm9 = vmor %vm3657_vm6, %vm3658_vm5  ;;  %vm3672_vm10 = vweird.f32 %v10945_v63 }
 0xb50   : > { %3750 = vrot.lane.b32.xlu0 %v8037_v57, %s8587_s6  ;;  %4168 = vrot.lane.b32.xlu1 %v4151_v56, %s8588_s7  ;;  %v4133_v57 = vpop.permute.xlu2 %4132  ;;  %v3648_v56 = vand.u32 2147483648, %v10900_v43  ;;  %v4046_v43 = vadd.f32 %v10968_v16, %v4045_v31  ;;  %vm3674_vm11 = vmor %vm3672_vm10, %vm3673_vm7  ;;  %vm4063_vm14 = vweird.f32 %v11027_v2  ;;  %v4068_v28 = vand.u32 2147483648, %v10973_v20 }
 0xb51   : > { %v4153_v7 = vmul.f32 %v4133_v57, %v11050_v37  ;;  %v4059_v50 = vsub.f32 1.0, %v4058_v27  ;;  %v3661_v57 = vand.u32 2147483647, %v10935_v32  ;;  %v3660_v54 = vsel %vm3659_vm9, %v10995_v18, %v3656_v34 }
 0xb52   : > { %v3649_v42 = vor.u32 1.1754944e-38, %v3648_v56  ;;  %v4050_v51 = vsel %vm11065_vm4, %v10968_v16, %v4046_v43  ;;  %v3678_v16 = vand.u32 2147483648, %v10945_v63  ;;  %v7345_v18 = vmul.f32 -1.442695, %v10848_v17 }
 0xb53   : > { %v11083_v24 = vsel %vm4052_vm8, %v4054_v48, %v4050_v51  ;;  %v4060_v23 = vmul.f32 %v11027_v2, %v4059_v50  ;;  %vm3662_vm12 = vcmp.eq.f32.partialorder %v3661_v57, 8.507059e+37  ;;  %vm4062_vm15 = vweird.f32 %v10973_v20 }
 0xb54   : > { %v11062_v19 = vsel %vm3647_vm2, %v3649_v42, %v3645_v10  ;;  %v4066_v27 = vand.u32 2147483647, %v10973_v20  ;;  %vm4064_vm1 = vmor %vm4062_vm15, %vm4063_vm14  ;;  %8046 = vpow2.f32 %v7345_v18  ;;  %v4069_v17 = vor.u32 1.1754944e-38, %v4068_v28 }
 0xb55   : > { %v4131_v5 = vpop.permute.xlu1 %4130  ;;  %v3721_v57 = vmul.f32 %v10850_v9, %v10585_v62 }
 0xb56   : > { %v4152_v33 = vmul.f32 %v4131_v5, %v11024_v15  ;;  %v3663_v5 = vand.u32 2147483648, %v10935_v32  ;;  %vm4067_vm2 = vcmp.eq.f32.partialorder %v4066_v27, 8.507059e+37 }
 0xb58   : > { %3780 = vrot.lane.b32.xlu0 %v3762_v35, %s8588_s7  ;;  %4138 = vrot.lane.b32.xlu1 %v8045_v47, %s8587_s6  ;;  %v3670_v35 = vmul.f32 %v11005_v59, %v3669_v38  ;;  %v4135_v26 = vpop.permute.xlu2 %4134  ;;  %v3676_v47 = vand.u32 2147483647, %v10945_v63  ;;  %v3664_v56 = vor.u32 1.1754944e-38, %v3663_v5  ;;  %v3679_v38 = vor.u32 1.1754944e-38, %v3678_v16 }
 0xb59   : > { %4170 = vrot.lane.b32.xlu2 %v4152_v33, %s8588_s7  ;;  %v4154_v32 = vmul.f32 %v4135_v26, %v11083_v24  ;;  %v4061_v63 = vadd.f32 %v11027_v2, %v4060_v23 }
 0xb5a   : > { %v3671_v33 = vadd.f32 %v11005_v59, %v3670_v35  ;;  %v11090_v30 = vsel %vm3662_vm12, %v3664_v56, %v3660_v54  ;;  %vm3677_vm13 = vcmp.eq.f32.partialorder %v3676_v47, 8.507059e+37  ;;  %v8047_v22 = vpop.eup %8046 }
 0xb5b   : > { %v3743_v4 = vpop.permute.xlu0 %3742  ;;  %v3590_v12 = vadd.f32 1.0, %v8047_v22 }
 0xb5c   : > { %v3763_v3 = vmul.f32 %v3743_v4, %v11062_v19  ;;  %v3675_v55 = vsel %vm3674_vm11, %v11005_v59, %v3671_v33 }
 0xb5d   : > { %v11097_v4 = vsel %vm3677_vm13, %v3679_v38, %v3675_v55  ;;  %8048 = vrcp.f32 %v3590_v12  ;;  %v3693_v48 = vand.u32 2147483648, %v3590_v12  ;;  %vm3687_vm4 = vweird.f32 %v3590_v12 }
 0xb5e   : > { %v3691_v5 = vand.u32 2147483647, %v3590_v12  ;;  %v7346_v38 = vmul.f32 -1.442695, %v10925_v52  ;;  %v4110_v52 = vmul.f32 %v10923_v25, %v10599_v46 }
 0xb5f   : > { %v3694_v33 = vor.u32 1.1754944e-38, %v3693_v48 }
 0xb60   : > { %4172 = vrot.lane.b32.xlu0 %v4153_v7, %s8588_s7  ;;  %3782 = vrot.lane.b32.xlu1 %v3763_v3, %s8588_s7  ;;  %v4065_v7 = vsel %vm4064_vm1, %v11027_v2, %v4061_v63  ;;  %vm3692_vm6 = vcmp.eq.f32.partialorder %v3691_v5, 8.507059e+37 }
 0xb61   : > { %v11106_v42 = vsel %vm4067_vm2, %v4069_v17, %v4065_v7 }
 0xb63   : > { %v3745_v31 = vpop.permute.xlu0 %3744  ;;  %v8049_v3 = vpop.eup %8048 }
 0xb64   : > { %v3764_v49 = vmul.f32 %v3745_v31, %v11090_v30  ;;  %v3683_v20 = vmul.f32 %v8049_v3, %v3590_v12  ;;  %vm3688_vm3 = vweird.f32 %v8049_v3  ;;  %v7361_v31 = vmul.f32 -1.442695, %v10978_v45 }
 0xb65   : > { %vm3689_vm5 = vmor %vm3687_vm4, %vm3688_vm3  ;;  %v3720_v45 = vmul.f32 %v10915_v61, %v10573_v40 }
 0xb66   : > { %v3684_v34 = vsub.f32 1.0, %v3683_v20 }
 0xb68   : > { %4174 = vrot.lane.b32.xlu0 %v4154_v32, %s8588_s7  ;;  %3784 = vrot.lane.b32.xlu1 %v3764_v49, %s8588_s7  ;;  %v3685_v50 = vmul.f32 %v8049_v3, %v3684_v34  ;;  %v7362_v32 = vmul.f32 -1.442695, %v10868_v8 }
 0xb6a   : > { %v3686_v51 = vadd.f32 %v8049_v3, %v3685_v50 }
 0xb6b   : > { %v3747_v10 = vpop.permute.xlu1 %3746 }
 0xb6c   : > { %v3765_v59 = vmul.f32 %v3747_v10, %v11097_v4  ;;  %v3690_v26 = vsel %vm3689_vm5, %v8049_v3, %v3686_v51 }
 0xb6d   : > { %v4137_v43 = vpop.permute.xlu0 %4136  ;;  %v11114_v54 = vsel %vm3692_vm6, %v3694_v33, %v3690_v26 }
 0xb6e   : > { %3786 = vrot.lane.b32.xlu2 %v3765_v59, %s8588_s7  ;;  %v4155_v35 = vmul.f32 %v4137_v43, %v11106_v42 }
 0xb70   : > { %4176 = vrot.lane.b32.xlu1 %v4155_v35, %s8588_s7 }
 0xb90   : > { %v3779_v2 = vpop.permute.xlu2 %3778 }
 0xb91   : > { %v11112_v16 = vadd.f32 %v3779_v2, %v3721_v57 }
 0xb93   : > { %8050 = vtanh.f32 %v11112_v16 }
 0xb94   : > { %8052 = vpow2.f32 %v7362_v32 }
 0xb95   : > { %8054 = vpow2.f32 %v7361_v31 }
 0xb98   : > { %v3749_v47 = vpop.permute.xlu2 %3748 }
 0xb99   : > { %v3766_v23 = vmul.f32 %v3749_v47, %v11114_v54  ;;  %v8051_v56 = vpop.eup %8050 }
 0xb9a   : > { %v8053_v62 = vpop.eup %8052 }
 0xb9b   : > { %3788 = vrot.lane.b32.xlu2 %v3766_v23, %s8588_s7  ;;  %v3981_v55 = vadd.f32 1.0, %v8053_v62  ;;  %v8055_v49 = vpop.eup %8054 }
 0xb9c   : > { %v3980_v63 = vadd.f32 1.0, %v8055_v49 }
 0xb9d   : > { %8056 = vrcp.f32 %v3981_v55  ;;  %v4098_v50 = vand.u32 2147483648, %v3981_v55  ;;  %vm4092_vm8 = vweird.f32 %v3981_v55  ;;  %v4096_v2 = vand.u32 2147483647, %v3981_v55 }
 0xb9e   : > { %8058 = vpow2.f32 %v7346_v38  ;;  %v4083_v62 = vand.u32 2147483648, %v3980_v63  ;;  %vm4077_vm12 = vweird.f32 %v3980_v63  ;;  %v3722_v38 = vmul.f32 %v11008_v41, %v10620_v6 }
 0xb9f   : > { %8060 = vrcp.f32 %v3980_v63  ;;  %v4099_v33 = vor.u32 1.1754944e-38, %v4098_v50  ;;  %vm4097_vm10 = vcmp.eq.f32.partialorder %v4096_v2, 8.507059e+37  ;;  %v3723_v2 = vmul.f32 %v11062_v19, %v10615_v53 }
 0xba0   : > { %v4141_v57 = vpop.permute.xlu2 %4140 }
 0xba3   : > { %3826 = vrot.lane.b32.xlu2 %v8051_v56, %s8587_s6  ;;  %v8057_v8 = vpop.eup %8056 }
 0xba4   : > { %v8059_v18 = vpop.eup %8058  ;;  %v4088_v10 = vmul.f32 %v8057_v8, %v3981_v55  ;;  %vm4093_vm7 = vweird.f32 %v8057_v8  ;;  %v4081_v55 = vand.u32 2147483647, %v3980_v63 }
 0xba5   : > { %v11123_v28 = vadd.f32 1.0, %v8059_v18  ;;  %v8061_v59 = vpop.eup %8060  ;;  %vm4094_vm9 = vmor %vm4092_vm8, %vm4093_vm7 }
 0xba6   : > { %v4089_v27 = vsub.f32 1.0, %v4088_v10  ;;  %v4073_v35 = vmul.f32 %v8061_v59, %v3980_v63  ;;  %vm4078_vm11 = vweird.f32 %v8061_v59  ;;  %vm4082_vm14 = vcmp.eq.f32.partialorder %v4081_v55, 8.507059e+37 }
 0xba7   : > { %8062 = vrcp.f32 %v11123_v28  ;;  %vm4079_vm13 = vmor %vm4077_vm12, %vm4078_vm11  ;;  %v3708_v6 = vand.u32 2147483648, %v11123_v28  ;;  %vm3702_vm1 = vweird.f32 %v11123_v28  ;;  %v4115_v55 = vmul.f32 %v11106_v42, %v10649_v13 }
 0xba8   : > { %v4090_v22 = vmul.f32 %v8057_v8, %v4089_v27  ;;  %v4074_v40 = vsub.f32 1.0, %v4073_v35  ;;  %v3726_v13 = vmul.f32 %v11114_v54, %v10678_v39 }
 0xbaa   : > { %v4091_v20 = vadd.f32 %v8057_v8, %v4090_v22  ;;  %v4075_v48 = vmul.f32 %v8061_v59, %v4074_v40 }
 0xbac   : > { %v4095_v26 = vsel %vm4094_vm9, %v8057_v8, %v4091_v20  ;;  %v4076_v31 = vadd.f32 %v8061_v59, %v4075_v48  ;;  %v3709_v20 = vor.u32 1.1754944e-38, %v3708_v6 }
 0xbad   : > { %v8063_v3 = vpop.eup %8062  ;;  %v11139_v23 = vsel %vm4097_vm10, %v4099_v33, %v4095_v26 }
 0xbae   : > { %v3698_v46 = vmul.f32 %v8063_v3, %v11123_v28  ;;  %v4157_v56 = vmul.f32 %v4141_v57, %v11139_v23  ;;  %v4080_v18 = vsel %vm4079_vm13, %v8061_v59, %v4076_v31  ;;  %vm3703_vm15 = vweird.f32 %v8063_v3 }
 0xbaf   : > { %vm3704_vm2 = vmor %vm3702_vm1, %vm3703_vm15  ;;  %v4113_v59 = vmul.f32 %v11050_v37, %v10645_v29  ;;  %v4112_v57 = vmul.f32 %v11024_v15, %v10631_v58  ;;  %v4117_v39 = vmul.f32 %v11139_v23, %v10672_v0 }
 0xbb0   : > { %v3699_v32 = vsub.f32 1.0, %v3698_v46 }
 0xbb2   : > { %v3700_v49 = vmul.f32 %v8063_v3, %v3699_v32 }
 0xbb3   : > { %v4171_v53 = vpop.permute.xlu2 %4170 }
 0xbb8   : > { %v3777_v7 = vpop.permute.xlu1 %3776 }
 0xbb9   : > { %v11127_v17 = vadd.f32 %v3777_v7, %v3720_v45  ;;  %v4084_v45 = vor.u32 1.1754944e-38, %v4083_v62  ;;  %v3725_v62 = vmul.f32 %v11097_v4, %v10647_v14 }
 0xbba   : > { %v4167_v43 = vpop.permute.xlu0 %4166 }
 0xbbb   : > { %8064 = vtanh.f32 %v11127_v17  ;;  %v11133_v12 = vadd.f32 %v4167_v43, %v4110_v52  ;;  %v11148_v27 = vsel %vm4082_vm14, %v4084_v45, %v4080_v18  ;;  %v3701_v52 = vadd.f32 %v8063_v3, %v3700_v49 }
 0xbbc   : > { %v3706_v43 = vand.u32 2147483647, %v11123_v28 }
 0xbbd   : > { %8066 = vtanh.f32 %v11133_v12  ;;  %v3705_v35 = vsel %vm3704_vm2, %v8063_v3, %v3701_v52 }
 0xbbe   : > { %vm3707_vm3 = vcmp.eq.f32.partialorder %v3706_v43, 8.507059e+37 }
 0xbbf   : > { %v11164_v28 = vsel %vm3707_vm3, %v3709_v20, %v3705_v35 }
 0xbc1   : > { %v8065_v34 = vpop.eup %8064 }
 0xbc2   : > { %3824 = vrot.lane.b32.xlu1 %v8065_v34, %s8587_s6  ;;  %v3751_v51 = vpop.permute.xlu0 %3750  ;;  %v4169_v47 = vpop.permute.xlu1 %4168  ;;  %v4111_v34 = vmul.f32 %v10986_v36, %v10604_v11  ;;  %v4114_v11 = vmul.f32 %v11083_v24, %v10658_v1 }
 0xbc3   : > { %v8067_v5 = vpop.eup %8066  ;;  %v3767_v3 = vmul.f32 %v3751_v51, %v11164_v28  ;;  %v3724_v51 = vmul.f32 %v11090_v30, %v10633_v44 }
 0xbc4   : > { %4214 = vrot.lane.b32.xlu2 %v8067_v5, %s8587_s6  ;;  %v11166_v46 = vadd.f32 %v4169_v47, %v4111_v34  ;;  %v11184_v47 = vadd.f32 %v4171_v53, %v4112_v57 }
 0xbc8   : > { %v3787_v58 = vpop.permute.xlu2 %3786 }
 0xbca   : > { %4180 = vrot.lane.b32.xlu1 %v4157_v56, %s8588_s7  ;;  %v3781_v8 = vpop.permute.xlu0 %3780  ;;  %v4139_v7 = vpop.permute.xlu1 %4138 }
 0xbcb   : > { %v11145_v10 = vadd.f32 %v3781_v8, %v3722_v38  ;;  %v4156_v63 = vmul.f32 %v4139_v7, %v11148_v27  ;;  %v11198_v38 = vadd.f32 %v3787_v58, %v3725_v62 }
 0xbcd   : > { %8068 = vtanh.f32 %v11145_v10  ;;  %4178 = vrot.lane.b32.xlu0 %v4156_v63, %s8588_s7 }
 0xbd2   : > { %v4173_v22 = vpop.permute.xlu0 %4172  ;;  %v3783_v29 = vpop.permute.xlu1 %3782 }
 0xbd3   : > { %v8069_v40 = vpop.eup %8068  ;;  %v11159_v50 = vadd.f32 %v4173_v22, %v4113_v59  ;;  %v11170_v48 = vadd.f32 %v3783_v29, %v3723_v2 }
 0xbd4   : > { %3828 = vrot.lane.b32.xlu1 %v8069_v40, %s8587_s6 }
 0xbd5   : > { %8070 = vtanh.f32 %v11159_v50  ;;  %3790 = vrot.lane.b32.xlu0 %v3767_v3, %s8588_s7 }
 0xbd6   : > { %8072 = vtanh.f32 %v11170_v48 }
 0xbd7   : > { %8074 = vtanh.f32 %v11166_v46 }
 0xbda   : > { %v4175_v5 = vpop.permute.xlu0 %4174  ;;  %v3785_v32 = vpop.permute.xlu1 %3784 }
 0xbdb   : > { %v8071_v26 = vpop.eup %8070  ;;  %v11179_v33 = vadd.f32 %v4175_v5, %v4114_v11  ;;  %v11187_v1 = vadd.f32 %v3785_v32, %v3724_v51 }
 0xbdc   : > { %4220 = vrot.lane.b32.xlu1 %v8071_v26, %s8587_s6  ;;  %v8073_v31 = vpop.eup %8072  ;;  %v4116_v26 = vmul.f32 %v11148_v27, %v10684_v21 }
 0xbdd   : > { %8076 = vtanh.f32 %v11179_v33  ;;  %v8075_v56 = vpop.eup %8074  ;;  %3830 = vrot.lane.b32.xlu2 %v8073_v31, %s8587_s6 }
 0xbde   : > { %8078 = vtanh.f32 %v11187_v1  ;;  %4216 = vrot.lane.b32.xlu0 %v8075_v56, %s8587_s6 }
 0xbdf   : > { %8080 = vtanh.f32 %v11184_v47 }
 0xbe2   : > { %v4177_v49 = vpop.permute.xlu1 %4176 }
 0xbe3   : > { %v8077_v44 = vpop.eup %8076  ;;  %v11200_v18 = vadd.f32 %v4177_v49, %v4115_v55 }
 0xbe4   : > { %4222 = vrot.lane.b32.xlu1 %v8077_v44, %s8587_s6  ;;  %v8079_v8 = vpop.eup %8078 }
 0xbe5   : > { %v8081_v45 = vpop.eup %8080  ;;  %3832 = vrot.lane.b32.xlu2 %v8079_v8, %s8587_s6  ;;  %8082 = vtanh.f32 %v11200_v18 }
 0xbe6   : > { %4218 = vrot.lane.b32.xlu0 %v8081_v45, %s8587_s6  ;;  %8084 = vtanh.f32 %v11198_v38 }
 0xbeb   : > { %v8083_v14 = vpop.eup %8082 }
 0xbec   : > { %v8085_v7 = vpop.eup %8084 }
 0xbed   : > { %4224 = vrot.lane.b32.xlu2 %v8083_v14, %s8587_s6 }
 0xbee   : > { %3834 = vrot.lane.b32.xlu0 %v8085_v7, %s8587_s6 }
 0xbf5   : > { %v3789_v52 = vpop.permute.xlu2 %3788 }
 0xbf6   : > { %v11210_v63 = vadd.f32 %v3789_v52, %v3726_v13 }
 0xbf8   : > { %8086 = vtanh.f32 %v11210_v63 }
 0xbfd   : > { %v3827_v43 = vpop.permute.xlu2 %3826 }
 0xbfe   : > { %v8087_v6 = vpop.eup %8086  ;;  %v3849_v35 = vmul.f32 %v3827_v43, %v10850_v9 }
 0xbff   : > { %3836 = vrot.lane.b32.xlu2 %v8087_v6, %s8587_s6 }
 0xc1e   : > { %v4215_v2 = vpop.permute.xlu2 %4214 }
 0xc1f   : > { %v4238_v32 = vmul.f32 %v4215_v2, %v10923_v25 }
 0xc34   : > { %v3825_v59 = vpop.permute.xlu1 %3824 }
 0xc35   : > { %v3848_v22 = vmul.f32 %v3825_v59, %v10915_v61  ;;  %v3727_v61 = vmul.f32 %v11164_v28, %v10667_v60 }
 0xc37   : > { %v4254_v40 = vpack.c.bf16 %v3849_v35, %v3848_v22  ;;  %v3831_v9 = vpop.permute.xlu2 %3830 }
 0xc38   : > { %v3851_v62 = vmul.f32 %v3831_v9, %v11062_v19 }
 0xc39   : > { %4262 = vrot.lane.b32.xlu0 %v4254_v40, %s8588_s7 }
 0xc3c   : > { %v4181_v20 = vpop.permute.xlu1 %4180 }
 0xc3d   : > { %v11219_v34 = vadd.f32 %v4181_v20, %v4117_v39 }
 0xc3f   : > { %8088 = vtanh.f32 %v11219_v34  ;;  %v4179_v29 = vpop.permute.xlu0 %4178  ;;  %v3833_v31 = vpop.permute.xlu2 %3832 }
 0xc40   : > { %v11232_v58 = vadd.f32 %v4179_v29, %v4116_v26  ;;  %v3852_v19 = vmul.f32 %v3833_v31, %v11090_v30  ;;  %v8569_v30 = vld [vmem:[%s13012_s2 + $0x10] sm:$0xff] }
 0xc45   : > { %v8089_v3 = vpop.eup %8088 }
 0xc46   : > { %4228 = vrot.lane.b32.xlu2 %v8089_v3, %s8587_s6  ;;  %v3829_v11 = vpop.permute.xlu1 %3828 }
 0xc47   : > { %v3791_v53 = vpop.permute.xlu0 %3790  ;;  %v3850_v44 = vmul.f32 %v3829_v11, %v11008_v41  ;;  %v4225_v25 = vpop.permute.xlu2 %4224 }
 0xc48   : > { %v11225_v5 = vadd.f32 %v3791_v53, %v3727_v61  ;;  %v4243_v45 = vmul.f32 %v4225_v25, %v11106_v42 }
 0xc49   : > { %v4255_v21 = vpack.c.bf16 %v3851_v62, %v3850_v44 }
 0xc4a   : > { %8090 = vtanh.f32 %v11225_v5 }
 0xc4b   : > { %8092 = vtanh.f32 %v11232_v58 }
 0xc4e   : > { %v4221_v0 = vpop.permute.xlu1 %4220 }
 0xc4f   : > { %v4241_v13 = vmul.f32 %v4221_v0, %v11050_v37  ;;  %v8568_v37 = vld [vmem:[%s13011_s1 + $0x18] sm:$0xff] }
 0xc50   : > { %v4217_v57 = vpop.permute.xlu0 %4216  ;;  %v8091_v51 = vpop.eup %8090 }
 0xc51   : > { %v4239_v56 = vmul.f32 %v4217_v57, %v10986_v36  ;;  %3838 = vrot.lane.b32.xlu0 %v8091_v51, %s8587_s6  ;;  %v8093_v36 = vpop.eup %8092  ;;  %v13126_v57 = vld [vmem:[#allocation18_spill] sm:$0xff] }
 0xc53   : > { %v4644_v60 = vpack.c.bf16 %v4239_v56, %v4238_v32 }
 0xc55   : > { %4652 = vrot.lane.b32.xlu1 %v4644_v60, %s8588_s7 }
 0xc56   : > { %v4223_v49 = vpop.permute.xlu1 %4222 }
 0xc57   : > { %v4242_v8 = vmul.f32 %v4223_v49, %v11083_v24 }
 0xc58   : > { %v4219_v55 = vpop.permute.xlu0 %4218 }
 0xc59   : > { %4264 = vrot.lane.b32.xlu0 %v4255_v21, %s8588_s7  ;;  %v4240_v41 = vmul.f32 %v4219_v55, %v11024_v15  ;;  %v4646_v14 = vpack.c.bf16 %v4243_v45, %v4242_v8  ;;  %v8567_v15 = vld [vmem:[%s13012_s2 + $0x18] sm:$0xff]  ;;  %v3837_v42 = vpop.permute.xlu2 %3836  ;;  %v13127_v55 = vld [vmem:[#allocation21_spill] sm:$0xff] }
 0xc5a   : > { %v3854_v35 = vmul.f32 %v3837_v42, %v11114_v54  ;;  %v13129_v42 = vld [vmem:[#allocation27_spill] sm:$0xff] }
 0xc5b   : > { %v4645_v6 = vpack.c.bf16 %v4241_v13, %v4240_v41 }
 0xc5d   : > { %4226 = vrot.lane.b32.xlu1 %v8093_v36, %s8587_s6  ;;  %v11302_v36 = vld [vmem:[%s13013_s3 + $0x1] ss:$0 sm:$0xff] }
 0xc60   : > { %v3835_v7 = vpop.permute.xlu0 %3834 }
 0xc61   : > { %v3853_v52 = vmul.f32 %v3835_v7, %v11097_v4  ;;  %4656 = vrot.lane.b32.xlu0 %v4646_v14, %s8588_s7  ;;  %v8570_v4 = vld [vmem:[%s13011_s1 + $0x10] sm:$0xff] }
 0xc63   : > { %v4256_v43 = vpack.c.bf16 %v3853_v52, %v3852_v19  ;;  %v13128_v19 = vld [vmem:[#allocation24_spill] sm:$0xff] }
 0xc65   : > { %4266 = vrot.lane.b32.xlu2 %v4256_v43, %s8588_s7  ;;  %4654 = vrot.lane.b32.xlu1 %v4645_v6, %s8588_s7 }
 0xca0   : > { %v4229_v2 = vpop.permute.xlu2 %4228 }
 0xca1   : > { %v4245_v3 = vmul.f32 %v4229_v2, %v11139_v23  ;;  %v11280_v23 = vld [vmem:[%s13013_s3] ss:$0 sm:$0xff] }
 0xca2   : > { %v660_v51 = vadd.f32 %v11280_v23, %v13126_v57  ;;  %v663_v49 = vadd.f32 %v11280_v23, %v13127_v55  ;;  %v665_v13 = vadd.f32 %v11280_v23, %v13128_v19 }
 0xcab   : > { %v4263_v24 = vpop.permute.xlu0 %4262 }
 0xcac   : > { %7363 = vmatmul.msk.bf16.vlgmr.msrb.gmra.mxu1 %vm250_vm0, %v4263_v24  ;;  %7375 = vmatmul.msk.bf16.vlgmr.msrb.gmra.mxu2 %vm250_vm0, %v4263_v24 }
 0xcad   : > { %6196 = vmatpush.bf16.msrb.mxu1 %v8567_v15  ;;  %6557 = vmatpush.bf16.msrb.mxu2 %v8568_v37 }
 0xcb1   : > { %6197 = vmatpush.bf16.msrb.mxu1 %v8569_v30  ;;  %6558 = vmatpush.bf16.msrb.mxu2 %v8570_v4 }
 0xcbf   : > { %v4267_v9 = vpop.permute.xlu2 %4266 }
 0xcc3   : > { %v3839_v59 = vpop.permute.xlu0 %3838 }
 0xcc4   : > { %v3855_v22 = vmul.f32 %v3839_v59, %v11164_v28  ;;  %v668_v59 = vadd.f32 %v11280_v23, %v13129_v42 }
 0xcc6   : > { %v4257_v40 = vpack.c.bf16 %v3855_v22, %v3854_v35 }
 0xcc7   : > { %v4653_v39 = vpop.permute.xlu1 %4652 }
 0xcc8   : > { %7379 = vmatmul.msk.bf16.vlgmr.msrb.gmra.mxu3 %vm250_vm0, %v4653_v39  ;;  %4268 = vrot.lane.b32.xlu1 %v4257_v40, %s8588_s7 }
 0xcc9   : > { %6614 = vmatpush.bf16.msrb.mxu3 %v8567_v15 }
 0xccb   : > { %v4265_v20 = vpop.permute.xlu0 %4264 }
 0xccc   : > { %7364 = vmatmul.msk.bf16.gmra.mxu1 %vm250_vm0, %v4265_v20  ;;  %7376 = vmatmul.msk.bf16.gmra.mxu2 %vm250_vm0, %v4265_v20 }
 0xccd   : > { %6615 = vmatpush.bf16.msrb.mxu3 %v8569_v30 }
 0xccf   : > { %v4227_v29 = vpop.permute.xlu1 %4226 }
 0xcd0   : > { %v4244_v54 = vmul.f32 %v4227_v29, %v11148_v27  ;;  %v13125_v27 = vld [vmem:[#allocation15_spill] sm:$0xff] }
 0xcd1   : > { %v658_v53 = vadd.f32 %v11280_v23, %v13125_v27 }
 0xcd2   : > { %v4647_v28 = vpack.c.bf16 %v4245_v3, %v4244_v54  ;;  %v13130_v54 = vld [vmem:[#allocation30_spill] sm:$0xff] }
 0xcd3   : > { %v4657_v61 = vpop.permute.xlu0 %4656 }
 0xcd4   : > { %4658 = vrot.lane.b32.xlu2 %v4647_v28, %s8588_s7  ;;  %v670_v28 = vadd.f32 %v11280_v23, %v13130_v54 }
 0xcd7   : > { %v4655_v11 = vpop.permute.xlu1 %4654 }
 0xcd8   : > { %7380 = vmatmul.msk.bf16.gmra.mxu3 %vm250_vm0, %v4655_v11 }
 0xcdc   : > { %7365 = vmatmul.msk.bf16.gmra.mxu1 %vm250_vm0, %v4267_v9  ;;  %7377 = vmatmul.msk.bf16.gmra.mxu2 %vm250_vm0, %v4267_v9 }
 0xce8   : > { %7381 = vmatmul.msk.bf16.gmra.mxu3 %vm250_vm0, %v4657_v61 }
 0xd29   : > { %v4291_v0 = vpop.f32.mrf.mxu1 }
 0xd2a   : > { %v11284_v26 = vadd.f32 %v4291_v0, %v658_v53 }
 0xd2c   : > { %8094 = vtanh.f32 %v11284_v26 }
 0xd2e   : > { %v4659_v32 = vpop.permute.xlu2 %4658 }
 0xd2f   : > { %7382 = vmatmul.msk.bf16.gmra.mxu3 %vm250_vm0, %v4659_v32  ;;  %v4624_v21 = vpop.f32.mrf.mxu2 }
 0xd30   : > { %v4625_v8 = vadd.f32 %v11302_v36, %v4624_v21 }
 0xd31   : > { %v4293_v31 = vpop.f32.mrf.mxu1 }
 0xd32   : > { %v8095_v56 = vpop.eup %8094  ;;  %v11290_v60 = vadd.f32 %v4293_v31, %v660_v51 }
 0xd33   : > { %4495 = vrot.lane.b32.xlu0 %v8095_v56, %s8587_s6 }
 0xd34   : > { %8096 = vtanh.f32 %v11290_v60  ;;  %v7368_v19 = vmul.f32 -1.442695, %v11290_v60 }
 0xd37   : > { %v4626_v25 = vpop.f32.mrf.mxu2 }
 0xd38   : > { %v4627_v6 = vadd.f32 %v11302_v36, %v4626_v25 }
 0xd3a   : > { %v8097_v44 = vpop.eup %8096  ;;  %v4269_v62 = vpop.permute.xlu1 %4268 }
 0xd3b   : > { %4497 = vrot.lane.b32.xlu1 %v8097_v44, %s8587_s6  ;;  %7366 = vmatmul.msk.bf16.gmra.mxu1 %vm250_vm0, %v4269_v62 }
 0xd3c   : > { %7378 = vmatmul.msk.bf16.gmra.mxu2 %vm250_vm0, %v4269_v62 }
 0xd49   : > { %v4296_v45 = vpop.f32.mrf.mxu1 }
 0xd4a   : > { %v11305_v41 = vadd.f32 %v4296_v45, %v663_v49  ;;  %v7367_v45 = vmul.f32 -1.442695, %v11284_v26 }
 0xd4b   : > { %v4681_v14 = vpop.f32.mrf.mxu3 }
 0xd4c   : > { %v11307_v7 = vadd.f32 %v4681_v14, %v4625_v8  ;;  %8098 = vtanh.f32 %v11305_v41 }
 0xd4e   : > { %8100 = vtanh.f32 %v11307_v7 }
 0xd4f   : > { %v4629_v52 = vpop.f32.mrf.mxu2 }
 0xd50   : > { %v4630_v35 = vadd.f32 %v11302_v36, %v4629_v52 }
 0xd51   : > { %v4298_v43 = vpop.f32.mrf.mxu1 }
 0xd52   : > { %v8099_v24 = vpop.eup %8098  ;;  %v11314_v15 = vadd.f32 %v4298_v43, %v665_v13 }
 0xd53   : > { %v4683_v37 = vpop.f32.mrf.mxu3  ;;  %4499 = vrot.lane.b32.xlu1 %v8099_v24, %s8587_s6 }
 0xd54   : > { %v8101_v30 = vpop.eup %8100  ;;  %v11316_v4 = vadd.f32 %v4683_v37, %v4627_v6  ;;  %8102 = vtanh.f32 %v11314_v15 }
 0xd55   : > { %4885 = vrot.lane.b32.xlu2 %v8101_v30, %s8587_s6 }
 0xd56   : > { %8104 = vtanh.f32 %v11316_v4  ;;  %v7384_v54 = vmul.f32 -1.442695, %v11316_v4 }
 0xd57   : > { %v4631_v39 = vpop.f32.mrf.mxu2 }
 0xd58   : > { %v4632_v11 = vadd.f32 %v11302_v36, %v4631_v39 }
 0xd59   : > { %v4301_v22 = vpop.f32.mrf.mxu1 }
 0xd5a   : > { %v8103_v40 = vpop.eup %8102  ;;  %v11325_v20 = vadd.f32 %v4301_v22, %v668_v59 }
 0xd5b   : > { %v4686_v2 = vpop.f32.mrf.mxu3 }
 0xd5c   : > { %v8105_v29 = vpop.eup %8104  ;;  %v11327_v3 = vadd.f32 %v4686_v2, %v4630_v35  ;;  %8106 = vtanh.f32 %v11325_v20 }
 0xd5d   : > { %4887 = vrot.lane.b32.xlu0 %v8105_v29, %s8587_s6  ;;  %4501 = vrot.lane.b32.xlu2 %v8103_v40, %s8587_s6 }
 0xd5e   : > { %8108 = vtanh.f32 %v11327_v3 }
 0xd5f   : > { %v4634_v51 = vpop.f32.mrf.mxu2 }
 0xd60   : > { %v4635_v32 = vadd.f32 %v11302_v36, %v4634_v51 }
 0xd61   : > { %v4303_v9 = vpop.f32.mrf.mxu1 }
 0xd62   : > { %v8107_v61 = vpop.eup %8106  ;;  %v11336_v27 = vadd.f32 %v4303_v9, %v670_v28  ;;  %v7383_v9 = vmul.f32 -1.442695, %v11307_v7 }
 0xd63   : > { %v4688_v53 = vpop.f32.mrf.mxu3 }
 0xd64   : > { %v8109_v0 = vpop.eup %8108  ;;  %v11338_v57 = vadd.f32 %v4688_v53, %v4632_v11  ;;  %8110 = vtanh.f32 %v11336_v27 }
 0xd65   : > { %4503 = vrot.lane.b32.xlu2 %v8107_v61, %s8587_s6  ;;  %4889 = vrot.lane.b32.xlu0 %v8109_v0, %s8587_s6 }
 0xd66   : > { %8112 = vtanh.f32 %v11338_v57 }
 0xd67   : > { %v4636_v21 = vpop.f32.mrf.mxu2 }
 0xd68   : > { %v4637_v55 = vadd.f32 %v11302_v36, %v4636_v21 }
 0xd6a   : > { %v8111_v31 = vpop.eup %8110 }
 0xd6b   : > { %v4691_v56 = vpop.f32.mrf.mxu3 }
 0xd6c   : > { %v8113_v44 = vpop.eup %8112  ;;  %v11345_v62 = vadd.f32 %v4691_v56, %v4635_v32  ;;  %v7369_v32 = vmul.f32 -1.442695, %v11305_v41  ;;  %v7385_v56 = vmul.f32 -1.442695, %v11327_v3  ;;  %v7370_v41 = vmul.f32 -1.442695, %v11314_v15 }
 0xd6d   : > { %4505 = vrot.lane.b32.xlu0 %v8111_v31, %s8587_s6  ;;  %4891 = vrot.lane.b32.xlu1 %v8113_v44, %s8587_s6  ;;  %v7372_v3 = vmul.f32 -1.442695, %v11336_v27 }
 0xd6e   : > { %8114 = vtanh.f32 %v11345_v62 }
 0xd73   : > { %v4693_v49 = vpop.f32.mrf.mxu3 }
 0xd74   : > { %v8115_v25 = vpop.eup %8114  ;;  %v11351_v8 = vadd.f32 %v4693_v49, %v4637_v55 }
 0xd75   : > { %4893 = vrot.lane.b32.xlu1 %v8115_v25, %s8587_s6 }
 0xd76   : > { %8116 = vtanh.f32 %v11351_v8 }
 0xd77   : > { %8118 = vpow2.f32 %v7367_v45 }
 0xd78   : > { %8120 = vpow2.f32 %v7368_v19  ;;  %v7386_v19 = vmul.f32 -1.442695, %v11338_v57 }
 0xd7c   : > { %v8117_v14 = vpop.eup %8116 }
 0xd7d   : > { %4895 = vrot.lane.b32.xlu2 %v8117_v14, %s8587_s6  ;;  %v8119_v13 = vpop.eup %8118 }
 0xd7e   : > { %v4343_v52 = vadd.f32 1.0, %v8119_v13  ;;  %v8121_v6 = vpop.eup %8120 }
 0xd7f   : > { %v4344_v43 = vadd.f32 1.0, %v8121_v6  ;;  %v7371_v6 = vmul.f32 -1.442695, %v11325_v20 }
 0xd80   : > { %8122 = vrcp.f32 %v4343_v52  ;;  %v4362_v40 = vand.u32 2147483648, %v4343_v52  ;;  %vm4356_vm5 = vweird.f32 %v4343_v52  ;;  %v4360_v60 = vand.u32 2147483647, %v4343_v52 }
 0xd81   : > { %8124 = vrcp.f32 %v4344_v43  ;;  %v4377_v0 = vand.u32 2147483648, %v4344_v43  ;;  %vm4371_vm9 = vweird.f32 %v4344_v43  ;;  %v4375_v51 = vand.u32 2147483647, %v4344_v43 }
 0xd82   : > { %v4363_v29 = vor.u32 1.1754944e-38, %v4362_v40  ;;  %vm4361_vm7 = vcmp.eq.f32.partialorder %v4360_v60, 8.507059e+37  ;;  %8126 = vpow2.f32 %v7384_v54 }
 0xd83   : > { %8128 = vpow2.f32 %v7383_v9  ;;  %v4378_v31 = vor.u32 1.1754944e-38, %v4377_v0  ;;  %vm4376_vm11 = vcmp.eq.f32.partialorder %v4375_v51, 8.507059e+37  ;;  %v13132_v9 = vld [vmem:[#allocation36_spill] sm:$0xff] }
 0xd84   : > { %8130 = vpow2.f32 %v7369_v32 }
 0xd85   : > { %8132 = vpow2.f32 %v7385_v56 }
 0xd86   : > { %v8123_v24 = vpop.eup %8122 }
 0xd87   : > { %v4352_v37 = vmul.f32 %v8123_v24, %v4343_v52  ;;  %v8125_v30 = vpop.eup %8124  ;;  %vm4357_vm4 = vweird.f32 %v8123_v24 }
 0xd88   : > { %v4367_v59 = vmul.f32 %v8125_v30, %v4344_v43  ;;  %vm4358_vm6 = vmor %vm4356_vm5, %vm4357_vm4  ;;  %vm4372_vm8 = vweird.f32 %v8125_v30  ;;  %v8127_v21 = vpop.eup %8126 }
 0xd89   : > { %v4353_v26 = vsub.f32 1.0, %v4352_v37  ;;  %vm4373_vm10 = vmor %vm4371_vm9, %vm4372_vm8  ;;  %v8129_v49 = vpop.eup %8128  ;;  %v11370_v25 = vadd.f32 1.0, %v8127_v21  ;;  %v7387_v37 = vmul.f32 -1.442695, %v11345_v62 }
 0xd8a   : > { %v4368_v22 = vsub.f32 1.0, %v4367_v59  ;;  %v11373_v45 = vadd.f32 1.0, %v8129_v49  ;;  %v8131_v14 = vpop.eup %8130 }
 0xd8b   : > { %v4354_v42 = vmul.f32 %v8123_v24, %v4353_v26  ;;  %8134 = vrcp.f32 %v11370_v25  ;;  %v8133_v13 = vpop.eup %8132  ;;  %v11378_v52 = vadd.f32 1.0, %v8131_v14  ;;  %vm4761_vm15 = vweird.f32 %v11370_v25 }
 0xd8c   : > { %v4369_v2 = vmul.f32 %v8125_v30, %v4368_v22  ;;  %8136 = vpow2.f32 %v7370_v41  ;;  %v11382_v15 = vadd.f32 1.0, %v8133_v13  ;;  %vm4746_vm2 = vweird.f32 %v11373_v45 }
 0xd8d   : > { %v4355_v35 = vadd.f32 %v8123_v24, %v4354_v42  ;;  %8138 = vrcp.f32 %v11373_v45  ;;  %v4390_v14 = vand.u32 2147483647, %v11378_v52  ;;  %v4392_v13 = vand.u32 2147483648, %v11378_v52 }
 0xd8e   : > { %v4370_v53 = vadd.f32 %v8125_v30, %v4369_v2  ;;  %8140 = vpow2.f32 %v7372_v3  ;;  %vm4386_vm14 = vweird.f32 %v11378_v52 }
 0xd8f   : > { %v4359_v39 = vsel %vm4358_vm6, %v8123_v24, %v4355_v35  ;;  %8142 = vpow2.f32 %v7386_v19  ;;  %v13131_v24 = vld [vmem:[#allocation33_spill] sm:$0xff]  ;;  %v4750_v19 = vand.u32 2147483647, %v11373_v45  ;;  %vm11511_vm8 = vcmp.eq.f32.partialorder %v4390_v14, 8.507059e+37 }
 0xd90   : > { %v11359_v28 = vsel %vm4361_vm7, %v4363_v29, %v4359_v39  ;;  %v4374_v4 = vsel %vm4373_vm10, %v8125_v30, %v4370_v53  ;;  %v673_v27 = vadd.f32 %v11280_v23, %v13131_v24  ;;  %8144 = vrcp.f32 %v11378_v52 }
 0xd91   : > { %v11366_v7 = vsel %vm4376_vm11, %v4378_v31, %v4374_v4  ;;  %v11384_v43 = vpop.eup %8134  ;;  %8146 = vpow2.f32 %v7371_v6  ;;  %v7388_v53 = vmul.f32 -1.442695, %v11351_v8  ;;  %vm11482_vm4 = vcmp.eq.f32.partialorder %v4750_v19, 8.507059e+37 }
 0xd92   : > { %v8137_v57 = vpop.eup %8136  ;;  %8148 = vrcp.f32 %v11382_v15  ;;  %v4757_v59 = vmul.f32 %v11384_v43, %v11370_v25  ;;  %vm4762_vm12 = vweird.f32 %v11384_v43  ;;  %vm4776_vm10 = vweird.f32 %v11382_v15 }
 0xd93   : > { %v11390_v30 = vpop.eup %8138  ;;  %v11398_v22 = vadd.f32 1.0, %v8137_v57  ;;  %v4752_v57 = vand.u32 2147483648, %v11373_v45  ;;  %vm11457_vm1 = vmor %vm4761_vm15, %vm4762_vm12  ;;  %v4780_v14 = vand.u32 2147483647, %v11382_v15 }
 0xd94   : > { %v8141_v20 = vpop.eup %8140  ;;  %v4742_v60 = vmul.f32 %v11390_v30, %v11373_v45  ;;  %v4758_v54 = vsub.f32 1.0, %v4757_v59  ;;  %vm4747_vm13 = vweird.f32 %v11390_v30 }
 0xd95   : > { %v8143_v35 = vpop.eup %8142  ;;  %v11402_v62 = vadd.f32 1.0, %v8141_v20  ;;  %vm11478_vm3 = vmor %vm4746_vm2, %vm4747_vm13  ;;  %vm4401_vm12 = vweird.f32 %v11398_v22 }
 0xd96   : > { %v11400_v40 = vpop.eup %8144  ;;  %v11406_v39 = vadd.f32 1.0, %v8143_v35  ;;  %v4743_v31 = vsub.f32 1.0, %v4742_v60  ;;  %v4767_v60 = vand.u32 2147483648, %v11370_v25 }
 0xd97   : > { %v4382_v32 = vmul.f32 %v11400_v40, %v11378_v52  ;;  %vm4387_vm5 = vweird.f32 %v11400_v40  ;;  %v4407_v52 = vand.u32 2147483648, %v11398_v22 }
 0xd98   : > { %v4744_v41 = vmul.f32 %v11390_v30, %v4743_v31  ;;  %vm11522_vm9 = vmor %vm4386_vm14, %vm4387_vm5  ;;  %vm4781_vm14 = vcmp.eq.f32.partialorder %v4780_v14, 8.507059e+37  ;;  %v4435_v14 = vand.u32 2147483647, %v11402_v62  ;;  %vm4791_vm5 = vweird.f32 %v11406_v39 }
 0xda5   : > { %v4496_v11 = vpop.permute.xlu0 %4495 }
 0xda6   : > { %v4519_v61 = vmul.f32 %v4496_v11, %v11359_v28  ;;  %v8147_v11 = vpop.eup %8146 }
 0xda7   : > { %v11413_v0 = vpop.eup %8148  ;;  %v11424_v8 = vadd.f32 1.0, %v8147_v11  ;;  %v4745_v11 = vadd.f32 %v11390_v30, %v4744_v41 }
 0xda8   : > { %4535 = vrot.lane.b32.xlu0 %v4519_v61, %s8588_s7  ;;  %v675_v61 = vadd.f32 %v11280_v23, %v13132_v9  ;;  %v4759_v23 = vmul.f32 %v11384_v43, %v4758_v54  ;;  %v4772_v21 = vmul.f32 %v11413_v0, %v11382_v15  ;;  %vm4777_vm7 = vweird.f32 %v11413_v0 }
 0xda9   : > { %v4749_v41 = vsel %vm11478_vm3, %v11390_v30, %v4745_v11  ;;  %vm11537_vm11 = vmor %vm4776_vm10, %vm4777_vm7  ;;  %vm4431_vm3 = vweird.f32 %v11402_v62 }
 0xdaa   : > { %v4760_v24 = vadd.f32 %v11384_v43, %v4759_v23  ;;  %v4768_v23 = vor.u32 1.1754944e-38, %v4767_v60 }
 0xdac   : > { %v4764_v31 = vsel %vm11457_vm1, %v11384_v43, %v4760_v24 }
 0xdad   : > { %v4498_v44 = vpop.permute.xlu1 %4497 }
 0xdae   : > { %v4520_v55 = vmul.f32 %v4498_v44, %v11366_v7 }
 0xdaf   : > { %v4886_v24 = vpop.permute.xlu2 %4885 }
 0xdb0   : > { %4537 = vrot.lane.b32.xlu1 %v4520_v55, %s8588_s7  ;;  %v4383_v55 = vsub.f32 1.0, %v4382_v32 }
 0xdb2   : > { %v11408_v2 = vpop.f32.mrf.mxu3  ;;  %v4384_v35 = vmul.f32 %v11400_v40, %v4383_v55 }
 0xdb8   : > { %v4306_v26 = vpop.f32.mrf.mxu1 }
 0xdb9   : > { %v11392_v42 = vadd.f32 %v4306_v26, %v673_v27  ;;  %v4773_v26 = vsub.f32 1.0, %v4772_v21 }
 0xdba   : > { %v4698_v59 = vpop.f32.mrf.mxu3 }
 0xdbb   : > { %8150 = vtanh.f32 %v11392_v42 }
 0xdbc   : > { %8152 = vpow2.f32 %v7387_v37 }
 0xdbd   : > { %8154 = vrcp.f32 %v11398_v22 }
 0xdbe   : > { %8156 = vrcp.f32 %v11402_v62 }
 0xdbf   : > { %v4639_v29 = vpop.f32.mrf.mxu2  ;;  %8158 = vrcp.f32 %v11406_v39 }
 0xdc0   : > { %v4308_v51 = vpop.f32.mrf.mxu1  ;;  %8160 = vpow2.f32 %v7388_v53  ;;  %v4765_v53 = vand.u32 2147483647, %v11370_v25 }
 0xdc1   : > { %v8151_v4 = vpop.eup %8150  ;;  %v11419_v56 = vadd.f32 %v4308_v51, %v675_v61  ;;  %v4420_v61 = vand.u32 2147483647, %v11424_v8 }
 0xdc2   : > { %v8153_v44 = vpop.eup %8152  ;;  %4507 = vrot.lane.b32.xlu1 %v8151_v4, %s8587_s6  ;;  %v4640_v4 = vadd.f32 %v11302_v36, %v4639_v29  ;;  %v4753_v29 = vor.u32 1.1754944e-38, %v4752_v57  ;;  %vm4766_vm6 = vcmp.eq.f32.partialorder %v4765_v53, 8.507059e+37  ;;  %v4782_v53 = vand.u32 2147483648, %v11382_v15 }
 0xdc3   : > { %8162 = vtanh.f32 %v11419_v56  ;;  %v11429_v49 = vadd.f32 1.0, %v8153_v44  ;;  %v11433_v3 = vpop.eup %8154  ;;  %v4774_v44 = vmul.f32 %v11413_v0, %v4773_v26  ;;  %v11498_v26 = vsel %vm4766_vm6, %v4768_v23, %v4764_v31 }
 0xdc4   : > { %v11439_v27 = vpop.eup %8156  ;;  %8164 = vrcp.f32 %v11424_v8  ;;  %v4397_v32 = vmul.f32 %v11433_v3, %v11398_v22  ;;  %v4393_v15 = vor.u32 1.1754944e-38, %v4392_v13  ;;  %vm4402_vm13 = vweird.f32 %v11433_v3 }
 0xdc5   : > { %v11444_v20 = vpop.eup %8158  ;;  %8166 = vrcp.f32 %v11429_v49  ;;  %v4427_v25 = vmul.f32 %v11439_v27, %v11402_v62  ;;  %vm4432_vm15 = vweird.f32 %v11439_v27  ;;  %vm11573_vm2 = vmor %vm4401_vm12, %vm4402_vm13  ;;  %vm4416_vm12 = vweird.f32 %v11424_v8 }
 0xdc6   : > { %v8161_v54 = vpop.eup %8160  ;;  %v4787_v45 = vmul.f32 %v11444_v20, %v11406_v39  ;;  %v4398_v19 = vsub.f32 1.0, %v4397_v32  ;;  %vm4792_vm1 = vweird.f32 %v11444_v20 }
 0xdc7   : > { %v4641_v6 = vpop.f32.mrf.mxu2  ;;  %v11489_v55 = vadd.f32 1.0, %v8161_v54  ;;  %v4775_v54 = vadd.f32 %v11413_v0, %v4774_v44  ;;  %v4428_v30 = vsub.f32 1.0, %v4427_v25  ;;  %v4502_v25 = vpop.permute.xlu2 %4501  ;;  %vm11598_vm6 = vmor %vm4791_vm5, %vm4792_vm1  ;;  %vm4421_vm1 = vcmp.eq.f32.partialorder %v4420_v61, 8.507059e+37 }
 0xdc8   : > { %v4642_v37 = vadd.f32 %v11302_v36, %v4641_v6  ;;  %v4385_v6 = vadd.f32 %v11400_v40, %v4384_v35  ;;  %v4788_v11 = vsub.f32 1.0, %v4787_v45  ;;  %v11507_v35 = vsel %vm11482_vm4, %v4753_v29, %v4749_v41  ;;  %vm11585_vm4 = vmor %vm4431_vm3, %vm4432_vm15 }
 0xdc9   : > { %v8163_v51 = vpop.eup %8162  ;;  %v4909_v32 = vmul.f32 %v4886_v24, %v11507_v35  ;;  %v4399_v31 = vmul.f32 %v11433_v3, %v4398_v19  ;;  %v4429_v36 = vmul.f32 %v11439_v27, %v4428_v30  ;;  %v4405_v29 = vand.u32 2147483647, %v11398_v22 }
 0xdca   : > { %v11453_v9 = vadd.f32 %v4698_v59, %v4642_v37  ;;  %4509 = vrot.lane.b32.xlu2 %v8163_v51, %s8587_s6  ;;  %v11487_v21 = vpop.eup %8164  ;;  %v11496_v37 = vadd.f32 %v11408_v2, %v4640_v4  ;;  %v4389_v44 = vsel %vm11522_vm9, %v11400_v40, %v4385_v6  ;;  %v4779_v40 = vsel %vm11537_vm11, %v11413_v0, %v4775_v54  ;;  %v4500_v6 = vpop.permute.xlu1 %4499 }
 0xdcb   : > { %v11501_v59 = vpop.eup %8166  ;;  %v4412_v2 = vmul.f32 %v11487_v21, %v11424_v8  ;;  %v4789_v43 = vmul.f32 %v11444_v20, %v4788_v11  ;;  %v4783_v41 = vor.u32 1.1754944e-38, %v4782_v53  ;;  %v11557_v13 = vsel %vm11511_vm8, %v4393_v15, %v4389_v44 }
 0xdcc   : > { %8168 = vtanh.f32 %v11453_v9  ;;  %v4802_v45 = vmul.f32 %v11501_v59, %v11429_v49  ;;  %v4400_v0 = vadd.f32 %v11433_v3, %v4399_v31  ;;  %v4430_v30 = vadd.f32 %v11439_v27, %v4429_v36 }
 0xdcd   : > { %8170 = vrcp.f32 %v11489_v55  ;;  %v4413_v23 = vsub.f32 1.0, %v4412_v2  ;;  %v11560_v19 = vsel %vm4781_vm14, %v4783_v41, %v4779_v40  ;;  %v4790_v11 = vadd.f32 %v11444_v20, %v4789_v43 }
 0xdce   : > { %8172 = vtanh.f32 %v11496_v37  ;;  %v4521_v4 = vmul.f32 %v4500_v6, %v11557_v13  ;;  %v4795_v31 = vand.u32 2147483647, %v11406_v39  ;;  %v4404_v44 = vsel %vm11573_vm2, %v11433_v3, %v4400_v0 }
 0xdcf   : > { %v4888_v57 = vpop.permute.xlu0 %4887  ;;  %v4414_v53 = vmul.f32 %v11487_v21, %v4413_v23  ;;  %v4794_v3 = vsel %vm11598_vm6, %v11444_v20, %v4790_v11  ;;  %vm4406_vm7 = vcmp.eq.f32.partialorder %v4405_v29, 8.507059e+37  ;;  %vm4417_vm8 = vweird.f32 %v11487_v21  ;;  %v4504_v22 = vpop.permute.xlu2 %4503 }
 0xdd0   : > { %v4910_v60 = vmul.f32 %v4888_v57, %v11498_v26  ;;  %v4803_v57 = vsub.f32 1.0, %v4802_v45  ;;  %vm4436_vm9 = vcmp.eq.f32.partialorder %v4435_v14, 8.507059e+37  ;;  %vm4796_vm10 = vcmp.eq.f32.partialorder %v4795_v31, 8.507059e+37  ;;  %vm11630_vm13 = vmor %vm4416_vm12, %vm4417_vm8 }
 0xdd1   : > { %v4415_v41 = vadd.f32 %v11487_v21, %v4414_v53  ;;  %vm4807_vm11 = vweird.f32 %v11501_v59  ;;  %v4812_v11 = vand.u32 2147483648, %v11429_v49  ;;  %vm4806_vm14 = vweird.f32 %v11429_v49 }
 0xdd2   : > { %v8169_v51 = vpop.eup %8168  ;;  %4927 = vrot.lane.b32.xlu0 %v4910_v60, %s8588_s7  ;;  %4925 = vrot.lane.b32.xlu2 %v4909_v32, %s8588_s7  ;;  %v4797_v32 = vand.u32 2147483648, %v11406_v39  ;;  %v4804_v15 = vmul.f32 %v11501_v59, %v4803_v57  ;;  %v4434_v39 = vsel %vm11585_vm4, %v11439_v27, %v4430_v30  ;;  %v4422_v30 = vand.u32 2147483648, %v11424_v8  ;;  %vm4808_vm15 = vmor %vm4806_vm14, %vm4807_vm11 }
 0xdd3   : > { %4899 = vrot.lane.b32.xlu1 %v8169_v51, %s8587_s6  ;;  %v11563_v60 = vpop.eup %8170  ;;  %v4437_v51 = vand.u32 2147483648, %v11402_v62  ;;  %v4408_v62 = vor.u32 1.1754944e-38, %v4407_v52  ;;  %v4810_v53 = vand.u32 2147483647, %v11429_v49  ;;  %v4813_v14 = vor.u32 1.1754944e-38, %v4812_v11 }
 0xdd4   : > { %v8173_v2 = vpop.eup %8172  ;;  %v4817_v40 = vmul.f32 %v11563_v60, %v11489_v55  ;;  %v4798_v43 = vor.u32 1.1754944e-38, %v4797_v32  ;;  %v4423_v8 = vor.u32 1.1754944e-38, %v4422_v30  ;;  %vm4822_vm3 = vweird.f32 %v11563_v60 }
 0xdd5   : > { %v4438_v36 = vor.u32 1.1754944e-38, %v4437_v51  ;;  %v11613_v23 = vsel %vm4406_vm7, %v4408_v62, %v4404_v44  ;;  %v4419_v51 = vsel %vm11630_vm13, %v11487_v21, %v4415_v41  ;;  %vm4811_vm2 = vcmp.eq.f32.partialorder %v4810_v53, 8.507059e+37 }
 0xdd6   : > { %v11618_v6 = vsel %vm4796_vm10, %v4798_v43, %v4794_v3  ;;  %v4522_v20 = vmul.f32 %v4502_v25, %v11613_v23  ;;  %v4818_v29 = vsub.f32 1.0, %v4817_v40  ;;  %v11645_v31 = vsel %vm4421_vm1, %v4423_v8, %v4419_v51 }
 0xdd7   : > { %v4890_v24 = vpop.permute.xlu0 %4889  ;;  %v11616_v52 = vsel %vm4436_vm9, %v4438_v36, %v4434_v39  ;;  %v4523_v25 = vmul.f32 %v4504_v22, %v11645_v31  ;;  %vm4821_vm4 = vweird.f32 %v11489_v55  ;;  %v4896_v40 = vpop.permute.xlu2 %4895  ;;  %v7374_v43 = vmul.f32 -1.442695, %v11419_v56 }
 0xdd8   : > { %v4911_v54 = vmul.f32 %v4890_v24, %v11560_v19  ;;  %v4805_v24 = vadd.f32 %v11501_v59, %v4804_v15  ;;  %v4819_v32 = vmul.f32 %v11563_v60, %v4818_v29  ;;  %v4825_v15 = vand.u32 2147483647, %v11489_v55  ;;  %vm4823_vm5 = vmor %vm4821_vm4, %vm4822_vm3 }
 0xdd9   : > { %8174 = vpow2.f32 %v7374_v43  ;;  %v4479_v29 = vmul.f32 %v11359_v28, %v11127_v17  ;;  %v7390_v30 = vmul.f32 -1.442695, %v11453_v9 }
 0xdda   : > { %4897 = vrot.lane.b32.xlu0 %v8173_v2, %s8587_s6  ;;  %4539 = vrot.lane.b32.xlu2 %v4521_v4, %s8588_s7  ;;  %v4809_v4 = vsel %vm4808_vm15, %v11501_v59, %v4805_v24  ;;  %v4820_v21 = vadd.f32 %v11563_v60, %v4819_v32  ;;  %v4827_v59 = vand.u32 2147483648, %v11489_v55  ;;  %vm4826_vm6 = vcmp.eq.f32.partialorder %v4825_v15, 8.507059e+37 }
 0xddb   : > { %4929 = vrot.lane.b32.xlu1 %v4911_v54, %s8588_s7  ;;  %v11647_v49 = vsel %vm4811_vm2, %v4813_v14, %v4809_v4  ;;  %v7389_v2 = vmul.f32 -1.442695, %v11496_v37 }
 0xddc   : > { %v4824_v62 = vsel %vm4823_vm5, %v11563_v60, %v4820_v21  ;;  %v4828_v39 = vor.u32 1.1754944e-38, %v4827_v59 }
 0xdde   : > { %v11659_v3 = vsel %vm4826_vm6, %v4828_v39, %v4824_v62 }
 0xddf   : > { %v4506_v0 = vpop.permute.xlu0 %4505  ;;  %v4892_v27 = vpop.permute.xlu1 %4891  ;;  %v4914_v36 = vmul.f32 %v4896_v40, %v11659_v3 }
 0xde0   : > { %v4524_v57 = vmul.f32 %v4506_v0, %v11616_v52  ;;  %v4912_v54 = vmul.f32 %v4892_v27, %v11618_v6  ;;  %v8175_v55 = vpop.eup %8174  ;;  %v7373_v0 = vmul.f32 -1.442695, %v11392_v42 }
 0xde1   : > { %v4350_v41 = vadd.f32 1.0, %v8175_v55 }
 0xde2   : > { %4541 = vrot.lane.b32.xlu0 %v4522_v20, %s8588_s7  ;;  %4931 = vrot.lane.b32.xlu2 %v4912_v54, %s8588_s7 }
 0xde3   : > { %4545 = vrot.lane.b32.xlu1 %v4524_v57, %s8588_s7  ;;  %8176 = vrcp.f32 %v4350_v41  ;;  %v4467_v51 = vand.u32 2147483648, %v4350_v41  ;;  %vm4461_vm8 = vweird.f32 %v4350_v41  ;;  %v4465_v17 = vand.u32 2147483647, %v4350_v41 }
 0xde4   : > { %8178 = vpow2.f32 %v7373_v0 }
 0xde5   : > { %v4468_v8 = vor.u32 1.1754944e-38, %v4467_v51  ;;  %vm4466_vm10 = vcmp.eq.f32.partialorder %v4465_v17, 8.507059e+37 }
 0xde7   : > { %v4894_v44 = vpop.permute.xlu1 %4893 }
 0xde8   : > { %v4913_v45 = vmul.f32 %v4894_v44, %v11647_v49 }
 0xde9   : > { %v8177_v60 = vpop.eup %8176 }
 0xdea   : > { %4543 = vrot.lane.b32.xlu0 %v4523_v25, %s8588_s7  ;;  %4933 = vrot.lane.b32.xlu2 %v4913_v45, %s8588_s7  ;;  %v8179_v27 = vpop.eup %8178  ;;  %v4457_v24 = vmul.f32 %v8177_v60, %v4350_v41  ;;  %vm4462_vm7 = vweird.f32 %v8177_v60  ;;  %v4480_v41 = vmul.f32 %v11366_v7, %v11112_v16  ;;  %v4869_v16 = vmul.f32 %v11507_v35, %v11133_v12 }
 0xdeb   : > { %v4349_v20 = vadd.f32 1.0, %v8179_v27  ;;  %vm4463_vm9 = vmor %vm4461_vm8, %vm4462_vm7  ;;  %v4481_v12 = vmul.f32 %v11557_v13, %v11145_v10 }
 0xdec   : > { %v4458_v54 = vsub.f32 1.0, %v4457_v24 }
 0xded   : > { %8180 = vrcp.f32 %v4349_v20  ;;  %v4452_v39 = vand.u32 2147483648, %v4349_v20  ;;  %vm4446_vm12 = vweird.f32 %v4349_v20 }
 0xdee   : > { %v4459_v56 = vmul.f32 %v8177_v60, %v4458_v54 }
 0xdef   : > { %v4453_v0 = vor.u32 1.1754944e-38, %v4452_v39 }
 0xdf0   : > { %v4460_v61 = vadd.f32 %v8177_v60, %v4459_v56 }
 0xdf2   : > { %4935 = vrot.lane.b32.xlu0 %v4914_v36, %s8588_s7  ;;  %v4464_v4 = vsel %vm4463_vm9, %v8177_v60, %v4460_v61  ;;  %v4450_v36 = vand.u32 2147483647, %v4349_v20 }
 0xdf3   : > { %v8181_v42 = vpop.eup %8180  ;;  %v11673_v44 = vsel %vm4466_vm10, %v4468_v8, %v4464_v4 }
 0xdf4   : > { %v4442_v9 = vmul.f32 %v8181_v42, %v4349_v20  ;;  %vm4447_vm11 = vweird.f32 %v8181_v42  ;;  %vm4451_vm14 = vcmp.eq.f32.partialorder %v4450_v36, 8.507059e+37  ;;  %v4870_v36 = vmul.f32 %v11498_v26, %v11166_v46 }
 0xdf5   : > { %vm4448_vm13 = vmor %vm4446_vm12, %vm4447_vm11  ;;  %v4871_v46 = vmul.f32 %v11560_v19, %v11184_v47  ;;  %v4483_v47 = vmul.f32 %v11645_v31, %v11187_v1  ;;  %v4874_v1 = vmul.f32 %v11659_v3, %v11200_v18 }
 0xdf6   : > { %v4443_v37 = vsub.f32 1.0, %v4442_v9 }
 0xdf8   : > { %v4444_v45 = vmul.f32 %v8181_v42, %v4443_v37 }
 0xdfa   : > { %v4445_v62 = vadd.f32 %v8181_v42, %v4444_v45 }
 0xdfc   : > { %v4449_v43 = vsel %vm4448_vm13, %v8181_v42, %v4445_v62 }
 0xdfd   : > { %v11684_v24 = vsel %vm4451_vm14, %v4453_v0, %v4449_v43 }
 0xe1a   : > { %v4536_v57 = vpop.permute.xlu0 %4535 }
 0xe1b   : > { %v11668_v11 = vadd.f32 %v4536_v57, %v4479_v29 }
 0xe1d   : > { %8182 = vtanh.f32 %v11668_v11 }
 0xe1e   : > { %8184 = vpow2.f32 %v7390_v30 }
 0xe1f   : > { %8186 = vpow2.f32 %v7389_v2 }
 0xe22   : > { %v4538_v15 = vpop.permute.xlu1 %4537 }
 0xe23   : > { %v8183_v53 = vpop.eup %8182  ;;  %v11682_v27 = vadd.f32 %v4538_v15, %v4480_v41 }
 0xe24   : > { %4583 = vrot.lane.b32.xlu0 %v8183_v53, %s8587_s6  ;;  %v8185_v32 = vpop.eup %8184  ;;  %v4510_v14 = vpop.permute.xlu2 %4509 }
 0xe25   : > { %v4740_v22 = vadd.f32 1.0, %v8185_v32  ;;  %v4526_v25 = vmul.f32 %v4510_v14, %v11673_v44  ;;  %v8187_v21 = vpop.eup %8186 }
 0xe26   : > { %v11677_v59 = vadd.f32 1.0, %v8187_v21 }
 0xe27   : > { %8188 = vrcp.f32 %v4740_v22  ;;  %4549 = vrot.lane.b32.xlu2 %v4526_v25, %s8588_s7  ;;  %v4857_v17 = vand.u32 2147483648, %v4740_v22  ;;  %vm4851_vm1 = vweird.f32 %v4740_v22  ;;  %v4855_v32 = vand.u32 2147483647, %v4740_v22 }
 0xe28   : > { %8190 = vrcp.f32 %v11677_v59  ;;  %v4842_v15 = vand.u32 2147483648, %v11677_v59  ;;  %vm4836_vm5 = vweird.f32 %v11677_v59 }
 0xe29   : > { %8192 = vtanh.f32 %v11682_v27  ;;  %v4858_v8 = vor.u32 1.1754944e-38, %v4857_v17  ;;  %vm4856_vm3 = vcmp.eq.f32.partialorder %v4855_v32, 8.507059e+37 }
 0xe2a   : > { %v4843_v43 = vor.u32 1.1754944e-38, %v4842_v15 }
 0xe2c   : > { %v4926_v60 = vpop.permute.xlu2 %4925 }
 0xe2d   : > { %v8189_v40 = vpop.eup %8188  ;;  %v11692_v42 = vadd.f32 %v4926_v60, %v4869_v16 }
 0xe2e   : > { %v4847_v55 = vmul.f32 %v8189_v40, %v4740_v22  ;;  %v8191_v57 = vpop.eup %8190  ;;  %vm4852_vm15 = vweird.f32 %v8189_v40 }
 0xe2f   : > { %v4832_v20 = vmul.f32 %v8191_v57, %v11677_v59  ;;  %v8193_v51 = vpop.eup %8192  ;;  %8194 = vtanh.f32 %v11692_v42  ;;  %vm4853_vm2 = vmor %vm4851_vm1, %vm4852_vm15  ;;  %vm4837_vm4 = vweird.f32 %v8191_v57 }
 0xe30   : > { %v4848_v30 = vsub.f32 1.0, %v4847_v55  ;;  %vm4838_vm6 = vmor %vm4836_vm5, %vm4837_vm4  ;;  %v4872_v55 = vmul.f32 %v11618_v6, %v11159_v50 }
 0xe31   : > { %v4833_v2 = vsub.f32 1.0, %v4832_v20  ;;  %v4482_v20 = vmul.f32 %v11613_v23, %v11170_v48 }
 0xe32   : > { %v4849_v56 = vmul.f32 %v8189_v40, %v4848_v30 }
 0xe33   : > { %v4834_v9 = vmul.f32 %v8191_v57, %v4833_v2 }
 0xe34   : > { %v4508_v29 = vpop.permute.xlu1 %4507  ;;  %v4540_v61 = vpop.permute.xlu2 %4539  ;;  %v4850_v53 = vadd.f32 %v8189_v40, %v4849_v56 }
 0xe35   : > { %v4525_v54 = vmul.f32 %v4508_v29, %v11684_v24  ;;  %v11698_v37 = vadd.f32 %v4540_v61, %v4481_v12  ;;  %v4835_v45 = vadd.f32 %v8191_v57, %v4834_v9  ;;  %v8195_v62 = vpop.eup %8194 }
 0xe36   : > { %v4854_v4 = vsel %vm4853_vm2, %v8189_v40, %v4850_v53  ;;  %v4840_v40 = vand.u32 2147483647, %v11677_v59 }
 0xe37   : > { %4547 = vrot.lane.b32.xlu1 %v4525_v54, %s8588_s7  ;;  %v11700_v25 = vsel %vm4856_vm3, %v4858_v8, %v4854_v4  ;;  %8196 = vtanh.f32 %v11698_v37  ;;  %v4839_v39 = vsel %vm4838_vm6, %v8191_v57, %v4835_v45  ;;  %v4873_v57 = vmul.f32 %v11647_v49, %v11179_v33 }
 0xe38   : > { %vm4841_vm7 = vcmp.eq.f32.partialorder %v4840_v40, 8.507059e+37  ;;  %v4484_v33 = vmul.f32 %v11616_v52, %v11198_v38 }
 0xe39   : > { %v11715_v0 = vsel %vm4841_vm7, %v4843_v43, %v4839_v39 }
 0xe3c   : > { %v4932_v10 = vpop.permute.xlu2 %4931 }
 0xe3d   : > { %v11717_v60 = vadd.f32 %v4932_v10, %v4872_v55  ;;  %v8197_v54 = vpop.eup %8196 }
 0xe3f   : > { %4585 = vrot.lane.b32.xlu1 %v8193_v51, %s8587_s6 }
 0xe44   : > { %v4928_v14 = vpop.permute.xlu0 %4927  ;;  %v4934_v50 = vpop.permute.xlu2 %4933 }
 0xe45   : > { %v4900_v21 = vpop.permute.xlu1 %4899  ;;  %v11713_v41 = vadd.f32 %v4928_v14, %v4870_v36  ;;  %v11732_v2 = vadd.f32 %v4934_v50, %v4873_v57  ;;  %v4486_v36 = vmul.f32 %v11673_v44, %v11225_v5  ;;  %v4876_v50 = vmul.f32 %v11700_v25, %v11219_v34 }
 0xe46   : > { %v4916_v22 = vmul.f32 %v4900_v21, %v11700_v25  ;;  %v4875_v5 = vmul.f32 %v11715_v0, %v11232_v58 }
 0xe47   : > { %4973 = vrot.lane.b32.xlu1 %v8195_v62, %s8587_s6  ;;  %8198 = vtanh.f32 %v11713_v41  ;;  %v4485_v62 = vmul.f32 %v11684_v24, %v11210_v63 }
 0xe48   : > { %4939 = vrot.lane.b32.xlu0 %v4916_v22, %s8588_s7  ;;  %8200 = vtanh.f32 %v11717_v60 }
 0xe4c   : > { %v4898_v59 = vpop.permute.xlu0 %4897 }
 0xe4d   : > { %v4915_v29 = vmul.f32 %v4898_v59, %v11715_v0  ;;  %v4930_v30 = vpop.permute.xlu1 %4929  ;;  %v8199_v53 = vpop.eup %8198 }
 0xe4e   : > { %v11730_v56 = vadd.f32 %v4930_v30, %v4871_v46  ;;  %v8201_v51 = vpop.eup %8200 }
 0xe4f   : > { %4937 = vrot.lane.b32.xlu2 %v4915_v29, %s8588_s7 }
 0xe50   : > { %4587 = vrot.lane.b32.xlu0 %v8197_v54, %s8587_s6 }
 0xe54   : > { %v4542_v16 = vpop.permute.xlu0 %4541 }
 0xe55   : > { %v11734_v61 = vadd.f32 %v4542_v16, %v4482_v20  ;;  %v4546_v48 = vpop.permute.xlu1 %4545 }
 0xe56   : > { %v11745_v17 = vadd.f32 %v4546_v48, %v4484_v33 }
 0xe57   : > { %8202 = vtanh.f32 %v11734_v61  ;;  %4975 = vrot.lane.b32.xlu2 %v8199_v53, %s8587_s6 }
 0xe58   : > { %8204 = vtanh.f32 %v11730_v56  ;;  %4979 = vrot.lane.b32.xlu0 %v8201_v51, %s8587_s6 }
 0xe59   : > { %8206 = vtanh.f32 %v11732_v2 }
 0xe5c   : > { %v4544_v32 = vpop.permute.xlu0 %4543 }
 0xe5d   : > { %v8203_v9 = vpop.eup %8202  ;;  %v11747_v4 = vadd.f32 %v4544_v32, %v4483_v47 }
 0xe5e   : > { %v8205_v12 = vpop.eup %8204  ;;  %4589 = vrot.lane.b32.xlu1 %v8203_v9, %s8587_s6 }
 0xe5f   : > { %v8207_v8 = vpop.eup %8206  ;;  %8208 = vtanh.f32 %v11747_v4  ;;  %4977 = vrot.lane.b32.xlu2 %v8205_v12, %s8587_s6 }
 0xe60   : > { %8210 = vtanh.f32 %v11745_v17  ;;  %4981 = vrot.lane.b32.xlu0 %v8207_v8, %s8587_s6 }
 0xe64   : > { %v4936_v38 = vpop.permute.xlu0 %4935 }
 0xe65   : > { %v8209_v14 = vpop.eup %8208  ;;  %v11756_v21 = vadd.f32 %v4936_v38, %v4874_v1 }
 0xe66   : > { %v8211_v45 = vpop.eup %8210  ;;  %4591 = vrot.lane.b32.xlu1 %v8209_v14, %s8587_s6 }
 0xe67   : > { %8212 = vtanh.f32 %v11756_v21  ;;  %4593 = vrot.lane.b32.xlu2 %v8211_v45, %s8587_s6 }
 0xe6d   : > { %v8213_v22 = vpop.eup %8212 }
 0xe6e   : > { %4983 = vrot.lane.b32.xlu1 %v8213_v22, %s8587_s6 }
 0xe81   : > { %v4550_v15 = vpop.permute.xlu2 %4549 }
 0xe82   : > { %v11771_v54 = vadd.f32 %v4550_v15, %v4486_v36 }
 0xe96   : > { %v4584_v39 = vpop.permute.xlu0 %4583 }
 0xe97   : > { %v4607_v59 = vmul.f32 %v4584_v39, %v11359_v28 }
 0xea9   : > { %v4548_v40 = vpop.permute.xlu1 %4547  ;;  %v4938_v10 = vpop.permute.xlu2 %4937 }
 0xeaa   : > { %v11764_v18 = vadd.f32 %v4548_v40, %v4485_v62  ;;  %v11784_v16 = vadd.f32 %v4938_v10, %v4875_v5 }
 0xeac   : > { %8214 = vtanh.f32 %v11764_v18 }
 0xead   : > { %8216 = vtanh.f32 %v11771_v54 }
 0xeb1   : > { %v4586_v43 = vpop.permute.xlu1 %4585  ;;  %v4976_v30 = vpop.permute.xlu2 %4975 }
 0xeb2   : > { %v8215_v55 = vpop.eup %8214  ;;  %v4608_v29 = vmul.f32 %v4586_v43, %v11366_v7  ;;  %v4998_v7 = vmul.f32 %v4976_v30, %v11498_v26 }
 0xeb3   : > { %4595 = vrot.lane.b32.xlu1 %v8215_v55, %s8587_s6  ;;  %v8217_v51 = vpop.eup %8216 }
 0xeb4   : > { %v5013_v63 = vpack.c.bf16 %v4608_v29, %v4607_v59 }
 0xeb6   : > { %5021 = vrot.lane.b32.xlu2 %v5013_v63, %s8588_s7 }
 0xeb9   : > { %v4974_v28 = vpop.permute.xlu1 %4973 }
 0xeba   : > { %v4940_v46 = vpop.permute.xlu0 %4939  ;;  %v4997_v20 = vmul.f32 %v4974_v28, %v11507_v35  ;;  %v4978_v35 = vpop.permute.xlu2 %4977  ;;  %v13154_v28 = vld [vmem:[#allocation19_spill] sm:$0xff] }
 0xebb   : > { %v11781_v57 = vadd.f32 %v4940_v46, %v4876_v50  ;;  %v4999_v33 = vmul.f32 %v4978_v35, %v11560_v19 }
 0xebc   : > { %v5403_v53 = vpack.c.bf16 %v4998_v7, %v4997_v20 }
 0xebd   : > { %8218 = vtanh.f32 %v11781_v57 }
 0xebe   : > { %4597 = vrot.lane.b32.xlu2 %v8217_v51, %s8587_s6  ;;  %5411 = vrot.lane.b32.xlu0 %v5403_v53, %s8588_s7  ;;  %8220 = vtanh.f32 %v11784_v16 }
 0xec2   : > { %v4588_v34 = vpop.permute.xlu0 %4587  ;;  %v4594_v38 = vpop.permute.xlu2 %4593 }
 0xec3   : > { %v8219_v58 = vpop.eup %8218  ;;  %v4609_v12 = vmul.f32 %v4588_v34, %v11557_v13  ;;  %v4612_v45 = vmul.f32 %v4594_v38, %v11616_v52 }
 0xec4   : > { %4987 = vrot.lane.b32.xlu1 %v8219_v58, %s8587_s6  ;;  %v8221_v26 = vpop.eup %8220 }
 0xec6   : > { %4985 = vrot.lane.b32.xlu0 %v8221_v26, %s8587_s6  ;;  %v13155_v26 = vld [vmem:[#allocation22_spill] sm:$0xff] }
 0xeca   : > { %v4980_v48 = vpop.permute.xlu0 %4979 }
 0xecb   : > { %v5000_v47 = vmul.f32 %v4980_v48, %v11618_v6 }
 0xecd   : > { %v5404_v32 = vpack.c.bf16 %v5000_v47, %v4999_v33 }
 0xecf   : > { %5413 = vrot.lane.b32.xlu0 %v5404_v32, %s8588_s7 }
 0xed0   : > { %v4590_v9 = vpop.permute.xlu1 %4589 }
 0xed1   : > { %v4610_v8 = vmul.f32 %v4590_v9, %v11613_v23  ;;  %v11847_v9 = vld [vmem:[%s13013_s3 + $0x1] ss:$0 sm:$0xff] }
 0xed2   : > { %v4982_v6 = vpop.permute.xlu0 %4981 }
 0xed3   : > { %v5014_v1 = vpack.c.bf16 %v4610_v8, %v4609_v12  ;;  %v5001_v62 = vmul.f32 %v4982_v6, %v11647_v49 }
 0xed5   : > { %5023 = vrot.lane.b32.xlu2 %v5014_v1, %s8588_s7 }
 0xed8   : > { %v4592_v14 = vpop.permute.xlu1 %4591 }
 0xed9   : > { %v4611_v22 = vmul.f32 %v4592_v14, %v11645_v31 }
 0xedb   : > { %v5015_v19 = vpack.c.bf16 %v4612_v45, %v4611_v22  ;;  %v13156_v22 = vld [vmem:[#allocation25_spill] sm:$0xff] }
 0xedd   : > { %5025 = vrot.lane.b32.xlu1 %v5015_v19, %s8588_s7 }
 0xee0   : > { %v4984_v15 = vpop.permute.xlu1 %4983 }
 0xee1   : > { %v5002_v13 = vmul.f32 %v4984_v15, %v11659_v3 }
 0xee3   : > { %v5405_v40 = vpack.c.bf16 %v5002_v13, %v5001_v62 }
 0xee5   : > { %5415 = vrot.lane.b32.xlu2 %v5405_v40, %s8588_s7 }
 0xf10   : > { %v5022_v23 = vpop.permute.xlu2 %5021 }
 0xf11   : > { %7391 = vmatmul.msk.bf16.vlgmr.msra.gmra.mxu0 %vm250_vm0, %v5022_v23  ;;  %7403 = vmatmul.msk.bf16.vlgmr.msra.gmra.mxu1 %vm250_vm0, %v5022_v23 }
 0xf18   : > { %v4598_v52 = vpop.permute.xlu2 %4597 }
 0xf19   : > { %v4614_v31 = vmul.f32 %v4598_v52, %v11673_v44 }
 0xf25   : > { %v4596_v10 = vpop.permute.xlu1 %4595 }
 0xf26   : > { %v4613_v39 = vmul.f32 %v4596_v10, %v11684_v24 }
 0xf28   : > { %v5016_v36 = vpack.c.bf16 %v4614_v31, %v4613_v39 }
 0xf2a   : > { %5027 = vrot.lane.b32.xlu0 %v5016_v36, %s8588_s7 }
 0xf2f   : > { %v5024_v49 = vpop.permute.xlu2 %5023 }
 0xf30   : > { %7392 = vmatmul.msk.bf16.gmra.mxu0 %vm250_vm0, %v5024_v49  ;;  %7404 = vmatmul.msk.bf16.gmra.mxu1 %vm250_vm0, %v5024_v49  ;;  %v5412_v3 = vpop.permute.xlu0 %5411 }
 0xf31   : > { %7407 = vmatmul.msk.bf16.vlgmr.msra.gmra.mxu2 %vm250_vm0, %v5412_v3  ;;  %v13157_v3 = vld [vmem:[#allocation28_spill] sm:$0xff] }
 0xf36   : > { %v4988_v43 = vpop.permute.xlu1 %4987 }
 0xf37   : > { %v5004_v59 = vmul.f32 %v4988_v43, %v11700_v25  ;;  %v11822_v25 = vld [vmem:[%s13013_s3] ss:$0 sm:$0xff] }
 0xf38   : > { %v4986_v55 = vpop.permute.xlu0 %4985  ;;  %v737_v7 = vadd.f32 %v11822_v25, %v13154_v28  ;;  %v740_v35 = vadd.f32 %v11822_v25, %v13155_v26  ;;  %v742_v19 = vadd.f32 %v11822_v25, %v13156_v22  ;;  %v745_v43 = vadd.f32 %v11822_v25, %v13157_v3 }
 0xf39   : > { %v5003_v29 = vmul.f32 %v4986_v55, %v11715_v0  ;;  %v13153_v0 = vld [vmem:[#allocation16_spill] sm:$0xff] }
 0xf3a   : > { %v735_v50 = vadd.f32 %v11822_v25, %v13153_v0  ;;  %v13158_v0 = vld [vmem:[#allocation31_spill] sm:$0xff] }
 0xf3b   : > { %v5406_v44 = vpack.c.bf16 %v5004_v59, %v5003_v29 }
 0xf3d   : > { %5417 = vrot.lane.b32.xlu1 %v5406_v44, %s8588_s7 }
 0xf3f   : > { %v5416_v30 = vpop.permute.xlu2 %5415 }
 0xf41   : > { %v5414_v24 = vpop.permute.xlu0 %5413 }
 0xf42   : > { %7408 = vmatmul.msk.bf16.gmra.mxu2 %vm250_vm0, %v5414_v24 }
 0xf4f   : > { %v5026_v63 = vpop.permute.xlu1 %5025 }
 0xf50   : > { %7393 = vmatmul.msk.bf16.gmra.mxu0 %vm250_vm0, %v5026_v63  ;;  %7405 = vmatmul.msk.bf16.gmra.mxu1 %vm250_vm0, %v5026_v63 }
 0xf52   : > { %7409 = vmatmul.msk.bf16.gmra.mxu2 %vm250_vm0, %v5416_v30 }
 0xf8e   : > { %v5050_v5 = vpop.f32.mrf.mxu0  ;;  %v5383_v48 = vpop.f32.mrf.mxu1 }
 0xf8f   : > { %v11826_v46 = vadd.f32 %v5050_v5, %v735_v50  ;;  %v5384_v12 = vadd.f32 %v11847_v9, %v5383_v48  ;;  %v747_v50 = vadd.f32 %v11822_v25, %v13158_v0 }
 0xf91   : > { %8222 = vtanh.f32 %v11826_v46 }
 0xf96   : > { %v5052_v20 = vpop.f32.mrf.mxu0  ;;  %v5385_v1 = vpop.f32.mrf.mxu1 }
 0xf97   : > { %v8223_v53 = vpop.eup %8222  ;;  %v11831_v51 = vadd.f32 %v5052_v20, %v737_v7  ;;  %v5386_v15 = vadd.f32 %v11847_v9, %v5385_v1 }
 0xf98   : > { %5254 = vrot.lane.b32.xlu2 %v8223_v53, %s8587_s6 }
 0xf99   : > { %8224 = vtanh.f32 %v11831_v51 }
 0xf9c   : > { %v5028_v34 = vpop.permute.xlu0 %5027 }
 0xf9d   : > { %7394 = vmatmul.msk.bf16.gmra.mxu0 %vm250_vm0, %v5028_v34  ;;  %7406 = vmatmul.msk.bf16.gmra.mxu1 %vm250_vm0, %v5028_v34 }
 0xf9f   : > { %v8225_v58 = vpop.eup %8224 }
 0xfa0   : > { %5256 = vrot.lane.b32.xlu0 %v8225_v58, %s8587_s6 }
 0xfad   : > { %v5055_v33 = vpop.f32.mrf.mxu0  ;;  %v5388_v62 = vpop.f32.mrf.mxu1 }
 0xfae   : > { %v11840_v47 = vadd.f32 %v5055_v33, %v740_v35  ;;  %v5389_v52 = vadd.f32 %v11847_v9, %v5388_v62  ;;  %v7395_v62 = vmul.f32 -1.442695, %v11826_v46 }
 0xfaf   : > { %v5418_v32 = vpop.permute.xlu1 %5417 }
 0xfb0   : > { %8226 = vtanh.f32 %v11840_v47  ;;  %7410 = vmatmul.msk.bf16.gmra.mxu2 %vm250_vm0, %v5418_v32 }
 0xfb4   : > { %v5440_v38 = vpop.f32.mrf.mxu2 }
 0xfb5   : > { %v11850_v14 = vadd.f32 %v5440_v38, %v5384_v12  ;;  %v5057_v45 = vpop.f32.mrf.mxu0  ;;  %v5390_v49 = vpop.f32.mrf.mxu1 }
 0xfb6   : > { %v8227_v8 = vpop.eup %8226  ;;  %v11856_v6 = vadd.f32 %v5057_v45, %v742_v19  ;;  %v5391_v55 = vadd.f32 %v11847_v9, %v5390_v49 }
 0xfb7   : > { %5258 = vrot.lane.b32.xlu0 %v8227_v8, %s8587_s6  ;;  %8228 = vtanh.f32 %v11850_v14  ;;  %v7396_v8 = vmul.f32 -1.442695, %v11831_v51 }
 0xfb8   : > { %8230 = vtanh.f32 %v11856_v6 }
 0xfbc   : > { %v5442_v13 = vpop.f32.mrf.mxu2 }
 0xfbd   : > { %v8229_v40 = vpop.eup %8228  ;;  %v5461_v23 = vadd.f32 %v5442_v13, %v5386_v15  ;;  %v7397_v13 = vmul.f32 -1.442695, %v11840_v47 }
 0xfbe   : > { %5644 = vrot.lane.b32.xlu1 %v8229_v40, %s8587_s6  ;;  %v8231_v10 = vpop.eup %8230 }
 0xfbf   : > { %8232 = vtanh.f32 %v5461_v23  ;;  %v7412_v19 = vmul.f32 -1.442695, %v5461_v23 }
 0xfc5   : > { %v5445_v31 = vpop.f32.mrf.mxu2  ;;  %v8233_v39 = vpop.eup %8232 }
 0xfc6   : > { %v11862_v36 = vadd.f32 %v5445_v31, %v5389_v52  ;;  %5646 = vrot.lane.b32.xlu2 %v8233_v39, %s8587_s6  ;;  %5260 = vrot.lane.b32.xlu1 %v8231_v10, %s8587_s6  ;;  %v7411_v52 = vmul.f32 -1.442695, %v11850_v14 }
 0xfc8   : > { %8234 = vtanh.f32 %v11862_v36 }
 0xfcd   : > { %v5060_v59 = vpop.f32.mrf.mxu0  ;;  %v5447_v44 = vpop.f32.mrf.mxu2 }
 0xfce   : > { %v11870_v29 = vadd.f32 %v5060_v59, %v745_v43  ;;  %v8235_v24 = vpop.eup %8234  ;;  %v11872_v63 = vadd.f32 %v5447_v44, %v5391_v55  ;;  %v5393_v30 = vpop.f32.mrf.mxu1 }
 0xfcf   : > { %5648 = vrot.lane.b32.xlu2 %v8235_v24, %s8587_s6  ;;  %v5394_v5 = vadd.f32 %v11847_v9, %v5393_v30 }
 0xfd0   : > { %8236 = vtanh.f32 %v11870_v29 }
 0xfd1   : > { %8238 = vtanh.f32 %v11872_v63 }
 0xfd5   : > { %v5062_v28 = vpop.f32.mrf.mxu0  ;;  %v5450_v53 = vpop.f32.mrf.mxu2 }
 0xfd6   : > { %v8237_v7 = vpop.eup %8236  ;;  %v11880_v20 = vadd.f32 %v5062_v28, %v747_v50  ;;  %v11882_v58 = vadd.f32 %v5450_v53, %v5394_v5  ;;  %v5395_v26 = vpop.f32.mrf.mxu1  ;;  %v7398_v50 = vmul.f32 -1.442695, %v11856_v6  ;;  %v13159_v53 = vld [vmem:[#allocation34_spill] sm:$0xff]  ;;  %v7413_v6 = vmul.f32 -1.442695, %v11862_v36 }
 0xfd7   : > { %v8239_v34 = vpop.eup %8238  ;;  %5262 = vrot.lane.b32.xlu1 %v8237_v7, %s8587_s6  ;;  %v5396_v35 = vadd.f32 %v11847_v9, %v5395_v26 }
 0xfd8   : > { %8240 = vtanh.f32 %v11880_v20  ;;  %5650 = vrot.lane.b32.xlu0 %v8239_v34, %s8587_s6  ;;  %v750_v34 = vadd.f32 %v11822_v25, %v13159_v53 }
 0xfd9   : > { %8242 = vtanh.f32 %v11882_v58 }
 0xfdd   : > { %v5452_v33 = vpop.f32.mrf.mxu2 }
 0xfde   : > { %v8241_v48 = vpop.eup %8240  ;;  %v11889_v12 = vadd.f32 %v5452_v33, %v5396_v35 }
 0xfdf   : > { %v8243_v32 = vpop.eup %8242  ;;  %5264 = vrot.lane.b32.xlu2 %v8241_v48, %s8587_s6 }
 0xfe0   : > { %5652 = vrot.lane.b32.xlu0 %v8243_v32, %s8587_s6  ;;  %8244 = vtanh.f32 %v11889_v12  ;;  %v7399_v32 = vmul.f32 -1.442695, %v11870_v29 }
 0xfe1   : > { %8246 = vpow2.f32 %v7396_v8 }
 0xfe6   : > { %v8245_v1 = vpop.eup %8244 }
 0xfe7   : > { %5654 = vrot.lane.b32.xlu1 %v8245_v1, %s8587_s6  ;;  %v8247_v38 = vpop.eup %8246 }
 0xfe8   : > { %v5103_v45 = vadd.f32 1.0, %v8247_v38  ;;  %v7414_v38 = vmul.f32 -1.442695, %v11872_v63  ;;  %v13160_v63 = vld [vmem:[#allocation37_spill] sm:$0xff] }
 0xfea   : > { %8248 = vrcp.f32 %v5103_v45  ;;  %v5136_v23 = vand.u32 2147483648, %v5103_v45  ;;  %vm5130_vm9 = vweird.f32 %v5103_v45  ;;  %v5134_v46 = vand.u32 2147483647, %v5103_v45 }
 0xfeb   : > { %8250 = vpow2.f32 %v7412_v19 }
 0xfec   : > { %8252 = vpow2.f32 %v7395_v62  ;;  %v5137_v59 = vor.u32 1.1754944e-38, %v5136_v23  ;;  %vm5135_vm11 = vcmp.eq.f32.partialorder %v5134_v46, 8.507059e+37 }
 0xfed   : > { %8254 = vpow2.f32 %v7397_v13  ;;  %v752_v13 = vadd.f32 %v11822_v25, %v13160_v63  ;;  %v7415_v25 = vmul.f32 -1.442695, %v11882_v58 }
 0xfee   : > { %8256 = vpow2.f32 %v7411_v52 }
 0xff0   : > { %v8249_v22 = vpop.eup %8248 }
 0xff1   : > { %v5126_v15 = vmul.f32 %v8249_v22, %v5103_v45  ;;  %v8251_v51 = vpop.eup %8250  ;;  %vm5131_vm8 = vweird.f32 %v8249_v22 }
 0xff2   : > { %v11899_v31 = vadd.f32 1.0, %v8251_v51  ;;  %v8253_v39 = vpop.eup %8252  ;;  %vm5132_vm10 = vmor %vm5130_vm9, %vm5131_vm8 }
 0xff3   : > { %v5127_v40 = vsub.f32 1.0, %v5126_v15  ;;  %v8255_v3 = vpop.eup %8254  ;;  %v11902_v43 = vadd.f32 1.0, %v8253_v39  ;;  %v11941_v15 = vpop.permute.xlu2 %5254 }
 0xff4   : > { %8258 = vrcp.f32 %v11899_v31  ;;  %v8257_v47 = vpop.eup %8256  ;;  %v11904_v55 = vadd.f32 1.0, %v8255_v3  ;;  %v5526_v3 = vand.u32 2147483648, %v11899_v31  ;;  %vm5520_vm13 = vweird.f32 %v11899_v31 }
 0xff5   : > { %v5128_v10 = vmul.f32 %v8249_v22, %v5127_v40  ;;  %v11906_v44 = vadd.f32 1.0, %v8257_v47  ;;  %8260 = vrcp.f32 %v11902_v43  ;;  %v5121_v58 = vand.u32 2147483648, %v11902_v43 }
 0xff6   : > { %8262 = vrcp.f32 %v11904_v55  ;;  %vm5145_vm2 = vweird.f32 %v11904_v55  ;;  %vm5115_vm7 = vweird.f32 %v11902_v43 }
 0xff7   : > { %v5129_v49 = vadd.f32 %v8249_v22, %v5128_v10  ;;  %8264 = vrcp.f32 %v11906_v44  ;;  %v5511_v63 = vand.u32 2147483648, %v11906_v44  ;;  %vm5505_vm6 = vweird.f32 %v11906_v44 }
 0xff8   : > { %8266 = vpow2.f32 %v7398_v50 }
 0xff9   : > { %v5133_v14 = vsel %vm5132_vm10, %v8249_v22, %v5129_v49  ;;  %v7400_v49 = vmul.f32 -1.442695, %v11880_v20  ;;  %v5119_v20 = vand.u32 2147483647, %v11902_v43 }
 0xffa   : > { %v11909_v24 = vsel %vm5135_vm11, %v5137_v59, %v5133_v14  ;;  %v11911_v0 = vpop.eup %8258  ;;  %v5524_v14 = vand.u32 2147483647, %v11899_v31 }
 0xffb   : > { %v5516_v28 = vmul.f32 %v11911_v0, %v11899_v31  ;;  %v11920_v7 = vpop.eup %8260  ;;  %vm5521_vm12 = vweird.f32 %v11911_v0  ;;  %vm12021_vm10 = vcmp.eq.f32.partialorder %v5119_v20, 8.507059e+37 }
 0xffc   : > { %v11924_v26 = vpop.eup %8262  ;;  %v5111_v8 = vmul.f32 %v11920_v7, %v11902_v43  ;;  %vm11962_vm14 = vmor %vm5520_vm13, %vm5521_vm12  ;;  %vm5116_vm15 = vweird.f32 %v11920_v7  ;;  %vm5525_vm1 = vcmp.eq.f32.partialorder %v5524_v14, 8.507059e+37 }
 0xffd   : > { %v5517_v48 = vsub.f32 1.0, %v5516_v28  ;;  %v11927_v33 = vpop.eup %8264  ;;  %v5141_v36 = vmul.f32 %v11924_v26, %v11904_v55  ;;  %vm5146_vm3 = vweird.f32 %v11924_v26  ;;  %vm12017_vm9 = vmor %vm5115_vm7, %vm5116_vm15 }
 0xffe   : > { %v8267_v45 = vpop.eup %8266  ;;  %v5501_v19 = vmul.f32 %v11927_v33, %v11906_v44  ;;  %v5112_v29 = vsub.f32 1.0, %v5111_v8  ;;  %vm5506_vm4 = vweird.f32 %v11927_v33  ;;  %vm11997_vm5 = vmor %vm5145_vm2, %vm5146_vm3 }
 0xfff   : > { %v5518_v22 = vmul.f32 %v11911_v0, %v5517_v48  ;;  %v11943_v62 = vadd.f32 1.0, %v8267_v45  ;;  %v5142_v51 = vsub.f32 1.0, %v5141_v36  ;;  %vm12009_vm8 = vmor %vm5505_vm6, %vm5506_vm4 }
0x1000   : > { %v5502_v10 = vsub.f32 1.0, %v5501_v19  ;;  %v5113_v23 = vmul.f32 %v11920_v7, %v5112_v29  ;;  %v5149_v19 = vand.u32 2147483647, %v11904_v55  ;;  %v5151_v29 = vand.u32 2147483648, %v11904_v55 }
0x1001   : > { %v5519_v40 = vadd.f32 %v11911_v0, %v5518_v22 }
0x1002   : > { %v5503_v28 = vmul.f32 %v11927_v33, %v5502_v10  ;;  %v5114_v48 = vadd.f32 %v11920_v7, %v5113_v23  ;;  %vm5150_vm11 = vcmp.eq.f32.partialorder %v5149_v19, 8.507059e+37 }
0x1003   : > { %v5523_v31 = vsel %vm11962_vm14, %v11911_v0, %v5519_v40  ;;  %v5166_v40 = vand.u32 2147483648, %v11943_v62  ;;  %vm5160_vm14 = vweird.f32 %v11943_v62 }
0x1004   : > { %v5504_v22 = vadd.f32 %v11927_v33, %v5503_v28 }
0x1006   : > { %v5508_v23 = vsel %vm12009_vm8, %v11927_v33, %v5504_v22 }
0x1012   : > { %v5257_v30 = vpop.permute.xlu0 %5256 }
0x1013   : > { %v5279_v5 = vmul.f32 %v5257_v30, %v11909_v24 }
0x1015   : > { %5296 = vrot.lane.b32.xlu0 %v5279_v5, %s8588_s7  ;;  %v5143_v5 = vmul.f32 %v11924_v26, %v5142_v51 }
0x1017   : > { %v5144_v45 = vadd.f32 %v11924_v26, %v5143_v5 }
0x1019   : > { %v5148_v43 = vsel %vm11997_vm5, %v11924_v26, %v5144_v45 }
0x101a   : > { %v5065_v35 = vpop.f32.mrf.mxu0  ;;  %v5398_v55 = vpop.f32.mrf.mxu1 }
0x101b   : > { %v11932_v1 = vadd.f32 %v5065_v35, %v750_v34  ;;  %v5527_v34 = vor.u32 1.1754944e-38, %v5526_v3  ;;  %v5118_v3 = vsel %vm12017_vm9, %v11920_v7, %v5114_v48  ;;  %v5399_v28 = vadd.f32 %v11847_v9, %v5398_v55 }
0x101d   : > { %8268 = vtanh.f32 %v11932_v1  ;;  %v11981_v0 = vsel %vm5525_vm1, %v5527_v34, %v5523_v31 }
0x101e   : > { %8270 = vpow2.f32 %v7413_v6 }
0x101f   : > { %8272 = vpow2.f32 %v7399_v32 }
0x1020   : > { %8274 = vpow2.f32 %v7414_v38  ;;  %v5647_v6 = vpop.permute.xlu2 %5646 }
0x1021   : > { %8276 = vrcp.f32 %v11943_v62  ;;  %v5669_v38 = vmul.f32 %v5647_v6, %v11981_v0 }
0x1022   : > { %v5067_v52 = vpop.f32.mrf.mxu0 }
0x1023   : > { %v8269_v39 = vpop.eup %8268  ;;  %v11952_v46 = vadd.f32 %v5067_v52, %v752_v13  ;;  %v7416_v13 = vmul.f32 -1.442695, %v11889_v12  ;;  %v5509_v52 = vand.u32 2147483647, %v11906_v44 }
0x1024   : > { %v8271_v47 = vpop.eup %8270  ;;  %5266 = vrot.lane.b32.xlu1 %v8269_v39, %s8587_s6 }
0x1025   : > { %v8273_v59 = vpop.eup %8272  ;;  %8278 = vtanh.f32 %v11952_v46  ;;  %v11973_v53 = vadd.f32 1.0, %v8271_v47  ;;  %v5122_v47 = vor.u32 1.1754944e-38, %v5121_v58  ;;  %vm5510_vm12 = vcmp.eq.f32.partialorder %v5509_v52, 8.507059e+37 }
0x1026   : > { %v8275_v50 = vpop.eup %8274  ;;  %8280 = vpow2.f32 %v7400_v49  ;;  %v11976_v35 = vadd.f32 1.0, %v8273_v59  ;;  %v5512_v59 = vor.u32 1.1754944e-38, %v5511_v63 }
0x1027   : > { %8282 = vpow2.f32 %v7415_v25  ;;  %v11979_v32 = vadd.f32 1.0, %v8275_v50  ;;  %v11985_v8 = vpop.eup %8276  ;;  %v5152_v25 = vor.u32 1.1754944e-38, %v5151_v29  ;;  %v12048_v58 = vsel %vm12021_vm10, %v5122_v47, %v5118_v3 }
0x1028   : > { %8284 = vrcp.f32 %v11973_v53  ;;  %v5156_v10 = vmul.f32 %v11985_v8, %v11943_v62  ;;  %v12042_v33 = vsel %vm5510_vm12, %v5512_v59, %v5508_v23  ;;  %vm5161_vm13 = vweird.f32 %v11985_v8 }
0x1029   : > { %8286 = vrcp.f32 %v11976_v35  ;;  %v5259_v14 = vpop.permute.xlu0 %5258  ;;  %v12040_v50 = vsel %vm5150_vm11, %v5152_v25, %v5148_v43  ;;  %v5164_v43 = vand.u32 2147483647, %v11943_v62  ;;  %vm12084_vm15 = vmor %vm5160_vm14, %vm5161_vm13  ;;  %v5167_v59 = vor.u32 1.1754944e-38, %v5166_v40 }
0x102a   : > { %8288 = vrcp.f32 %v11979_v32  ;;  %v5157_v5 = vsub.f32 1.0, %v5156_v10  ;;  %v5280_v34 = vmul.f32 %v5259_v14, %v12040_v50  ;;  %vm5535_vm2 = vweird.f32 %v11973_v53 }
0x102b   : > { %v8279_v36 = vpop.eup %8278  ;;  %8290 = vpow2.f32 %v7416_v13  ;;  %v5400_v13 = vpop.f32.mrf.mxu1  ;;  %vm5165_vm1 = vcmp.eq.f32.partialorder %v5164_v43, 8.507059e+37  ;;  %vm5175_vm4 = vweird.f32 %v11976_v35  ;;  %v5556_v40 = vand.u32 2147483648, %v11979_v32 }
0x102c   : > { %5686 = vrot.lane.b32.xlu1 %v5669_v38, %s8588_s7  ;;  %5268 = vrot.lane.b32.xlu2 %v8279_v36, %s8587_s6  ;;  %v8281_v51 = vpop.eup %8280  ;;  %v5278_v38 = vmul.f32 %v11941_v15, %v12048_v58  ;;  %v5158_v19 = vmul.f32 %v11985_v8, %v5157_v5  ;;  %v5401_v10 = vadd.f32 %v11847_v9, %v5400_v13  ;;  %vm5550_vm8 = vweird.f32 %v11979_v32 }
0x102d   : > { %v8283_v39 = vpop.eup %8282  ;;  %v12034_v20 = vadd.f32 1.0, %v8281_v51  ;;  %v5179_v43 = vand.u32 2147483647, %v11976_v35 }
0x102e   : > { %v12036_v30 = vpop.eup %8284  ;;  %v12038_v26 = vadd.f32 1.0, %v8283_v39  ;;  %v5159_v55 = vadd.f32 %v11985_v8, %v5158_v19 }
0x102f   : > { %v12044_v7 = vpop.eup %8286  ;;  %8292 = vrcp.f32 %v12034_v20  ;;  %v5531_v36 = vmul.f32 %v12036_v30, %v11973_v53  ;;  %vm5536_vm3 = vweird.f32 %v12036_v30  ;;  %vm5180_vm13 = vcmp.eq.f32.partialorder %v5179_v43, 8.507059e+37 }
0x1030   : > { %v5645_v31 = vpop.permute.xlu1 %5644  ;;  %v12053_v48 = vpop.eup %8288  ;;  %8294 = vrcp.f32 %v12038_v26  ;;  %v5171_v63 = vmul.f32 %v12044_v7, %v11976_v35  ;;  %v5163_v14 = vsel %vm12084_vm15, %v11985_v8, %v5159_v55  ;;  %vm5176_vm5 = vweird.f32 %v12044_v7  ;;  %vm12116_vm7 = vmor %vm5535_vm2, %vm5536_vm3 }
0x1031   : > { %v5668_v6 = vmul.f32 %v5645_v31, %v12042_v33  ;;  %v8291_v29 = vpop.eup %8290  ;;  %v5546_v15 = vmul.f32 %v12053_v48, %v11979_v32  ;;  %v5532_v51 = vsub.f32 1.0, %v5531_v36  ;;  %v12105_v8 = vsel %vm5165_vm1, %v5167_v59, %v5163_v14  ;;  %vm12130_vm9 = vmor %vm5175_vm4, %vm5176_vm5 }
0x1032   : > { %v12073_v52 = vadd.f32 1.0, %v8291_v29  ;;  %v5172_v44 = vsub.f32 1.0, %v5171_v63  ;;  %vm5551_vm6 = vweird.f32 %v12053_v48  ;;  %v5557_v14 = vor.u32 1.1754944e-38, %v5556_v40 }
0x1033   : > { %v5455_v45 = vpop.f32.mrf.mxu2  ;;  %5684 = vrot.lane.b32.xlu0 %v5668_v6, %s8588_s7  ;;  %v5547_v39 = vsub.f32 1.0, %v5546_v15  ;;  %v5533_v9 = vmul.f32 %v12036_v30, %v5532_v51  ;;  %v5181_v51 = vand.u32 2147483648, %v11976_v35  ;;  %vm12142_vm10 = vmor %vm5550_vm8, %vm5551_vm6  ;;  %vm5565_vm1 = vweird.f32 %v12038_v26 }
0x1034   : > { %v12058_v22 = vadd.f32 %v5455_v45, %v5399_v28  ;;  %5298 = vrot.lane.b32.xlu1 %v5280_v34, %s8588_s7  ;;  %5294 = vrot.lane.b32.xlu2 %v5278_v38, %s8588_s7  ;;  %v5173_v31 = vmul.f32 %v12044_v7, %v5172_v44  ;;  %v5541_v38 = vand.u32 2147483648, %v11973_v53  ;;  %vm5190_vm2 = vweird.f32 %v12034_v20 }
0x1035   : > { %v12077_v12 = vpop.eup %8292  ;;  %v5548_v62 = vmul.f32 %v12053_v48, %v5547_v39  ;;  %v5534_v6 = vadd.f32 %v12036_v30, %v5533_v9  ;;  %v5554_v39 = vand.u32 2147483647, %v11979_v32  ;;  %v5182_v59 = vor.u32 1.1754944e-38, %v5181_v51 }
0x1036   : > { %8296 = vtanh.f32 %v12058_v22  ;;  %v12080_v49 = vpop.eup %8294  ;;  %v5186_v28 = vmul.f32 %v12077_v12, %v12034_v20  ;;  %v5174_v36 = vadd.f32 %v12044_v7, %v5173_v31  ;;  %v5542_v47 = vor.u32 1.1754944e-38, %v5541_v38 }
0x1037   : > { %8298 = vrcp.f32 %v12073_v52  ;;  %v5561_v5 = vmul.f32 %v12080_v49, %v12038_v26  ;;  %v5549_v45 = vadd.f32 %v12053_v48, %v5548_v62  ;;  %v5649_v62 = vpop.permute.xlu2 %5648  ;;  %vm5555_vm12 = vcmp.eq.f32.partialorder %v5554_v39, 8.507059e+37 }
0x1038   : > { %v5261_v34 = vpop.permute.xlu1 %5260  ;;  %v5187_v63 = vsub.f32 1.0, %v5186_v28  ;;  %v5178_v35 = vsel %vm12130_vm9, %v12044_v7, %v5174_v36  ;;  %vm5566_vm14 = vweird.f32 %v12080_v49  ;;  %vm5191_vm15 = vweird.f32 %v12077_v12 }
0x1039   : > { %v5562_v19 = vsub.f32 1.0, %v5561_v5  ;;  %v5281_v13 = vmul.f32 %v5261_v34, %v12105_v8  ;;  %v5553_v32 = vsel %vm12142_vm10, %v12053_v48, %v5549_v45  ;;  %v12160_v28 = vsel %vm5180_vm13, %v5182_v59, %v5178_v35  ;;  %vm5567_vm3 = vmor %vm5565_vm1, %vm5566_vm14 }
0x103a   : > { %v5188_v9 = vmul.f32 %v12077_v12, %v5187_v63  ;;  %v12158_v5 = vsel %vm5555_vm12, %v5557_v14, %v5553_v32  ;;  %v5571_v34 = vand.u32 2147483648, %v12038_v26  ;;  %v5196_v63 = vand.u32 2147483648, %v12034_v20  ;;  %vm5192_vm4 = vmor %vm5190_vm2, %vm5191_vm15 }
0x103b   : > { %v5457_v23 = vpop.f32.mrf.mxu2  ;;  %v5194_v40 = vand.u32 2147483647, %v12034_v20  ;;  %vm5580_vm8 = vweird.f32 %v12073_v52  ;;  %v5584_v35 = vand.u32 2147483647, %v12073_v52 }
0x103c   : > { %v8297_v3 = vpop.eup %8296  ;;  %v12088_v25 = vadd.f32 %v5457_v23, %v5401_v10  ;;  %v5539_v10 = vand.u32 2147483647, %v11973_v53  ;;  %v5538_v23 = vsel %vm12116_vm7, %v12036_v30, %v5534_v6  ;;  %v5563_v30 = vmul.f32 %v12080_v49, %v5562_v19 }
0x103d   : > { %5656 = vrot.lane.b32.xlu2 %v8297_v3, %s8587_s6  ;;  %v12114_v29 = vpop.eup %8298  ;;  %v5189_v19 = vadd.f32 %v12077_v12, %v5188_v9  ;;  %v5572_v39 = vor.u32 1.1754944e-38, %v5571_v34  ;;  %v5197_v43 = vor.u32 1.1754944e-38, %v5196_v63  ;;  %vm5195_vm6 = vcmp.eq.f32.partialorder %v5194_v40, 8.507059e+37 }
0x103e   : > { %8300 = vtanh.f32 %v12088_v25  ;;  %v5576_v3 = vmul.f32 %v12114_v29, %v12073_v52  ;;  %vm5540_vm11 = vcmp.eq.f32.partialorder %v5539_v10, 8.507059e+37  ;;  %v5564_v38 = vadd.f32 %v12080_v49, %v5563_v30 }
0x103f   : > { %v12156_v48 = vsel %vm5540_vm11, %v5542_v47, %v5538_v23  ;;  %v5193_v10 = vsel %vm5192_vm4, %v12077_v12, %v5189_v19  ;;  %v5265_v44 = vpop.permute.xlu2 %5264  ;;  %vm5581_vm7 = vweird.f32 %v12114_v29  ;;  %v5586_v12 = vand.u32 2147483648, %v12073_v52 }
0x1040   : > { %v5577_v45 = vsub.f32 1.0, %v5576_v3  ;;  %v5670_v36 = vmul.f32 %v5649_v62, %v12156_v48  ;;  %v5568_v51 = vsel %vm5567_vm3, %v12080_v49, %v5564_v38  ;;  %v12183_v20 = vsel %vm5195_vm6, %v5197_v43, %v5193_v10  ;;  %vm5582_vm9 = vmor %vm5580_vm8, %vm5581_vm7 }
0x1041   : > { %v5283_v49 = vmul.f32 %v5265_v44, %v12183_v20  ;;  %v5587_v3 = vor.u32 1.1754944e-38, %v5586_v12  ;;  %vm5585_vm10 = vcmp.eq.f32.partialorder %v5584_v35, 8.507059e+37  ;;  %v7402_v47 = vmul.f32 -1.442695, %v11952_v46 }
0x1042   : > { %v7401_v52 = vmul.f32 -1.442695, %v11932_v1  ;;  %v5238_v35 = vmul.f32 %v12048_v58, %v11668_v11 }
0x1043   : > { %8302 = vpow2.f32 %v7402_v47 }
0x1044   : > { %v8301_v55 = vpop.eup %8300 }
0x1045   : > { %5658 = vrot.lane.b32.xlu0 %v8301_v55, %s8587_s6  ;;  %5300 = vrot.lane.b32.xlu2 %v5281_v13, %s8588_s7  ;;  %v5569_v13 = vand.u32 2147483647, %v12038_v26  ;;  %v5578_v55 = vmul.f32 %v12114_v29, %v5577_v45 }
0x1047   : > { %vm5570_vm5 = vcmp.eq.f32.partialorder %v5569_v13, 8.507059e+37  ;;  %v5579_v32 = vadd.f32 %v12114_v29, %v5578_v55 }
0x1048   : > { %v12181_v23 = vsel %vm5570_vm5, %v5572_v39, %v5568_v51 }
0x1049   : > { %v5263_v31 = vpop.permute.xlu1 %5262  ;;  %v5583_v30 = vsel %vm5582_vm9, %v12114_v29, %v5579_v32  ;;  %v8303_v62 = vpop.eup %8302  ;;  %v7418_v32 = vmul.f32 -1.442695, %v12088_v25 }
0x104a   : > { %v5651_v7 = vpop.permute.xlu0 %5650  ;;  %v5282_v15 = vmul.f32 %v5263_v31, %v12160_v28  ;;  %v12196_v9 = vsel %vm5585_vm10, %v5587_v3, %v5583_v30  ;;  %v5109_v31 = vadd.f32 1.0, %v8303_v62 }
0x104b   : > { %v5671_v6 = vmul.f32 %v5651_v7, %v12158_v5  ;;  %v7417_v7 = vmul.f32 -1.442695, %v12058_v22 }
0x104c   : > { %8304 = vrcp.f32 %v5109_v31  ;;  %v5226_v13 = vand.u32 2147483648, %v5109_v31  ;;  %vm5220_vm12 = vweird.f32 %v5109_v31  ;;  %v5224_v40 = vand.u32 2147483647, %v5109_v31 }
0x104d   : > { %5690 = vrot.lane.b32.xlu1 %v5671_v6, %s8588_s7  ;;  %5688 = vrot.lane.b32.xlu0 %v5670_v36, %s8588_s7  ;;  %8306 = vpow2.f32 %v7401_v52 }
0x104e   : > { %5302 = vrot.lane.b32.xlu2 %v5282_v15, %s8588_s7  ;;  %8308 = vpow2.f32 %v7417_v7  ;;  %v5227_v55 = vor.u32 1.1754944e-38, %v5226_v13  ;;  %vm5225_vm14 = vcmp.eq.f32.partialorder %v5224_v40, 8.507059e+37 }
0x1052   : > { %v5653_v26 = vpop.permute.xlu0 %5652  ;;  %v8305_v29 = vpop.eup %8304 }
0x1053   : > { %v5672_v53 = vmul.f32 %v5653_v26, %v12181_v23  ;;  %v8307_v34 = vpop.eup %8306  ;;  %v5216_v46 = vmul.f32 %v8305_v29, %v5109_v31  ;;  %vm5221_vm11 = vweird.f32 %v8305_v29 }
0x1054   : > { %v8309_v6 = vpop.eup %8308  ;;  %v5108_v38 = vadd.f32 1.0, %v8307_v34  ;;  %vm5222_vm13 = vmor %vm5220_vm12, %vm5221_vm11 }
0x1055   : > { %5692 = vrot.lane.b32.xlu1 %v5672_v53, %s8588_s7  ;;  %5304 = vrot.lane.b32.xlu0 %v5283_v49, %s8588_s7  ;;  %v5498_v45 = vadd.f32 1.0, %v8309_v6  ;;  %v5217_v36 = vsub.f32 1.0, %v5216_v46 }
0x1056   : > { %8310 = vrcp.f32 %v5108_v38  ;;  %vm5205_vm2 = vweird.f32 %v5108_v38  ;;  %v5209_v62 = vand.u32 2147483647, %v5108_v38 }
0x1057   : > { %8312 = vrcp.f32 %v5498_v45  ;;  %v5218_v19 = vmul.f32 %v8305_v29, %v5217_v36  ;;  %v5601_v31 = vand.u32 2147483648, %v5498_v45  ;;  %vm5595_vm4 = vweird.f32 %v5498_v45 }
0x1058   : > { %8314 = vpow2.f32 %v7418_v32  ;;  %v5599_v25 = vand.u32 2147483647, %v5498_v45  ;;  %vm5210_vm6 = vcmp.eq.f32.partialorder %v5209_v62, 8.507059e+37 }
0x1059   : > { %v5655_v14 = vpop.permute.xlu1 %5654  ;;  %v5219_v15 = vadd.f32 %v8305_v29, %v5218_v19  ;;  %v5602_v6 = vor.u32 1.1754944e-38, %v5601_v31  ;;  %v5242_v31 = vmul.f32 %v12160_v28, %v11747_v4 }
0x105a   : > { %v5673_v59 = vmul.f32 %v5655_v14, %v12196_v9  ;;  %v5211_v14 = vand.u32 2147483648, %v5108_v38  ;;  %vm5600_vm7 = vcmp.eq.f32.partialorder %v5599_v25, 8.507059e+37 }
0x105b   : > { %v5223_v22 = vsel %vm5222_vm13, %v8305_v29, %v5219_v15  ;;  %v5239_v29 = vmul.f32 %v11909_v24, %v11682_v27  ;;  %v5629_v27 = vmul.f32 %v11981_v0, %v11713_v41 }
0x105c   : > { %5694 = vrot.lane.b32.xlu2 %v5673_v59, %s8588_s7  ;;  %v8311_v63 = vpop.eup %8310  ;;  %v12202_v44 = vsel %vm5225_vm14, %v5227_v55, %v5223_v22  ;;  %v5212_v34 = vor.u32 1.1754944e-38, %v5211_v14 }
0x105d   : > { %v8313_v1 = vpop.eup %8312  ;;  %v5201_v51 = vmul.f32 %v8311_v63, %v5108_v38  ;;  %vm5206_vm15 = vweird.f32 %v8311_v63 }
0x105e   : > { %v5591_v10 = vmul.f32 %v8313_v1, %v5498_v45  ;;  %vm5596_vm1 = vweird.f32 %v8313_v1  ;;  %vm5207_vm3 = vmor %vm5205_vm2, %vm5206_vm15  ;;  %v8315_v11 = vpop.eup %8314 }
0x105f   : > { %v5202_v26 = vsub.f32 1.0, %v5201_v51  ;;  %vm5597_vm5 = vmor %vm5595_vm4, %vm5596_vm1  ;;  %v5499_v15 = vadd.f32 1.0, %v8315_v11 }
0x1060   : > { %v5592_v53 = vsub.f32 1.0, %v5591_v10 }
0x1061   : > { %v5203_v49 = vmul.f32 %v8311_v63, %v5202_v26  ;;  %v5616_v14 = vand.u32 2147483648, %v5499_v15  ;;  %vm5610_vm9 = vweird.f32 %v5499_v15  ;;  %v5614_v62 = vand.u32 2147483647, %v5499_v15 }
0x1062   : > { %v5593_v12 = vmul.f32 %v8313_v1, %v5592_v53 }
0x1063   : > { %v5204_v3 = vadd.f32 %v8311_v63, %v5203_v49  ;;  %v5617_v11 = vor.u32 1.1754944e-38, %v5616_v14  ;;  %vm5615_vm11 = vcmp.eq.f32.partialorder %v5614_v62, 8.507059e+37 }
0x1064   : > { %v5594_v59 = vadd.f32 %v8313_v1, %v5593_v12  ;;  %v5241_v12 = vmul.f32 %v12105_v8, %v11734_v61 }
0x1065   : > { %v5208_v7 = vsel %vm5207_vm3, %v8311_v63, %v5204_v3 }
0x1066   : > { %v5598_v46 = vsel %vm5597_vm5, %v8313_v1, %v5594_v59  ;;  %v12216_v38 = vsel %vm5210_vm6, %v5212_v34, %v5208_v7 }
0x1067   : > { %v12219_v63 = vsel %vm5600_vm7, %v5602_v6, %v5598_v46  ;;  %v5244_v14 = vmul.f32 %v12216_v38, %v11764_v18 }
0x1086   : > { %v5269_v39 = vpop.permute.xlu2 %5268 }
0x1087   : > { %v5285_v43 = vmul.f32 %v5269_v39, %v12202_v44  ;;  %v5297_v52 = vpop.permute.xlu0 %5296 }
0x1088   : > { %v12214_v36 = vadd.f32 %v5297_v52, %v5239_v29  ;;  %v5240_v52 = vmul.f32 %v12040_v50, %v11698_v37  ;;  %v5633_v37 = vmul.f32 %v12196_v9, %v11756_v21  ;;  %v5243_v21 = vmul.f32 %v12183_v20, %v11745_v17 }
0x1089   : > { %5308 = vrot.lane.b32.xlu1 %v5285_v43, %s8588_s7  ;;  %v5628_v43 = vmul.f32 %v12042_v33, %v11692_v42 }
0x108e   : > { %v5295_v30 = vpop.permute.xlu2 %5294 }
0x108f   : > { %v12209_v47 = vadd.f32 %v5295_v30, %v5238_v35 }
0x1091   : > { %8316 = vtanh.f32 %v12209_v47 }
0x1092   : > { %8318 = vtanh.f32 %v12214_v36 }
0x1093   : > { %8320 = vrcp.f32 %v5499_v15 }
0x1096   : > { %v5267_v19 = vpop.permute.xlu1 %5266 }
0x1097   : > { %v5284_v45 = vmul.f32 %v5267_v19, %v12216_v38  ;;  %v5657_v13 = vpop.permute.xlu2 %5656  ;;  %v8317_v40 = vpop.eup %8316 }
0x1098   : > { %v5674_v22 = vmul.f32 %v5657_v13, %v12219_v63  ;;  %5342 = vrot.lane.b32.xlu2 %v8317_v40, %s8587_s6  ;;  %v8319_v55 = vpop.eup %8318  ;;  %v5630_v40 = vmul.f32 %v12156_v48, %v11730_v56 }
0x1099   : > { %5306 = vrot.lane.b32.xlu0 %v5284_v45, %s8588_s7  ;;  %v8321_v10 = vpop.eup %8320  ;;  %v5631_v45 = vmul.f32 %v12158_v5, %v11717_v60  ;;  %v5632_v60 = vmul.f32 %v12181_v23, %v11732_v2 }
0x109a   : > { %5696 = vrot.lane.b32.xlu1 %v5674_v22, %s8588_s7  ;;  %v5606_v39 = vmul.f32 %v8321_v10, %v5499_v15  ;;  %vm5611_vm8 = vweird.f32 %v8321_v10 }
0x109b   : > { %vm5612_vm10 = vmor %vm5610_vm9, %vm5611_vm8 }
0x109c   : > { %v5607_v41 = vsub.f32 1.0, %v5606_v39 }
0x109e   : > { %v5687_v1 = vpop.permute.xlu1 %5686  ;;  %v5608_v35 = vmul.f32 %v8321_v10, %v5607_v41 }
0x109f   : > { %v12228_v51 = vadd.f32 %v5687_v1, %v5629_v27  ;;  %v5301_v49 = vpop.permute.xlu2 %5300 }
0x10a0   : > { %v12240_v30 = vadd.f32 %v5301_v49, %v5241_v12  ;;  %v5609_v42 = vadd.f32 %v8321_v10, %v5608_v35  ;;  %v5245_v12 = vmul.f32 %v12202_v44, %v11771_v54  ;;  %v5634_v54 = vmul.f32 %v12219_v63, %v11784_v16 }
0x10a1   : > { %8322 = vtanh.f32 %v12228_v51  ;;  %5344 = vrot.lane.b32.xlu0 %v8319_v55, %s8587_s6 }
0x10a2   : > { %v5613_v61 = vsel %vm5612_vm10, %v8321_v10, %v5609_v42 }
0x10a3   : > { %v12252_v46 = vsel %vm5615_vm11, %v5617_v11, %v5613_v61 }
0x10a4   : > { %v5635_v11 = vmul.f32 %v12252_v46, %v11781_v57 }
0x10a5   : > { %v5685_v26 = vpop.permute.xlu0 %5684 }
0x10a6   : > { %v12234_v32 = vadd.f32 %v5685_v26, %v5628_v43  ;;  %v5299_v25 = vpop.permute.xlu1 %5298 }
0x10a7   : > { %v8323_v53 = vpop.eup %8322  ;;  %v12250_v34 = vadd.f32 %v5299_v25, %v5240_v52 }
0x10a8   : > { %5734 = vrot.lane.b32.xlu1 %v8323_v53, %s8587_s6  ;;  %8324 = vtanh.f32 %v12234_v32  ;;  %v5303_v59 = vpop.permute.xlu2 %5302 }
0x10a9   : > { %8326 = vtanh.f32 %v12240_v30  ;;  %v12248_v7 = vadd.f32 %v5303_v59, %v5242_v31 }
0x10ab   : > { %8328 = vtanh.f32 %v12248_v7 }
0x10ac   : > { %8330 = vtanh.f32 %v12250_v34 }
0x10ae   : > { %v8325_v3 = vpop.eup %8324 }
0x10af   : > { %5732 = vrot.lane.b32.xlu0 %v8325_v3, %s8587_s6  ;;  %v8327_v29 = vpop.eup %8326 }
0x10b1   : > { %v8329_v22 = vpop.eup %8328 }
0x10b2   : > { %v8331_v10 = vpop.eup %8330 }
0x10b6   : > { %v5695_v4 = vpop.permute.xlu2 %5694 }
0x10b7   : > { %v5659_v6 = vpop.permute.xlu0 %5658  ;;  %5348 = vrot.lane.b32.xlu0 %v8327_v29, %s8587_s6  ;;  %v12261_v15 = vadd.f32 %v5695_v4, %v5633_v37 }
0x10b8   : > { %v5675_v19 = vmul.f32 %v5659_v6, %v12252_v46 }
0x10b9   : > { %8332 = vtanh.f32 %v12261_v15 }
0x10ba   : > { %5698 = vrot.lane.b32.xlu2 %v5675_v19, %s8588_s7 }
0x10bf   : > { %v5691_v13 = vpop.permute.xlu1 %5690  ;;  %v5689_v1 = vpop.permute.xlu0 %5688  ;;  %5350 = vrot.lane.b32.xlu0 %v8329_v22, %s8587_s6 }
0x10c0   : > { %v12267_v27 = vadd.f32 %v5691_v13, %v5631_v45  ;;  %v12269_v55 = vadd.f32 %v5689_v1, %v5630_v40  ;;  %v8333_v39 = vpop.eup %8332 }
0x10c2   : > { %8334 = vtanh.f32 %v12269_v55  ;;  %5346 = vrot.lane.b32.xlu2 %v8331_v10, %s8587_s6 }
0x10c3   : > { %8336 = vtanh.f32 %v12267_v27 }
0x10c7   : > { %v5693_v56 = vpop.permute.xlu1 %5692  ;;  %v5305_v26 = vpop.permute.xlu0 %5304  ;;  %5742 = vrot.lane.b32.xlu0 %v8333_v39, %s8587_s6 }
0x10c8   : > { %v12280_v43 = vadd.f32 %v5693_v56, %v5632_v60  ;;  %v8335_v53 = vpop.eup %8334  ;;  %v12282_v49 = vadd.f32 %v5305_v26, %v5243_v21 }
0x10c9   : > { %v8337_v41 = vpop.eup %8336  ;;  %5736 = vrot.lane.b32.xlu1 %v8335_v53, %s8587_s6 }
0x10ca   : > { %8338 = vtanh.f32 %v12282_v49  ;;  %5738 = vrot.lane.b32.xlu2 %v8337_v41, %s8587_s6 }
0x10cb   : > { %8340 = vtanh.f32 %v12280_v43 }
0x10d0   : > { %v8339_v2 = vpop.eup %8338 }
0x10d1   : > { %v8341_v17 = vpop.eup %8340  ;;  %5352 = vrot.lane.b32.xlu1 %v8339_v2, %s8587_s6 }
0x10d2   : > { %5740 = vrot.lane.b32.xlu2 %v8341_v17, %s8587_s6 }
0x10f2   : > { %v5343_v62 = vpop.permute.xlu2 %5342 }
0x10f3   : > { %v5366_v6 = vmul.f32 %v5343_v62, %v12048_v58 }
0x10fb   : > { %v5309_v35 = vpop.permute.xlu1 %5308 }
0x10fc   : > { %v12293_v3 = vadd.f32 %v5309_v35, %v5245_v12 }
0x10fe   : > { %8342 = vtanh.f32 %v12293_v3 }
0x1104   : > { %v8343_v42 = vpop.eup %8342 }
0x1105   : > { %5356 = vrot.lane.b32.xlu0 %v8343_v42, %s8587_s6 }
0x110b   : > { %v5307_v59 = vpop.permute.xlu0 %5306 }
0x110c   : > { %v12299_v31 = vadd.f32 %v5307_v59, %v5244_v14  ;;  %v5697_v25 = vpop.permute.xlu1 %5696 }
0x110d   : > { %v12304_v61 = vadd.f32 %v5697_v25, %v5634_v54 }
0x110e   : > { %8344 = vtanh.f32 %v12299_v31 }
0x110f   : > { %8346 = vtanh.f32 %v12304_v61 }
0x1113   : > { %v5345_v52 = vpop.permute.xlu0 %5344 }
0x1114   : > { %v8345_v29 = vpop.eup %8344  ;;  %v5367_v18 = vmul.f32 %v5345_v52, %v11909_v24  ;;  %v5699_v19 = vpop.permute.xlu2 %5698 }
0x1115   : > { %v12310_v4 = vadd.f32 %v5699_v19, %v5635_v11  ;;  %5354 = vrot.lane.b32.xlu2 %v8345_v29, %s8587_s6  ;;  %v8347_v16 = vpop.eup %8346  ;;  %v13179_v19 = vld [vmem:[#allocation14_spill] sm:$0xff] }
0x1116   : > { %v5772_v37 = vpack.c.bf16 %v5367_v18, %v5366_v6  ;;  %v12354_v18 = vld [vmem:[%s13013_s3] ss:$0 sm:$0xff] }
0x1117   : > { %8348 = vtanh.f32 %v12310_v4 }
0x1118   : > { %5780 = vrot.lane.b32.xlu1 %v5772_v37, %s8588_s7  ;;  %v812_v37 = vadd.f32 %v12354_v18, %v13179_v19 }
0x111a   : > { %v5735_v57 = vpop.permute.xlu1 %5734 }
0x111b   : > { %v5757_v58 = vmul.f32 %v5735_v57, %v11981_v0 }
0x111c   : > { %v5347_v40 = vpop.permute.xlu2 %5346 }
0x111d   : > { %v8349_v45 = vpop.eup %8348  ;;  %5744 = vrot.lane.b32.xlu2 %v8347_v16, %s8587_s6  ;;  %v5368_v10 = vmul.f32 %v5347_v40, %v12040_v50 }
0x111e   : > { %5746 = vrot.lane.b32.xlu0 %v8349_v45, %s8587_s6 }
0x1121   : > { %v5733_v24 = vpop.permute.xlu0 %5732 }
0x1122   : > { %v5756_v13 = vmul.f32 %v5733_v24, %v12042_v33  ;;  %v13180_v24 = vld [vmem:[#allocation17_spill] sm:$0xff] }
0x1124   : > { %v6162_v22 = vpack.c.bf16 %v5757_v58, %v5756_v13  ;;  %v5739_v21 = vpop.permute.xlu2 %5738  ;;  %v814_v58 = vadd.f32 %v12354_v18, %v13180_v24  ;;  %v12366_v13 = vld [vmem:[%s13013_s3 + $0x1] ss:$0 sm:$0xff] }
0x1125   : > { %v5759_v2 = vmul.f32 %v5739_v21, %v12158_v5 }
0x1126   : > { %6170 = vrot.lane.b32.xlu1 %v6162_v22, %s8588_s7 }
0x1129   : > { %v5349_v1 = vpop.permute.xlu0 %5348 }
0x112a   : > { %v5369_v60 = vmul.f32 %v5349_v1, %v12105_v8 }
0x112c   : > { %v5773_v56 = vpack.c.bf16 %v5369_v60, %v5368_v10  ;;  %v5741_v26 = vpop.permute.xlu2 %5740 }
0x112d   : > { %v5760_v0 = vmul.f32 %v5741_v26, %v12181_v23 }
0x112e   : > { %5782 = vrot.lane.b32.xlu1 %v5773_v56, %s8588_s7 }
0x1131   : > { %v5351_v39 = vpop.permute.xlu0 %5350 }
0x1132   : > { %v5370_v35 = vmul.f32 %v5351_v39, %v12160_v28 }
0x1139   : > { %v5743_v53 = vpop.permute.xlu0 %5742 }
0x113a   : > { %v5761_v33 = vmul.f32 %v5743_v53, %v12196_v9 }
0x113b   : > { %v5737_v41 = vpop.permute.xlu1 %5736 }
0x113c   : > { %v5758_v17 = vmul.f32 %v5737_v41, %v12156_v48  ;;  %v6164_v12 = vpack.c.bf16 %v5761_v33, %v5760_v0 }
0x113e   : > { %v6163_v50 = vpack.c.bf16 %v5759_v2, %v5758_v17  ;;  %6174 = vrot.lane.b32.xlu1 %v6164_v12, %s8588_s7  ;;  %v13181_v2 = vld [vmem:[#allocation20_spill] sm:$0xff] }
0x113f   : > { %v817_v17 = vadd.f32 %v12354_v18, %v13181_v2 }
0x1140   : > { %6172 = vrot.lane.b32.xlu2 %v6163_v50, %s8588_s7 }
0x1143   : > { %v5353_v8 = vpop.permute.xlu1 %5352 }
0x1144   : > { %v5371_v42 = vmul.f32 %v5353_v8, %v12183_v20 }
0x1146   : > { %v5774_v14 = vpack.c.bf16 %v5371_v42, %v5370_v35 }
0x1148   : > { %5784 = vrot.lane.b32.xlu0 %v5774_v14, %s8588_s7 }
0x116f   : > { %v5355_v23 = vpop.permute.xlu2 %5354 }
0x1170   : > { %v5372_v5 = vmul.f32 %v5355_v23, %v12216_v38  ;;  %v13182_v23 = vld [vmem:[#allocation23_spill] sm:$0xff] }
0x1177   : > { %v5357_v9 = vpop.permute.xlu0 %5356  ;;  %v5745_v28 = vpop.permute.xlu2 %5744 }
0x1178   : > { %v5373_v48 = vmul.f32 %v5357_v9, %v12202_v44  ;;  %v5762_v20 = vmul.f32 %v5745_v28, %v12219_v63  ;;  %v819_v9 = vadd.f32 %v12354_v18, %v13182_v23 }
0x117a   : > { %v5775_v59 = vpack.c.bf16 %v5373_v48, %v5372_v5 }
0x117c   : > { %5786 = vrot.lane.b32.xlu2 %v5775_v59, %s8588_s7 }
0x118a   : > { %v5781_v62 = vpop.permute.xlu1 %5780 }
0x118b   : > { %7419 = vmatmul.msk.bf16.vlgmr.msra.gmra.mxu3 %vm250_vm0, %v5781_v62  ;;  %7431 = vmatmul.msk.bf16.vlgmr.msrb.gmra.mxu0 %vm250_vm0, %v5781_v62 }
0x1190   : > { %v5747_v25 = vpop.permute.xlu0 %5746 }
0x1191   : > { %v5763_v54 = vmul.f32 %v5747_v25, %v12252_v46 }
0x1193   : > { %v6165_v52 = vpack.c.bf16 %v5763_v54, %v5762_v20 }
0x1195   : > { %6176 = vrot.lane.b32.xlu0 %v6165_v52, %s8588_s7 }
0x1198   : > { %v6171_v38 = vpop.permute.xlu1 %6170 }
0x1199   : > { %7435 = vmatmul.msk.bf16.vlgmr.msrb.gmra.mxu1 %vm250_vm0, %v6171_v38 }
0x119a   : > { %v6173_v11 = vpop.permute.xlu2 %6172 }
0x11a0   : > { %v5783_v44 = vpop.permute.xlu1 %5782 }
0x11a1   : > { %7420 = vmatmul.msk.bf16.gmra.mxu3 %vm250_vm0, %v5783_v44  ;;  %7432 = vmatmul.msk.bf16.gmra.mxu0 %vm250_vm0, %v5783_v44 }
0x11a9   : > { %7436 = vmatmul.msk.bf16.gmra.mxu1 %vm250_vm0, %v6173_v11 }
0x11b0   : > { %v6175_v29 = vpop.permute.xlu1 %6174 }
0x11b9   : > { %7437 = vmatmul.msk.bf16.gmra.mxu1 %vm250_vm0, %v6175_v29 }
0x11ba   : > { %v5785_v63 = vpop.permute.xlu0 %5784 }
0x11bb   : > { %7421 = vmatmul.msk.bf16.gmra.mxu3 %vm250_vm0, %v5785_v63  ;;  %7433 = vmatmul.msk.bf16.gmra.mxu0 %vm250_vm0, %v5785_v63 }
0x11d6   : > { %v5787_v46 = vpop.permute.xlu2 %5786 }
0x11d7   : > { %7422 = vmatmul.msk.bf16.gmra.mxu3 %vm250_vm0, %v5787_v46  ;;  %7434 = vmatmul.msk.bf16.gmra.mxu0 %vm250_vm0, %v5787_v46  ;;  %v13183_v46 = vld [vmem:[#allocation26_spill] sm:$0xff] }
0x1207   : > { %v6177_v6 = vpop.permute.xlu0 %6176 }
0x1208   : > { %7438 = vmatmul.msk.bf16.gmra.mxu1 %vm250_vm0, %v6177_v6  ;;  %v6142_v57 = vpop.f32.mrf.mxu0  ;;  %v822_v6 = vadd.f32 %v12354_v18, %v13183_v46 }
0x1209   : > { %v6143_v40 = vadd.f32 %v12366_v13, %v6142_v57 }
0x120e   : > { %v5809_v16 = vpop.f32.mrf.mxu3 }
0x120f   : > { %v12358_v45 = vadd.f32 %v5809_v16, %v812_v37 }
0x1210   : > { %v6144_v21 = vpop.f32.mrf.mxu0 }
0x1211   : > { %8350 = vtanh.f32 %v12358_v45  ;;  %v6145_v39 = vadd.f32 %v12366_v13, %v6144_v21 }
0x1216   : > { %v5811_v22 = vpop.f32.mrf.mxu3  ;;  %v6199_v60 = vpop.f32.mrf.mxu1 }
0x1217   : > { %v8351_v1 = vpop.eup %8350  ;;  %v12369_v10 = vadd.f32 %v5811_v22, %v814_v58  ;;  %v12371_v56 = vadd.f32 %v6199_v60, %v6143_v40  ;;  %v13184_v22 = vld [vmem:[#allocation29_spill] sm:$0xff] }
0x1218   : > { %6013 = vrot.lane.b32.xlu1 %v8351_v1, %s8587_s6  ;;  %v824_v1 = vadd.f32 %v12354_v18, %v13184_v22 }
0x1219   : > { %8352 = vtanh.f32 %v12369_v10 }
0x121a   : > { %8354 = vtanh.f32 %v12371_v56 }
0x121e   : > { %v6201_v53 = vpop.f32.mrf.mxu1  ;;  %v6147_v41 = vpop.f32.mrf.mxu0 }
0x121f   : > { %v8353_v26 = vpop.eup %8352  ;;  %v12377_v33 = vadd.f32 %v6201_v53, %v6145_v39  ;;  %v6148_v50 = vadd.f32 %v12366_v13, %v6147_v41 }
0x1220   : > { %v8355_v0 = vpop.eup %8354  ;;  %6015 = vrot.lane.b32.xlu2 %v8353_v26, %s8587_s6  ;;  %v7424_v26 = vmul.f32 -1.442695, %v12369_v10 }
0x1221   : > { %6403 = vrot.lane.b32.xlu0 %v8355_v0, %s8587_s6  ;;  %8356 = vtanh.f32 %v12377_v33 }
0x1224   : > { %v5814_v12 = vpop.f32.mrf.mxu3 }
0x1225   : > { %v12385_v8 = vadd.f32 %v5814_v12, %v817_v17  ;;  %v7423_v12 = vmul.f32 -1.442695, %v12358_v45  ;;  %v7440_v45 = vmul.f32 -1.442695, %v12377_v33 }
0x1226   : > { %v6204_v35 = vpop.f32.mrf.mxu1  ;;  %v6149_v5 = vpop.f32.mrf.mxu0 }
0x1227   : > { %v8357_v42 = vpop.eup %8356  ;;  %8358 = vtanh.f32 %v12385_v8  ;;  %v12388_v14 = vadd.f32 %v6204_v35, %v6148_v50  ;;  %v6150_v25 = vadd.f32 %v12366_v13, %v6149_v5  ;;  %v13185_v50 = vld [vmem:[#allocation35_spill] sm:$0xff] }
0x1228   : > { %6405 = vrot.lane.b32.xlu1 %v8357_v42, %s8587_s6  ;;  %v829_v35 = vadd.f32 %v12354_v18, %v13185_v50 }
0x1229   : > { %8360 = vtanh.f32 %v12388_v14  ;;  %v7441_v33 = vmul.f32 -1.442695, %v12388_v14 }
0x122c   : > { %v5816_v48 = vpop.f32.mrf.mxu3 }
0x122d   : > { %v8359_v59 = vpop.eup %8358  ;;  %v12394_v62 = vadd.f32 %v5816_v48, %v819_v9  ;;  %v7439_v9 = vmul.f32 -1.442695, %v12371_v56 }
0x122e   : > { %v6206_v28 = vpop.f32.mrf.mxu1  ;;  %6017 = vrot.lane.b32.xlu2 %v8359_v59, %s8587_s6 }
0x122f   : > { %8362 = vtanh.f32 %v12394_v62  ;;  %v8361_v20 = vpop.eup %8360  ;;  %v12399_v54 = vadd.f32 %v6206_v28, %v6150_v25 }
0x1230   : > { %6407 = vrot.lane.b32.xlu1 %v8361_v20, %s8587_s6  ;;  %v7425_v20 = vmul.f32 -1.442695, %v12385_v8 }
0x1231   : > { %8364 = vtanh.f32 %v12399_v54 }
0x1235   : > { %v8363_v52 = vpop.eup %8362 }
0x1236   : > { %6019 = vrot.lane.b32.xlu0 %v8363_v52, %s8587_s6  ;;  %v6209_v44 = vpop.f32.mrf.mxu1 }
0x1237   : > { %v8365_v63 = vpop.eup %8364 }
0x1238   : > { %v6152_v38 = vpop.f32.mrf.mxu0  ;;  %6409 = vrot.lane.b32.xlu2 %v8365_v63, %s8587_s6 }
0x1239   : > { %v6153_v11 = vadd.f32 %v12366_v13, %v6152_v38 }
0x123b   : > { %v12405_v29 = vadd.f32 %v6209_v44, %v6153_v11 }
0x123d   : > { %8366 = vtanh.f32 %v12405_v29 }
0x123e   : > { %v5819_v19 = vpop.f32.mrf.mxu3  ;;  %v6211_v24 = vpop.f32.mrf.mxu1 }
0x123f   : > { %v12411_v37 = vadd.f32 %v5819_v19, %v822_v6  ;;  %v7442_v19 = vmul.f32 -1.442695, %v12399_v54 }
0x1240   : > { %v6154_v16 = vpop.f32.mrf.mxu0 }
0x1241   : > { %8368 = vtanh.f32 %v12411_v37  ;;  %v6155_v57 = vadd.f32 %v12366_v13, %v6154_v16 }
0x1243   : > { %v8367_v58 = vpop.eup %8366  ;;  %v12415_v40 = vadd.f32 %v6211_v24, %v6155_v57  ;;  %v13186_v24 = vld [vmem:[#allocation32_spill] sm:$0xff] }
0x1244   : > { %6411 = vrot.lane.b32.xlu2 %v8367_v58, %s8587_s6  ;;  %v827_v58 = vadd.f32 %v12354_v18, %v13186_v24  ;;  %v7426_v18 = vmul.f32 -1.442695, %v12394_v62 }
0x1245   : > { %8370 = vtanh.f32 %v12415_v40 }
0x1246   : > { %v5821_v60 = vpop.f32.mrf.mxu3 }
0x1247   : > { %v8369_v21 = vpop.eup %8368  ;;  %v12420_v39 = vadd.f32 %v5821_v60, %v824_v1 }
0x1248   : > { %6021 = vrot.lane.b32.xlu0 %v8369_v21, %s8587_s6 }
0x1249   : > { %8372 = vtanh.f32 %v12420_v39 }
0x124a   : > { %8374 = vpow2.f32 %v7424_v26 }
0x124b   : > { %v8371_v53 = vpop.eup %8370 }
0x124f   : > { %v8373_v0 = vpop.eup %8372 }
0x1250   : > { %6023 = vrot.lane.b32.xlu1 %v8373_v0, %s8587_s6  ;;  %6413 = vrot.lane.b32.xlu0 %v8371_v53, %s8587_s6  ;;  %v8375_v41 = vpop.eup %8374 }
0x1251   : > { %v5862_v2 = vadd.f32 1.0, %v8375_v41  ;;  %v7443_v41 = vmul.f32 -1.442695, %v12405_v29 }
0x1253   : > { %8376 = vrcp.f32 %v5862_v2  ;;  %v5895_v63 = vand.u32 2147483648, %v5862_v2  ;;  %vm5889_vm13 = vweird.f32 %v5862_v2  ;;  %v5893_v8 = vand.u32 2147483647, %v5862_v2 }
0x1254   : > { %8378 = vpow2.f32 %v7423_v12  ;;  %v12471_v12 = vpop.f32.mrf.mxu0 }
0x1255   : > { %v5896_v1 = vor.u32 1.1754944e-38, %v5895_v63  ;;  %vm5894_vm15 = vcmp.eq.f32.partialorder %v5893_v8, 8.507059e+37 }
0x1259   : > { %v8377_v10 = vpop.eup %8376 }
0x125a   : > { %v5824_v17 = vpop.f32.mrf.mxu3  ;;  %v8379_v5 = vpop.eup %8378  ;;  %v5885_v48 = vmul.f32 %v8377_v10, %v5862_v2  ;;  %vm5890_vm12 = vweird.f32 %v8377_v10 }
0x125b   : > { %v12435_v59 = vadd.f32 1.0, %v8379_v5  ;;  %vm5891_vm14 = vmor %vm5889_vm13, %vm5890_vm12  ;;  %v12456_v14 = vadd.f32 %v5824_v17, %v827_v58 }
0x125c   : > { %v5886_v25 = vsub.f32 1.0, %v5885_v48  ;;  %v6159_v8 = vpop.f32.mrf.mxu0 }
0x125d   : > { %vm5874_vm2 = vweird.f32 %v12435_v59 }
0x125e   : > { %v5887_v56 = vmul.f32 %v8377_v10, %v5886_v25  ;;  %v5878_v25 = vand.u32 2147483647, %v12435_v59 }
0x1260   : > { %v5888_v44 = vadd.f32 %v8377_v10, %v5887_v56  ;;  %vm5879_vm4 = vcmp.eq.f32.partialorder %v5878_v25, 8.507059e+37 }
0x1262   : > { %v5826_v42 = vpop.f32.mrf.mxu3  ;;  %v5892_v16 = vsel %vm5891_vm14, %v8377_v10, %v5888_v44 }
0x1263   : > { %v12431_v23 = vadd.f32 %v5826_v42, %v829_v35  ;;  %v12458_v54 = vsel %vm5894_vm15, %v5896_v1, %v5892_v16 }
0x1265   : > { %8380 = vtanh.f32 %v12431_v23 }
0x1266   : > { %8382 = vpow2.f32 %v7439_v9 }
0x1267   : > { %8384 = vrcp.f32 %v12435_v59 }
0x1268   : > { %8386 = vpow2.f32 %v7440_v45 }
0x1269   : > { %8388 = vpow2.f32 %v7425_v20 }
0x126b   : > { %v8381_v28 = vpop.eup %8380 }
0x126c   : > { %6027 = vrot.lane.b32.xlu0 %v8381_v28, %s8587_s6  ;;  %v8383_v52 = vpop.eup %8382  ;;  %v5880_v28 = vand.u32 2147483648, %v12435_v59 }
0x126d   : > { %v12441_v38 = vadd.f32 1.0, %v8383_v52  ;;  %v12443_v11 = vpop.eup %8384 }
0x126e   : > { %v8387_v46 = vpop.eup %8386  ;;  %v5870_v57 = vmul.f32 %v12443_v11, %v12435_v59  ;;  %vm5875_vm1 = vweird.f32 %v12443_v11 }
0x126f   : > { %8390 = vrcp.f32 %v12441_v38  ;;  %v8389_v6 = vpop.eup %8388  ;;  %v12452_v22 = vadd.f32 1.0, %v8387_v46  ;;  %vm5876_vm3 = vmor %vm5874_vm2, %vm5875_vm1  ;;  %vm6264_vm6 = vweird.f32 %v12441_v38 }
0x1270   : > { %v12454_v60 = vadd.f32 1.0, %v8389_v6  ;;  %8392 = vpow2.f32 %v7441_v33  ;;  %v5871_v0 = vsub.f32 1.0, %v5870_v57  ;;  %v5881_v33 = vor.u32 1.1754944e-38, %v5880_v28 }
0x1271   : > { %8394 = vpow2.f32 %v7442_v19  ;;  %vm6279_vm9 = vweird.f32 %v12452_v22 }
0x1272   : > { %8396 = vrcp.f32 %v12452_v22  ;;  %v5872_v50 = vmul.f32 %v12443_v11, %v5871_v0  ;;  %vm5904_vm12 = vweird.f32 %v12454_v60 }
0x1273   : > { %8398 = vrcp.f32 %v12454_v60 }
0x1274   : > { %8400 = vtanh.f32 %v12456_v14  ;;  %v5873_v5 = vadd.f32 %v12443_v11, %v5872_v50 }
0x1275   : > { %v12460_v26 = vpop.eup %8390  ;;  %8402 = vpow2.f32 %v7426_v18  ;;  %v7427_v18 = vmul.f32 -1.442695, %v12411_v37 }
0x1276   : > { %v6260_v2 = vmul.f32 %v12460_v26, %v12441_v38  ;;  %v8393_v17 = vpop.eup %8392  ;;  %8404 = vpow2.f32 %v7443_v41  ;;  %v5877_v44 = vsel %vm5876_vm3, %v12443_v11, %v5873_v5  ;;  %vm6265_vm5 = vweird.f32 %v12460_v26 }
0x1277   : > { %v8395_v35 = vpop.eup %8394  ;;  %v12476_v10 = vadd.f32 1.0, %v8393_v17  ;;  %v12500_v6 = vsel %vm5879_vm4, %v5881_v33, %v5877_v44  ;;  %vm6266_vm7 = vmor %vm6264_vm6, %vm6265_vm5  ;;  %v7444_v44 = vmul.f32 -1.442695, %v12415_v40  ;;  %v6283_v40 = vand.u32 2147483647, %v12452_v22 }
0x1278   : > { %v12474_v42 = vpop.eup %8396  ;;  %v6261_v62 = vsub.f32 1.0, %v6260_v2  ;;  %v12480_v29 = vadd.f32 1.0, %v8395_v35  ;;  %v6268_v2 = vand.u32 2147483647, %v12441_v38 }
0x1279   : > { %v12478_v9 = vpop.eup %8398  ;;  %8406 = vrcp.f32 %v12476_v10  ;;  %v6275_v63 = vmul.f32 %v12474_v42, %v12452_v22  ;;  %vm6280_vm10 = vweird.f32 %v12474_v42  ;;  %vm6284_vm1 = vcmp.eq.f32.partialorder %v6283_v40, 8.507059e+37 }
0x127a   : > { %v6016_v21 = vpop.permute.xlu2 %6015  ;;  %v8401_v48 = vpop.eup %8400  ;;  %v6262_v20 = vmul.f32 %v12460_v26, %v6261_v62  ;;  %8408 = vrcp.f32 %v12480_v29  ;;  %v5900_v56 = vmul.f32 %v12478_v9, %v12454_v60  ;;  %vm6269_vm8 = vcmp.eq.f32.partialorder %v6268_v2, 8.507059e+37  ;;  %vm12551_vm13 = vmor %vm6279_vm9, %vm6280_vm10 }
0x127b   : > { %v6038_v53 = vmul.f32 %v6016_v21, %v12458_v54  ;;  %v8403_v52 = vpop.eup %8402  ;;  %v6276_v58 = vsub.f32 1.0, %v6275_v63  ;;  %v6160_v21 = vadd.f32 %v12366_v13, %v6159_v8  ;;  %vm5905_vm11 = vweird.f32 %v12478_v9 }
0x127c   : > { %v8405_v46 = vpop.eup %8404  ;;  %v12498_v59 = vadd.f32 1.0, %v8403_v52  ;;  %v6263_v16 = vadd.f32 %v12460_v26, %v6262_v20  ;;  %v5901_v24 = vsub.f32 1.0, %v5900_v56  ;;  %v5910_v63 = vand.u32 2147483648, %v12454_v60  ;;  %vm12558_vm14 = vmor %vm5904_vm12, %vm5905_vm11 }
0x127d   : > { %6055 = vrot.lane.b32.xlu2 %v6038_v53, %s8588_s7  ;;  %v12504_v57 = vadd.f32 1.0, %v8405_v46  ;;  %v6270_v53 = vand.u32 2147483648, %v12441_v38  ;;  %v6277_v62 = vmul.f32 %v12474_v42, %v6276_v58  ;;  %vm6294_vm4 = vweird.f32 %v12476_v10 }
0x127e   : > { %8410 = vrcp.f32 %v12498_v59  ;;  %v6267_v50 = vsel %vm6266_vm7, %v12460_v26, %v6263_v16  ;;  %v5902_v35 = vmul.f32 %v12478_v9, %v5901_v24  ;;  %v6285_v26 = vand.u32 2147483648, %v12452_v22 }
0x127f   : > { %v12507_v1 = vpop.eup %8406  ;;  %8412 = vrcp.f32 %v12504_v57  ;;  %v6271_v5 = vor.u32 1.1754944e-38, %v6270_v53  ;;  %v6278_v20 = vadd.f32 %v12474_v42, %v6277_v62  ;;  %v5908_v16 = vand.u32 2147483647, %v12454_v60 }
0x1280   : > { %v12512_v0 = vpop.eup %8408  ;;  %v6290_v37 = vmul.f32 %v12507_v1, %v12476_v10  ;;  %v5903_v28 = vadd.f32 %v12478_v9, %v5902_v35  ;;  %vm6295_vm2 = vweird.f32 %v12507_v1  ;;  %vm6309_vm5 = vweird.f32 %v12480_v29 }
0x1281   : > { %v6305_v38 = vmul.f32 %v12512_v0, %v12480_v29  ;;  %v6282_v22 = vsel %vm12551_vm13, %v12474_v42, %v6278_v20  ;;  %vm5909_vm15 = vcmp.eq.f32.partialorder %v5908_v16, 8.507059e+37  ;;  %vm6310_vm3 = vweird.f32 %v12512_v0  ;;  %vm12603_vm6 = vmor %vm6294_vm4, %vm6295_vm2 }
0x1282   : > { %v6291_v52 = vsub.f32 1.0, %v6290_v37  ;;  %vm6311_vm7 = vmor %vm6309_vm5, %vm6310_vm3  ;;  %vm5919_vm10 = vweird.f32 %v12498_v59  ;;  %vm6324_vm13 = vweird.f32 %v12504_v57 }
0x1283   : > { %v6306_v33 = vsub.f32 1.0, %v6305_v38 }
0x1284   : > { %v12537_v56 = vpop.eup %8410  ;;  %v6292_v53 = vmul.f32 %v12507_v1, %v6291_v52  ;;  %v6315_v52 = vand.u32 2147483648, %v12480_v29 }
0x1285   : > { %6025 = vrot.lane.b32.xlu2 %v8401_v48, %s8587_s6  ;;  %v12486_v45 = vpop.f32.mrf.mxu1  ;;  %v12529_v48 = vsel %vm6269_vm8, %v6271_v5, %v6267_v50  ;;  %v12542_v8 = vpop.eup %8412  ;;  %v6307_v2 = vmul.f32 %v12512_v0, %v6306_v33  ;;  %v6298_v33 = vand.u32 2147483647, %v12476_v10  ;;  %vm5920_vm11 = vweird.f32 %v12537_v56 }
0x1286   : > { %v6320_v50 = vmul.f32 %v12542_v8, %v12504_v57  ;;  %v6316_v58 = vor.u32 1.1754944e-38, %v6315_v52  ;;  %vm6325_vm12 = vweird.f32 %v12542_v8 }
0x1287   : > { %vm6299_vm9 = vcmp.eq.f32.partialorder %v6298_v33, 8.507059e+37 }
0x1288   : > { %v6018_v35 = vpop.permute.xlu2 %6017  ;;  %v6321_v20 = vsub.f32 1.0, %v6320_v50  ;;  %v6330_v50 = vand.u32 2147483648, %v12504_v57 }
0x128a   : > { %v6014_v19 = vpop.permute.xlu1 %6013  ;;  %v6322_v16 = vmul.f32 %v12542_v8, %v6321_v20  ;;  %v6331_v20 = vor.u32 1.1754944e-38, %v6330_v50 }
0x128b   : > { %v6037_v11 = vmul.f32 %v6014_v19, %v12500_v6  ;;  %v7428_v19 = vmul.f32 -1.442695, %v12420_v39  ;;  %v6286_v39 = vor.u32 1.1754944e-38, %v6285_v26  ;;  %v6293_v26 = vadd.f32 %v12507_v1, %v6292_v53 }
0x128c   : > { %v6323_v53 = vadd.f32 %v12542_v8, %v6322_v16 }
0x128d   : > { %v6216_v41 = vpop.f32.mrf.mxu1  ;;  %6053 = vrot.lane.b32.xlu1 %v6037_v11, %s8588_s7  ;;  %v12582_v37 = vsel %vm6284_vm1, %v6286_v39, %v6282_v22  ;;  %v6297_v24 = vsel %vm12603_vm6, %v12507_v1, %v6293_v26 }
0x128e   : > { %v12518_v17 = vadd.f32 %v6216_v41, %v6160_v21  ;;  %v5907_v21 = vsel %vm12558_vm14, %v12478_v9, %v5903_v28  ;;  %v5911_v41 = vor.u32 1.1754944e-38, %v5910_v63  ;;  %v6158_v9 = vadd.f32 %v12366_v13, %v12471_v12  ;;  %vm12644_vm14 = vmor %vm5919_vm10, %vm5920_vm11 }
0x128f   : > { %v6308_v28 = vadd.f32 %v12512_v0, %v6307_v2  ;;  %v6313_v63 = vand.u32 2147483647, %v12480_v29 }
0x1290   : > { %8414 = vtanh.f32 %v12518_v17  ;;  %v12580_v62 = vsel %vm5909_vm15, %v5911_v41, %v5907_v21  ;;  %v12586_v5 = vadd.f32 %v12486_v45, %v6158_v9  ;;  %v6300_v45 = vand.u32 2147483648, %v12476_v10  ;;  %vm6326_vm15 = vmor %vm6324_vm13, %vm6325_vm12 }
0x1291   : > { %8416 = vpow2.f32 %v7427_v18  ;;  %v5915_v18 = vmul.f32 %v12537_v56, %v12498_v59  ;;  %v6039_v12 = vmul.f32 %v6018_v35, %v12580_v62  ;;  %v6312_v29 = vsel %vm6311_vm7, %v12512_v0, %v6308_v28 }
0x1292   : > { %8418 = vpow2.f32 %v7444_v44  ;;  %v6410_v10 = vpop.permute.xlu2 %6409  ;;  %v6301_v39 = vor.u32 1.1754944e-38, %v6300_v45  ;;  %vm6314_vm8 = vcmp.eq.f32.partialorder %v6313_v63, 8.507059e+37  ;;  %v5925_v35 = vand.u32 2147483648, %v12498_v59 }
0x1293   : > { %v6404_v25 = vpop.permute.xlu0 %6403  ;;  %8420 = vpow2.f32 %v7428_v19  ;;  %v5916_v13 = vsub.f32 1.0, %v5915_v18  ;;  %v12621_v21 = vsel %vm6314_vm8, %v6316_v58, %v6312_v29 }
0x1294   : > { %v6427_v46 = vmul.f32 %v6404_v25, %v12529_v48  ;;  %v12623_v0 = vsel %vm6299_vm9, %v6301_v39, %v6297_v24  ;;  %v6430_v22 = vmul.f32 %v6410_v10, %v12621_v21  ;;  %v5926_v45 = vor.u32 1.1754944e-38, %v5925_v35 }
0x1295   : > { %v5917_v40 = vmul.f32 %v12537_v56, %v5916_v13  ;;  %v5923_v13 = vand.u32 2147483647, %v12498_v59  ;;  %v7430_v24 = vmul.f32 -1.442695, %v12431_v23 }
0x1296   : > { %v8415_v11 = vpop.eup %8414  ;;  %6443 = vrot.lane.b32.xlu0 %v6427_v46, %s8588_s7 }
0x1297   : > { %v8417_v60 = vpop.eup %8416  ;;  %6417 = vrot.lane.b32.xlu2 %v8415_v11, %s8587_s6  ;;  %v5918_v41 = vadd.f32 %v12537_v56, %v5917_v40  ;;  %vm5924_vm2 = vcmp.eq.f32.partialorder %v5923_v13, 8.507059e+37  ;;  %v7429_v40 = vmul.f32 -1.442695, %v12456_v14 }
0x1298   : > { %v12578_v42 = vadd.f32 1.0, %v8417_v60  ;;  %v8419_v44 = vpop.eup %8418 }
0x1299   : > { %v8421_v19 = vpop.eup %8420  ;;  %v12617_v11 = vadd.f32 1.0, %v8419_v44  ;;  %v5922_v28 = vsel %vm12644_vm14, %v12537_v56, %v5918_v41 }
0x129a   : > { %v6406_v38 = vpop.permute.xlu1 %6405  ;;  %8422 = vrcp.f32 %v12578_v42  ;;  %v12619_v60 = vadd.f32 1.0, %v8421_v19  ;;  %v12659_v63 = vsel %vm5924_vm2, %v5926_v45, %v5922_v28  ;;  %vm5934_vm4 = vweird.f32 %v12578_v42 }
0x129b   : > { %v6428_v25 = vmul.f32 %v6406_v38, %v12582_v37  ;;  %8424 = vtanh.f32 %v12586_v5  ;;  %v6328_v38 = vand.u32 2147483647, %v12504_v57  ;;  %vm6339_vm9 = vweird.f32 %v12617_v11 }
0x129c   : > { %8426 = vrcp.f32 %v12617_v11  ;;  %vm5949_vm11 = vweird.f32 %v12619_v60  ;;  %v5953_v28 = vand.u32 2147483647, %v12619_v60 }
0x129d   : > { %6445 = vrot.lane.b32.xlu1 %v6428_v25, %s8588_s7  ;;  %8428 = vrcp.f32 %v12619_v60  ;;  %vm6329_vm1 = vcmp.eq.f32.partialorder %v6328_v38, 8.507059e+37 }
0x129e   : > { %6057 = vrot.lane.b32.xlu0 %v6039_v12, %s8588_s7  ;;  %v6327_v12 = vsel %vm6326_vm15, %v12542_v8, %v6323_v53  ;;  %v6412_v25 = vpop.permute.xlu2 %6411  ;;  %8430 = vpow2.f32 %v7430_v24  ;;  %v5938_v53 = vand.u32 2147483647, %v12578_v42  ;;  %vm5954_vm14 = vcmp.eq.f32.partialorder %v5953_v28, 8.507059e+37 }
0x129f   : > { %v12657_v44 = vsel %vm6329_vm1, %v6331_v20, %v6327_v12  ;;  %8432 = vpow2.f32 %v7429_v40  ;;  %v6343_v12 = vand.u32 2147483647, %v12617_v11 }
0x12a0   : > { %v8423_v1 = vpop.eup %8422  ;;  %v6431_v19 = vmul.f32 %v6412_v25, %v12657_v44  ;;  %vm5939_vm6 = vcmp.eq.f32.partialorder %v5938_v53, 8.507059e+37 }
0x12a1   : > { %v8425_v2 = vpop.eup %8424  ;;  %v5930_v57 = vmul.f32 %v8423_v1, %v12578_v42  ;;  %vm5935_vm3 = vweird.f32 %v8423_v1  ;;  %vm6344_vm13 = vcmp.eq.f32.partialorder %v6343_v12, 8.507059e+37 }
0x12a2   : > { %v6408_v18 = vpop.permute.xlu1 %6407  ;;  %v8427_v59 = vpop.eup %8426  ;;  %vm5936_vm5 = vmor %vm5934_vm4, %vm5935_vm3 }
0x12a3   : > { %v6429_v9 = vmul.f32 %v6408_v18, %v12623_v0  ;;  %v5931_v46 = vsub.f32 1.0, %v5930_v57  ;;  %v8429_v33 = vpop.eup %8428  ;;  %v6335_v29 = vmul.f32 %v8427_v59, %v12617_v11  ;;  %vm6340_vm7 = vweird.f32 %v8427_v59 }
0x12a4   : > { %v5945_v16 = vmul.f32 %v8429_v33, %v12619_v60  ;;  %vm5950_vm8 = vweird.f32 %v8429_v33  ;;  %vm12679_vm10 = vmor %vm6339_vm9, %vm6340_vm7 }
0x12a5   : > { %6415 = vrot.lane.b32.xlu1 %v8425_v2, %s8587_s6  ;;  %6447 = vrot.lane.b32.xlu2 %v6429_v9, %s8588_s7  ;;  %v5932_v56 = vmul.f32 %v8423_v1, %v5931_v46  ;;  %v6336_v10 = vsub.f32 1.0, %v6335_v29  ;;  %v8431_v9 = vpop.eup %8430  ;;  %vm5951_vm12 = vmor %vm5949_vm11, %vm5950_vm8 }
0x12a6   : > { %6449 = vrot.lane.b32.xlu0 %v6430_v22, %s8588_s7  ;;  %v5946_v39 = vsub.f32 1.0, %v5945_v16  ;;  %v5940_v22 = vand.u32 2147483648, %v12578_v42  ;;  %v8433_v13 = vpop.eup %8432  ;;  %v6345_v42 = vand.u32 2147483648, %v12617_v11  ;;  %v5868_v25 = vadd.f32 1.0, %v8431_v9 }
0x12a7   : > { %v5933_v58 = vadd.f32 %v8423_v1, %v5932_v56  ;;  %v6337_v41 = vmul.f32 %v8427_v59, %v6336_v10  ;;  %v5867_v20 = vadd.f32 1.0, %v8433_v13  ;;  %v5998_v13 = vmul.f32 %v12458_v54, %v12214_v36 }
0x12a8   : > { %v6020_v52 = vpop.permute.xlu0 %6019  ;;  %v5947_v2 = vmul.f32 %v8429_v33, %v5946_v39  ;;  %v5941_v50 = vor.u32 1.1754944e-38, %v5940_v22  ;;  %v6346_v46 = vor.u32 1.1754944e-38, %v6345_v42  ;;  %8434 = vrcp.f32 %v5868_v25 }
0x12a9   : > { %v6040_v8 = vmul.f32 %v6020_v52, %v12659_v63  ;;  %v5937_v18 = vsel %vm5936_vm5, %v8423_v1, %v5933_v58  ;;  %v6338_v38 = vadd.f32 %v8427_v59, %v6337_v41  ;;  %v5955_v1 = vand.u32 2147483648, %v12619_v60 }
0x12aa   : > { %v12672_v14 = vsel %vm5939_vm6, %v5941_v50, %v5937_v18  ;;  %v5948_v26 = vadd.f32 %v8429_v33, %v5947_v2  ;;  %8436 = vrcp.f32 %v5867_v20  ;;  %v5985_v41 = vand.u32 2147483648, %v5868_v25 }
0x12ab   : > { %v6342_v52 = vsel %vm12679_vm10, %v8427_v59, %v6338_v38  ;;  %vm5979_vm2 = vweird.f32 %v5868_v25  ;;  %v5983_v50 = vand.u32 2147483647, %v5868_v25  ;;  %vm5964_vm4 = vweird.f32 %v5867_v20 }
0x12ac   : > { %v5952_v45 = vsel %vm5951_vm12, %v8429_v33, %v5948_v26  ;;  %v12688_v56 = vsel %vm6344_vm13, %v6346_v46, %v6342_v52  ;;  %v5968_v9 = vand.u32 2147483647, %v5867_v20  ;;  %v5986_v38 = vor.u32 1.1754944e-38, %v5985_v41 }
0x12ad   : > { %6059 = vrot.lane.b32.xlu1 %v6040_v8, %s8588_s7  ;;  %vm5984_vm6 = vcmp.eq.f32.partialorder %v5983_v50, 8.507059e+37 }
0x12ae   : > { %6451 = vrot.lane.b32.xlu0 %v6431_v19, %s8588_s7  ;;  %v5956_v19 = vor.u32 1.1754944e-38, %v5955_v1  ;;  %v8435_v59 = vpop.eup %8434  ;;  %vm5969_vm7 = vcmp.eq.f32.partialorder %v5968_v9, 8.507059e+37 }
0x12af   : > { %v5975_v24 = vmul.f32 %v8435_v59, %v5868_v25  ;;  %vm5980_vm15 = vweird.f32 %v8435_v59 }
0x12b0   : > { %v12690_v11 = vsel %vm5954_vm14, %v5956_v19, %v5952_v45  ;;  %v8437_v33 = vpop.eup %8436  ;;  %vm5981_vm3 = vmor %vm5979_vm2, %vm5980_vm15  ;;  %v7446_v45 = vmul.f32 -1.442695, %v12518_v17  ;;  %v7445_v19 = vmul.f32 -1.442695, %v12586_v5  ;;  %v5997_v17 = vmul.f32 %v12500_v6, %v12209_v47 }
0x12b1   : > { %v5960_v40 = vmul.f32 %v8437_v33, %v5867_v20  ;;  %v5976_v58 = vsub.f32 1.0, %v5975_v24  ;;  %vm5965_vm1 = vweird.f32 %v8437_v33  ;;  %v6387_v5 = vmul.f32 %v12529_v48, %v12234_v32 }
0x12b2   : > { %vm5966_vm5 = vmor %vm5964_vm4, %vm5965_vm1 }
0x12b3   : > { %v5961_v10 = vsub.f32 1.0, %v5960_v40  ;;  %v5977_v39 = vmul.f32 %v8435_v59, %v5976_v58 }
0x12b5   : > { %v5962_v22 = vmul.f32 %v8437_v33, %v5961_v10  ;;  %v5978_v18 = vadd.f32 %v8435_v59, %v5977_v39 }
0x12b7   : > { %v5963_v2 = vadd.f32 %v8437_v33, %v5962_v22 }
0x12b9   : > { %v5967_v26 = vsel %vm5966_vm5, %v8437_v33, %v5963_v2 }
0x12ba   : > { %v6022_v23 = vpop.permute.xlu0 %6021 }
0x12bb   : > { %v6041_v35 = vmul.f32 %v6022_v23, %v12672_v14  ;;  %v5970_v23 = vand.u32 2147483648, %v5867_v20 }
0x12bd   : > { %6061 = vrot.lane.b32.xlu1 %v6041_v35, %s8588_s7  ;;  %v5982_v35 = vsel %vm5981_vm3, %v8435_v59, %v5978_v18  ;;  %v5971_v42 = vor.u32 1.1754944e-38, %v5970_v23 }
0x12be   : > { %v12698_v1 = vsel %vm5984_vm6, %v5986_v38, %v5982_v35 }
0x12bf   : > { %v12701_v25 = vsel %vm5969_vm7, %v5971_v42, %v5967_v26 }
0x12c2   : > { %v6414_v8 = vpop.permute.xlu0 %6413  ;;  %v6024_v29 = vpop.permute.xlu1 %6023 }
0x12c3   : > { %v6432_v60 = vmul.f32 %v6414_v8, %v12688_v56  ;;  %v6042_v16 = vmul.f32 %v6024_v29, %v12690_v11 }
0x12c5   : > { %6453 = vrot.lane.b32.xlu1 %v6432_v60, %s8588_s7  ;;  %6063 = vrot.lane.b32.xlu2 %v6042_v16, %s8588_s7 }
0x12d7   : > { %v6056_v53 = vpop.permute.xlu2 %6055 }
0x12d8   : > { %v6078_v12 = vadd.f32 %v6056_v53, %v5998_v13  ;;  %v5999_v13 = vmul.f32 %v12580_v62, %v12250_v34 }
0x12da   : > { %8438 = vtanh.f32 %v6078_v12 }
0x12db   : > { %8440 = vpow2.f32 %v7446_v45 }
0x12dc   : > { %8442 = vpow2.f32 %v7445_v19  ;;  %v6390_v19 = vmul.f32 %v12621_v21, %v12267_v27 }
0x12de   : > { %v6028_v57 = vpop.permute.xlu0 %6027 }
0x12df   : > { %v6044_v28 = vmul.f32 %v6028_v57, %v12698_v1  ;;  %v6026_v52 = vpop.permute.xlu2 %6025 }
0x12e0   : > { %v6043_v20 = vmul.f32 %v6026_v52, %v12701_v25  ;;  %v8439_v36 = vpop.eup %8438 }
0x12e1   : > { %6067 = vrot.lane.b32.xlu0 %v6044_v28, %s8588_s7  ;;  %v8441_v46 = vpop.eup %8440 }
0x12e2   : > { %6065 = vrot.lane.b32.xlu2 %v6043_v20, %s8588_s7  ;;  %v6258_v8 = vadd.f32 1.0, %v8441_v46  ;;  %v8443_v29 = vpop.eup %8442  ;;  %v6388_v46 = vmul.f32 %v12582_v37, %v12228_v51  ;;  %v6389_v51 = vmul.f32 %v12623_v0, %v12269_v55 }
0x12e3   : > { %v6257_v16 = vadd.f32 1.0, %v8443_v29 }
0x12e4   : > { %8444 = vrcp.f32 %v6258_v8  ;;  %v6375_v18 = vand.u32 2147483648, %v6258_v8  ;;  %vm6369_vm9 = vweird.f32 %v6258_v8  ;;  %v6373_v2 = vand.u32 2147483647, %v6258_v8 }
0x12e5   : > { %8446 = vrcp.f32 %v6257_v16  ;;  %v6360_v20 = vand.u32 2147483648, %v6257_v16  ;;  %vm6354_vm13 = vweird.f32 %v6257_v16  ;;  %v6358_v45 = vand.u32 2147483647, %v6257_v16 }
0x12e6   : > { %v6376_v35 = vor.u32 1.1754944e-38, %v6375_v18  ;;  %vm6374_vm11 = vcmp.eq.f32.partialorder %v6373_v2, 8.507059e+37 }
0x12e7   : > { %v6361_v34 = vor.u32 1.1754944e-38, %v6360_v20  ;;  %vm6359_vm15 = vcmp.eq.f32.partialorder %v6358_v45, 8.507059e+37  ;;  %v6004_v45 = vmul.f32 %v12698_v1, %v12293_v3 }
0x12ea   : > { %6103 = vrot.lane.b32.xlu2 %v8439_v36, %s8587_s6  ;;  %v8445_v60 = vpop.eup %8444 }
0x12eb   : > { %v6365_v59 = vmul.f32 %v8445_v60, %v6258_v8  ;;  %v8447_v58 = vpop.eup %8446  ;;  %vm6370_vm8 = vweird.f32 %v8445_v60 }
0x12ec   : > { %v6350_v39 = vmul.f32 %v8447_v58, %v6257_v16  ;;  %vm6371_vm10 = vmor %vm6369_vm9, %vm6370_vm8  ;;  %vm6355_vm12 = vweird.f32 %v8447_v58 }
0x12ed   : > { %v6366_v33 = vsub.f32 1.0, %v6365_v59  ;;  %vm6356_vm14 = vmor %vm6354_vm13, %vm6355_vm12 }
0x12ee   : > { %v6351_v47 = vsub.f32 1.0, %v6350_v39 }
0x12ef   : > { %v6367_v10 = vmul.f32 %v8445_v60, %v6366_v33 }
0x12f0   : > { %v6352_v38 = vmul.f32 %v8447_v58, %v6351_v47 }
0x12f1   : > { %v6368_v22 = vadd.f32 %v8445_v60, %v6367_v10  ;;  %v6418_v9 = vpop.permute.xlu2 %6417 }
0x12f2   : > { %v6353_v52 = vadd.f32 %v8447_v58, %v6352_v38 }
0x12f3   : > { %v6372_v23 = vsel %vm6371_vm10, %v8445_v60, %v6368_v22 }
0x12f4   : > { %v12717_v26 = vsel %vm6374_vm11, %v6376_v35, %v6372_v23  ;;  %v6357_v36 = vsel %vm6356_vm14, %v8447_v58, %v6353_v52  ;;  %v6000_v58 = vmul.f32 %v12659_v63, %v12240_v30  ;;  %v6002_v30 = vmul.f32 %v12690_v11, %v12282_v49 }
0x12f5   : > { %v6434_v32 = vmul.f32 %v6418_v9, %v12717_v26  ;;  %v12730_v60 = vsel %vm6359_vm15, %v6361_v34, %v6357_v36  ;;  %v6001_v23 = vmul.f32 %v12672_v14, %v12248_v7  ;;  %v6392_v49 = vmul.f32 %v12688_v56, %v12261_v15 }
0x12f6   : > { %v6003_v7 = vmul.f32 %v12701_v25, %v12299_v31 }
0x12ff   : > { %v6054_v24 = vpop.permute.xlu1 %6053 }
0x1300   : > { %v6077_v40 = vadd.f32 %v6054_v24, %v5997_v17  ;;  %v6448_v24 = vpop.permute.xlu2 %6447 }
0x1301   : > { %v12741_v27 = vadd.f32 %v6448_v24, %v6389_v51 }
0x1302   : > { %8448 = vtanh.f32 %v6077_v40  ;;  %v6391_v40 = vmul.f32 %v12657_v44, %v12280_v43 }
0x1308   : > { %v8449_v53 = vpop.eup %8448  ;;  %v6444_v41 = vpop.permute.xlu0 %6443 }
0x1309   : > { %v12713_v50 = vadd.f32 %v6444_v41, %v6387_v5  ;;  %6101 = vrot.lane.b32.xlu1 %v8449_v53, %s8587_s6 }
0x130b   : > { %8450 = vtanh.f32 %v12713_v50 }
0x130f   : > { %v6446_v57 = vpop.permute.xlu1 %6445 }
0x1310   : > { %v6058_v42 = vpop.permute.xlu0 %6057  ;;  %v12728_v8 = vadd.f32 %v6446_v57, %v6388_v46 }
0x1311   : > { %v8451_v12 = vpop.eup %8450  ;;  %v6079_v28 = vadd.f32 %v6058_v42, %v5999_v13  ;;  %6457 = vrot.lane.b32.xlu1 %v6434_v32, %s8588_s7 }
0x1312   : > { %6491 = vrot.lane.b32.xlu2 %v8451_v12, %s8587_s6 }
0x1313   : > { %8452 = vtanh.f32 %v6079_v28 }
0x1317   : > { %v6416_v59 = vpop.permute.xlu1 %6415 }
0x1318   : > { %v6450_v29 = vpop.permute.xlu0 %6449  ;;  %v6433_v16 = vmul.f32 %v6416_v59, %v12730_v60  ;;  %v6394_v59 = vmul.f32 %v12717_v26, %v12310_v4 }
0x1319   : > { %v8453_v17 = vpop.eup %8452  ;;  %v12732_v33 = vadd.f32 %v6450_v29, %v6390_v19 }
0x131a   : > { %6105 = vrot.lane.b32.xlu1 %v8453_v17, %s8587_s6  ;;  %6455 = vrot.lane.b32.xlu0 %v6433_v16, %s8588_s7 }
0x131b   : > { %8454 = vtanh.f32 %v12732_v33 }
0x131c   : > { %8456 = vtanh.f32 %v12728_v8 }
0x131d   : > { %8458 = vtanh.f32 %v12741_v27 }
0x131f   : > { %v6060_v39 = vpop.permute.xlu1 %6059  ;;  %v6064_v55 = vpop.permute.xlu2 %6063 }
0x1320   : > { %v6452_v10 = vpop.permute.xlu0 %6451  ;;  %v6080_v53 = vadd.f32 %v6060_v39, %v6000_v58  ;;  %v6082_v41 = vadd.f32 %v6064_v55, %v6002_v30 }
0x1321   : > { %v8455_v22 = vpop.eup %8454  ;;  %v12747_v5 = vadd.f32 %v6452_v10, %v6391_v40 }
0x1322   : > { %v8457_v18 = vpop.eup %8456  ;;  %6497 = vrot.lane.b32.xlu1 %v8455_v22, %s8587_s6  ;;  %v6393_v22 = vmul.f32 %v12730_v60, %v12304_v61 }
0x1323   : > { %8460 = vtanh.f32 %v12747_v5  ;;  %6493 = vrot.lane.b32.xlu0 %v8457_v18, %s8587_s6  ;;  %v8459_v43 = vpop.eup %8458 }
0x1324   : > { %8462 = vtanh.f32 %v6080_v53 }
0x1325   : > { %8464 = vtanh.f32 %v6082_v41 }
0x1329   : > { %v8461_v2 = vpop.eup %8460 }
0x132a   : > { %v8463_v47 = vpop.eup %8462  ;;  %6499 = vrot.lane.b32.xlu1 %v8461_v2, %s8587_s6 }
0x132b   : > { %6107 = vrot.lane.b32.xlu2 %v8463_v47, %s8587_s6  ;;  %6495 = vrot.lane.b32.xlu0 %v8459_v43, %s8587_s6  ;;  %v8465_v38 = vpop.eup %8464 }
0x132f   : > { %v6062_v9 = vpop.permute.xlu1 %6061 }
0x1330   : > { %v6081_v35 = vadd.f32 %v6062_v9, %v6001_v23 }
0x1332   : > { %8466 = vtanh.f32 %v6081_v35 }
0x1333   : > { %6111 = vrot.lane.b32.xlu0 %v8465_v38, %s8587_s6 }
0x1337   : > { %v6454_v32 = vpop.permute.xlu1 %6453 }
0x1338   : > { %v8467_v13 = vpop.eup %8466  ;;  %v12763_v42 = vadd.f32 %v6454_v32, %v6392_v49 }
0x1339   : > { %6109 = vrot.lane.b32.xlu2 %v8467_v13, %s8587_s6 }
0x133a   : > { %8468 = vtanh.f32 %v12763_v42 }
0x133c   : > { %v6066_v57 = vpop.permute.xlu2 %6065 }
0x133d   : > { %v6083_v12 = vadd.f32 %v6066_v57, %v6003_v7 }
0x133f   : > { %8470 = vtanh.f32 %v6083_v12 }
0x1340   : > { %v8469_v28 = vpop.eup %8468 }
0x1341   : > { %6501 = vrot.lane.b32.xlu2 %v8469_v28, %s8587_s6 }
0x1344   : > { %v6104_v15 = vpop.permute.xlu2 %6103 }
0x1345   : > { %v8471_v52 = vpop.eup %8470  ;;  %v6126_v46 = vmul.f32 %v6104_v15, %v12458_v54 }
0x1349   : > { %6113 = vrot.lane.b32.xlu2 %v8471_v52, %s8587_s6 }
0x1353   : > { %v6068_v20 = vpop.permute.xlu0 %6067 }
0x1354   : > { %v6084_v31 = vadd.f32 %v6068_v20, %v6004_v45 }
0x1356   : > { %8472 = vtanh.f32 %v6084_v31 }
0x135c   : > { %v8473_v3 = vpop.eup %8472 }
0x136c   : > { %v6492_v29 = vpop.permute.xlu2 %6491 }
0x136d   : > { %v6515_v18 = vmul.f32 %v6492_v29, %v12529_v48 }
0x137b   : > { %v6102_v36 = vpop.permute.xlu1 %6101 }
0x137c   : > { %v6125_v34 = vmul.f32 %v6102_v36, %v12500_v6 }
0x137e   : > { %v6523_v19 = vpack.c.bf16 %v6126_v46, %v6125_v34 }
0x1380   : > { %6531 = vrot.lane.b32.xlu0 %v6523_v19, %s8588_s7 }
0x1383   : > { %v6458_v17 = vpop.permute.xlu1 %6457 }
0x1384   : > { %v12778_v16 = vadd.f32 %v6458_v17, %v6394_v59 }
0x1385   : > { %v6108_v54 = vpop.permute.xlu2 %6107 }
0x1386   : > { %8474 = vtanh.f32 %v12778_v16  ;;  %v6128_v51 = vmul.f32 %v6108_v54, %v12659_v63 }
0x1388   : > { %6115 = vrot.lane.b32.xlu0 %v8473_v3, %s8587_s6 }
0x138c   : > { %v8475_v24 = vpop.eup %8474  ;;  %v6106_v6 = vpop.permute.xlu1 %6105 }
0x138d   : > { %v6127_v40 = vmul.f32 %v6106_v6, %v12580_v62  ;;  %v6456_v58 = vpop.permute.xlu0 %6455  ;;  %6505 = vrot.lane.b32.xlu2 %v8475_v24, %s8587_s6 }
0x138e   : > { %v12790_v30 = vadd.f32 %v6456_v58, %v6393_v22 }
0x138f   : > { %v6524_v10 = vpack.c.bf16 %v6128_v51, %v6127_v40 }
0x1390   : > { %8476 = vtanh.f32 %v12790_v30 }
0x1391   : > { %6533 = vrot.lane.b32.xlu0 %v6524_v10, %s8588_s7 }
0x1393   : > { %v6110_v4 = vpop.permute.xlu2 %6109 }
0x1394   : > { %v6498_v39 = vpop.permute.xlu1 %6497  ;;  %v6129_v9 = vmul.f32 %v6110_v4, %v12672_v14 }
0x1395   : > { %v6494_v53 = vpop.permute.xlu0 %6493  ;;  %v6518_v35 = vmul.f32 %v6498_v39, %v12621_v21 }
0x1396   : > { %v6516_v55 = vmul.f32 %v6494_v53, %v12582_v37  ;;  %v8477_v23 = vpop.eup %8476 }
0x1398   : > { %v6580_v63 = vpack.c.bf16 %v6516_v55, %v6515_v18 }
0x139a   : > { %6588 = vrot.lane.b32.xlu1 %v6580_v63, %s8588_s7 }
0x139b   : > { %v6502_v62 = vpop.permute.xlu2 %6501 }
0x139c   : > { %v6520_v43 = vmul.f32 %v6502_v62, %v12688_v56  ;;  %v6500_v41 = vpop.permute.xlu1 %6499 }
0x139d   : > { %v6519_v2 = vmul.f32 %v6500_v41, %v12657_v44  ;;  %v6496_v47 = vpop.permute.xlu0 %6495 }
0x139e   : > { %v6517_v48 = vmul.f32 %v6496_v47, %v12623_v0 }
0x139f   : > { %v6582_v61 = vpack.c.bf16 %v6520_v43, %v6519_v2 }
0x13a0   : > { %v6581_v56 = vpack.c.bf16 %v6518_v35, %v6517_v48 }
0x13a1   : > { %6592 = vrot.lane.b32.xlu0 %v6582_v61, %s8588_s7 }
0x13a2   : > { %6503 = vrot.lane.b32.xlu1 %v8477_v23, %s8587_s6 }
0x13a3   : > { %v6114_v32 = vpop.permute.xlu2 %6113 }
0x13a4   : > { %v6131_v0 = vmul.f32 %v6114_v32, %v12701_v25 }
0x13a5   : > { %v6112_v37 = vpop.permute.xlu0 %6111 }
0x13a6   : > { %v6130_v38 = vmul.f32 %v6112_v37, %v12690_v11 }
0x13a8   : > { %v6525_v49 = vpack.c.bf16 %v6130_v38, %v6129_v9 }
0x13aa   : > { %6535 = vrot.lane.b32.xlu2 %v6525_v49, %s8588_s7  ;;  %6590 = vrot.lane.b32.xlu1 %v6581_v56, %s8588_s7 }
0x13e7   : > { %v6506_v11 = vpop.permute.xlu2 %6505 }
0x13e8   : > { %v6522_v52 = vmul.f32 %v6506_v11, %v12717_v26  ;;  %v12821_v26 = vld [vmem:[%s13013_s3 + $0x1] ss:$0 sm:$0xff] }
0x13f2   : > { %v6532_v44 = vpop.permute.xlu0 %6531 }
0x13f3   : > { %7447 = vmatmul.msk.bf16.vlgmr.msrb.gmra.mxu2 %vm250_vm0, %v6532_v44 }
0x13fa   : > { %v6116_v13 = vpop.permute.xlu0 %6115 }
0x13fb   : > { %v6132_v7 = vmul.f32 %v6116_v13, %v12698_v1 }
0x13fd   : > { %v6526_v14 = vpack.c.bf16 %v6132_v7, %v6131_v0 }
0x13ff   : > { %6537 = vrot.lane.b32.xlu1 %v6526_v14, %s8588_s7 }
0x1403   : > { %v6534_v21 = vpop.permute.xlu0 %6533 }
0x1404   : > { %7448 = vmatmul.msk.bf16.gmra.mxu2 %vm250_vm0, %v6534_v21  ;;  %v6536_v12 = vpop.permute.xlu2 %6535 }
0x140c   : > { %v6589_v57 = vpop.permute.xlu1 %6588 }
0x140d   : > { %7451 = vmatmul.msk.bf16.vlgmr.msrb.gmra.mxu3 %vm250_vm0, %v6589_v57 }
0x1413   : > { %v6593_v20 = vpop.permute.xlu0 %6592 }
0x1414   : > { %7449 = vmatmul.msk.bf16.gmra.mxu2 %vm250_vm0, %v6536_v12  ;;  %v6504_v28 = vpop.permute.xlu1 %6503 }
0x1415   : > { %v6521_v25 = vmul.f32 %v6504_v28, %v12730_v60 }
0x1417   : > { %v6583_v15 = vpack.c.bf16 %v6522_v52, %v6521_v25 }
0x1419   : > { %6594 = vrot.lane.b32.xlu2 %v6583_v15, %s8588_s7 }
0x141c   : > { %v6591_v1 = vpop.permute.xlu1 %6590 }
0x141d   : > { %7452 = vmatmul.msk.bf16.gmra.mxu3 %vm250_vm0, %v6591_v1 }
0x142d   : > { %7453 = vmatmul.msk.bf16.gmra.mxu3 %vm250_vm0, %v6593_v20 }
0x1471   : > { %v6538_v45 = vpop.permute.xlu1 %6537 }
0x1472   : > { %7450 = vmatmul.msk.bf16.gmra.mxu2 %vm250_vm0, %v6538_v45 }
0x1473   : > { %v6595_v36 = vpop.permute.xlu2 %6594 }
0x1474   : > { %7454 = vmatmul.msk.bf16.gmra.mxu3 %vm250_vm0, %v6595_v36 }
0x1476   : > { %v6560_v46 = vpop.f32.mrf.mxu2 }
0x1477   : > { %v6561_v60 = vadd.f32 %v12821_v26, %v6560_v46 }
0x147e   : > { %v6562_v34 = vpop.f32.mrf.mxu2 }
0x147f   : > { %v6563_v59 = vadd.f32 %v12821_v26, %v6562_v34 }
0x1487   : > { %v6565_v29 = vpop.f32.mrf.mxu2 }
0x1488   : > { %v6566_v24 = vadd.f32 %v12821_v26, %v6565_v29 }
0x148f   : > { %v6567_v6 = vpop.f32.mrf.mxu2 }
0x1490   : > { %v6617_v31 = vpop.f32.mrf.mxu3  ;;  %v6568_v10 = vadd.f32 %v12821_v26, %v6567_v6 }
0x1491   : > { %v6637_v19 = vadd.f32 %v6617_v31, %v6561_v60 }
0x1493   : > { %8478 = vtanh.f32 %v6637_v19  ;;  %v7455_v48 = vmul.f32 -1.442695, %v6637_v19 }
0x1497   : > { %v6570_v53 = vpop.f32.mrf.mxu2 }
0x1498   : > { %v6619_v17 = vpop.f32.mrf.mxu3  ;;  %v6571_v18 = vadd.f32 %v12821_v26, %v6570_v53 }
0x1499   : > { %v8479_v3 = vpop.eup %8478  ;;  %v6638_v54 = vadd.f32 %v6619_v17, %v6563_v59 }
0x149a   : > { %6821 = vrot.lane.b32.xlu0 %v8479_v3, %s8587_s6 }
0x149b   : > { %8480 = vtanh.f32 %v6638_v54  ;;  %v7456_v9 = vmul.f32 -1.442695, %v6638_v54 }
0x149f   : > { %v6572_v43 = vpop.f32.mrf.mxu2 }
0x14a0   : > { %v6622_v51 = vpop.f32.mrf.mxu3  ;;  %v6573_v41 = vadd.f32 %v12821_v26, %v6572_v43 }
0x14a1   : > { %v8481_v40 = vpop.eup %8480  ;;  %v6639_v58 = vadd.f32 %v6622_v51, %v6566_v24 }
0x14a2   : > { %6823 = vrot.lane.b32.xlu1 %v8481_v40, %s8587_s6 }
0x14a3   : > { %8482 = vtanh.f32 %v6639_v58  ;;  %v7457_v37 = vmul.f32 -1.442695, %v6639_v58 }
0x14a8   : > { %v6624_v4 = vpop.f32.mrf.mxu3 }
0x14a9   : > { %v8483_v39 = vpop.eup %8482  ;;  %v6640_v22 = vadd.f32 %v6624_v4, %v6568_v10 }
0x14aa   : > { %6825 = vrot.lane.b32.xlu2 %v8483_v39, %s8587_s6 }
0x14ab   : > { %8484 = vtanh.f32 %v6640_v22  ;;  %v7458_v21 = vmul.f32 -1.442695, %v6640_v22 }
0x14b0   : > { %v6627_v55 = vpop.f32.mrf.mxu3 }
0x14b1   : > { %v8485_v63 = vpop.eup %8484  ;;  %v6641_v62 = vadd.f32 %v6627_v55, %v6571_v18 }
0x14b2   : > { %6827 = vrot.lane.b32.xlu0 %v8485_v63, %s8587_s6 }
0x14b3   : > { %8486 = vtanh.f32 %v6641_v62  ;;  %v7459_v46 = vmul.f32 -1.442695, %v6641_v62 }
0x14b8   : > { %v6629_v2 = vpop.f32.mrf.mxu3 }
0x14b9   : > { %v8487_v47 = vpop.eup %8486  ;;  %v6642_v61 = vadd.f32 %v6629_v2, %v6573_v41 }
0x14ba   : > { %6829 = vrot.lane.b32.xlu1 %v8487_v47, %s8587_s6 }
0x14bb   : > { %8488 = vtanh.f32 %v6642_v61  ;;  %v7460_v44 = vmul.f32 -1.442695, %v6642_v61 }
0x14bc   : > { %8490 = vpow2.f32 %v7455_v48 }
0x14bd   : > { %8492 = vpow2.f32 %v7457_v37 }
0x14be   : > { %8494 = vpow2.f32 %v7456_v9 }
0x14c1   : > { %v8489_v23 = vpop.eup %8488 }
0x14c2   : > { %6831 = vrot.lane.b32.xlu2 %v8489_v23, %s8587_s6  ;;  %v8491_v35 = vpop.eup %8490 }
0x14c3   : > { %v8493_v38 = vpop.eup %8492  ;;  %v12835_v56 = vadd.f32 1.0, %v8491_v35 }
0x14c4   : > { %v12837_v49 = vadd.f32 1.0, %v8493_v38  ;;  %v8495_v32 = vpop.eup %8494 }
0x14c5   : > { %8496 = vrcp.f32 %v12835_v56  ;;  %v12841_v13 = vadd.f32 1.0, %v8495_v32  ;;  %vm6682_vm2 = vweird.f32 %v12835_v56  ;;  %v6688_v51 = vand.u32 2147483648, %v12835_v56 }
0x14c6   : > { %8498 = vrcp.f32 %v12837_v49  ;;  %v6686_v10 = vand.u32 2147483647, %v12835_v56  ;;  %v6718_v39 = vand.u32 2147483648, %v12837_v49  ;;  %vm6712_vm5 = vweird.f32 %v12837_v49 }
0x14c7   : > { %8500 = vpow2.f32 %v7460_v44  ;;  %v6716_v18 = vand.u32 2147483647, %v12837_v49  ;;  %v6689_v43 = vor.u32 1.1754944e-38, %v6688_v51  ;;  %vm6697_vm10 = vweird.f32 %v12841_v13 }
0x14c8   : > { %8502 = vrcp.f32 %v12841_v13  ;;  %vm6687_vm7 = vcmp.eq.f32.partialorder %v6686_v10, 8.507059e+37  ;;  %v6719_v61 = vor.u32 1.1754944e-38, %v6718_v39  ;;  %v6701_v32 = vand.u32 2147483647, %v12841_v13 }
0x14c9   : > { %vm6717_vm9 = vcmp.eq.f32.partialorder %v6716_v18, 8.507059e+37 }
0x14ca   : > { %vm6702_vm12 = vcmp.eq.f32.partialorder %v6701_v32, 8.507059e+37 }
0x14cb   : > { %v8497_v0 = vpop.eup %8496 }
0x14cc   : > { %v12844_v57 = vpop.eup %8498  ;;  %v6678_v28 = vmul.f32 %v8497_v0, %v12835_v56  ;;  %vm6683_vm1 = vweird.f32 %v8497_v0 }
0x14cd   : > { %v8501_v52 = vpop.eup %8500  ;;  %v6708_v25 = vmul.f32 %v12844_v57, %v12837_v49  ;;  %vm6713_vm3 = vweird.f32 %v12844_v57  ;;  %vm12874_vm4 = vmor %vm6682_vm2, %vm6683_vm1  ;;  %v6703_v49 = vand.u32 2147483648, %v12841_v13 }
0x14ce   : > { %v12853_v15 = vadd.f32 1.0, %v8501_v52  ;;  %v6679_v1 = vsub.f32 1.0, %v6678_v28  ;;  %v12855_v45 = vpop.eup %8502  ;;  %vm12889_vm6 = vmor %vm6712_vm5, %vm6713_vm3 }
0x14cf   : > { %v6709_v60 = vsub.f32 1.0, %v6708_v25  ;;  %v6693_v17 = vmul.f32 %v12855_v45, %v12841_v13  ;;  %vm6698_vm8 = vweird.f32 %v12855_v45 }
0x14d0   : > { %v6680_v29 = vmul.f32 %v8497_v0, %v6679_v1  ;;  %vm6699_vm11 = vmor %vm6697_vm10, %vm6698_vm8  ;;  %v6763_v1 = vand.u32 2147483648, %v12853_v15  ;;  %vm6757_vm14 = vweird.f32 %v12853_v15 }
0x14d1   : > { %v6694_v24 = vsub.f32 1.0, %v6693_v17 }
0x14d2   : > { %v6681_v54 = vadd.f32 %v8497_v0, %v6680_v29 }
0x14d3   : > { %v6695_v55 = vmul.f32 %v12855_v45, %v6694_v24 }
0x14d4   : > { %v6685_v22 = vsel %vm12874_vm4, %v8497_v0, %v6681_v54 }
0x14d5   : > { %v12898_v48 = vsel %vm6687_vm7, %v6689_v43, %v6685_v22  ;;  %v6696_v9 = vadd.f32 %v12855_v45, %v6695_v55 }
0x14d7   : > { %v6700_v0 = vsel %vm6699_vm11, %v12855_v45, %v6696_v9 }
0x14f5   : > { %v6575_v7 = vpop.f32.mrf.mxu2 }
0x14f6   : > { %v6576_v14 = vadd.f32 %v12821_v26, %v6575_v7 }
0x14f7   : > { %v6632_v11 = vpop.f32.mrf.mxu3 }
0x14f8   : > { %v12847_v12 = vadd.f32 %v6632_v11, %v6576_v14 }
0x14fa   : > { %8504 = vtanh.f32 %v12847_v12 }
0x14fb   : > { %8506 = vpow2.f32 %v7458_v21  ;;  %v6704_v21 = vor.u32 1.1754944e-38, %v6703_v49 }
0x14fc   : > { %8508 = vrcp.f32 %v12853_v15 }
0x14fd   : > { %v6577_v20 = vpop.f32.mrf.mxu2  ;;  %v12915_v11 = vsel %vm6702_vm12, %v6704_v21, %v6700_v0 }
0x14fe   : > { %v6578_v36 = vadd.f32 %v12821_v26, %v6577_v20  ;;  %v6710_v26 = vmul.f32 %v12844_v57, %v6709_v60  ;;  %v6761_v20 = vand.u32 2147483647, %v12853_v15 }
0x14ff   : > { %v6634_v34 = vpop.f32.mrf.mxu3 }
0x1500   : > { %v8505_v31 = vpop.eup %8504  ;;  %v12859_v19 = vadd.f32 %v6634_v34, %v6578_v36  ;;  %v6711_v40 = vadd.f32 %v12844_v57, %v6710_v26  ;;  %v6764_v34 = vor.u32 1.1754944e-38, %v6763_v1  ;;  %vm6762_vm1 = vcmp.eq.f32.partialorder %v6761_v20, 8.507059e+37 }
0x1501   : > { %v8507_v59 = vpop.eup %8506  ;;  %6833 = vrot.lane.b32.xlu0 %v8505_v31, %s8587_s6 }
0x1502   : > { %8510 = vtanh.f32 %v12859_v19  ;;  %v12866_v3 = vadd.f32 1.0, %v8507_v59  ;;  %v12868_v6 = vpop.eup %8508  ;;  %v6715_v41 = vsel %vm12889_vm6, %v12844_v57, %v6711_v40  ;;  %v7462_v62 = vmul.f32 -1.442695, %v12859_v19 }
0x1503   : > { %8512 = vpow2.f32 %v7459_v46  ;;  %v6753_v63 = vmul.f32 %v12868_v6, %v12853_v15  ;;  %v12903_v56 = vsel %vm6717_vm9, %v6719_v61, %v6715_v41  ;;  %vm6758_vm13 = vweird.f32 %v12868_v6 }
0x1504   : > { %8514 = vrcp.f32 %v12866_v3  ;;  %v6826_v47 = vpop.permute.xlu2 %6825  ;;  %vm6759_vm15 = vmor %vm6757_vm14, %vm6758_vm13  ;;  %v6733_v26 = vand.u32 2147483648, %v12866_v3  ;;  %vm6727_vm3 = vweird.f32 %v12866_v3  ;;  %v6731_v15 = vand.u32 2147483647, %v12866_v3 }
0x1505   : > { %v6754_v35 = vsub.f32 1.0, %v6753_v63  ;;  %v6847_v44 = vmul.f32 %v6826_v47, %v12903_v56  ;;  %v7461_v63 = vmul.f32 -1.442695, %v12847_v12 }
0x1506   : > { %vm6732_vm5 = vcmp.eq.f32.partialorder %v6731_v15, 8.507059e+37 }
0x1507   : > { %v6755_v7 = vmul.f32 %v12868_v6, %v6754_v35  ;;  %v6805_v35 = vmul.f32 %v12898_v48, %v12713_v50 }
0x1508   : > { %v8511_v4 = vpop.eup %8510 }
0x1509   : > { %v8513_v53 = vpop.eup %8512  ;;  %6835 = vrot.lane.b32.xlu1 %v8511_v4, %s8587_s6  ;;  %v6756_v13 = vadd.f32 %v12868_v6, %v6755_v7 }
0x150a   : > { %v12896_v2 = vadd.f32 1.0, %v8513_v53  ;;  %v8515_v38 = vpop.eup %8514 }
0x150b   : > { %v6723_v14 = vmul.f32 %v8515_v38, %v12866_v3  ;;  %v6760_v45 = vsel %vm6759_vm15, %v12868_v6, %v6756_v13  ;;  %vm6728_vm2 = vweird.f32 %v8515_v38  ;;  %v6734_v6 = vor.u32 1.1754944e-38, %v6733_v26 }
0x150c   : > { %v6822_v23 = vpop.permute.xlu0 %6821  ;;  %8516 = vrcp.f32 %v12896_v2  ;;  %v12926_v31 = vsel %vm6762_vm1, %v6764_v34, %v6760_v45  ;;  %vm6729_vm4 = vmor %vm6727_vm3, %vm6728_vm2  ;;  %v6748_v4 = vand.u32 2147483648, %v12896_v2  ;;  %vm6742_vm7 = vweird.f32 %v12896_v2 }
0x150d   : > { %v6845_v37 = vmul.f32 %v6822_v23, %v12898_v48  ;;  %v6724_v52 = vsub.f32 1.0, %v6723_v14  ;;  %v6746_v3 = vand.u32 2147483647, %v12896_v2  ;;  %8518 = vpow2.f32 %v7461_v63 }
0x150e   : > { %v6749_v22 = vor.u32 1.1754944e-38, %v6748_v4  ;;  %8520 = vpow2.f32 %v7462_v62  ;;  %v6807_v26 = vmul.f32 %v12903_v56, %v12741_v27 }
0x150f   : > { %6861 = vrot.lane.b32.xlu2 %v6845_v37, %s8588_s7  ;;  %v6725_v36 = vmul.f32 %v8515_v38, %v6724_v52  ;;  %vm6747_vm9 = vcmp.eq.f32.partialorder %v6746_v3, 8.507059e+37 }
0x1511   : > { %6865 = vrot.lane.b32.xlu1 %v6847_v44, %s8588_s7  ;;  %v6726_v59 = vadd.f32 %v8515_v38, %v6725_v36 }
0x1512   : > { %v8517_v25 = vpop.eup %8516 }
0x1513   : > { %v6738_v46 = vmul.f32 %v8517_v25, %v12896_v2  ;;  %v6730_v54 = vsel %vm6729_vm4, %v8515_v38, %v6726_v59  ;;  %vm6743_vm6 = vweird.f32 %v8517_v25  ;;  %v8519_v43 = vpop.eup %8518 }
0x1514   : > { %v6824_v57 = vpop.permute.xlu1 %6823  ;;  %v12933_v40 = vsel %vm6732_vm5, %v6734_v6, %v6730_v54  ;;  %vm6744_vm8 = vmor %vm6742_vm7, %vm6743_vm6  ;;  %v6675_v41 = vadd.f32 1.0, %v8519_v43  ;;  %v8521_v2 = vpop.eup %8520 }
0x1515   : > { %v6846_v28 = vmul.f32 %v6824_v57, %v12915_v11  ;;  %v6739_v17 = vsub.f32 1.0, %v6738_v46  ;;  %v6676_v47 = vadd.f32 1.0, %v8521_v2 }
0x1516   : > { %8522 = vrcp.f32 %v6675_v41  ;;  %v6778_v0 = vand.u32 2147483648, %v6675_v41  ;;  %vm6772_vm11 = vweird.f32 %v6675_v41  ;;  %v6776_v7 = vand.u32 2147483647, %v6675_v41 }
0x1517   : > { %6863 = vrot.lane.b32.xlu0 %v6846_v28, %s8588_s7  ;;  %v6740_v24 = vmul.f32 %v8517_v25, %v6739_v17  ;;  %8524 = vrcp.f32 %v6676_v47  ;;  %v6793_v1 = vand.u32 2147483648, %v6676_v47  ;;  %vm6787_vm15 = vweird.f32 %v6676_v47 }
0x1518   : > { %v6779_v57 = vor.u32 1.1754944e-38, %v6778_v0  ;;  %vm6777_vm13 = vcmp.eq.f32.partialorder %v6776_v7, 8.507059e+37  ;;  %v6791_v20 = vand.u32 2147483647, %v6676_v47 }
0x1519   : > { %v6741_v10 = vadd.f32 %v8517_v25, %v6740_v24  ;;  %v6794_v36 = vor.u32 1.1754944e-38, %v6793_v1  ;;  %v6806_v24 = vmul.f32 %v12915_v11, %v12728_v8 }
0x151a   : > { %vm6792_vm2 = vcmp.eq.f32.partialorder %v6791_v20, 8.507059e+37 }
0x151b   : > { %v6745_v39 = vsel %vm6744_vm8, %v8517_v25, %v6741_v10 }
0x151c   : > { %v6832_v60 = vpop.permute.xlu2 %6831  ;;  %v12940_v53 = vsel %vm6747_vm9, %v6749_v22, %v6745_v39  ;;  %v8523_v61 = vpop.eup %8522 }
0x151d   : > { %v6850_v29 = vmul.f32 %v6832_v60, %v12926_v31  ;;  %v6768_v23 = vmul.f32 %v8523_v61, %v6675_v41  ;;  %v8525_v9 = vpop.eup %8524  ;;  %vm6773_vm10 = vweird.f32 %v8523_v61  ;;  %v6809_v8 = vmul.f32 %v12940_v53, %v12747_v5 }
0x151e   : > { %v6783_v49 = vmul.f32 %v8525_v9, %v6676_v47  ;;  %vm6774_vm12 = vmor %vm6772_vm11, %vm6773_vm10  ;;  %vm6788_vm14 = vweird.f32 %v8525_v9 }
0x151f   : > { %6871 = vrot.lane.b32.xlu1 %v6850_v29, %s8588_s7  ;;  %v6769_v37 = vsub.f32 1.0, %v6768_v23  ;;  %vm6789_vm1 = vmor %vm6787_vm15, %vm6788_vm14  ;;  %v6808_v29 = vmul.f32 %v12933_v40, %v12732_v33  ;;  %v6810_v33 = vmul.f32 %v12926_v31, %v12763_v42 }
0x1520   : > { %v6784_v32 = vsub.f32 1.0, %v6783_v49 }
0x1521   : > { %v6770_v38 = vmul.f32 %v8523_v61, %v6769_v37 }
0x1522   : > { %v6785_v21 = vmul.f32 %v8525_v9, %v6784_v32 }
0x1523   : > { %v6771_v19 = vadd.f32 %v8523_v61, %v6770_v38 }
0x1524   : > { %v6828_v51 = vpop.permute.xlu0 %6827  ;;  %v6786_v25 = vadd.f32 %v8525_v9, %v6785_v21 }
0x1525   : > { %v6848_v58 = vmul.f32 %v6828_v51, %v12933_v40  ;;  %v6775_v14 = vsel %vm6774_vm12, %v8523_v61, %v6771_v19 }
0x1526   : > { %v12949_v13 = vsel %vm6777_vm13, %v6779_v57, %v6775_v14  ;;  %v6790_v45 = vsel %vm6789_vm1, %v8525_v9, %v6786_v25 }
0x1527   : > { %6867 = vrot.lane.b32.xlu2 %v6848_v58, %s8588_s7  ;;  %v12953_v46 = vsel %vm6792_vm2, %v6794_v36, %v6790_v45  ;;  %v6811_v42 = vmul.f32 %v12949_v13, %v12790_v30 }
0x1528   : > { %v6812_v61 = vmul.f32 %v12953_v46, %v12778_v16 }
0x152c   : > { %v6830_v18 = vpop.permute.xlu1 %6829 }
0x152d   : > { %v6849_v55 = vmul.f32 %v6830_v18, %v12940_v53 }
0x152f   : > { %6869 = vrot.lane.b32.xlu0 %v6849_v55, %s8588_s7 }
0x1569   : > { %v6862_v12 = vpop.permute.xlu2 %6861 }
0x156a   : > { %v6885_v44 = vadd.f32 %v6862_v12, %v6805_v35 }
0x156c   : > { %8526 = vtanh.f32 %v6885_v44 }
0x1572   : > { %v8527_v28 = vpop.eup %8526 }
0x1573   : > { %6909 = vrot.lane.b32.xlu1 %v8527_v28, %s8587_s6  ;;  %v6834_v50 = vpop.permute.xlu0 %6833 }
0x1574   : > { %v6851_v52 = vmul.f32 %v6834_v50, %v12949_v13 }
0x1576   : > { %6873 = vrot.lane.b32.xlu2 %v6851_v52, %s8588_s7 }
0x157b   : > { %v6836_v34 = vpop.permute.xlu1 %6835 }
0x157c   : > { %v6852_v60 = vmul.f32 %v6836_v34, %v12953_v46 }
0x157e   : > { %6875 = vrot.lane.b32.xlu0 %v6852_v60, %s8588_s7 }
0x1581   : > { %v6868_v59 = vpop.permute.xlu2 %6867 }
0x1582   : > { %v6888_v17 = vadd.f32 %v6868_v59, %v6808_v29 }
0x1583   : > { %v6866_v15 = vpop.permute.xlu1 %6865 }
0x1584   : > { %8528 = vtanh.f32 %v6888_v17  ;;  %v6887_v54 = vadd.f32 %v6866_v15, %v6807_v26 }
0x1586   : > { %8530 = vtanh.f32 %v6887_v54 }
0x1589   : > { %v6864_v6 = vpop.permute.xlu0 %6863 }
0x158a   : > { %v8529_v51 = vpop.eup %8528  ;;  %v6886_v58 = vadd.f32 %v6864_v6, %v6806_v24 }
0x158b   : > { %6915 = vrot.lane.b32.xlu1 %v8529_v51, %s8587_s6 }
0x158c   : > { %v8531_v10 = vpop.eup %8530  ;;  %8532 = vtanh.f32 %v6886_v58 }
0x158d   : > { %6913 = vrot.lane.b32.xlu0 %v8531_v10, %s8587_s6 }
0x1591   : > { %v6872_v27 = vpop.permute.xlu1 %6871 }
0x1592   : > { %v8533_v4 = vpop.eup %8532  ;;  %v6890_v3 = vadd.f32 %v6872_v27, %v6810_v33 }
0x1593   : > { %6911 = vrot.lane.b32.xlu2 %v8533_v4, %s8587_s6 }
0x1594   : > { %8534 = vtanh.f32 %v6890_v3 }
0x159a   : > { %v8535_v39 = vpop.eup %8534 }
0x159b   : > { %6919 = vrot.lane.b32.xlu0 %v8535_v39, %s8587_s6 }
0x15a1   : > { %v6870_v22 = vpop.permute.xlu0 %6869 }
0x15a2   : > { %v6889_v18 = vadd.f32 %v6870_v22, %v6809_v8 }
0x15a4   : > { %8536 = vtanh.f32 %v6889_v18 }
0x15aa   : > { %v8537_v55 = vpop.eup %8536 }
0x15ab   : > { %6917 = vrot.lane.b32.xlu2 %v8537_v55, %s8587_s6 }
0x15d0   : > { %v6874_v63 = vpop.permute.xlu2 %6873 }
0x15d1   : > { %v6891_v62 = vadd.f32 %v6874_v63, %v6811_v42 }
0x15d3   : > { %8538 = vtanh.f32 %v6891_v62 }
0x15d9   : > { %v8539_v43 = vpop.eup %8538 }
0x15da   : > { %6921 = vrot.lane.b32.xlu1 %v8539_v43, %s8587_s6 }
0x15e5   : > { %v6910_v41 = vpop.permute.xlu1 %6909 }
0x15e6   : > { %v6933_v2 = vmul.f32 %v6910_v41, %v12898_v48 }
0x15e8   : > { %6949 = vrot.lane.b32.xlu0 %v6933_v2, %s8588_s7 }
0x15ed   : > { %v6912_v5 = vpop.permute.xlu2 %6911 }
0x15ee   : > { %v6934_v47 = vmul.f32 %v6912_v5, %v12915_v11 }
0x15f0   : > { %6951 = vrot.lane.b32.xlu1 %v6934_v47, %s8588_s7  ;;  %v6876_v30 = vpop.permute.xlu0 %6875 }
0x15f1   : > { %v6892_v23 = vadd.f32 %v6876_v30, %v6812_v61 }
0x15f3   : > { %8540 = vtanh.f32 %v6892_v23 }
0x15f9   : > { %v8541_v37 = vpop.eup %8540 }
0x15fa   : > { %6923 = vrot.lane.b32.xlu2 %v8541_v37, %s8587_s6  ;;  %s7044_s6 = sshll.u32 %s7037_s16, 3 }
0x15fb   : > { %p196_p4 = scmp.lt.s32.totalorder %s7044_s6, 63 }
0x15fd   : > { %v6916_v9 = vpop.permute.xlu1 %6915  ;;  %s13204_s6 = smov (!%p196_p4, %s7044_s6), 63 }
0x15fe   : > { %v6936_v48 = vmul.f32 %v6916_v9, %v12933_v40  ;;  %s7045_s26 = sshll.u32 %s13204_s6, 3 }
0x15ff   : > { %v6914_v35 = vpop.permute.xlu0 %6913  ;;  %s199_s29 = scalar_lea.vmem %s13014_s4, %s7045_s26 }
0x1600   : > { %v6935_v38 = vmul.f32 %v6914_v35, %v12903_v56  ;;  %6955 = vrot.lane.b32.xlu0 %v6936_v48, %s8588_s7 }
0x1602   : > { %6953 = vrot.lane.b32.xlu2 %v6935_v38, %s8588_s7 }
0x1605   : > { %v6918_v16 = vpop.permute.xlu2 %6917 }
0x1606   : > { %v6937_v11 = vmul.f32 %v6918_v16, %v12940_v53 }
0x1608   : > { %6957 = vrot.lane.b32.xlu1 %v6937_v11, %s8588_s7 }
0x160d   : > { %v6920_v49 = vpop.permute.xlu0 %6919 }
0x160e   : > { %v6938_v12 = vmul.f32 %v6920_v49, %v12926_v31 }
0x1610   : > { %6959 = vrot.lane.b32.xlu2 %v6938_v12, %s8588_s7 }
0x164c   : > { %v6922_v40 = vpop.permute.xlu1 %6921 }
0x164d   : > { %v6939_v44 = vmul.f32 %v6922_v40, %v12949_v13 }
0x164f   : > { %6961 = vrot.lane.b32.xlu0 %v6939_v44, %s8588_s7 }
0x1654   : > { %v6924_v56 = vpop.permute.xlu2 %6923 }
0x1655   : > { %v6940_v19 = vmul.f32 %v6924_v56, %v12953_v46 }
0x1657   : > { %6963 = vrot.lane.b32.xlu1 %v6940_v19, %s8588_s7 }
0x165a   : > { %v6950_v31 = vpop.permute.xlu0 %6949 }
0x165b   : > { %6973 = vst.msk [vmem:[%s199_s29] sm:$0xff] %vm250_vm0, %v6950_v31 }
0x165c   : > { %v6954_v53 = vpop.permute.xlu2 %6953 }
0x165d   : > { %6975 = vst.msk [vmem:[%s199_s29 + $0x10] sm:$0xff] %vm250_vm0, %v6954_v53 }
0x1662   : > { %v6952_v32 = vpop.permute.xlu1 %6951 }
0x1663   : > { %6974 = vst.msk [vmem:[%s199_s29 + $0x8] sm:$0xff] %vm250_vm0, %v6952_v32 }
0x166a   : > { %v6960_v0 = vpop.permute.xlu2 %6959 }
0x166b   : > { %6978 = vst.msk [vmem:[%s199_s29 + $0x28] sm:$0xff] %vm250_vm0, %v6960_v0 }
0x1672   : > { %v6956_v7 = vpop.permute.xlu0 %6955 }
0x1673   : > { %6976 = vst.msk [vmem:[%s199_s29 + $0x18] sm:$0xff] %vm250_vm0, %v6956_v7 }
0x167a   : > { %v6958_v14 = vpop.permute.xlu1 %6957 }
0x167b   : > { %6977 = vst.msk [vmem:[%s199_s29 + $0x20] sm:$0xff] %vm250_vm0, %v6958_v14 }
0x16c1   : > { %v6962_v21 = vpop.permute.xlu0 %6961 }
0x16c2   : > { %6979 = vst.msk [vmem:[%s199_s29 + $0x30] sm:$0xff] %vm250_vm0, %v6962_v21 }
0x16c9   : > { %v6964_v57 = vpop.permute.xlu1 %6963 }
0x16ca   : > { %6980 = vst.msk [vmem:[%s199_s29 + $0x38] sm:$0xff] %vm250_vm0, %v6964_v57 }
0x16cb PF: > { %s14_s15 = sadd.s32 1, %s8584_s15  }
0x16cc   : > { %p11_p5 = scmp.ge.s32.totalorder %s14_s15, 10  }
0x16ce   :  { %13 = sbr.rel (!%p11_p5) target bundleno = 1 (0x1), region = 69 }

</bundles_post_ra>
